<compile_context>
chip_gen: v7x
topology: tpu7x:2x2x1
jax: 0.10.0
libtpu: 0.0.40
codegen_flags: <defaults>
</compile_context>

<pallas_src>
import math
import functools

import jax
import jax.numpy as jnp
from jax.experimental import pallas as pl
from jax.experimental.pallas import tpu as pltpu

CNUM = 32
BN_EPS = 1e-5
MAX_TILE_M = 1024                     # rows per grid block at large resolutions
VMEM_LIMIT = 32 * 1024 * 1024         # explicit scoped-VMEM limit (safe on v5e/v6e/v7x)


def get_pad(in_, ksize, stride, dilation=1):
    if isinstance(in_, (list, tuple)):
        return (get_pad(in_[0], ksize, stride, dilation),
                get_pad(in_[1], ksize, stride, dilation))
    out_ = math.ceil(float(in_) / stride)
    return int(((out_ - 1) * stride + dilation * (ksize - 1) + 1 - in_) / 2)


def _round_up(x, m):
    return ((x + m - 1) // m) * m


# ---------------------------- Pallas kernels ----------------------------

def _gated_conv_kernel(p_ref, w_ref, b_ref, o_ref, *, use_leaky, np_, clip_out):
    # Single fused matmul: output columns [0:np_] = feature conv (eval-mode
    # BatchNorm already folded into the weights/bias), columns [np_:2*np_] =
    # gating conv.  f32 accumulation, bf16 store.
    res = jnp.dot(p_ref[...], w_ref[...], preferred_element_type=jnp.float32)
    res = res + b_ref[...]
    feat = res[:, :np_]
    gate = res[:, np_:]
    if use_leaky:
        feat = jnp.where(feat >= 0.0, feat, 0.2 * feat)   # LeakyReLU(0.2)
    out = feat * jax.nn.sigmoid(gate)
    if clip_out:                                          # fused torch.clamp
        out = jnp.clip(out, -1.0, 1.0)
    o_ref[...] = out.astype(o_ref.dtype)


def _self_attn_kernel(x_ref, wqk_ref, wv_ref, bqk_ref, bv_ref, gamma_ref,
                      o_ref, *, cqp):
    xb = x_ref[...]                                        # (N, C) bf16
    qk = jnp.dot(xb, wqk_ref[...], preferred_element_type=jnp.float32)
    qk = qk + bqk_ref[...]
    q = qk[:, :cqp]                                        # padded lanes are 0
    k = qk[:, cqp:]
    v = jnp.dot(xb, wv_ref[...], preferred_element_type=jnp.float32) + bv_ref[...]
    # attention[n, m] = <q_n, k_m>, softmax over m (zero-padded q/k lanes add 0)
    s = jax.lax.dot_general(q, k, (((1,), (1,)), ((), ())),
                            preferred_element_type=jnp.float32)   # (N, N)
    s = s - jnp.max(s, axis=-1, keepdims=True)
    e = jnp.exp(s)
    a = e * pl.reciprocal(jnp.sum(e, axis=-1, keepdims=True), approx=True)
    out = jnp.dot(a.astype(jnp.bfloat16), v.astype(jnp.bfloat16),
                  preferred_element_type=jnp.float32)             # (N, C)
    o_ref[...] = (gamma_ref[0] * out + xb.astype(jnp.float32)).astype(o_ref.dtype)


# ---------------------------- layer wrappers ----------------------------

def _im2col(x, k, stride, dilation, pad_hw):
    # TODO(synk): patches are built host-side (k^2 activation duplication in
    # HBM); an in-kernel VMEM patch builder would cut LHS bytes further.
    ph, pw = pad_hw
    x = jnp.pad(x, ((0, 0), (ph, ph), (pw, pw), (0, 0)))
    _, Hp, Wp, _ = x.shape
    eff = dilation * (k - 1) + 1
    Ho = (Hp - eff) // stride + 1
    Wo = (Wp - eff) // stride + 1
    cols = []
    for i in range(k):
        for j in range(k):
            cols.append(
                x[:, i * dilation:i * dilation + (Ho - 1) * stride + 1:stride,
                     j * dilation:j * dilation + (Wo - 1) * stride + 1:stride, :])
    return jnp.concatenate(cols, axis=-1), Ho, Wo


def gated_conv(x, layer):
    """x: (B, H, W, Cin) NHWC -> (B, Ho, Wo, Cout) bfloat16."""
    if layer['upsample']:
        # F.interpolate(scale_factor=2), mode='nearest'
        # TODO(synk): nearest-upsample is host-side repeat (4x HBM copy); could
        # be folded into the im2col gather.
        x = jnp.repeat(jnp.repeat(x, 2, axis=1), 2, axis=2)
    x = x.astype(jnp.bfloat16)       # bf16 LHS: 2x MXU rate, half the HBM bytes
    k, stride, dilation = layer['k'], layer['stride'], layer['dilation']
    cols, Ho, Wo = _im2col(x, k, stride, dilation, layer['pad'])
    B = x.shape[0]
    M = B * Ho * Wo
    Kraw = cols.shape[-1]
    Kp, N2 = layer['w'].shape
    Np = layer['np_']
    cout = layer['cout']

    # M tiling: pad only to bf16 sublane granularity (16), keep >=2 parallel
    # grid steps (both v7x TensorCores get work), cap block at MAX_TILE_M rows.
    num_m = max(2, pl.cdiv(M, MAX_TILE_M))
    tile_m = _round_up(pl.cdiv(M, num_m), 16)
    Mp = tile_m * num_m

    pmat = cols.reshape(M, Kraw)
    if Mp != M or Kp != Kraw:
        pmat = jnp.pad(pmat, ((0, Mp - M), (0, Kp - Kraw)))

    kernel = functools.partial(_gated_conv_kernel,
                               use_leaky=layer['use_leaky'], np_=Np,
                               clip_out=layer['clip_out'])
    out = pl.pallas_call(
        kernel,
        out_shape=jax.ShapeDtypeStruct((Mp, Np), jnp.bfloat16),
        grid=(num_m,),
        in_specs=[
            pl.BlockSpec((tile_m, Kp), lambda i: (i, 0)),
            pl.BlockSpec((Kp, N2), lambda i: (0, 0)),
            pl.BlockSpec((1, N2), lambda i: (0, 0)),
        ],
        out_specs=pl.BlockSpec((tile_m, Np), lambda i: (i, 0)),
        compiler_params=pltpu.CompilerParams(
            dimension_semantics=("parallel",),
            vmem_limit_bytes=VMEM_LIMIT),
    )(pmat, layer['w'], layer['b'])
    return out[:M, :cout].reshape(B, Ho, Wo, cout)


def self_attn(x, p):
    """x: (B, H, W, C) NHWC bfloat16 -> same shape/dtype."""
    # TODO(synk): scores are materialized as a full (N, N) tile; fine for
    # N = (H/4)*(W/4) at these sizes — switch to flash-style KV blocking for
    # large resolutions (v7x VMEM is 64 MiB).
    B, H, W, C = x.shape
    N = H * W
    cqp = p['cqp']
    xf = x.reshape(B, N, C).astype(jnp.bfloat16)
    kernel = functools.partial(_self_attn_kernel, cqp=cqp)
    out = pl.pallas_call(
        kernel,
        out_shape=jax.ShapeDtypeStruct((B, N, C), jnp.bfloat16),
        grid=(B,),
        in_specs=[
            pl.BlockSpec((None, N, C), lambda b: (b, 0, 0)),
            pl.BlockSpec((C, 2 * cqp), lambda b: (0, 0)),
            pl.BlockSpec((C, C), lambda b: (0, 0)),
            pl.BlockSpec((1, 2 * cqp), lambda b: (0, 0)),
            pl.BlockSpec((1, C), lambda b: (0, 0)),
            pl.BlockSpec(memory_space=pltpu.MemorySpace.SMEM),   # gamma scalar
        ],
        out_specs=pl.BlockSpec((None, N, C), lambda b: (b, 0, 0)),
        compiler_params=pltpu.CompilerParams(
            dimension_semantics=("parallel",),
            vmem_limit_bytes=VMEM_LIMIT),
    )(xf, p['wqk'], p['wv'], p['bqk'], p['bv'], p['gamma'])
    return out.reshape(B, H, W, C)


# ---------------------------- parameter setup ----------------------------

def _init_conv_w(key, k, cin, cout):
    fan_in = cin * k * k
    std = math.sqrt(2.0 / fan_in)                       # kaiming_normal_
    w = jax.random.normal(key, (k, k, cin, cout), jnp.float32) * std
    return w.reshape(k * k * cin, cout)                 # matches im2col order


def _init_conv_b(key, k, cin, cout):
    bound = 1.0 / math.sqrt(cin * k * k)
    return jax.random.uniform(key, (cout,), jnp.float32, -bound, bound)


def make_gated_layer(key, cin, cout, k, stride, pad, dilation=1,
                     use_leaky=True, upsample=False, clip_out=False):
    kf, kbf, kg, kbg = jax.random.split(key, 4)
    Kraw = k * k * cin
    Kp = _round_up(Kraw, 128)
    Np = _round_up(cout, 128)

    wf = _init_conv_w(kf, k, cin, cout)
    wg = _init_conv_w(kg, k, cin, cout)
    bf = _init_conv_b(kbf, k, cin, cout)
    bg = _init_conv_b(kbg, k, cin, cout)

    # PyTorch order: conv -> BatchNorm -> LeakyReLU -> * sigmoid(gate).
    # Eval-mode BN is affine on the feature-conv output, so fold it into wf/bf.
    # TODO(synk): BatchNorm2d is applied in eval mode with freshly-initialized
    # running stats (mean=0, var=1, gamma=1, beta=0); training-mode batch
    # statistics are not reproduced.
    bn_scale = 1.0 / math.sqrt(1.0 + BN_EPS)
    bn_shift = 0.0
    wf = wf * bn_scale
    bf = bf * bn_scale + bn_shift

    def pad_w(w):
        return jnp.pad(w, ((0, Kp - Kraw), (0, Np - cout)))

    def pad_b(b):
        return jnp.pad(b, ((0, Np - cout),))

    w_fused = jnp.concatenate([pad_w(wf), pad_w(wg)], axis=1).astype(jnp.bfloat16)
    b_fused = jnp.concatenate([pad_b(bf), pad_b(bg)]).reshape(1, 2 * Np)
    return dict(
        w=w_fused, b=b_fused.astype(jnp.float32),
        cout=cout, np_=Np, k=k, stride=stride, dilation=dilation,
        pad=pad if isinstance(pad, tuple) else (pad, pad),
        use_leaky=use_leaky, upsample=upsample, clip_out=clip_out,
    )


def make_attn_params(key, C):
    Cq = C // 8
    Cqp = _round_up(max(Cq, 1), 128)        # lane-aligned q/k width
    kq, kk, kv, kbq, kbk, kbv = jax.random.split(key, 6)
    bound = 1.0 / math.sqrt(C)              # default Conv2d(kernel_size=1) init

    def w(key_, cout):
        return jax.random.uniform(key_, (C, cout), jnp.float32, -bound, bound)

    def b(key_, cout):
        return jax.random.uniform(key_, (cout,), jnp.float32, -bound, bound)

    wq = jnp.pad(w(kq, Cq), ((0, 0), (0, Cqp - Cq)))
    wk = jnp.pad(w(kk, Cq), ((0, 0), (0, Cqp - Cq)))
    bq = jnp.pad(b(kbq, Cq), ((0, Cqp - Cq),))
    bk = jnp.pad(b(kbk, Cq), ((0, Cqp - Cq),))
    return dict(
        wqk=jnp.concatenate([wq, wk], axis=1).astype(jnp.bfloat16),   # (C, 2*Cqp)
        wv=w(kv, C).astype(jnp.bfloat16),                             # (C, C)
        bqk=jnp.concatenate([bq, bk]).reshape(1, 2 * Cqp),
        bv=b(kbv, C).reshape(1, C),
        gamma=jnp.zeros((1,), jnp.float32),                           # init = 0
        cqp=Cqp,
    )


def build_params(key, n_in_channel=4, img_size=(16, 16)):
    cnum = CNUM
    h, w = img_size
    it = iter(jax.random.split(key, 40))

    def L(cin, cout, k, s, pad, d=1, act=True, up=False, clip=False):
        return make_gated_layer(next(it), cin, cout, k, s, pad,
                                dilation=d, use_leaky=act, upsample=up,
                                clip_out=clip)

    coarse = [
        L(n_in_channel, cnum, 5, 1, get_pad(img_size, 5, 1)),
        L(cnum, 2 * cnum, 4, 2, get_pad(img_size, 4, 2)),
        L(2 * cnum, 2 * cnum, 3, 1, get_pad((h // 2, w // 2), 3, 1)),
        L(2 * cnum, 4 * cnum, 4, 2, get_pad((h // 2, w // 2), 4, 2)),
        L(4 * cnum, 4 * cnum, 3, 1, get_pad((h // 4, w // 4), 3, 1)),
        L(4 * cnum, 4 * cnum, 3, 1, get_pad((h // 4, w // 4), 3, 1)),
        L(4 * cnum, 4 * cnum, 3, 1, get_pad((h // 4, w // 4), 3, 1, 2), d=2),
        L(4 * cnum, 4 * cnum, 3, 1, get_pad((h // 4, w // 4), 3, 1, 4), d=4),
        L(4 * cnum, 4 * cnum, 3, 1, get_pad((h // 4, w // 4), 3, 1, 8), d=8),
        L(4 * cnum, 4 * cnum, 3, 1, get_pad((h // 4, w // 4), 3, 1, 16), d=16),
        L(4 * cnum, 4 * cnum, 3, 1, get_pad((h // 4, w // 4), 3, 1)),
        L(4 * cnum, 4 * cnum, 3, 1, get_pad((h // 4, w // 4), 3, 1)),
        L(4 * cnum, 2 * cnum, 3, 1, get_pad((h // 2, w // 2), 3, 1), up=True),
        L(2 * cnum, 2 * cnum, 3, 1, get_pad((h // 2, w // 2), 3, 1)),
        L(2 * cnum, cnum, 3, 1, get_pad(img_size, 3, 1), up=True),
        L(cnum, cnum // 2, 3, 1, get_pad(img_size, 3, 1)),
        L(cnum // 2, 3, 3, 1, get_pad(img_size, 3, 1), act=False, clip=True),
    ]
    refine_conv = [
        L(n_in_channel, cnum, 5, 1, get_pad(img_size, 5, 1)),
        L(cnum, cnum, 4, 2, get_pad(img_size, 4, 2)),
        L(cnum, 2 * cnum, 3, 1, get_pad((h // 2, w // 2), 3, 1)),
        L(2 * cnum, 2 * cnum, 4, 2, get_pad((h // 2, w // 2), 4, 2)),
        L(2 * cnum, 4 * cnum, 3, 1, get_pad((h // 4, w // 4), 3, 1)),
        L(4 * cnum, 4 * cnum, 3, 1, get_pad((h // 4, w // 4), 3, 1)),
        L(4 * cnum, 4 * cnum, 3, 1, get_pad((h // 4, w // 4), 3, 1)),
        L(4 * cnum, 4 * cnum, 3, 1, get_pad((h // 4, w // 4), 3, 1, 2), d=2),
        L(4 * cnum, 4 * cnum, 3, 1, get_pad((h // 4, w // 4), 3, 1, 4), d=4),
        L(4 * cnum, 4 * cnum, 3, 1, get_pad((h // 4, w // 4), 3, 1, 8), d=8),
        L(4 * cnum, 4 * cnum, 3, 1, get_pad((h // 4, w // 4), 3, 1, 16), d=16),
    ]
    refine_up = [
        L(4 * cnum, 4 * cnum, 3, 1, get_pad((h // 4, w // 4), 3, 1)),
        L(4 * cnum, 4 * cnum, 3, 1, get_pad((h // 4, w // 4), 3, 1)),
        L(4 * cnum, 2 * cnum, 3, 1, get_pad((h // 2, w // 2), 3, 1), up=True),
        L(2 * cnum, 2 * cnum, 3, 1, get_pad((h // 2, w // 2), 3, 1)),
        L(2 * cnum, cnum, 3, 1, get_pad(img_size, 3, 1), up=True),
        L(cnum, cnum // 2, 3, 1, get_pad(img_size, 3, 1)),
        L(cnum // 2, 3, 3, 1, get_pad(img_size, 3, 1), act=False, clip=True),
    ]
    attn = make_attn_params(next(it), 4 * cnum)
    return dict(coarse=coarse, refine_conv=refine_conv,
                attn=attn, refine_up=refine_up)


# ---------------------------- full forward ----------------------------

def inpaint_forward(params, imgs, masks):
    """imgs: (B, 3, H, W), masks: (B, 1, H, W) in NCHW.  Returns NCHW f32 outputs."""
    masked = imgs * (1.0 - masks) + masks
    x = jnp.concatenate([masked, masks], axis=1)          # (B, 4, H, W)
    x = jnp.transpose(x, (0, 2, 3, 1)).astype(jnp.bfloat16)   # -> NHWC bf16
    for layer in params['coarse']:
        x = gated_conv(x, layer)                          # clamp fused in last layer
    coarse_x = jnp.transpose(x, (0, 3, 1, 2)).astype(jnp.float32)   # NCHW f32

    masked = imgs * (1.0 - masks) + coarse_x * masks
    x = jnp.concatenate([masked, masks], axis=1)
    x = jnp.transpose(x, (0, 2, 3, 1)).astype(jnp.bfloat16)
    for layer in params['refine_conv']:
        x = gated_conv(x, layer)
    x = self_attn(x, params['attn'])
    for layer in params['refine_up']:
        x = gated_conv(x, layer)                          # clamp fused in last layer
    refined = jnp.transpose(x, (0, 3, 1, 2)).astype(jnp.float32)
    return coarse_x, refined


if __name__ == "__main__":
    key = jax.random.PRNGKey(0)
    kp, ki, km = jax.random.split(key, 3)
    B, H, W = 2, 16, 16
    params = build_params(kp, n_in_channel=4, img_size=(H, W))
    imgs = jax.random.uniform(ki, (B, 3, H, W), jnp.float32, -1.0, 1.0)
    masks = (jax.random.uniform(km, (B, 1, H, W)) > 0.5).astype(jnp.float32)

    fwd = jax.jit(lambda i, m: inpaint_forward(params, i, m))
    coarse_x, refined = fwd(imgs, masks)
    jax.block_until_ready((coarse_x, refined))
    assert coarse_x.shape == (B, 3, H, W) and refined.shape == (B, 3, H, W)
    assert bool(jnp.all(jnp.isfinite(coarse_x))) and bool(jnp.all(jnp.isfinite(refined)))
    assert bool(jnp.all(jnp.abs(coarse_x) <= 1.0)) and bool(jnp.all(jnp.abs(refined) <= 1.0))
    print("KERNEL_OK")
</pallas_src>

<mosaic_0001>
module attributes {stable_mosaic.version = 11 : i64} {
  func.func @_gated_conv_kernel(%arg0: i32, %arg1: memref<256x128xbf16, #tpu.memory_space<vmem>>, %arg2: memref<128x256xbf16, #tpu.memory_space<vmem>>, %arg3: memref<1x256xf32, #tpu.memory_space<vmem>>, %arg4: memref<256x128xbf16, #tpu.memory_space<vmem>>) attributes {dimension_semantics = [#tpu.dimension_semantics<parallel>], iteration_bounds = array<i64: 2>, scalar_prefetch = 0 : i64, scratch_operands = 0 : i64, tpu.core_type = #tpu.core_type<tc>, window_params = [{transform_indices = @transform_0, window_bounds = array<i64: 256, 128>}, {pipeline_mode = #tpu.pipeline_mode<synchronous>, transform_indices = @transform_1, window_bounds = array<i64: 128, 256>}, {pipeline_mode = #tpu.pipeline_mode<synchronous>, transform_indices = @transform_2, window_bounds = array<i64: 1, 256>}, {transform_indices = @transform_3, window_bounds = array<i64: 256, 128>}]} {
    %c0 = arith.constant 0 : index
    %c0_0 = arith.constant 0 : index
    %0 = vector.load %arg1[%c0, %c0_0] : memref<256x128xbf16, #tpu.memory_space<vmem>>, vector<256x128xbf16>
    %c0_1 = arith.constant 0 : index
    %c0_2 = arith.constant 0 : index
    %1 = vector.load %arg2[%c0_1, %c0_2] : memref<128x256xbf16, #tpu.memory_space<vmem>>, vector<128x256xbf16>
    %cst = arith.constant dense<0.000000e+00> : vector<256x256xf32>
    %2 = tpu.matmul %0, %1, %cst {dimension_numbers = #tpu.dot_dimension_numbers<[1], [0], [0], [1], [0, 0, 1, 1], [], []>} : vector<256x128xbf16>, vector<128x256xbf16>, vector<256x256xf32> -> vector<256x256xf32>
    %c0_3 = arith.constant 0 : index
    %c0_4 = arith.constant 0 : index
    %3 = vector.load %arg3[%c0_3, %c0_4] : memref<1x256xf32, #tpu.memory_space<vmem>>, vector<1x256xf32>
    %4 = vector.broadcast %3 : vector<1x256xf32> to vector<256x256xf32>
    %5 = arith.addf %2, %4 : vector<256x256xf32>
    %6 = vector.extract_strided_slice %5 {offsets = [0, 0], sizes = [256, 128], strides = [1, 1]} : vector<256x256xf32> to vector<256x128xf32>
    %7 = vector.extract_strided_slice %5 {offsets = [0, 128], sizes = [256, 128], strides = [1, 1]} : vector<256x256xf32> to vector<256x128xf32>
    %cst_5 = arith.constant 0.000000e+00 : f32
    %8 = vector.broadcast %cst_5 : f32 to vector<256x128xf32>
    %9 = arith.cmpf oge, %6, %8 : vector<256x128xf32>
    %cst_6 = arith.constant 2.000000e-01 : f32
    %10 = vector.broadcast %cst_6 : f32 to vector<256x128xf32>
    %11 = arith.mulf %10, %6 : vector<256x128xf32>
    %12 = arith.select %9, %6, %11 : vector<256x128xi1>, vector<256x128xf32>
    %13 = arith.negf %7 : vector<256x128xf32>
    %14 = math.exp %13 : vector<256x128xf32>
    %cst_7 = arith.constant 1.000000e+00 : f32
    %15 = vector.broadcast %cst_7 : f32 to vector<256x128xf32>
    %16 = arith.addf %15, %14 : vector<256x128xf32>
    %17 = arith.divf %15, %16 : vector<256x128xf32>
    %18 = arith.mulf %12, %17 : vector<256x128xf32>
    %19 = arith.truncf %18 : vector<256x128xf32> to vector<256x128xbf16>
    %c0_8 = arith.constant 0 : index
    %c0_9 = arith.constant 0 : index
    %20 = vector.load %arg4[%c0_8, %c0_9] : memref<256x128xbf16, #tpu.memory_space<vmem>>, vector<256x128xbf16>
    tpu.vector_store %arg4[%c0_8, %c0_9], %19 {strides = array<i32>} : memref<256x128xbf16, #tpu.memory_space<vmem>>, vector<256x128xbf16>,
    return
  }
  func.func @transform_0(%arg0: i32) -> (i32, i32) {
    %c0_i32 = arith.constant 0 : i32
    %c0_i32_0 = arith.constant 0 : i32
    return %arg0, %c0_i32 : i32, i32
  }
  func.func @transform_1(%arg0: i32) -> (i32, i32) {
    %c0_i32 = arith.constant 0 : i32
    %c0_i32_0 = arith.constant 0 : i32
    %c0_i32_1 = arith.constant 0 : i32
    return %c0_i32, %c0_i32_0 : i32, i32
  }
  func.func @transform_2(%arg0: i32) -> (i32, i32) {
    %c0_i32 = arith.constant 0 : i32
    %c0_i32_0 = arith.constant 0 : i32
    %c0_i32_1 = arith.constant 0 : i32
    return %c0_i32, %c0_i32_0 : i32, i32
  }
  func.func @transform_3(%arg0: i32) -> (i32, i32) {
    %c0_i32 = arith.constant 0 : i32
    %c0_i32_0 = arith.constant 0 : i32
    return %arg0, %c0_i32 : i32, i32
  }
}

module attributes {stable_mosaic.version = 11 : i64} {
  func.func @_gated_conv_kernel(%arg0: i32, %arg1: memref<64x512xbf16, #tpu.memory_space<vmem>>, %arg2: memref<512x256xbf16, #tpu.memory_space<vmem>>, %arg3: memref<1x256xf32, #tpu.memory_space<vmem>>, %arg4: memref<64x128xbf16, #tpu.memory_space<vmem>>) attributes {dimension_semantics = [#tpu.dimension_semantics<parallel>], iteration_bounds = array<i64: 2>, scalar_prefetch = 0 : i64, scratch_operands = 0 : i64, tpu.core_type = #tpu.core_type<tc>, window_params = [{transform_indices = @transform_0, window_bounds = array<i64: 64, 512>}, {pipeline_mode = #tpu.pipeline_mode<synchronous>, transform_indices = @transform_1, window_bounds = array<i64: 512, 256>}, {pipeline_mode = #tpu.pipeline_mode<synchronous>, transform_indices = @transform_2, window_bounds = array<i64: 1, 256>}, {transform_indices = @transform_3, window_bounds = array<i64: 64, 128>}]} {
    %c0 = arith.constant 0 : index
    %c0_0 = arith.constant 0 : index
    %0 = vector.load %arg1[%c0, %c0_0] : memref<64x512xbf16, #tpu.memory_space<vmem>>, vector<64x512xbf16>
    %c0_1 = arith.constant 0 : index
    %c0_2 = arith.constant 0 : index
    %1 = vector.load %arg2[%c0_1, %c0_2] : memref<512x256xbf16, #tpu.memory_space<vmem>>, vector<512x256xbf16>
    %cst = arith.constant dense<0.000000e+00> : vector<64x256xf32>
    %2 = tpu.matmul %0, %1, %cst {dimension_numbers = #tpu.dot_dimension_numbers<[1], [0], [0], [1], [0, 0, 1, 1], [], []>} : vector<64x512xbf16>, vector<512x256xbf16>, vector<64x256xf32> -> vector<64x256xf32>
    %c0_3 = arith.constant 0 : index
    %c0_4 = arith.constant 0 : index
    %3 = vector.load %arg3[%c0_3, %c0_4] : memref<1x256xf32, #tpu.memory_space<vmem>>, vector<1x256xf32>
    %4 = vector.broadcast %3 : vector<1x256xf32> to vector<64x256xf32>
    %5 = arith.addf %2, %4 : vector<64x256xf32>
    %6 = vector.extract_strided_slice %5 {offsets = [0, 0], sizes = [64, 128], strides = [1, 1]} : vector<64x256xf32> to vector<64x128xf32>
    %7 = vector.extract_strided_slice %5 {offsets = [0, 128], sizes = [64, 128], strides = [1, 1]} : vector<64x256xf32> to vector<64x128xf32>
    %cst_5 = arith.constant 0.000000e+00 : f32
    %8 = vector.broadcast %cst_5 : f32 to vector<64x128xf32>
    %9 = arith.cmpf oge, %6, %8 : vector<64x128xf32>
    %cst_6 = arith.constant 2.000000e-01 : f32
    %10 = vector.broadcast %cst_6 : f32 to vector<64x128xf32>
    %11 = arith.mulf %10, %6 : vector<64x128xf32>
    %12 = arith.select %9, %6, %11 : vector<64x128xi1>, vector<64x128xf32>
    %13 = arith.negf %7 : vector<64x128xf32>
    %14 = math.exp %13 : vector<64x128xf32>
    %cst_7 = arith.constant 1.000000e+00 : f32
    %15 = vector.broadcast %cst_7 : f32 to vector<64x128xf32>
    %16 = arith.addf %15, %14 : vector<64x128xf32>
    %17 = arith.divf %15, %16 : vector<64x128xf32>
    %18 = arith.mulf %12, %17 : vector<64x128xf32>
    %19 = arith.truncf %18 : vector<64x128xf32> to vector<64x128xbf16>
    %c0_8 = arith.constant 0 : index
    %c0_9 = arith.constant 0 : index
    %20 = vector.load %arg4[%c0_8, %c0_9] : memref<64x128xbf16, #tpu.memory_space<vmem>>, vector<64x128xbf16>
    tpu.vector_store %arg4[%c0_8, %c0_9], %19 {strides = array<i32>} : memref<64x128xbf16, #tpu.memory_space<vmem>>, vector<64x128xbf16>,
    return
  }
  func.func @transform_0(%arg0: i32) -> (i32, i32) {
    %c0_i32 = arith.constant 0 : i32
    %c0_i32_0 = arith.constant 0 : i32
    return %arg0, %c0_i32 : i32, i32
  }
  func.func @transform_1(%arg0: i32) -> (i32, i32) {
    %c0_i32 = arith.constant 0 : i32
    %c0_i32_0 = arith.constant 0 : i32
    %c0_i32_1 = arith.constant 0 : i32
    return %c0_i32, %c0_i32_0 : i32, i32
  }
  func.func @transform_2(%arg0: i32) -> (i32, i32) {
    %c0_i32 = arith.constant 0 : i32
    %c0_i32_0 = arith.constant 0 : i32
    %c0_i32_1 = arith.constant 0 : i32
    return %c0_i32, %c0_i32_0 : i32, i32
  }
  func.func @transform_3(%arg0: i32) -> (i32, i32) {
    %c0_i32 = arith.constant 0 : i32
    %c0_i32_0 = arith.constant 0 : i32
    return %arg0, %c0_i32 : i32, i32
  }
}

module attributes {stable_mosaic.version = 11 : i64} {
  func.func @_gated_conv_kernel(%arg0: i32, %arg1: memref<64x640xbf16, #tpu.memory_space<vmem>>, %arg2: memref<640x256xbf16, #tpu.memory_space<vmem>>, %arg3: memref<1x256xf32, #tpu.memory_space<vmem>>, %arg4: memref<64x128xbf16, #tpu.memory_space<vmem>>) attributes {dimension_semantics = [#tpu.dimension_semantics<parallel>], iteration_bounds = array<i64: 2>, scalar_prefetch = 0 : i64, scratch_operands = 0 : i64, tpu.core_type = #tpu.core_type<tc>, window_params = [{transform_indices = @transform_0, window_bounds = array<i64: 64, 640>}, {pipeline_mode = #tpu.pipeline_mode<synchronous>, transform_indices = @transform_1, window_bounds = array<i64: 640, 256>}, {pipeline_mode = #tpu.pipeline_mode<synchronous>, transform_indices = @transform_2, window_bounds = array<i64: 1, 256>}, {transform_indices = @transform_3, window_bounds = array<i64: 64, 128>}]} {
    %c0 = arith.constant 0 : index
    %c0_0 = arith.constant 0 : index
    %0 = vector.load %arg1[%c0, %c0_0] : memref<64x640xbf16, #tpu.memory_space<vmem>>, vector<64x640xbf16>
    %c0_1 = arith.constant 0 : index
    %c0_2 = arith.constant 0 : index
    %1 = vector.load %arg2[%c0_1, %c0_2] : memref<640x256xbf16, #tpu.memory_space<vmem>>, vector<640x256xbf16>
    %cst = arith.constant dense<0.000000e+00> : vector<64x256xf32>
    %2 = tpu.matmul %0, %1, %cst {dimension_numbers = #tpu.dot_dimension_numbers<[1], [0], [0], [1], [0, 0, 1, 1], [], []>} : vector<64x640xbf16>, vector<640x256xbf16>, vector<64x256xf32> -> vector<64x256xf32>
    %c0_3 = arith.constant 0 : index
    %c0_4 = arith.constant 0 : index
    %3 = vector.load %arg3[%c0_3, %c0_4] : memref<1x256xf32, #tpu.memory_space<vmem>>, vector<1x256xf32>
    %4 = vector.broadcast %3 : vector<1x256xf32> to vector<64x256xf32>
    %5 = arith.addf %2, %4 : vector<64x256xf32>
    %6 = vector.extract_strided_slice %5 {offsets = [0, 0], sizes = [64, 128], strides = [1, 1]} : vector<64x256xf32> to vector<64x128xf32>
    %7 = vector.extract_strided_slice %5 {offsets = [0, 128], sizes = [64, 128], strides = [1, 1]} : vector<64x256xf32> to vector<64x128xf32>
    %cst_5 = arith.constant 0.000000e+00 : f32
    %8 = vector.broadcast %cst_5 : f32 to vector<64x128xf32>
    %9 = arith.cmpf oge, %6, %8 : vector<64x128xf32>
    %cst_6 = arith.constant 2.000000e-01 : f32
    %10 = vector.broadcast %cst_6 : f32 to vector<64x128xf32>
    %11 = arith.mulf %10, %6 : vector<64x128xf32>
    %12 = arith.select %9, %6, %11 : vector<64x128xi1>, vector<64x128xf32>
    %13 = arith.negf %7 : vector<64x128xf32>
    %14 = math.exp %13 : vector<64x128xf32>
    %cst_7 = arith.constant 1.000000e+00 : f32
    %15 = vector.broadcast %cst_7 : f32 to vector<64x128xf32>
    %16 = arith.addf %15, %14 : vector<64x128xf32>
    %17 = arith.divf %15, %16 : vector<64x128xf32>
    %18 = arith.mulf %12, %17 : vector<64x128xf32>
    %19 = arith.truncf %18 : vector<64x128xf32> to vector<64x128xbf16>
    %c0_8 = arith.constant 0 : index
    %c0_9 = arith.constant 0 : index
    %20 = vector.load %arg4[%c0_8, %c0_9] : memref<64x128xbf16, #tpu.memory_space<vmem>>, vector<64x128xbf16>
    tpu.vector_store %arg4[%c0_8, %c0_9], %19 {strides = array<i32>} : memref<64x128xbf16, #tpu.memory_space<vmem>>, vector<64x128xbf16>,
    return
  }
  func.func @transform_0(%arg0: i32) -> (i32, i32) {
    %c0_i32 = arith.constant 0 : i32
    %c0_i32_0 = arith.constant 0 : i32
    return %arg0, %c0_i32 : i32, i32
  }
  func.func @transform_1(%arg0: i32) -> (i32, i32) {
    %c0_i32 = arith.constant 0 : i32
    %c0_i32_0 = arith.constant 0 : i32
    %c0_i32_1 = arith.constant 0 : i32
    return %c0_i32, %c0_i32_0 : i32, i32
  }
  func.func @transform_2(%arg0: i32) -> (i32, i32) {
    %c0_i32 = arith.constant 0 : i32
    %c0_i32_0 = arith.constant 0 : i32
    %c0_i32_1 = arith.constant 0 : i32
    return %c0_i32, %c0_i32_0 : i32, i32
  }
  func.func @transform_3(%arg0: i32) -> (i32, i32) {
    %c0_i32 = arith.constant 0 : i32
    %c0_i32_0 = arith.constant 0 : i32
    return %arg0, %c0_i32 : i32, i32
  }
}

module attributes {stable_mosaic.version = 11 : i64} {
  func.func @_gated_conv_kernel(%arg0: i32, %arg1: memref<16x1024xbf16, #tpu.memory_space<vmem>>, %arg2: memref<1024x256xbf16, #tpu.memory_space<vmem>>, %arg3: memref<1x256xf32, #tpu.memory_space<vmem>>, %arg4: memref<16x128xbf16, #tpu.memory_space<vmem>>) attributes {dimension_semantics = [#tpu.dimension_semantics<parallel>], iteration_bounds = array<i64: 2>, scalar_prefetch = 0 : i64, scratch_operands = 0 : i64, tpu.core_type = #tpu.core_type<tc>, window_params = [{transform_indices = @transform_0, window_bounds = array<i64: 16, 1024>}, {pipeline_mode = #tpu.pipeline_mode<synchronous>, transform_indices = @transform_1, window_bounds = array<i64: 1024, 256>}, {pipeline_mode = #tpu.pipeline_mode<synchronous>, transform_indices = @transform_2, window_bounds = array<i64: 1, 256>}, {transform_indices = @transform_3, window_bounds = array<i64: 16, 128>}]} {
    %c0 = arith.constant 0 : index
    %c0_0 = arith.constant 0 : index
    %0 = vector.load %arg1[%c0, %c0_0] : memref<16x1024xbf16, #tpu.memory_space<vmem>>, vector<16x1024xbf16>
    %c0_1 = arith.constant 0 : index
    %c0_2 = arith.constant 0 : index
    %1 = vector.load %arg2[%c0_1, %c0_2] : memref<1024x256xbf16, #tpu.memory_space<vmem>>, vector<1024x256xbf16>
    %cst = arith.constant dense<0.000000e+00> : vector<16x256xf32>
    %2 = tpu.matmul %0, %1, %cst {dimension_numbers = #tpu.dot_dimension_numbers<[1], [0], [0], [1], [0, 0, 1, 1], [], []>} : vector<16x1024xbf16>, vector<1024x256xbf16>, vector<16x256xf32> -> vector<16x256xf32>
    %c0_3 = arith.constant 0 : index
    %c0_4 = arith.constant 0 : index
    %3 = vector.load %arg3[%c0_3, %c0_4] : memref<1x256xf32, #tpu.memory_space<vmem>>, vector<1x256xf32>
    %4 = vector.broadcast %3 : vector<1x256xf32> to vector<16x256xf32>
    %5 = arith.addf %2, %4 : vector<16x256xf32>
    %6 = vector.extract_strided_slice %5 {offsets = [0, 0], sizes = [16, 128], strides = [1, 1]} : vector<16x256xf32> to vector<16x128xf32>
    %7 = vector.extract_strided_slice %5 {offsets = [0, 128], sizes = [16, 128], strides = [1, 1]} : vector<16x256xf32> to vector<16x128xf32>
    %cst_5 = arith.constant 0.000000e+00 : f32
    %8 = vector.broadcast %cst_5 : f32 to vector<16x128xf32>
    %9 = arith.cmpf oge, %6, %8 : vector<16x128xf32>
    %cst_6 = arith.constant 2.000000e-01 : f32
    %10 = vector.broadcast %cst_6 : f32 to vector<16x128xf32>
    %11 = arith.mulf %10, %6 : vector<16x128xf32>
    %12 = arith.select %9, %6, %11 : vector<16x128xi1>, vector<16x128xf32>
    %13 = arith.negf %7 : vector<16x128xf32>
    %14 = math.exp %13 : vector<16x128xf32>
    %cst_7 = arith.constant 1.000000e+00 : f32
    %15 = vector.broadcast %cst_7 : f32 to vector<16x128xf32>
    %16 = arith.addf %15, %14 : vector<16x128xf32>
    %17 = arith.divf %15, %16 : vector<16x128xf32>
    %18 = arith.mulf %12, %17 : vector<16x128xf32>
    %19 = arith.truncf %18 : vector<16x128xf32> to vector<16x128xbf16>
    %c0_8 = arith.constant 0 : index
    %c0_9 = arith.constant 0 : index
    %20 = vector.load %arg4[%c0_8, %c0_9] : memref<16x128xbf16, #tpu.memory_space<vmem>>, vector<16x128xbf16>
    tpu.vector_store %arg4[%c0_8, %c0_9], %19 {strides = array<i32>} : memref<16x128xbf16, #tpu.memory_space<vmem>>, vector<16x128xbf16>,
    return
  }
  func.func @transform_0(%arg0: i32) -> (i32, i32) {
    %c0_i32 = arith.constant 0 : i32
    %c0_i32_0 = arith.constant 0 : i32
    return %arg0, %c0_i32 : i32, i32
  }
  func.func @transform_1(%arg0: i32) -> (i32, i32) {
    %c0_i32 = arith.constant 0 : i32
    %c0_i32_0 = arith.constant 0 : i32
    %c0_i32_1 = arith.constant 0 : i32
    return %c0_i32, %c0_i32_0 : i32, i32
  }
  func.func @transform_2(%arg0: i32) -> (i32, i32) {
    %c0_i32 = arith.constant 0 : i32
    %c0_i32_0 = arith.constant 0 : i32
    %c0_i32_1 = arith.constant 0 : i32
    return %c0_i32, %c0_i32_0 : i32, i32
  }
  func.func @transform_3(%arg0: i32) -> (i32, i32) {
    %c0_i32 = arith.constant 0 : i32
    %c0_i32_0 = arith.constant 0 : i32
    return %arg0, %c0_i32 : i32, i32
  }
}

module attributes {stable_mosaic.version = 11 : i64} {
  func.func @_gated_conv_kernel(%arg0: i32, %arg1: memref<16x1152xbf16, #tpu.memory_space<vmem>>, %arg2: memref<1152x256xbf16, #tpu.memory_space<vmem>>, %arg3: memref<1x256xf32, #tpu.memory_space<vmem>>, %arg4: memref<16x128xbf16, #tpu.memory_space<vmem>>) attributes {dimension_semantics = [#tpu.dimension_semantics<parallel>], iteration_bounds = array<i64: 2>, scalar_prefetch = 0 : i64, scratch_operands = 0 : i64, tpu.core_type = #tpu.core_type<tc>, window_params = [{transform_indices = @transform_0, window_bounds = array<i64: 16, 1152>}, {pipeline_mode = #tpu.pipeline_mode<synchronous>, transform_indices = @transform_1, window_bounds = array<i64: 1152, 256>}, {pipeline_mode = #tpu.pipeline_mode<synchronous>, transform_indices = @transform_2, window_bounds = array<i64: 1, 256>}, {transform_indices = @transform_3, window_bounds = array<i64: 16, 128>}]} {
    %c0 = arith.constant 0 : index
    %c0_0 = arith.constant 0 : index
    %0 = vector.load %arg1[%c0, %c0_0] : memref<16x1152xbf16, #tpu.memory_space<vmem>>, vector<16x1152xbf16>
    %c0_1 = arith.constant 0 : index
    %c0_2 = arith.constant 0 : index
    %1 = vector.load %arg2[%c0_1, %c0_2] : memref<1152x256xbf16, #tpu.memory_space<vmem>>, vector<1152x256xbf16>
    %cst = arith.constant dense<0.000000e+00> : vector<16x256xf32>
    %2 = tpu.matmul %0, %1, %cst {dimension_numbers = #tpu.dot_dimension_numbers<[1], [0], [0], [1], [0, 0, 1, 1], [], []>} : vector<16x1152xbf16>, vector<1152x256xbf16>, vector<16x256xf32> -> vector<16x256xf32>
    %c0_3 = arith.constant 0 : index
    %c0_4 = arith.constant 0 : index
    %3 = vector.load %arg3[%c0_3, %c0_4] : memref<1x256xf32, #tpu.memory_space<vmem>>, vector<1x256xf32>
    %4 = vector.broadcast %3 : vector<1x256xf32> to vector<16x256xf32>
    %5 = arith.addf %2, %4 : vector<16x256xf32>
    %6 = vector.extract_strided_slice %5 {offsets = [0, 0], sizes = [16, 128], strides = [1, 1]} : vector<16x256xf32> to vector<16x128xf32>
    %7 = vector.extract_strided_slice %5 {offsets = [0, 128], sizes = [16, 128], strides = [1, 1]} : vector<16x256xf32> to vector<16x128xf32>
    %cst_5 = arith.constant 0.000000e+00 : f32
    %8 = vector.broadcast %cst_5 : f32 to vector<16x128xf32>
    %9 = arith.cmpf oge, %6, %8 : vector<16x128xf32>
    %cst_6 = arith.constant 2.000000e-01 : f32
    %10 = vector.broadcast %cst_6 : f32 to vector<16x128xf32>
    %11 = arith.mulf %10, %6 : vector<16x128xf32>
    %12 = arith.select %9, %6, %11 : vector<16x128xi1>, vector<16x128xf32>
    %13 = arith.negf %7 : vector<16x128xf32>
    %14 = math.exp %13 : vector<16x128xf32>
    %cst_7 = arith.constant 1.000000e+00 : f32
    %15 = vector.broadcast %cst_7 : f32 to vector<16x128xf32>
    %16 = arith.addf %15, %14 : vector<16x128xf32>
    %17 = arith.divf %15, %16 : vector<16x128xf32>
    %18 = arith.mulf %12, %17 : vector<16x128xf32>
    %19 = arith.truncf %18 : vector<16x128xf32> to vector<16x128xbf16>
    %c0_8 = arith.constant 0 : index
    %c0_9 = arith.constant 0 : index
    %20 = vector.load %arg4[%c0_8, %c0_9] : memref<16x128xbf16, #tpu.memory_space<vmem>>, vector<16x128xbf16>
    tpu.vector_store %arg4[%c0_8, %c0_9], %19 {strides = array<i32>} : memref<16x128xbf16, #tpu.memory_space<vmem>>, vector<16x128xbf16>,
    return
  }
  func.func @transform_0(%arg0: i32) -> (i32, i32) {
    %c0_i32 = arith.constant 0 : i32
    %c0_i32_0 = arith.constant 0 : i32
    return %arg0, %c0_i32 : i32, i32
  }
  func.func @transform_1(%arg0: i32) -> (i32, i32) {
    %c0_i32 = arith.constant 0 : i32
    %c0_i32_0 = arith.constant 0 : i32
    %c0_i32_1 = arith.constant 0 : i32
    return %c0_i32, %c0_i32_0 : i32, i32
  }
  func.func @transform_2(%arg0: i32) -> (i32, i32) {
    %c0_i32 = arith.constant 0 : i32
    %c0_i32_0 = arith.constant 0 : i32
    %c0_i32_1 = arith.constant 0 : i32
    return %c0_i32, %c0_i32_0 : i32, i32
  }
  func.func @transform_3(%arg0: i32) -> (i32, i32) {
    %c0_i32 = arith.constant 0 : i32
    %c0_i32_0 = arith.constant 0 : i32
    return %arg0, %c0_i32 : i32, i32
  }
}

module attributes {stable_mosaic.version = 11 : i64} {
  func.func @_gated_conv_kernel(%arg0: i32, %arg1: memref<64x1152xbf16, #tpu.memory_space<vmem>>, %arg2: memref<1152x256xbf16, #tpu.memory_space<vmem>>, %arg3: memref<1x256xf32, #tpu.memory_space<vmem>>, %arg4: memref<64x128xbf16, #tpu.memory_space<vmem>>) attributes {dimension_semantics = [#tpu.dimension_semantics<parallel>], iteration_bounds = array<i64: 2>, scalar_prefetch = 0 : i64, scratch_operands = 0 : i64, tpu.core_type = #tpu.core_type<tc>, window_params = [{transform_indices = @transform_0, window_bounds = array<i64: 64, 1152>}, {pipeline_mode = #tpu.pipeline_mode<synchronous>, transform_indices = @transform_1, window_bounds = array<i64: 1152, 256>}, {pipeline_mode = #tpu.pipeline_mode<synchronous>, transform_indices = @transform_2, window_bounds = array<i64: 1, 256>}, {transform_indices = @transform_3, window_bounds = array<i64: 64, 128>}]} {
    %c0 = arith.constant 0 : index
    %c0_0 = arith.constant 0 : index
    %0 = vector.load %arg1[%c0, %c0_0] : memref<64x1152xbf16, #tpu.memory_space<vmem>>, vector<64x1152xbf16>
    %c0_1 = arith.constant 0 : index
    %c0_2 = arith.constant 0 : index
    %1 = vector.load %arg2[%c0_1, %c0_2] : memref<1152x256xbf16, #tpu.memory_space<vmem>>, vector<1152x256xbf16>
    %cst = arith.constant dense<0.000000e+00> : vector<64x256xf32>
    %2 = tpu.matmul %0, %1, %cst {dimension_numbers = #tpu.dot_dimension_numbers<[1], [0], [0], [1], [0, 0, 1, 1], [], []>} : vector<64x1152xbf16>, vector<1152x256xbf16>, vector<64x256xf32> -> vector<64x256xf32>
    %c0_3 = arith.constant 0 : index
    %c0_4 = arith.constant 0 : index
    %3 = vector.load %arg3[%c0_3, %c0_4] : memref<1x256xf32, #tpu.memory_space<vmem>>, vector<1x256xf32>
    %4 = vector.broadcast %3 : vector<1x256xf32> to vector<64x256xf32>
    %5 = arith.addf %2, %4 : vector<64x256xf32>
    %6 = vector.extract_strided_slice %5 {offsets = [0, 0], sizes = [64, 128], strides = [1, 1]} : vector<64x256xf32> to vector<64x128xf32>
    %7 = vector.extract_strided_slice %5 {offsets = [0, 128], sizes = [64, 128], strides = [1, 1]} : vector<64x256xf32> to vector<64x128xf32>
    %cst_5 = arith.constant 0.000000e+00 : f32
    %8 = vector.broadcast %cst_5 : f32 to vector<64x128xf32>
    %9 = arith.cmpf oge, %6, %8 : vector<64x128xf32>
    %cst_6 = arith.constant 2.000000e-01 : f32
    %10 = vector.broadcast %cst_6 : f32 to vector<64x128xf32>
    %11 = arith.mulf %10, %6 : vector<64x128xf32>
    %12 = arith.select %9, %6, %11 : vector<64x128xi1>, vector<64x128xf32>
    %13 = arith.negf %7 : vector<64x128xf32>
    %14 = math.exp %13 : vector<64x128xf32>
    %cst_7 = arith.constant 1.000000e+00 : f32
    %15 = vector.broadcast %cst_7 : f32 to vector<64x128xf32>
    %16 = arith.addf %15, %14 : vector<64x128xf32>
    %17 = arith.divf %15, %16 : vector<64x128xf32>
    %18 = arith.mulf %12, %17 : vector<64x128xf32>
    %19 = arith.truncf %18 : vector<64x128xf32> to vector<64x128xbf16>
    %c0_8 = arith.constant 0 : index
    %c0_9 = arith.constant 0 : index
    %20 = vector.load %arg4[%c0_8, %c0_9] : memref<64x128xbf16, #tpu.memory_space<vmem>>, vector<64x128xbf16>
    tpu.vector_store %arg4[%c0_8, %c0_9], %19 {strides = array<i32>} : memref<64x128xbf16, #tpu.memory_space<vmem>>, vector<64x128xbf16>,
    return
  }
  func.func @transform_0(%arg0: i32) -> (i32, i32) {
    %c0_i32 = arith.constant 0 : i32
    %c0_i32_0 = arith.constant 0 : i32
    return %arg0, %c0_i32 : i32, i32
  }
  func.func @transform_1(%arg0: i32) -> (i32, i32) {
    %c0_i32 = arith.constant 0 : i32
    %c0_i32_0 = arith.constant 0 : i32
    %c0_i32_1 = arith.constant 0 : i32
    return %c0_i32, %c0_i32_0 : i32, i32
  }
  func.func @transform_2(%arg0: i32) -> (i32, i32) {
    %c0_i32 = arith.constant 0 : i32
    %c0_i32_0 = arith.constant 0 : i32
    %c0_i32_1 = arith.constant 0 : i32
    return %c0_i32, %c0_i32_0 : i32, i32
  }
  func.func @transform_3(%arg0: i32) -> (i32, i32) {
    %c0_i32 = arith.constant 0 : i32
    %c0_i32_0 = arith.constant 0 : i32
    return %arg0, %c0_i32 : i32, i32
  }
}

module attributes {stable_mosaic.version = 11 : i64} {
  func.func @_gated_conv_kernel(%arg0: i32, %arg1: memref<256x640xbf16, #tpu.memory_space<vmem>>, %arg2: memref<640x256xbf16, #tpu.memory_space<vmem>>, %arg3: memref<1x256xf32, #tpu.memory_space<vmem>>, %arg4: memref<256x128xbf16, #tpu.memory_space<vmem>>) attributes {dimension_semantics = [#tpu.dimension_semantics<parallel>], iteration_bounds = array<i64: 2>, scalar_prefetch = 0 : i64, scratch_operands = 0 : i64, tpu.core_type = #tpu.core_type<tc>, window_params = [{transform_indices = @transform_0, window_bounds = array<i64: 256, 640>}, {pipeline_mode = #tpu.pipeline_mode<synchronous>, transform_indices = @transform_1, window_bounds = array<i64: 640, 256>}, {pipeline_mode = #tpu.pipeline_mode<synchronous>, transform_indices = @transform_2, window_bounds = array<i64: 1, 256>}, {transform_indices = @transform_3, window_bounds = array<i64: 256, 128>}]} {
    %c0 = arith.constant 0 : index
    %c0_0 = arith.constant 0 : index
    %0 = vector.load %arg1[%c0, %c0_0] : memref<256x640xbf16, #tpu.memory_space<vmem>>, vector<256x640xbf16>
    %c0_1 = arith.constant 0 : index
    %c0_2 = arith.constant 0 : index
    %1 = vector.load %arg2[%c0_1, %c0_2] : memref<640x256xbf16, #tpu.memory_space<vmem>>, vector<640x256xbf16>
    %cst = arith.constant dense<0.000000e+00> : vector<256x256xf32>
    %2 = tpu.matmul %0, %1, %cst {dimension_numbers = #tpu.dot_dimension_numbers<[1], [0], [0], [1], [0, 0, 1, 1], [], []>} : vector<256x640xbf16>, vector<640x256xbf16>, vector<256x256xf32> -> vector<256x256xf32>
    %c0_3 = arith.constant 0 : index
    %c0_4 = arith.constant 0 : index
    %3 = vector.load %arg3[%c0_3, %c0_4] : memref<1x256xf32, #tpu.memory_space<vmem>>, vector<1x256xf32>
    %4 = vector.broadcast %3 : vector<1x256xf32> to vector<256x256xf32>
    %5 = arith.addf %2, %4 : vector<256x256xf32>
    %6 = vector.extract_strided_slice %5 {offsets = [0, 0], sizes = [256, 128], strides = [1, 1]} : vector<256x256xf32> to vector<256x128xf32>
    %7 = vector.extract_strided_slice %5 {offsets = [0, 128], sizes = [256, 128], strides = [1, 1]} : vector<256x256xf32> to vector<256x128xf32>
    %cst_5 = arith.constant 0.000000e+00 : f32
    %8 = vector.broadcast %cst_5 : f32 to vector<256x128xf32>
    %9 = arith.cmpf oge, %6, %8 : vector<256x128xf32>
    %cst_6 = arith.constant 2.000000e-01 : f32
    %10 = vector.broadcast %cst_6 : f32 to vector<256x128xf32>
    %11 = arith.mulf %10, %6 : vector<256x128xf32>
    %12 = arith.select %9, %6, %11 : vector<256x128xi1>, vector<256x128xf32>
    %13 = arith.negf %7 : vector<256x128xf32>
    %14 = math.exp %13 : vector<256x128xf32>
    %cst_7 = arith.constant 1.000000e+00 : f32
    %15 = vector.broadcast %cst_7 : f32 to vector<256x128xf32>
    %16 = arith.addf %15, %14 : vector<256x128xf32>
    %17 = arith.divf %15, %16 : vector<256x128xf32>
    %18 = arith.mulf %12, %17 : vector<256x128xf32>
    %19 = arith.truncf %18 : vector<256x128xf32> to vector<256x128xbf16>
    %c0_8 = arith.constant 0 : index
    %c0_9 = arith.constant 0 : index
    %20 = vector.load %arg4[%c0_8, %c0_9] : memref<256x128xbf16, #tpu.memory_space<vmem>>, vector<256x128xbf16>
    tpu.vector_store %arg4[%c0_8, %c0_9], %19 {strides = array<i32>} : memref<256x128xbf16, #tpu.memory_space<vmem>>, vector<256x128xbf16>,
    return
  }
  func.func @transform_0(%arg0: i32) -> (i32, i32) {
    %c0_i32 = arith.constant 0 : i32
    %c0_i32_0 = arith.constant 0 : i32
    return %arg0, %c0_i32 : i32, i32
  }
  func.func @transform_1(%arg0: i32) -> (i32, i32) {
    %c0_i32 = arith.constant 0 : i32
    %c0_i32_0 = arith.constant 0 : i32
    %c0_i32_1 = arith.constant 0 : i32
    return %c0_i32, %c0_i32_0 : i32, i32
  }
  func.func @transform_2(%arg0: i32) -> (i32, i32) {
    %c0_i32 = arith.constant 0 : i32
    %c0_i32_0 = arith.constant 0 : i32
    %c0_i32_1 = arith.constant 0 : i32
    return %c0_i32, %c0_i32_0 : i32, i32
  }
  func.func @transform_3(%arg0: i32) -> (i32, i32) {
    %c0_i32 = arith.constant 0 : i32
    %c0_i32_0 = arith.constant 0 : i32
    return %arg0, %c0_i32 : i32, i32
  }
}

module attributes {stable_mosaic.version = 11 : i64} {
  func.func @_gated_conv_kernel(%arg0: i32, %arg1: memref<256x384xbf16, #tpu.memory_space<vmem>>, %arg2: memref<384x256xbf16, #tpu.memory_space<vmem>>, %arg3: memref<1x256xf32, #tpu.memory_space<vmem>>, %arg4: memref<256x128xbf16, #tpu.memory_space<vmem>>) attributes {dimension_semantics = [#tpu.dimension_semantics<parallel>], iteration_bounds = array<i64: 2>, scalar_prefetch = 0 : i64, scratch_operands = 0 : i64, tpu.core_type = #tpu.core_type<tc>, window_params = [{transform_indices = @transform_0, window_bounds = array<i64: 256, 384>}, {pipeline_mode = #tpu.pipeline_mode<synchronous>, transform_indices = @transform_1, window_bounds = array<i64: 384, 256>}, {pipeline_mode = #tpu.pipeline_mode<synchronous>, transform_indices = @transform_2, window_bounds = array<i64: 1, 256>}, {transform_indices = @transform_3, window_bounds = array<i64: 256, 128>}]} {
    %c0 = arith.constant 0 : index
    %c0_0 = arith.constant 0 : index
    %0 = vector.load %arg1[%c0, %c0_0] : memref<256x384xbf16, #tpu.memory_space<vmem>>, vector<256x384xbf16>
    %c0_1 = arith.constant 0 : index
    %c0_2 = arith.constant 0 : index
    %1 = vector.load %arg2[%c0_1, %c0_2] : memref<384x256xbf16, #tpu.memory_space<vmem>>, vector<384x256xbf16>
    %cst = arith.constant dense<0.000000e+00> : vector<256x256xf32>
    %2 = tpu.matmul %0, %1, %cst {dimension_numbers = #tpu.dot_dimension_numbers<[1], [0], [0], [1], [0, 0, 1, 1], [], []>} : vector<256x384xbf16>, vector<384x256xbf16>, vector<256x256xf32> -> vector<256x256xf32>
    %c0_3 = arith.constant 0 : index
    %c0_4 = arith.constant 0 : index
    %3 = vector.load %arg3[%c0_3, %c0_4] : memref<1x256xf32, #tpu.memory_space<vmem>>, vector<1x256xf32>
    %4 = vector.broadcast %3 : vector<1x256xf32> to vector<256x256xf32>
    %5 = arith.addf %2, %4 : vector<256x256xf32>
    %6 = vector.extract_strided_slice %5 {offsets = [0, 0], sizes = [256, 128], strides = [1, 1]} : vector<256x256xf32> to vector<256x128xf32>
    %7 = vector.extract_strided_slice %5 {offsets = [0, 128], sizes = [256, 128], strides = [1, 1]} : vector<256x256xf32> to vector<256x128xf32>
    %cst_5 = arith.constant 0.000000e+00 : f32
    %8 = vector.broadcast %cst_5 : f32 to vector<256x128xf32>
    %9 = arith.cmpf oge, %6, %8 : vector<256x128xf32>
    %cst_6 = arith.constant 2.000000e-01 : f32
    %10 = vector.broadcast %cst_6 : f32 to vector<256x128xf32>
    %11 = arith.mulf %10, %6 : vector<256x128xf32>
    %12 = arith.select %9, %6, %11 : vector<256x128xi1>, vector<256x128xf32>
    %13 = arith.negf %7 : vector<256x128xf32>
    %14 = math.exp %13 : vector<256x128xf32>
    %cst_7 = arith.constant 1.000000e+00 : f32
    %15 = vector.broadcast %cst_7 : f32 to vector<256x128xf32>
    %16 = arith.addf %15, %14 : vector<256x128xf32>
    %17 = arith.divf %15, %16 : vector<256x128xf32>
    %18 = arith.mulf %12, %17 : vector<256x128xf32>
    %19 = arith.truncf %18 : vector<256x128xf32> to vector<256x128xbf16>
    %c0_8 = arith.constant 0 : index
    %c0_9 = arith.constant 0 : index
    %20 = vector.load %arg4[%c0_8, %c0_9] : memref<256x128xbf16, #tpu.memory_space<vmem>>, vector<256x128xbf16>
    tpu.vector_store %arg4[%c0_8, %c0_9], %19 {strides = array<i32>} : memref<256x128xbf16, #tpu.memory_space<vmem>>, vector<256x128xbf16>,
    return
  }
  func.func @transform_0(%arg0: i32) -> (i32, i32) {
    %c0_i32 = arith.constant 0 : i32
    %c0_i32_0 = arith.constant 0 : i32
    return %arg0, %c0_i32 : i32, i32
  }
  func.func @transform_1(%arg0: i32) -> (i32, i32) {
    %c0_i32 = arith.constant 0 : i32
    %c0_i32_0 = arith.constant 0 : i32
    %c0_i32_1 = arith.constant 0 : i32
    return %c0_i32, %c0_i32_0 : i32, i32
  }
  func.func @transform_2(%arg0: i32) -> (i32, i32) {
    %c0_i32 = arith.constant 0 : i32
    %c0_i32_0 = arith.constant 0 : i32
    %c0_i32_1 = arith.constant 0 : i32
    return %c0_i32, %c0_i32_0 : i32, i32
  }
  func.func @transform_3(%arg0: i32) -> (i32, i32) {
    %c0_i32 = arith.constant 0 : i32
    %c0_i32_0 = arith.constant 0 : i32
    return %arg0, %c0_i32 : i32, i32
  }
}

module attributes {stable_mosaic.version = 11 : i64} {
  func.func @_gated_conv_kernel(%arg0: i32, %arg1: memref<256x256xbf16, #tpu.memory_space<vmem>>, %arg2: memref<256x256xbf16, #tpu.memory_space<vmem>>, %arg3: memref<1x256xf32, #tpu.memory_space<vmem>>, %arg4: memref<256x128xbf16, #tpu.memory_space<vmem>>) attributes {dimension_semantics = [#tpu.dimension_semantics<parallel>], iteration_bounds = array<i64: 2>, scalar_prefetch = 0 : i64, scratch_operands = 0 : i64, tpu.core_type = #tpu.core_type<tc>, window_params = [{transform_indices = @transform_0, window_bounds = array<i64: 256, 256>}, {pipeline_mode = #tpu.pipeline_mode<synchronous>, transform_indices = @transform_1, window_bounds = array<i64: 256, 256>}, {pipeline_mode = #tpu.pipeline_mode<synchronous>, transform_indices = @transform_2, window_bounds = array<i64: 1, 256>}, {transform_indices = @transform_3, window_bounds = array<i64: 256, 128>}]} {
    %c0 = arith.constant 0 : index
    %c0_0 = arith.constant 0 : index
    %0 = vector.load %arg1[%c0, %c0_0] : memref<256x256xbf16, #tpu.memory_space<vmem>>, vector<256x256xbf16>
    %c0_1 = arith.constant 0 : index
    %c0_2 = arith.constant 0 : index
    %1 = vector.load %arg2[%c0_1, %c0_2] : memref<256x256xbf16, #tpu.memory_space<vmem>>, vector<256x256xbf16>
    %cst = arith.constant dense<0.000000e+00> : vector<256x256xf32>
    %2 = tpu.matmul %0, %1, %cst {dimension_numbers = #tpu.dot_dimension_numbers<[1], [0], [0], [1], [0, 0, 1, 1], [], []>} : vector<256x256xbf16>, vector<256x256xbf16>, vector<256x256xf32> -> vector<256x256xf32>
    %c0_3 = arith.constant 0 : index
    %c0_4 = arith.constant 0 : index
    %3 = vector.load %arg3[%c0_3, %c0_4] : memref<1x256xf32, #tpu.memory_space<vmem>>, vector<1x256xf32>
    %4 = vector.broadcast %3 : vector<1x256xf32> to vector<256x256xf32>
    %5 = arith.addf %2, %4 : vector<256x256xf32>
    %6 = vector.extract_strided_slice %5 {offsets = [0, 0], sizes = [256, 128], strides = [1, 1]} : vector<256x256xf32> to vector<256x128xf32>
    %7 = vector.extract_strided_slice %5 {offsets = [0, 128], sizes = [256, 128], strides = [1, 1]} : vector<256x256xf32> to vector<256x128xf32>
    %8 = arith.negf %7 : vector<256x128xf32>
    %9 = math.exp %8 : vector<256x128xf32>
    %cst_5 = arith.constant 1.000000e+00 : f32
    %10 = vector.broadcast %cst_5 : f32 to vector<256x128xf32>
    %11 = arith.addf %10, %9 : vector<256x128xf32>
    %12 = arith.divf %10, %11 : vector<256x128xf32>
    %13 = arith.mulf %6, %12 : vector<256x128xf32>
    %cst_6 = arith.constant -1.000000e+00 : f32
    %cst_7 = arith.constant 1.000000e+00 : f32
    %14 = vector.broadcast %cst_6 : f32 to vector<256x128xf32>
    %15 = arith.maximumf %14, %13 : vector<256x128xf32>
    %16 = vector.broadcast %cst_7 : f32 to vector<256x128xf32>
    %17 = arith.minimumf %16, %15 : vector<256x128xf32>
    %18 = arith.truncf %17 : vector<256x128xf32> to vector<256x128xbf16>
    %c0_8 = arith.constant 0 : index
    %c0_9 = arith.constant 0 : index
    %19 = vector.load %arg4[%c0_8, %c0_9] : memref<256x128xbf16, #tpu.memory_space<vmem>>, vector<256x128xbf16>
    tpu.vector_store %arg4[%c0_8, %c0_9], %18 {strides = array<i32>} : memref<256x128xbf16, #tpu.memory_space<vmem>>, vector<256x128xbf16>,
    return
  }
  func.func @transform_0(%arg0: i32) -> (i32, i32) {
    %c0_i32 = arith.constant 0 : i32
    %c0_i32_0 = arith.constant 0 : i32
    return %arg0, %c0_i32 : i32, i32
  }
  func.func @transform_1(%arg0: i32) -> (i32, i32) {
    %c0_i32 = arith.constant 0 : i32
    %c0_i32_0 = arith.constant 0 : i32
    %c0_i32_1 = arith.constant 0 : i32
    return %c0_i32, %c0_i32_0 : i32, i32
  }
  func.func @transform_2(%arg0: i32) -> (i32, i32) {
    %c0_i32 = arith.constant 0 : i32
    %c0_i32_0 = arith.constant 0 : i32
    %c0_i32_1 = arith.constant 0 : i32
    return %c0_i32, %c0_i32_0 : i32, i32
  }
  func.func @transform_3(%arg0: i32) -> (i32, i32) {
    %c0_i32 = arith.constant 0 : i32
    %c0_i32_0 = arith.constant 0 : i32
    return %arg0, %c0_i32 : i32, i32
  }
}

module attributes {stable_mosaic.version = 11 : i64} {
  func.func @_gated_conv_kernel(%arg0: i32, %arg1: memref<64x384xbf16, #tpu.memory_space<vmem>>, %arg2: memref<384x256xbf16, #tpu.memory_space<vmem>>, %arg3: memref<1x256xf32, #tpu.memory_space<vmem>>, %arg4: memref<64x128xbf16, #tpu.memory_space<vmem>>) attributes {dimension_semantics = [#tpu.dimension_semantics<parallel>], iteration_bounds = array<i64: 2>, scalar_prefetch = 0 : i64, scratch_operands = 0 : i64, tpu.core_type = #tpu.core_type<tc>, window_params = [{transform_indices = @transform_0, window_bounds = array<i64: 64, 384>}, {pipeline_mode = #tpu.pipeline_mode<synchronous>, transform_indices = @transform_1, window_bounds = array<i64: 384, 256>}, {pipeline_mode = #tpu.pipeline_mode<synchronous>, transform_indices = @transform_2, window_bounds = array<i64: 1, 256>}, {transform_indices = @transform_3, window_bounds = array<i64: 64, 128>}]} {
    %c0 = arith.constant 0 : index
    %c0_0 = arith.constant 0 : index
    %0 = vector.load %arg1[%c0, %c0_0] : memref<64x384xbf16, #tpu.memory_space<vmem>>, vector<64x384xbf16>
    %c0_1 = arith.constant 0 : index
    %c0_2 = arith.constant 0 : index
    %1 = vector.load %arg2[%c0_1, %c0_2] : memref<384x256xbf16, #tpu.memory_space<vmem>>, vector<384x256xbf16>
    %cst = arith.constant dense<0.000000e+00> : vector<64x256xf32>
    %2 = tpu.matmul %0, %1, %cst {dimension_numbers = #tpu.dot_dimension_numbers<[1], [0], [0], [1], [0, 0, 1, 1], [], []>} : vector<64x384xbf16>, vector<384x256xbf16>, vector<64x256xf32> -> vector<64x256xf32>
    %c0_3 = arith.constant 0 : index
    %c0_4 = arith.constant 0 : index
    %3 = vector.load %arg3[%c0_3, %c0_4] : memref<1x256xf32, #tpu.memory_space<vmem>>, vector<1x256xf32>
    %4 = vector.broadcast %3 : vector<1x256xf32> to vector<64x256xf32>
    %5 = arith.addf %2, %4 : vector<64x256xf32>
    %6 = vector.extract_strided_slice %5 {offsets = [0, 0], sizes = [64, 128], strides = [1, 1]} : vector<64x256xf32> to vector<64x128xf32>
    %7 = vector.extract_strided_slice %5 {offsets = [0, 128], sizes = [64, 128], strides = [1, 1]} : vector<64x256xf32> to vector<64x128xf32>
    %cst_5 = arith.constant 0.000000e+00 : f32
    %8 = vector.broadcast %cst_5 : f32 to vector<64x128xf32>
    %9 = arith.cmpf oge, %6, %8 : vector<64x128xf32>
    %cst_6 = arith.constant 2.000000e-01 : f32
    %10 = vector.broadcast %cst_6 : f32 to vector<64x128xf32>
    %11 = arith.mulf %10, %6 : vector<64x128xf32>
    %12 = arith.select %9, %6, %11 : vector<64x128xi1>, vector<64x128xf32>
    %13 = arith.negf %7 : vector<64x128xf32>
    %14 = math.exp %13 : vector<64x128xf32>
    %cst_7 = arith.constant 1.000000e+00 : f32
    %15 = vector.broadcast %cst_7 : f32 to vector<64x128xf32>
    %16 = arith.addf %15, %14 : vector<64x128xf32>
    %17 = arith.divf %15, %16 : vector<64x128xf32>
    %18 = arith.mulf %12, %17 : vector<64x128xf32>
    %19 = arith.truncf %18 : vector<64x128xf32> to vector<64x128xbf16>
    %c0_8 = arith.constant 0 : index
    %c0_9 = arith.constant 0 : index
    %20 = vector.load %arg4[%c0_8, %c0_9] : memref<64x128xbf16, #tpu.memory_space<vmem>>, vector<64x128xbf16>
    tpu.vector_store %arg4[%c0_8, %c0_9], %19 {strides = array<i32>} : memref<64x128xbf16, #tpu.memory_space<vmem>>, vector<64x128xbf16>,
    return
  }
  func.func @transform_0(%arg0: i32) -> (i32, i32) {
    %c0_i32 = arith.constant 0 : i32
    %c0_i32_0 = arith.constant 0 : i32
    return %arg0, %c0_i32 : i32, i32
  }
  func.func @transform_1(%arg0: i32) -> (i32, i32) {
    %c0_i32 = arith.constant 0 : i32
    %c0_i32_0 = arith.constant 0 : i32
    %c0_i32_1 = arith.constant 0 : i32
    return %c0_i32, %c0_i32_0 : i32, i32
  }
  func.func @transform_2(%arg0: i32) -> (i32, i32) {
    %c0_i32 = arith.constant 0 : i32
    %c0_i32_0 = arith.constant 0 : i32
    %c0_i32_1 = arith.constant 0 : i32
    return %c0_i32, %c0_i32_0 : i32, i32
  }
  func.func @transform_3(%arg0: i32) -> (i32, i32) {
    %c0_i32 = arith.constant 0 : i32
    %c0_i32_0 = arith.constant 0 : i32
    return %arg0, %c0_i32 : i32, i32
  }
}

module attributes {stable_mosaic.version = 11 : i64} {
  func.func @_gated_conv_kernel(%arg0: i32, %arg1: memref<16x640xbf16, #tpu.memory_space<vmem>>, %arg2: memref<640x256xbf16, #tpu.memory_space<vmem>>, %arg3: memref<1x256xf32, #tpu.memory_space<vmem>>, %arg4: memref<16x128xbf16, #tpu.memory_space<vmem>>) attributes {dimension_semantics = [#tpu.dimension_semantics<parallel>], iteration_bounds = array<i64: 2>, scalar_prefetch = 0 : i64, scratch_operands = 0 : i64, tpu.core_type = #tpu.core_type<tc>, window_params = [{transform_indices = @transform_0, window_bounds = array<i64: 16, 640>}, {pipeline_mode = #tpu.pipeline_mode<synchronous>, transform_indices = @transform_1, window_bounds = array<i64: 640, 256>}, {pipeline_mode = #tpu.pipeline_mode<synchronous>, transform_indices = @transform_2, window_bounds = array<i64: 1, 256>}, {transform_indices = @transform_3, window_bounds = array<i64: 16, 128>}]} {
    %c0 = arith.constant 0 : index
    %c0_0 = arith.constant 0 : index
    %0 = vector.load %arg1[%c0, %c0_0] : memref<16x640xbf16, #tpu.memory_space<vmem>>, vector<16x640xbf16>
    %c0_1 = arith.constant 0 : index
    %c0_2 = arith.constant 0 : index
    %1 = vector.load %arg2[%c0_1, %c0_2] : memref<640x256xbf16, #tpu.memory_space<vmem>>, vector<640x256xbf16>
    %cst = arith.constant dense<0.000000e+00> : vector<16x256xf32>
    %2 = tpu.matmul %0, %1, %cst {dimension_numbers = #tpu.dot_dimension_numbers<[1], [0], [0], [1], [0, 0, 1, 1], [], []>} : vector<16x640xbf16>, vector<640x256xbf16>, vector<16x256xf32> -> vector<16x256xf32>
    %c0_3 = arith.constant 0 : index
    %c0_4 = arith.constant 0 : index
    %3 = vector.load %arg3[%c0_3, %c0_4] : memref<1x256xf32, #tpu.memory_space<vmem>>, vector<1x256xf32>
    %4 = vector.broadcast %3 : vector<1x256xf32> to vector<16x256xf32>
    %5 = arith.addf %2, %4 : vector<16x256xf32>
    %6 = vector.extract_strided_slice %5 {offsets = [0, 0], sizes = [16, 128], strides = [1, 1]} : vector<16x256xf32> to vector<16x128xf32>
    %7 = vector.extract_strided_slice %5 {offsets = [0, 128], sizes = [16, 128], strides = [1, 1]} : vector<16x256xf32> to vector<16x128xf32>
    %cst_5 = arith.constant 0.000000e+00 : f32
    %8 = vector.broadcast %cst_5 : f32 to vector<16x128xf32>
    %9 = arith.cmpf oge, %6, %8 : vector<16x128xf32>
    %cst_6 = arith.constant 2.000000e-01 : f32
    %10 = vector.broadcast %cst_6 : f32 to vector<16x128xf32>
    %11 = arith.mulf %10, %6 : vector<16x128xf32>
    %12 = arith.select %9, %6, %11 : vector<16x128xi1>, vector<16x128xf32>
    %13 = arith.negf %7 : vector<16x128xf32>
    %14 = math.exp %13 : vector<16x128xf32>
    %cst_7 = arith.constant 1.000000e+00 : f32
    %15 = vector.broadcast %cst_7 : f32 to vector<16x128xf32>
    %16 = arith.addf %15, %14 : vector<16x128xf32>
    %17 = arith.divf %15, %16 : vector<16x128xf32>
    %18 = arith.mulf %12, %17 : vector<16x128xf32>
    %19 = arith.truncf %18 : vector<16x128xf32> to vector<16x128xbf16>
    %c0_8 = arith.constant 0 : index
    %c0_9 = arith.constant 0 : index
    %20 = vector.load %arg4[%c0_8, %c0_9] : memref<16x128xbf16, #tpu.memory_space<vmem>>, vector<16x128xbf16>
    tpu.vector_store %arg4[%c0_8, %c0_9], %19 {strides = array<i32>} : memref<16x128xbf16, #tpu.memory_space<vmem>>, vector<16x128xbf16>,
    return
  }
  func.func @transform_0(%arg0: i32) -> (i32, i32) {
    %c0_i32 = arith.constant 0 : i32
    %c0_i32_0 = arith.constant 0 : i32
    return %arg0, %c0_i32 : i32, i32
  }
  func.func @transform_1(%arg0: i32) -> (i32, i32) {
    %c0_i32 = arith.constant 0 : i32
    %c0_i32_0 = arith.constant 0 : i32
    %c0_i32_1 = arith.constant 0 : i32
    return %c0_i32, %c0_i32_0 : i32, i32
  }
  func.func @transform_2(%arg0: i32) -> (i32, i32) {
    %c0_i32 = arith.constant 0 : i32
    %c0_i32_0 = arith.constant 0 : i32
    %c0_i32_1 = arith.constant 0 : i32
    return %c0_i32, %c0_i32_0 : i32, i32
  }
  func.func @transform_3(%arg0: i32) -> (i32, i32) {
    %c0_i32 = arith.constant 0 : i32
    %c0_i32_0 = arith.constant 0 : i32
    return %arg0, %c0_i32 : i32, i32
  }
}

module attributes {stable_mosaic.version = 11 : i64} {
  func.func @_self_attn_kernel(%arg0: i32, %arg1: memref<1x16x128xbf16, #tpu.memory_space<vmem>>, %arg2: memref<128x256xbf16, #tpu.memory_space<vmem>>, %arg3: memref<128x128xbf16, #tpu.memory_space<vmem>>, %arg4: memref<1x256xf32, #tpu.memory_space<vmem>>, %arg5: memref<1x128xf32, #tpu.memory_space<vmem>>, %arg6: memref<1xf32, #tpu.memory_space<smem>>, %arg7: memref<1x16x128xbf16, #tpu.memory_space<vmem>>) attributes {dimension_semantics = [#tpu.dimension_semantics<parallel>], iteration_bounds = array<i64: 2>, scalar_prefetch = 0 : i64, scratch_operands = 0 : i64, tpu.core_type = #tpu.core_type<tc>, window_params = [{transform_indices = @transform_0, window_bounds = array<i64: 1, 16, 128>}, {pipeline_mode = #tpu.pipeline_mode<synchronous>, transform_indices = @transform_1, window_bounds = array<i64: 128, 256>}, {pipeline_mode = #tpu.pipeline_mode<synchronous>, transform_indices = @transform_2, window_bounds = array<i64: 128, 128>}, {pipeline_mode = #tpu.pipeline_mode<synchronous>, transform_indices = @transform_3, window_bounds = array<i64: 1, 256>}, {pipeline_mode = #tpu.pipeline_mode<synchronous>, transform_indices = @transform_4, window_bounds = array<i64: 1, 128>}, {transform_indices = @transform_5, window_bounds = array<i64: 1>}, {transform_indices = @transform_6, window_bounds = array<i64: 1, 16, 128>}]} {
    %c0 = arith.constant 0 : index
    %c0_0 = arith.constant 0 : index
    %c0_1 = arith.constant 0 : index
    %0 = vector.load %arg1[%c0, %c0_0, %c0_1] : memref<1x16x128xbf16, #tpu.memory_space<vmem>>, vector<1x16x128xbf16>
    %1 = vector.shape_cast %0 : vector<1x16x128xbf16> to vector<16x128xbf16>
    %c0_2 = arith.constant 0 : index
    %c0_3 = arith.constant 0 : index
    %2 = vector.load %arg2[%c0_2, %c0_3] : memref<128x256xbf16, #tpu.memory_space<vmem>>, vector<128x256xbf16>
    %cst = arith.constant dense<0.000000e+00> : vector<16x256xf32>
    %3 = tpu.matmul %1, %2, %cst {dimension_numbers = #tpu.dot_dimension_numbers<[1], [0], [0], [1], [0, 0, 1, 1], [], []>} : vector<16x128xbf16>, vector<128x256xbf16>, vector<16x256xf32> -> vector<16x256xf32>
    %c0_4 = arith.constant 0 : index
    %c0_5 = arith.constant 0 : index
    %4 = vector.load %arg4[%c0_4, %c0_5] : memref<1x256xf32, #tpu.memory_space<vmem>>, vector<1x256xf32>
    %5 = vector.broadcast %4 : vector<1x256xf32> to vector<16x256xf32>
    %6 = arith.addf %3, %5 : vector<16x256xf32>
    %7 = vector.extract_strided_slice %6 {offsets = [0, 0], sizes = [16, 128], strides = [1, 1]} : vector<16x256xf32> to vector<16x128xf32>
    %8 = vector.extract_strided_slice %6 {offsets = [0, 128], sizes = [16, 128], strides = [1, 1]} : vector<16x256xf32> to vector<16x128xf32>
    %c0_6 = arith.constant 0 : index
    %c0_7 = arith.constant 0 : index
    %9 = vector.load %arg3[%c0_6, %c0_7] : memref<128x128xbf16, #tpu.memory_space<vmem>>, vector<128x128xbf16>
    %cst_8 = arith.constant dense<0.000000e+00> : vector<16x128xf32>
    %10 = tpu.matmul %1, %9, %cst_8 {dimension_numbers = #tpu.dot_dimension_numbers<[1], [0], [0], [1], [0, 0, 1, 1], [], []>} : vector<16x128xbf16>, vector<128x128xbf16>, vector<16x128xf32> -> vector<16x128xf32>
    %c0_9 = arith.constant 0 : index
    %c0_10 = arith.constant 0 : index
    %11 = vector.load %arg5[%c0_9, %c0_10] : memref<1x128xf32, #tpu.memory_space<vmem>>, vector<1x128xf32>
    %12 = vector.broadcast %11 : vector<1x128xf32> to vector<16x128xf32>
    %13 = arith.addf %10, %12 : vector<16x128xf32>
    %cst_11 = arith.constant dense<0.000000e+00> : vector<16x16xf32>
    %14 = tpu.matmul %7, %8, %cst_11 {dimension_numbers = #tpu.dot_dimension_numbers<[1], [1], [0], [0], [0, 0, 1, 0], [], []>} : vector<16x128xf32>, vector<16x128xf32>, vector<16x16xf32> -> vector<16x16xf32>
    %cst_12 = arith.constant dense<0xFF800000> : vector<16xf32>
    %15 = vector.multi_reduction <maximumf>, %14, %cst_12 [1] : vector<16x16xf32> to vector<16xf32>
    %16 = vector.shape_cast %15 : vector<16xf32> to vector<16x1xf32>
    %17 = vector.broadcast %16 : vector<16x1xf32> to vector<16x16xf32>
    %18 = arith.subf %14, %17 : vector<16x16xf32>
    %19 = math.exp %18 : vector<16x16xf32>
    %cst_13 = arith.constant dense<0.000000e+00> : vector<16xf32>
    %20 = vector.multi_reduction <add>, %19, %cst_13 [1] : vector<16x16xf32> to vector<16xf32>
    %21 = vector.shape_cast %20 : vector<16xf32> to vector<16x1xf32>
    %22 = tpu.reciprocal %21 {approx = true} : vector<16x1xf32> -> vector<16x1xf32>
    %23 = vector.broadcast %22 : vector<16x1xf32> to vector<16x16xf32>
    %24 = arith.mulf %19, %23 : vector<16x16xf32>
    %25 = arith.truncf %24 : vector<16x16xf32> to vector<16x16xbf16>
    %26 = arith.truncf %13 : vector<16x128xf32> to vector<16x128xbf16>
    %cst_14 = arith.constant dense<0.000000e+00> : vector<16x128xf32>
    %27 = tpu.matmul %25, %26, %cst_14 {dimension_numbers = #tpu.dot_dimension_numbers<[1], [0], [0], [1], [0, 0, 1, 1], [], []>} : vector<16x16xbf16>, vector<16x128xbf16>, vector<16x128xf32> -> vector<16x128xf32>
    %c0_15 = arith.constant 0 : index
    %28 = memref.load %arg6[%c0_15] : memref<1xf32, #tpu.memory_space<smem>>
    %29 = vector.broadcast %28 : f32 to vector<16x128xf32>
    %30 = arith.mulf %29, %27 : vector<16x128xf32>
    %31 = arith.extf %1 : vector<16x128xbf16> to vector<16x128xf32>
    %32 = arith.addf %30, %31 : vector<16x128xf32>
    %33 = arith.truncf %32 : vector<16x128xf32> to vector<16x128xbf16>
    %c0_16 = arith.constant 0 : index
    %c0_17 = arith.constant 0 : index
    %c0_18 = arith.constant 0 : index
    %34 = vector.load %arg7[%c0_16, %c0_17, %c0_18] : memref<1x16x128xbf16, #tpu.memory_space<vmem>>, vector<1x16x128xbf16>
    %35 = vector.shape_cast %34 : vector<1x16x128xbf16> to vector<16x128xbf16>
    %36 = vector.shape_cast %33 : vector<16x128xbf16> to vector<1x16x128xbf16>
    tpu.vector_store %arg7[%c0_16, %c0_17, %c0_18], %36 {strides = array<i32>} : memref<1x16x128xbf16, #tpu.memory_space<vmem>>, vector<1x16x128xbf16>,
    return
  }
  func.func @transform_0(%arg0: i32) -> (i32, i32, i32) {
    %c0_i32 = arith.constant 0 : i32
    %c0_i32_0 = arith.constant 0 : i32
    %c0_i32_1 = arith.constant 0 : i32
    return %arg0, %c0_i32, %c0_i32_0 : i32, i32, i32
  }
  func.func @transform_1(%arg0: i32) -> (i32, i32) {
    %c0_i32 = arith.constant 0 : i32
    %c0_i32_0 = arith.constant 0 : i32
    %c0_i32_1 = arith.constant 0 : i32
    return %c0_i32, %c0_i32_0 : i32, i32
  }
  func.func @transform_2(%arg0: i32) -> (i32, i32) {
    %c0_i32 = arith.constant 0 : i32
    %c0_i32_0 = arith.constant 0 : i32
    %c0_i32_1 = arith.constant 0 : i32
    return %c0_i32, %c0_i32_0 : i32, i32
  }
  func.func @transform_3(%arg0: i32) -> (i32, i32) {
    %c0_i32 = arith.constant 0 : i32
    %c0_i32_0 = arith.constant 0 : i32
    %c0_i32_1 = arith.constant 0 : i32
    return %c0_i32, %c0_i32_0 : i32, i32
  }
  func.func @transform_4(%arg0: i32) -> (i32, i32) {
    %c0_i32 = arith.constant 0 : i32
    %c0_i32_0 = arith.constant 0 : i32
    %c0_i32_1 = arith.constant 0 : i32
    return %c0_i32, %c0_i32_0 : i32, i32
  }
  func.func @transform_5(%arg0: i32) -> i32 {
    %c0_i32 = arith.constant 0 : i32
    %c0_i32_0 = arith.constant 0 : i32
    return %c0_i32 : i32
  }
  func.func @transform_6(%arg0: i32) -> (i32, i32, i32) {
    %c0_i32 = arith.constant 0 : i32
    %c0_i32_0 = arith.constant 0 : i32
    %c0_i32_1 = arith.constant 0 : i32
    return %arg0, %c0_i32, %c0_i32_0 : i32, i32, i32
  }
}

</mosaic_0001>

<bundles_post_ra>
// kernel: _lambda_.36
= control target key start
LH: loop header
LB: loop body
LE: loop exit
PB: predicated region body
PF: predicated region fallthrough
CT: control target
= control target key end

     0   :  { %s1596_s12 = smov 0   ;;  %s1933_s0 = inlined_call_operand.vmem [shape: bf16[512,128], index: 0, kind: input, shape index: {}]   ;;  %s1934_s1 = inlined_call_operand.vmem [shape: bf16[128,256], index: 1, kind: input, shape index: {}]   ;;  %s1935_s2 = inlined_call_operand.vmem [shape: f32[1,256], index: 2, kind: input, shape index: {}]   ;;  %s1936_s3 = inlined_call_operand.vmem [shape: bf16[512,128], index: 3, kind: output, shape index: {}]  }
   0x1 LB: > { %s1140_s13 = sadd.s32 4294967295, %s1573_s12   ;;  %p1144_p0 = scmp.ge.s32.totalorder %s1573_s12, 1  ;;  %s1573_s12 = sphi %s1596_s12, %s13_s12  }
   0x2   : > { %p138_p1 = scmp.lt.s32.totalorder %s1573_s12, 3 }
   0x4   : > { %p139_p2 = pnand %p1144_p0, %p138_p1 }
   0x5   : > { %v1399_v0 = vld [vmem:[%s1934_s1 + $0x4] ss:$8 sps:$4 sm:$0xff] (!%p139_p2)   ;;  %s1145_s16 = sshll.u32 (!%p139_p2), %s1140_s13, 5  ;;  %v1401_v1 = vld [vmem:[%s1934_s1] ss:$8 sps:$4 sm:$0xff] (!%p139_p2)   ;;  %v1575_v2 = vmov (!%p139_p2), 0   ;;  %v225_v33 = vlaneseq (!%p139_p2) }
   0x6   : > { %142 = sbr.rel (%p139_p2) target bundleno = 363 (0x16b), region = 32  ;;  %443 = vmatprep.mubr.bf16.mxu0 (!%p139_p2), %v1575_v2  ;;  %523 = vmatprep.mubr.bf16.mxu1 (!%p139_p2), %v1575_v2  ;;  %p163_p3 = scmp.lt.s32.totalorder (!%p139_p2), %s1145_s16, 63  ;;  %v1402_v3 = vld [vmem:[%s1934_s1 + $0x14] ss:$8 sps:$4 sm:$0xff] (!%p139_p2)   ;;  %v1404_v4 = vld [vmem:[%s1934_s1 + $0x10] ss:$8 sps:$4 sm:$0xff] (!%p139_p2)  }
   0x7   : > { %411 = vmatprep.subr.bf16.mxu0 (!%p139_p2), %v1399_v0  ;;  %1374 = vmatprep.subr.bf16.mxu1 (!%p139_p2), %v1399_v0  ;;  %v1405_v5 = vld [vmem:[%s1934_s1 + $0x24] ss:$8 sps:$4 sm:$0xff] (!%p139_p2)   ;;  %v1407_v6 = vld [vmem:[%s1934_s1 + $0x20] ss:$8 sps:$4 sm:$0xff] (!%p139_p2)   ;;  %v1408_v7 = vld [vmem:[%s1934_s1 + $0x34] ss:$8 sps:$4 sm:$0xff] (!%p139_p2)  }
   0x8   : > { %412 = vmatpush1.bf16.msra.mxu0 (!%p139_p2), %v1401_v1  ;;  %1382 = vmatpush1.bf16.msra.mxu1 (!%p139_p2), %v1401_v1  ;;  %v1410_v8 = vld [vmem:[%s1934_s1 + $0x30] ss:$8 sps:$4 sm:$0xff] (!%p139_p2)   ;;  %v1411_v9 = vld [vmem:[%s1934_s1 + $0x44] ss:$8 sps:$4 sm:$0xff] (!%p139_p2)   ;;  %v1413_v10 = vld [vmem:[%s1934_s1 + $0x40] ss:$8 sps:$4 sm:$0xff] (!%p139_p2)  }
   0x9   : > { %413 = vmatprep.subr.bf16.mxu0 (!%p139_p2), %v1402_v3  ;;  %1375 = vmatprep.subr.bf16.mxu1 (!%p139_p2), %v1402_v3  ;;  %v1414_v11 = vld [vmem:[%s1934_s1 + $0x54] ss:$8 sps:$4 sm:$0xff] (!%p139_p2)   ;;  %v1416_v12 = vld [vmem:[%s1934_s1 + $0x50] ss:$8 sps:$4 sm:$0xff] (!%p139_p2)   ;;  %v1417_v13 = vld [vmem:[%s1934_s1 + $0x64] ss:$8 sps:$4 sm:$0xff] (!%p139_p2)  }
   0xa   : > { %v1419_v14 = vld [vmem:[%s1934_s1 + $0x60] ss:$8 sps:$4 sm:$0xff] (!%p139_p2)   ;;  %v1420_v15 = vld [vmem:[%s1934_s1 + $0x74] ss:$8 sps:$4 sm:$0xff] (!%p139_p2)   ;;  %v1422_v16 = vld [vmem:[%s1934_s1 + $0x70] ss:$8 sps:$4 sm:$0xff] (!%p139_p2)  }
   0xb   : > { %v226_v34 = vshrl.u32 (!%p139_p2), %v225_v33, 7  ;;  %v223_v36 = vld [vmem:[%s1935_s2] sm:$0x3] (!%p139_p2) }
   0xc   : > { %414 = vmatpush1.bf16.msra.mxu0 (!%p139_p2), %v1404_v4  ;;  %1383 = vmatpush1.bf16.msra.mxu1 (!%p139_p2), %v1404_v4 }
   0xd   : > { %s1938_s16 = smov (!%p163_p3, %s1145_s16), 63  ;;  %415 = vmatprep.subr.bf16.mxu0 %v1405_v5  ;;  %1376 = vmatprep.subr.bf16.mxu1 %v1405_v5  ;;  %v231_v35 = vsub.s32 1, %v226_v34  ;;  %v227_v56 = vsub.s32 0, %v226_v34 }
   0xe   : > { %s1146_s25 = sshll.u32 %s1938_s16, 2 }
   0xf   : > { %s1635_s5 = scalar_lea.vmem %s1933_s0, %s1146_s25  ;;  %v1697_v37 = vrot.slane %v223_v36, %v231_v35  ;;  %v1713_v3 = vrot.slane %v223_v36, %v227_v56  ;;  %s1770_s4 = scalar_lea.vmem %s1936_s3, %s1146_s25 }
  0x10   : > { %416 = vmatpush1.bf16.msra.mxu0 %v1407_v6  ;;  %1384 = vmatpush1.bf16.msra.mxu1 %v1407_v6  ;;  %v1423_v17 = vld [vmem:[%s1635_s5] sm:$0xff]   ;;  %v1425_v19 = vld [vmem:[%s1635_s5 + $0x8] sm:$0xff]   ;;  %v1427_v21 = vld [vmem:[%s1635_s5 + $0x10] sm:$0xff]  }
  0x11   : > { %417 = vmatprep.subr.bf16.mxu0 %v1408_v7  ;;  %1377 = vmatprep.subr.bf16.mxu1 %v1408_v7  ;;  %v1424_v18 = vld [vmem:[%s1635_s5 + $0x40] sm:$0xff]   ;;  %v1426_v20 = vld [vmem:[%s1635_s5 + $0x48] sm:$0xff]   ;;  %v1428_v22 = vld [vmem:[%s1635_s5 + $0x50] sm:$0xff]  }
  0x12   : > { %v1429_v23 = vld [vmem:[%s1635_s5 + $0x18] sm:$0xff]   ;;  %v1431_v25 = vld [vmem:[%s1635_s5 + $0x20] sm:$0xff]   ;;  %v1433_v27 = vld [vmem:[%s1635_s5 + $0x28] sm:$0xff]  }
  0x13   : > { %v1430_v24 = vld [vmem:[%s1635_s5 + $0x58] sm:$0xff]   ;;  %v1432_v26 = vld [vmem:[%s1635_s5 + $0x60] sm:$0xff]   ;;  %v1434_v28 = vld [vmem:[%s1635_s5 + $0x68] sm:$0xff]  }
  0x14   : > { %418 = vmatpush1.bf16.msra.mxu0 %v1410_v8  ;;  %1385 = vmatpush1.bf16.msra.mxu1 %v1410_v8  ;;  %v1435_v29 = vld [vmem:[%s1635_s5 + $0x30] sm:$0xff]   ;;  %v1437_v31 = vld [vmem:[%s1635_s5 + $0x38] sm:$0xff]  }
  0x15   : > { %419 = vmatprep.subr.bf16.mxu0 %v1411_v9  ;;  %1378 = vmatprep.subr.bf16.mxu1 %v1411_v9  ;;  %v1436_v30 = vld [vmem:[%s1635_s5 + $0x70] sm:$0xff]   ;;  %v1438_v32 = vld [vmem:[%s1635_s5 + $0x78] sm:$0xff]  }
  0x18   : > { %420 = vmatpush1.bf16.msra.mxu0 %v1413_v10  ;;  %1386 = vmatpush1.bf16.msra.mxu1 %v1413_v10 }
  0x19   : > { %421 = vmatprep.subr.bf16.mxu0 %v1414_v11  ;;  %1379 = vmatprep.subr.bf16.mxu1 %v1414_v11 }
  0x1c   : > { %422 = vmatpush1.bf16.msra.mxu0 %v1416_v12  ;;  %1387 = vmatpush1.bf16.msra.mxu1 %v1416_v12 }
  0x1d   : > { %423 = vmatprep.subr.bf16.mxu0 %v1417_v13  ;;  %1380 = vmatprep.subr.bf16.mxu1 %v1417_v13 }
  0x20   : > { %424 = vmatpush1.bf16.msra.mxu0 %v1419_v14  ;;  %1388 = vmatpush1.bf16.msra.mxu1 %v1419_v14 }
  0x21   : > { %425 = vmatprep.subr.bf16.mxu0 %v1420_v15  ;;  %1381 = vmatprep.subr.bf16.mxu1 %v1420_v15 }
  0x24   : > { %426 = vmatpush1.bf16.msra.mxu0 %v1422_v16  ;;  %1389 = vmatpush1.bf16.msra.mxu1 %v1422_v16 }
  0x27   : > { %444 = vmatmul.mubr.bf16.vlgmr.msra.gmra.mrb[0].mxu0 %v1423_v17  ;;  %524 = vmatmul.mubr.bf16.vlgmr.msra.gmra.mrb[0].mxu1 %v1424_v18 }
  0x28   : > { %453 = vmatprep.mubr.bf16.mxu0 %v1575_v2  ;;  %533 = vmatprep.mubr.bf16.mxu1 %v1575_v2 }
  0x2f   : > { %454 = vmatmul.mubr.bf16.gmra.mrb[4].mxu0 %v1425_v19  ;;  %534 = vmatmul.mubr.bf16.gmra.mrb[4].mxu1 %v1426_v20 }
  0x30   : > { %463 = vmatprep.mubr.bf16.mxu0 %v1575_v2  ;;  %543 = vmatprep.mubr.bf16.mxu1 %v1575_v2 }
  0x37   : > { %464 = vmatmul.mubr.bf16.gmra.mrb[8].mxu0 %v1427_v21  ;;  %544 = vmatmul.mubr.bf16.gmra.mrb[8].mxu1 %v1428_v22 }
  0x38   : > { %473 = vmatprep.mubr.bf16.mxu0 %v1575_v2  ;;  %553 = vmatprep.mubr.bf16.mxu1 %v1575_v2 }
  0x3f   : > { %474 = vmatmul.mubr.bf16.gmra.mrb[12].mxu0 %v1429_v23  ;;  %554 = vmatmul.mubr.bf16.gmra.mrb[12].mxu1 %v1430_v24 }
  0x40   : > { %483 = vmatprep.mubr.bf16.mxu0 %v1575_v2  ;;  %563 = vmatprep.mubr.bf16.mxu1 %v1575_v2 }
  0x47   : > { %484 = vmatmul.mubr.bf16.gmra.mrb[16].mxu0 %v1431_v25  ;;  %564 = vmatmul.mubr.bf16.gmra.mrb[16].mxu1 %v1432_v26 }
  0x48   : > { %493 = vmatprep.mubr.bf16.mxu0 %v1575_v2  ;;  %573 = vmatprep.mubr.bf16.mxu1 %v1575_v2 }
  0x4f   : > { %494 = vmatmul.mubr.bf16.gmra.mrb[20].mxu0 %v1433_v27  ;;  %574 = vmatmul.mubr.bf16.gmra.mrb[20].mxu1 %v1434_v28 }
  0x50   : > { %503 = vmatprep.mubr.bf16.mxu0 %v1575_v2  ;;  %583 = vmatprep.mubr.bf16.mxu1 %v1575_v2 }
  0x57   : > { %504 = vmatmul.mubr.bf16.gmra.mrb[24].mxu0 %v1435_v29  ;;  %584 = vmatmul.mubr.bf16.gmra.mrb[24].mxu1 %v1436_v30 }
  0x58   : > { %513 = vmatprep.mubr.bf16.mxu0 %v1575_v2  ;;  %593 = vmatprep.mubr.bf16.mxu1 %v1575_v2 }
  0x5f   : > { %514 = vmatmul.mubr.bf16.gmra.mrb[28].mxu0 %v1437_v31  ;;  %594 = vmatmul.mubr.bf16.gmra.mrb[28].mxu1 %v1438_v32 }
  0xfa   : > { %v445_v38 = vpop.f32.mrb[0].mxu0  ;;  %v525_v39 = vpop.f32.mrb[0].mxu1 }
  0xfb   : > { %v447_v40 = vpop.f32.mrb[1].mxu0  ;;  %v527_v41 = vpop.f32.mrb[1].mxu1  ;;  %v446_v12 = vadd.f32 %v445_v38, %v1713_v3  ;;  %v526_v16 = vadd.f32 %v525_v39, %v1713_v3 }
  0xfc   : > { %v448_v42 = vadd.f32 %v447_v40, %v1697_v37  ;;  %v528_v43 = vadd.f32 %v527_v41, %v1697_v37  ;;  %v449_v44 = vpop.f32.mrb[2].mxu0  ;;  %v529_v45 = vpop.f32.mrb[2].mxu1 }
  0xfd   : > { %v451_v48 = vpop.f32.mrb[3].mxu0  ;;  %v531_v49 = vpop.f32.mrb[3].mxu1  ;;  %v450_v22 = vadd.f32 %v449_v44, %v1713_v3  ;;  %v530_v23 = vadd.f32 %v529_v45, %v1713_v3  ;;  %vm604_vm0 = vcmp.ge.f32.partialorder %v446_v12, 0.0  ;;  %v636_v32 = vmul.f32 0.2, %v446_v12 }
  0xfe   : > { %v1181_v46 = vmul.f32 -1.442695, %v448_v42  ;;  %v1197_v47 = vmul.f32 -1.442695, %v528_v43  ;;  %v452_v50 = vadd.f32 %v451_v48, %v1697_v37  ;;  %v532_v51 = vadd.f32 %v531_v49, %v1697_v37 }
  0xff   : > { %vm620_vm1 = vcmp.ge.f32.partialorder %v526_v16, 0.0  ;;  %v652_v33 = vmul.f32 0.2, %v526_v16  ;;  %v637_v34 = vmul.f32 0.2, %v450_v22  ;;  %vm605_vm2 = vcmp.ge.f32.partialorder %v450_v22, 0.0 }
 0x100   : > { %1439 = vpow2.f32 %v1181_v46  ;;  %v1182_v52 = vmul.f32 -1.442695, %v452_v50  ;;  %v1198_v53 = vmul.f32 -1.442695, %v532_v51  ;;  %v653_v35 = vmul.f32 0.2, %v530_v23 }
 0x101   : > { %1441 = vpow2.f32 %v1197_v47  ;;  %vm621_vm3 = vcmp.ge.f32.partialorder %v530_v23, 0.0  ;;  %v668_v47 = vsel %vm604_vm0, %v446_v12, %v636_v32  ;;  %v684_v48 = vsel %vm620_vm1, %v526_v16, %v652_v33 }
 0x102   : > { %v1703_v54 = vpop.f32.mrb[4].mxu0  ;;  %v1705_v55 = vpop.f32.mrb[4].mxu1  ;;  %1443 = vpow2.f32 %v1182_v52  ;;  %v685_v56 = vsel %vm621_vm3, %v530_v23, %v653_v35 }
 0x103   : > { %v457_v57 = vpop.f32.mrb[5].mxu0  ;;  %v537_v58 = vpop.f32.mrb[5].mxu1  ;;  %1445 = vpow2.f32 %v1198_v53  ;;  %v1739_v43 = vadd.f32 %v1703_v54, %v1713_v3  ;;  %v669_v53 = vsel %vm605_vm2, %v450_v22, %v637_v34 }
 0x104   : > { %v458_v59 = vadd.f32 %v457_v57, %v1697_v37  ;;  %v538_v60 = vadd.f32 %v537_v58, %v1697_v37  ;;  %v1709_v61 = vpop.f32.mrb[6].mxu0  ;;  %v1711_v62 = vpop.f32.mrb[6].mxu1 }
 0x105   : > { %v461_v1 = vpop.f32.mrb[7].mxu0  ;;  %v541_v2 = vpop.f32.mrb[7].mxu1  ;;  %vm606_vm4 = vcmp.ge.f32.partialorder %v1739_v43, 0.0  ;;  %v638_v12 = vmul.f32 0.2, %v1739_v43 }
 0x106   : > { %v1183_v63 = vmul.f32 -1.442695, %v458_v59  ;;  %v1199_v0 = vmul.f32 -1.442695, %v538_v60  ;;  %v462_v4 = vadd.f32 %v461_v1, %v1697_v37  ;;  %v542_v5 = vadd.f32 %v541_v2, %v1697_v37 }
 0x107   : > { %v536_v60 = vadd.f32 %v1705_v55, %v1713_v3 }
 0x108   : > { %1447 = vpow2.f32 %v1183_v63  ;;  %v1184_v6 = vmul.f32 -1.442695, %v462_v4  ;;  %v1200_v7 = vmul.f32 -1.442695, %v542_v5  ;;  %v460_v4 = vadd.f32 %v1709_v61, %v1713_v3 }
 0x109   : > { %1449 = vpow2.f32 %v1199_v0  ;;  %vm622_vm5 = vcmp.ge.f32.partialorder %v536_v60, 0.0 }
 0x10a   : > { %v1440_v8 = vpop.eup %1439  ;;  %v1717_v9 = vpop.f32.mrb[8].mxu0  ;;  %1451 = vpow2.f32 %v1184_v6  ;;  %vm607_vm6 = vcmp.ge.f32.partialorder %v460_v4, 0.0 }
 0x10b   : > { %v1719_v10 = vpop.f32.mrb[8].mxu1  ;;  %v1442_v11 = vpop.eup %1441  ;;  %v796_v13 = vadd.f32 1.0, %v1440_v8  ;;  %1453 = vpow2.f32 %v1200_v7  ;;  %v540_v8 = vadd.f32 %v1711_v62, %v1713_v3 }
 0x10c   : > { %v467_v14 = vpop.f32.mrb[9].mxu0  ;;  %v547_v15 = vpop.f32.mrb[9].mxu1  ;;  %v812_v17 = vadd.f32 1.0, %v1442_v11 }
 0x10d   : > { %v468_v18 = vadd.f32 %v467_v14, %v1697_v37  ;;  %v1724_v19 = vpop.f32.mrb[10].mxu0  ;;  %v1726_v20 = vpop.f32.mrb[10].mxu1  ;;  %1455 = vrcp.f32 %v796_v13  ;;  %v548_v24 = vadd.f32 %v547_v15, %v1697_v37  ;;  %v654_v15 = vmul.f32 0.2, %v536_v60 }
 0x10e   : > { %v1444_v21 = vpop.eup %1443  ;;  %v471_v25 = vpop.f32.mrb[11].mxu0  ;;  %1457 = vrcp.f32 %v812_v17  ;;  %vm623_vm7 = vcmp.ge.f32.partialorder %v540_v8, 0.0  ;;  %v655_v32 = vmul.f32 0.2, %v540_v8 }
 0x10f   : > { %v551_v26 = vpop.f32.mrb[11].mxu1  ;;  %v1446_v27 = vpop.eup %1445  ;;  %v797_v28 = vadd.f32 1.0, %v1444_v21  ;;  %v1185_v30 = vmul.f32 -1.442695, %v468_v18  ;;  %v1201_v31 = vmul.f32 -1.442695, %v548_v24  ;;  %v472_v36 = vadd.f32 %v471_v25, %v1697_v37 }
 0x110   : > { %v813_v29 = vadd.f32 1.0, %v1446_v27  ;;  %v552_v39 = vadd.f32 %v551_v26, %v1697_v37  ;;  %v639_v27 = vmul.f32 0.2, %v460_v4 }
 0x111   : > { %1459 = vrcp.f32 %v797_v28  ;;  %v1186_v45 = vmul.f32 -1.442695, %v472_v36 }
 0x112   : > { %1461 = vrcp.f32 %v813_v29  ;;  %v1448_v38 = vpop.eup %1447  ;;  %v1733_v40 = vpop.f32.mrb[12].mxu0  ;;  %v1202_v0 = vmul.f32 -1.442695, %v552_v39 }
 0x113   : > { %1463 = vpow2.f32 %v1185_v30  ;;  %v1735_v41 = vpop.f32.mrb[12].mxu1  ;;  %v1450_v42 = vpop.eup %1449  ;;  %v798_v44 = vadd.f32 1.0, %v1448_v38  ;;  %v466_v38 = vadd.f32 %v1717_v9, %v1713_v3 }
 0x114   : > { %1465 = vpow2.f32 %v1201_v31  ;;  %v477_v46 = vpop.f32.mrb[13].mxu0  ;;  %v814_v49 = vadd.f32 1.0, %v1450_v42  ;;  %v557_v50 = vpop.f32.mrb[13].mxu1 }
 0x115   : > { %v1743_v51 = vpop.f32.mrb[14].mxu0  ;;  %v1452_v52 = vpop.eup %1451  ;;  %1467 = vrcp.f32 %v798_v44  ;;  %v478_v54 = vadd.f32 %v477_v46, %v1697_v37  ;;  %v558_v13 = vadd.f32 %v557_v50, %v1697_v37  ;;  %v686_v46 = vsel %vm622_vm5, %v536_v60, %v654_v15 }
 0x116   : > { %v1748_v57 = vpop.f32.mrb[14].mxu1  ;;  %v481_v58 = vpop.f32.mrb[15].mxu0  ;;  %1469 = vrcp.f32 %v814_v49  ;;  %v799_v63 = vadd.f32 1.0, %v1452_v52  ;;  %v546_v50 = vadd.f32 %v1719_v10, %v1713_v3  ;;  %vm608_vm8 = vcmp.ge.f32.partialorder %v466_v38, 0.0 }
 0x117   : > { %v1454_v59 = vpop.eup %1453  ;;  %v561_v1 = vpop.f32.mrb[15].mxu1  ;;  %1471 = vpow2.f32 %v1186_v45  ;;  %v1187_v11 = vmul.f32 -1.442695, %v478_v54  ;;  %v482_v61 = vadd.f32 %v481_v58, %v1697_v37  ;;  %v1203_v21 = vmul.f32 -1.442695, %v558_v13 }
 0x118   : > { %v1456_v2 = vpop.eup %1455  ;;  %v815_v5 = vadd.f32 1.0, %v1454_v59  ;;  %1473 = vrcp.f32 %v799_v63  ;;  %v562_v22 = vadd.f32 %v561_v1, %v1697_v37  ;;  %v670_v45 = vsel %vm606_vm4, %v1739_v43, %v638_v12 }
 0x119   : > { %v1458_v6 = vpop.eup %1457  ;;  %v892_v7 = vmul.f32 %v1456_v2, %v668_v47  ;;  %v1188_v42 = vmul.f32 -1.442695, %v482_v61  ;;  %v687_v54 = vsel %vm623_vm7, %v540_v8, %v655_v32  ;;  %v640_v58 = vmul.f32 0.2, %v466_v38 }
 0x11a   : > { %v908_v55 = vmul.f32 %v1458_v6, %v684_v48  ;;  %1475 = vrcp.f32 %v815_v5  ;;  %v1760_v16 = vpop.f32.mrb[16].mxu0  ;;  %v1762_v17 = vpop.f32.mrb[16].mxu1  ;;  %v1204_v47 = vmul.f32 -1.442695, %v562_v22  ;;  %v470_v1 = vadd.f32 %v1724_v19, %v1713_v3 }
 0x11b   : > { %v1460_v14 = vpop.eup %1459  ;;  %1477 = vpow2.f32 %v1202_v0  ;;  %v487_v23 = vpop.f32.mrb[17].mxu0  ;;  %v672_v22 = vsel %vm608_vm8, %v466_v38, %v640_v58  ;;  %vm624_vm9 = vcmp.ge.f32.partialorder %v546_v50, 0.0 }
 0x11c   : > { %v1462_v62 = vpop.eup %1461  ;;  %v893_v18 = vmul.f32 %v1460_v14, %v669_v53  ;;  %1479 = vpow2.f32 %v1187_v11  ;;  %v567_v24 = vpop.f32.mrb[17].mxu1  ;;  %v488_v9 = vadd.f32 %v487_v23, %v1697_v37  ;;  %v656_v11 = vmul.f32 0.2, %v546_v50 }
 0x11d   : > { %v1464_v25 = vpop.eup %1463  ;;  %v909_v26 = vmul.f32 %v1462_v62, %v685_v56  ;;  %v1772_v28 = vpop.f32.mrb[18].mxu0  ;;  %1481 = vpow2.f32 %v1203_v21  ;;  %v671_v56 = vsel %vm607_vm6, %v460_v4, %v639_v27  ;;  %v568_v4 = vadd.f32 %v567_v24, %v1697_v37 }
 0x11e   : > { %v1774_v29 = vpop.f32.mrb[18].mxu1  ;;  %v1466_v30 = vpop.eup %1465  ;;  %v1282_v31 = vpack.c.bf16 %v893_v18, %v892_v7  ;;  %v800_v33 = vadd.f32 1.0, %v1464_v25  ;;  %v1189_v2 = vmul.f32 -1.442695, %v488_v9  ;;  %v641_v24 = vmul.f32 0.2, %v470_v1 }
 0x11f   : > { %v491_v34 = vpop.f32.mrb[19].mxu0  ;;  %v571_v35 = vpop.f32.mrb[19].mxu1  ;;  %v1322_v36 = vpack.c.bf16 %v909_v26, %v908_v55  ;;  %v816_v39 = vadd.f32 1.0, %v1466_v30  ;;  %v550_v55 = vadd.f32 %v1726_v20, %v1713_v3  ;;  %v1205_v61 = vmul.f32 -1.442695, %v568_v4 }
 0x120   : > { %v1468_v44 = vpop.eup %1467  ;;  %1283 = vst [vmem:[%s1770_s4] sm:$0xff] %v1282_v31   ;;  %1483 = vrcp.f32 %v800_v33  ;;  %v492_v25 = vadd.f32 %v491_v34, %v1697_v37  ;;  %v572_v26 = vadd.f32 %v571_v35, %v1697_v37  ;;  %vm609_vm10 = vcmp.ge.f32.partialorder %v470_v1, 0.0 }
 0x121   : > { %v1470_v48 = vpop.eup %1469  ;;  %1366 = vst [vmem:[%s1770_s4 + $0x40] sm:$0xff] %v1322_v36   ;;  %v894_v49 = vmul.f32 %v1468_v44, %v670_v45  ;;  %1485 = vrcp.f32 %v816_v39  ;;  %v476_v27 = vadd.f32 %v1733_v40, %v1713_v3  ;;  %v688_v32 = vsel %vm624_vm9, %v546_v50, %v656_v11 }
 0x122   : > { %v1472_v52 = vpop.eup %1471  ;;  %v910_v53 = vmul.f32 %v1470_v48, %v686_v46  ;;  %1487 = vpow2.f32 %v1188_v42  ;;  %v1789_v60 = vpop.f32.mrb[20].mxu0  ;;  %v657_v33 = vmul.f32 0.2, %v550_v55  ;;  %v1190_v36 = vmul.f32 -1.442695, %v492_v25 }
 0x123   : > { %v1474_v43 = vpop.eup %1473  ;;  %v801_v59 = vadd.f32 1.0, %v1472_v52  ;;  %1489 = vpow2.f32 %v1204_v47  ;;  %v1791_v63 = vpop.f32.mrb[20].mxu1  ;;  %v556_v42 = vadd.f32 %v1735_v41, %v1713_v3  ;;  %v1206_v34 = vmul.f32 -1.442695, %v572_v26 }
 0x124   : > { %v1476_v10 = vpop.eup %1475  ;;  %v895_v0 = vmul.f32 %v1474_v43, %v671_v56  ;;  %v497_v5 = vpop.f32.mrb[21].mxu0  ;;  %v673_v46 = vsel %vm609_vm10, %v470_v1, %v641_v24  ;;  %vm625_vm11 = vcmp.ge.f32.partialorder %v550_v55, 0.0  ;;  %v642_v50 = vmul.f32 0.2, %v476_v27 }
 0x125   : > { %v577_v6 = vpop.f32.mrb[21].mxu1  ;;  %v1478_v7 = vpop.eup %1477  ;;  %v911_v8 = vmul.f32 %v1476_v10, %v687_v54  ;;  %1491 = vrcp.f32 %v801_v59  ;;  %v498_v9 = vadd.f32 %v497_v5, %v1697_v37  ;;  %vm610_vm12 = vcmp.ge.f32.partialorder %v476_v27, 0.0 }
 0x126   : > { %v1798_v12 = vpop.f32.mrb[22].mxu0  ;;  %v1800_v13 = vpop.f32.mrb[22].mxu1  ;;  %v1287_v15 = vpack.c.bf16 %v895_v0, %v894_v49  ;;  %v817_v19 = vadd.f32 1.0, %v1478_v7  ;;  %1493 = vpow2.f32 %v1189_v2  ;;  %v480_v56 = vadd.f32 %v1743_v51, %v1713_v3 }
 0x127   : > { %v1480_v14 = vpop.eup %1479  ;;  %v1802_v62 = vpop.f32.mrb[23].mxu0  ;;  %v1327_v21 = vpack.c.bf16 %v911_v8, %v910_v53  ;;  %v578_v43 = vadd.f32 %v577_v6, %v1697_v37  ;;  %v689_v0 = vsel %vm625_vm11, %v550_v55, %v657_v33  ;;  %vm626_vm13 = vcmp.ge.f32.partialorder %v556_v42, 0.0 }
 0x128   : > { %v1804_v18 = vpop.f32.mrb[23].mxu1  ;;  %v802_v20 = vadd.f32 1.0, %v1480_v14  ;;  %v1482_v23 = vpop.eup %1481  ;;  %1359 = vst [vmem:[%s1770_s4 + $0x8] sm:$0xff] %v1287_v15   ;;  %1495 = vrcp.f32 %v817_v19  ;;  %v1191_v1 = vmul.f32 -1.442695, %v498_v9  ;;  %v560_v5 = vadd.f32 %v1748_v57, %v1713_v3 }
 0x129   : > { %1367 = vst [vmem:[%s1770_s4 + $0x48] sm:$0xff] %v1327_v21   ;;  %v818_v30 = vadd.f32 1.0, %v1482_v23  ;;  %v1207_v51 = vmul.f32 -1.442695, %v578_v43  ;;  %v674_v7 = vsel %vm610_vm12, %v476_v27, %v642_v50  ;;  %v658_v6 = vmul.f32 0.2, %v556_v42 }
 0x12a   : > { %1497 = vrcp.f32 %v802_v20  ;;  %v1484_v31 = vpop.eup %1483  ;;  %v1815_v35 = vpop.f32.mrb[24].mxu0  ;;  %v643_v15 = vmul.f32 0.2, %v480_v56  ;;  %v502_v55 = vadd.f32 %v1802_v62, %v1697_v37  ;;  %v486_v57 = vadd.f32 %v1760_v16, %v1713_v3 }
 0x12b   : > { %1499 = vpow2.f32 %v1205_v61  ;;  %v1486_v38 = vpop.eup %1485  ;;  %v896_v39 = vmul.f32 %v1484_v31, %v672_v22  ;;  %v1817_v44 = vpop.f32.mrb[24].mxu1  ;;  %v582_v21 = vadd.f32 %v1804_v18, %v1697_v37  ;;  %vm611_vm14 = vcmp.ge.f32.partialorder %v480_v56, 0.0 }
 0x12c   : > { %1501 = vrcp.f32 %v818_v30  ;;  %v1488_v45 = vpop.eup %1487  ;;  %v1819_v40 = vmul.f32 %v1486_v38, %v688_v32  ;;  %v1822_v47 = vpop.f32.mrb[25].mxu0  ;;  %v659_v25 = vmul.f32 0.2, %v560_v5  ;;  %v1192_v26 = vmul.f32 -1.442695, %v502_v55 }
 0x12d   : > { %1503 = vpow2.f32 %v1190_v36  ;;  %v1824_v48 = vpop.f32.mrb[25].mxu1  ;;  %v1490_v49 = vpop.eup %1489  ;;  %v803_v41 = vadd.f32 1.0, %v1488_v45  ;;  %v690_v30 = vsel %vm626_vm13, %v556_v42, %v658_v6  ;;  %v1208_v18 = vmul.f32 -1.442695, %v582_v21 }
 0x12e   : > { %1505 = vpow2.f32 %v1206_v34  ;;  %v1827_v52 = vpop.f32.mrb[26].mxu0  ;;  %v1829_v53 = vpop.f32.mrb[26].mxu1  ;;  %v819_v54 = vadd.f32 1.0, %v1490_v49  ;;  %vm627_vm15 = vcmp.ge.f32.partialorder %v560_v5, 0.0  ;;  %v675_v42 = vsel %vm611_vm14, %v480_v56, %v643_v15 }
 0x12f   : > { %v1834_v58 = vpop.f32.mrb[27].mxu0  ;;  %v1836_v59 = vpop.f32.mrb[27].mxu1  ;;  %1507 = vrcp.f32 %v803_v41  ;;  %vm612_vm0 = vcmp.ge.f32.partialorder %v486_v57, 0.0  ;;  %v490_v41 = vadd.f32 %v1772_v28, %v1713_v3  ;;  %v508_v43 = vadd.f32 %v1822_v47, %v1697_v37 }
 0x130   : > { %v1492_v10 = vpop.eup %1491  ;;  %1509 = vrcp.f32 %v819_v54  ;;  %v691_v54 = vsel %vm627_vm15, %v560_v5, %v659_v25  ;;  %v588_v56 = vadd.f32 %v1824_v48, %v1697_v37  ;;  %v496_v15 = vadd.f32 %v1789_v60, %v1713_v3 }
 0x131   : > { %v1494_v2 = vpop.eup %1493  ;;  %v897_v4 = vmul.f32 %v1492_v10, %v673_v46  ;;  %1511 = vpow2.f32 %v1191_v1  ;;  %v644_v46 = vmul.f32 0.2, %v486_v57  ;;  %v570_v1 = vadd.f32 %v1774_v29, %v1713_v3 }
 0x132   : > { %v804_v8 = vadd.f32 1.0, %v1494_v2  ;;  %v1496_v11 = vpop.eup %1495  ;;  %1513 = vpow2.f32 %v1207_v51  ;;  %v1848_v22 = vpop.f32.mrb[28].mxu0  ;;  %v1193_v51 = vmul.f32 -1.442695, %v508_v43  ;;  %v645_v6 = vmul.f32 0.2, %v490_v41 }
 0x133   : > { %v1292_v14 = vpack.c.bf16 %v897_v4, %v896_v39  ;;  %v913_v61 = vmul.f32 %v1496_v11, %v689_v0  ;;  %v1850_v20 = vpop.f32.mrb[28].mxu1  ;;  %v1853_v62 = vpop.f32.mrb[29].mxu0  ;;  %v566_v39 = vadd.f32 %v1762_v17, %v1713_v3  ;;  %v676_v4 = vsel %vm612_vm0, %v486_v57, %v644_v46 }
 0x134   : > { %v1498_v19 = vpop.eup %1497  ;;  %1515 = vrcp.f32 %v804_v8  ;;  %v1857_v32 = vpop.f32.mrb[29].mxu1  ;;  %v1209_v48 = vmul.f32 -1.442695, %v588_v56  ;;  %vm613_vm2 = vcmp.ge.f32.partialorder %v490_v41, 0.0  ;;  %vm629_vm3 = vcmp.ge.f32.partialorder %v570_v1, 0.0 }
 0x135   : > { %v1500_v23 = vpop.eup %1499  ;;  %1360 = vst [vmem:[%s1770_s4 + $0x10] sm:$0xff] %v1292_v14   ;;  %v898_v24 = vmul.f32 %v1498_v19, %v674_v7  ;;  %v1332_v16 = vpack.c.bf16 %v913_v61, %v1819_v40  ;;  %v1859_v33 = vpop.f32.mrb[30].mxu0  ;;  %1517 = vpow2.f32 %v1192_v26  ;;  %vm628_vm1 = vcmp.ge.f32.partialorder %v566_v39, 0.0 }
 0x136   : > { %v1502_v27 = vpop.eup %1501  ;;  %v820_v31 = vadd.f32 1.0, %v1500_v23  ;;  %v1863_v34 = vpop.f32.mrb[30].mxu1  ;;  %v660_v5 = vmul.f32 0.2, %v566_v39  ;;  %v661_v19 = vmul.f32 0.2, %v570_v1  ;;  %v512_v61 = vadd.f32 %v1834_v58, %v1697_v37 }
 0x137   : > { %v1504_v36 = vpop.eup %1503  ;;  %v914_v38 = vmul.f32 %v1502_v27, %v690_v30  ;;  %v1865_v45 = vpop.f32.mrb[31].mxu0  ;;  %1368 = vst [vmem:[%s1770_s4 + $0x50] sm:$0xff] %v1332_v16   ;;  %v592_v57 = vadd.f32 %v1836_v59, %v1697_v37  ;;  %v576_v60 = vadd.f32 %v1791_v63, %v1713_v3  ;;  %v677_v26 = vsel %vm613_vm2, %v490_v41, %v645_v6 }
 0x138   : > { %v1506_v40 = vpop.eup %1505  ;;  %1519 = vrcp.f32 %v820_v31  ;;  %v805_v49 = vadd.f32 1.0, %v1504_v36  ;;  %v1869_v50 = vpop.f32.mrb[31].mxu1  ;;  %v692_v23 = vsel %vm628_vm1, %v566_v39, %v660_v5  ;;  %vm614_vm4 = vcmp.ge.f32.partialorder %v496_v15, 0.0 }
 0x139   : > { %v821_v9 = vadd.f32 1.0, %v1506_v40  ;;  %1521 = vpow2.f32 %v1208_v18  ;;  %v1508_v17 = vpop.eup %1507  ;;  %v1194_v16 = vmul.f32 -1.442695, %v512_v61  ;;  %v693_v31 = vsel %vm629_vm3, %v570_v1, %v661_v19 }
 0x13a   : > { %1523 = vrcp.f32 %v805_v49  ;;  %v1510_v10 = vpop.eup %1509  ;;  %v899_v0 = vmul.f32 %v1508_v17, %v675_v42  ;;  %v646_v59 = vmul.f32 0.2, %v496_v15  ;;  %v1210_v18 = vmul.f32 -1.442695, %v592_v57 }
 0x13b   : > { %1525 = vrcp.f32 %v821_v9  ;;  %v1512_v28 = vpop.eup %1511  ;;  %v915_v2 = vmul.f32 %v1510_v10, %v691_v54  ;;  %v598_v63 = vadd.f32 %v1857_v32, %v1697_v37  ;;  %v662_v42 = vmul.f32 0.2, %v576_v60 }
 0x13c   : > { %v1514_v7 = vpop.eup %1513  ;;  %v1297_v47 = vpack.c.bf16 %v899_v0, %v898_v24  ;;  %v806_v8 = vadd.f32 1.0, %v1512_v28  ;;  %1527 = vpow2.f32 %v1193_v51  ;;  %v518_v24 = vadd.f32 %v1853_v62, %v1697_v37 }
 0x13d   : > { %v1337_v14 = vpack.c.bf16 %v915_v2, %v914_v38  ;;  %v822_v29 = vadd.f32 1.0, %v1514_v7  ;;  %v500_v46 = vadd.f32 %v1798_v12, %v1713_v3  ;;  %vm630_vm5 = vcmp.ge.f32.partialorder %v576_v60, 0.0 }
 0x13e   : > { %v1516_v11 = vpop.eup %1515  ;;  %1361 = vst [vmem:[%s1770_s4 + $0x18] sm:$0xff] %v1297_v47   ;;  %1529 = vrcp.f32 %v806_v8  ;;  %v1195_v39 = vmul.f32 -1.442695, %v518_v24  ;;  %v1211_v41 = vmul.f32 -1.442695, %v598_v63  ;;  %v522_v17 = vadd.f32 %v1865_v45, %v1697_v37 }
 0x13f   : > { %v900_v55 = vmul.f32 %v1516_v11, %v676_v4  ;;  %1369 = vst [vmem:[%s1770_s4 + $0x58] sm:$0xff] %v1337_v14   ;;  %1531 = vrcp.f32 %v822_v29  ;;  %v1518_v21 = vpop.eup %1517  ;;  %v580_v43 = vadd.f32 %v1800_v13, %v1713_v3  ;;  %v678_v12 = vsel %vm614_vm4, %v496_v15, %v646_v59 }
 0x140   : > { %1533 = vpow2.f32 %v1209_v48  ;;  %v807_v27 = vadd.f32 1.0, %v1518_v21  ;;  %v694_v10 = vsel %vm630_vm5, %v576_v60, %v662_v42  ;;  %v647_v2 = vmul.f32 0.2, %v500_v46 }
 0x141   : > { %v1196_v4 = vmul.f32 -1.442695, %v522_v17  ;;  %v602_v45 = vadd.f32 %v1869_v50, %v1697_v37  ;;  %vm615_vm6 = vcmp.ge.f32.partialorder %v500_v46, 0.0  ;;  %v663_v13 = vmul.f32 0.2, %v580_v43 }
 0x142   : > { %v1520_v25 = vpop.eup %1519  ;;  %1535 = vrcp.f32 %v807_v27  ;;  %vm631_vm7 = vcmp.ge.f32.partialorder %v580_v43, 0.0  ;;  %v506_v6 = vadd.f32 %v1815_v35, %v1713_v3  ;;  %v679_v48 = vsel %vm615_vm6, %v500_v46, %v647_v2 }
 0x143   : > { %v1522_v30 = vpop.eup %1521  ;;  %v916_v58 = vmul.f32 %v1520_v25, %v692_v23  ;;  %1537 = vpow2.f32 %v1194_v16  ;;  %v1212_v47 = vmul.f32 -1.442695, %v602_v45  ;;  %v695_v50 = vsel %vm631_vm7, %v580_v43, %v663_v13 }
 0x144   : > { %v1524_v36 = vpop.eup %1523  ;;  %v823_v38 = vadd.f32 1.0, %v1522_v30  ;;  %v586_v15 = vadd.f32 %v1817_v44, %v1713_v3  ;;  %v648_v57 = vmul.f32 0.2, %v506_v6  ;;  %vm616_vm8 = vcmp.ge.f32.partialorder %v506_v6, 0.0 }
 0x145   : > { %v1526_v40 = vpop.eup %1525  ;;  %v901_v62 = vmul.f32 %v1524_v36, %v677_v26  ;;  %v510_v26 = vadd.f32 %v1827_v52, %v1713_v3  ;;  %v516_v59 = vadd.f32 %v1848_v22, %v1713_v3 }
 0x146   : > { %v917_v49 = vmul.f32 %v1526_v40, %v693_v31  ;;  %1539 = vrcp.f32 %v823_v38  ;;  %v1528_v54 = vpop.eup %1527  ;;  %v664_v25 = vmul.f32 0.2, %v586_v15  ;;  %v680_v16 = vsel %vm616_vm8, %v506_v6, %v648_v57 }
 0x147   : > { %v1302_v9 = vpack.c.bf16 %v901_v62, %v900_v55  ;;  %1541 = vpow2.f32 %v1210_v18  ;;  %v808_v0 = vadd.f32 1.0, %v1528_v54  ;;  %vm632_vm9 = vcmp.ge.f32.partialorder %v586_v15, 0.0 }
 0x148   : > { %v1342_v32 = vpack.c.bf16 %v917_v49, %v916_v58  ;;  %1543 = vpow2.f32 %v1195_v39  ;;  %v1530_v56 = vpop.eup %1529  ;;  %v590_v31 = vadd.f32 %v1829_v53, %v1713_v3  ;;  %v696_v38 = vsel %vm632_vm9, %v586_v15, %v664_v25 }
 0x149   : > { %1362 = vst [vmem:[%s1770_s4 + $0x20] sm:$0xff] %v1302_v9   ;;  %1545 = vpow2.f32 %v1211_v41  ;;  %v1532_v1 = vpop.eup %1531  ;;  %v902_v28 = vmul.f32 %v1530_v56, %v678_v12  ;;  %v649_v52 = vmul.f32 0.2, %v510_v26  ;;  %v596_v39 = vadd.f32 %v1850_v20, %v1713_v3 }
 0x14a   : > { %1370 = vst [vmem:[%s1770_s4 + $0x60] sm:$0xff] %v1342_v32   ;;  %v1534_v5 = vpop.eup %1533  ;;  %v918_v51 = vmul.f32 %v1532_v1, %v694_v10  ;;  %1547 = vrcp.f32 %v808_v0  ;;  %vm617_vm10 = vcmp.ge.f32.partialorder %v510_v26, 0.0  ;;  %v665_v62 = vmul.f32 0.2, %v590_v31 }
 0x14b   : > { %v824_v7 = vadd.f32 1.0, %v1534_v5  ;;  %1549 = vpow2.f32 %v1196_v4  ;;  %vm633_vm11 = vcmp.ge.f32.partialorder %v590_v31, 0.0  ;;  %v650_v46 = vmul.f32 0.2, %v516_v59 }
 0x14c   : > { %v1536_v8 = vpop.eup %1535  ;;  %v520_v53 = vadd.f32 %v1859_v33, %v1713_v3  ;;  %v681_v22 = vsel %vm617_vm10, %v510_v26, %v649_v52  ;;  %vm618_vm12 = vcmp.ge.f32.partialorder %v516_v59, 0.0  ;;  %v666_v41 = vmul.f32 0.2, %v596_v39 }
 0x14d   : > { %1551 = vrcp.f32 %v824_v7  ;;  %v1538_v11 = vpop.eup %1537  ;;  %v903_v14 = vmul.f32 %v1536_v8, %v679_v48  ;;  %vm634_vm13 = vcmp.ge.f32.partialorder %v596_v39, 0.0  ;;  %v697_v17 = vsel %vm633_vm11, %v590_v31, %v665_v62 }
 0x14e   : > { %1553 = vpow2.f32 %v1212_v47  ;;  %v809_v29 = vadd.f32 1.0, %v1538_v11  ;;  %v600_v54 = vadd.f32 %v1863_v34, %v1713_v3  ;;  %v682_v12 = vsel %vm618_vm12, %v516_v59, %v650_v46 }
 0x14f   : > { %v1307_v19 = vpack.c.bf16 %v903_v14, %v902_v28  ;;  %v651_v10 = vmul.f32 0.2, %v520_v53  ;;  %v698_v0 = vsel %vm634_vm13, %v596_v39, %v666_v41  ;;  %vm619_vm14 = vcmp.ge.f32.partialorder %v520_v53, 0.0 }
 0x150   : > { %v1540_v37 = vpop.eup %1539  ;;  %1555 = vrcp.f32 %v809_v29  ;;  %v667_v4 = vmul.f32 0.2, %v600_v54  ;;  %vm635_vm15 = vcmp.ge.f32.partialorder %v600_v54, 0.0 }
 0x151   : > { %v1542_v55 = vpop.eup %1541  ;;  %v919_v61 = vmul.f32 %v1540_v37, %v695_v50  ;;  %1363 = vst [vmem:[%s1770_s4 + $0x28] sm:$0xff] %v1307_v19   ;;  %v683_v5 = vsel %vm619_vm14, %v520_v53, %v651_v10 }
 0x152   : > { %v1544_v21 = vpop.eup %1543  ;;  %v825_v35 = vadd.f32 1.0, %v1542_v55 }
 0x153   : > { %v1546_v23 = vpop.eup %1545  ;;  %v1347_v60 = vpack.c.bf16 %v919_v61, %v918_v51  ;;  %v810_v24 = vadd.f32 1.0, %v1544_v21  ;;  %v699_v51 = vsel %vm635_vm15, %v600_v54, %v667_v4 }
 0x154   : > { %1557 = vrcp.f32 %v825_v35  ;;  %v826_v44 = vadd.f32 1.0, %v1546_v23  ;;  %v1548_v27 = vpop.eup %1547 }
 0x155   : > { %1371 = vst [vmem:[%s1770_s4 + $0x68] sm:$0xff] %v1347_v60   ;;  %1559 = vrcp.f32 %v810_v24  ;;  %v1550_v30 = vpop.eup %1549  ;;  %v904_v58 = vmul.f32 %v1548_v27, %v680_v16 }
 0x156   : > { %1561 = vrcp.f32 %v826_v44  ;;  %v811_v18 = vadd.f32 1.0, %v1550_v30 }
 0x157   : > { %v1552_v36 = vpop.eup %1551 }
 0x158   : > { %v1554_v63 = vpop.eup %1553  ;;  %v920_v40 = vmul.f32 %v1552_v36, %v696_v38  ;;  %1563 = vrcp.f32 %v811_v18 }
 0x159   : > { %v827_v42 = vadd.f32 1.0, %v1554_v63 }
 0x15a   : > { %v1556_v49 = vpop.eup %1555 }
 0x15b   : > { %1565 = vrcp.f32 %v827_v42  ;;  %v905_v9 = vmul.f32 %v1556_v49, %v681_v22 }
 0x15d   : > { %v1312_v43 = vpack.c.bf16 %v905_v9, %v904_v58 }
 0x15e   : > { %v1558_v20 = vpop.eup %1557 }
 0x15f   : > { %v1560_v32 = vpop.eup %1559  ;;  %v921_v56 = vmul.f32 %v1558_v20, %v697_v17  ;;  %1364 = vst [vmem:[%s1770_s4 + $0x30] sm:$0xff] %v1312_v43  }
 0x160   : > { %v1562_v33 = vpop.eup %1561  ;;  %v906_v1 = vmul.f32 %v1560_v32, %v682_v12 }
 0x161   : > { %v1352_v28 = vpack.c.bf16 %v921_v56, %v920_v40  ;;  %v922_v2 = vmul.f32 %v1562_v33, %v698_v0 }
 0x162   : > { %v1564_v45 = vpop.eup %1563 }
 0x163   : > { %1372 = vst [vmem:[%s1770_s4 + $0x70] sm:$0xff] %v1352_v28   ;;  %v907_v3 = vmul.f32 %v1564_v45, %v683_v5 }
 0x165   : > { %v1566_v34 = vpop.eup %1565  ;;  %v1317_v13 = vpack.c.bf16 %v907_v3, %v906_v1 }
 0x166   : > { %v923_v7 = vmul.f32 %v1566_v34, %v699_v51 }
 0x167   : > { %1365 = vst [vmem:[%s1770_s4 + $0x38] sm:$0xff] %v1317_v13  }
 0x168   : > { %v1357_v47 = vpack.c.bf16 %v923_v7, %v922_v2 }
 0x16a   : > { %1373 = vst [vmem:[%s1770_s4 + $0x78] sm:$0xff] %v1357_v47  }
 0x16b PF: > { %s13_s12 = sadd.s32 1, %s1573_s12  }
 0x16c   : > { %p10_p4 = scmp.ge.s32.totalorder %s13_s12, 4  }
 0x16e   :  { %12 = sbr.rel (!%p10_p4) target bundleno = 1 (0x1), region = 62 }

// kernel: _lambda_.37
= control target key start
LH: loop header
LB: loop body
LE: loop exit
PB: predicated region body
PF: predicated region fallthrough
CT: control target
= control target key end

     0   :  { %s1351_s12 = smov 0   ;;  %s1648_s0 = inlined_call_operand.vmem [shape: bf16[128,512], index: 0, kind: input, shape index: {}]   ;;  %s1649_s1 = inlined_call_operand.vmem [shape: bf16[512,256], index: 1, kind: input, shape index: {}]   ;;  %s1650_s2 = inlined_call_operand.vmem [shape: f32[1,256], index: 2, kind: input, shape index: {}]   ;;  %s1651_s3 = inlined_call_operand.vmem [shape: bf16[128,128], index: 3, kind: output, shape index: {}]  }
   0x1 LB: > { %s991_s13 = sadd.s32 4294967295, %s1329_s12   ;;  %p995_p0 = scmp.ge.s32.totalorder %s1329_s12, 1  ;;  %s1329_s12 = sphi %s1351_s12, %s13_s12  }
   0x2   : > { %p139_p1 = scmp.lt.s32.totalorder %s1329_s12, 3 }
   0x4   : > { %p140_p2 = pnand %p995_p0, %p139_p1 }
   0x5   : > { %v1171_v0 = vld [vmem:[%s1649_s1 + $0x4] ss:$8 sps:$4 sm:$0xff] (!%p140_p2)   ;;  %v1175_v2 = vld [vmem:[%s1649_s1] ss:$8 sps:$4 sm:$0xff] (!%p140_p2)   ;;  %v1177_v4 = vld [vmem:[%s1649_s1 + $0x14] ss:$8 sps:$4 sm:$0xff] (!%p140_p2)  }
   0x6   : > { %143 = sbr.rel (%p140_p2) target bundleno = 345 (0x159), region = 32  ;;  %v1173_v1 = vld [vmem:[%s1649_s1 + $0x104] ss:$8 sps:$4 sm:$0xff] (!%p140_p2)   ;;  %669 = vmatprep.subr.bf16.mxu1 (!%p140_p2), %v1171_v0  ;;  %v1176_v3 = vld [vmem:[%s1649_s1 + $0x100] ss:$8 sps:$4 sm:$0xff] (!%p140_p2)   ;;  %s996_s24 = sshll.u32 (!%p140_p2), %s991_s13, 3 }
   0x7   : > { %742 = vmatprep.subr.bf16.mxu0 (!%p140_p2), %v1173_v1  ;;  %670 = vmatpush1.bf16.msra.mxu1 (!%p140_p2), %v1175_v2  ;;  %v1179_v5 = vld [vmem:[%s1649_s1 + $0x114] ss:$8 sps:$4 sm:$0xff] (!%p140_p2)   ;;  %v1181_v6 = vld [vmem:[%s1649_s1 + $0x10] ss:$8 sps:$4 sm:$0xff] (!%p140_p2)   ;;  %v1183_v8 = vld [vmem:[%s1649_s1 + $0x24] ss:$8 sps:$4 sm:$0xff] (!%p140_p2)  }
   0x8   : > { %743 = vmatpush1.bf16.msra.mxu0 (!%p140_p2), %v1176_v3  ;;  %671 = vmatprep.subr.bf16.mxu1 (!%p140_p2), %v1177_v4  ;;  %v1182_v7 = vld [vmem:[%s1649_s1 + $0x110] ss:$8 sps:$4 sm:$0xff] (!%p140_p2)   ;;  %v1185_v9 = vld [vmem:[%s1649_s1 + $0x124] ss:$8 sps:$4 sm:$0xff] (!%p140_p2)   ;;  %v1187_v10 = vld [vmem:[%s1649_s1 + $0x20] ss:$8 sps:$4 sm:$0xff] (!%p140_p2)  }
   0x9   : > { %744 = vmatprep.subr.bf16.mxu0 (!%p140_p2), %v1179_v5  ;;  %v1188_v11 = vld [vmem:[%s1649_s1 + $0x120] ss:$8 sps:$4 sm:$0xff] (!%p140_p2)   ;;  %v1189_v12 = vld [vmem:[%s1649_s1 + $0x34] ss:$8 sps:$4 sm:$0xff] (!%p140_p2)   ;;  %v1193_v14 = vld [vmem:[%s1649_s1 + $0x30] ss:$8 sps:$4 sm:$0xff] (!%p140_p2)  }
   0xa   : > { %v1191_v13 = vld [vmem:[%s1649_s1 + $0x134] ss:$8 sps:$4 sm:$0xff] (!%p140_p2)   ;;  %v1194_v15 = vld [vmem:[%s1649_s1 + $0x130] ss:$8 sps:$4 sm:$0xff] (!%p140_p2)   ;;  %v1195_v16 = vld [vmem:[%s1649_s1 + $0x44] ss:$8 sps:$4 sm:$0xff] (!%p140_p2)  }
   0xb   : > { %672 = vmatpush1.bf16.msra.mxu1 (!%p140_p2), %v1181_v6  ;;  %v1197_v17 = vld [vmem:[%s1649_s1 + $0x144] ss:$8 sps:$4 sm:$0xff] (!%p140_p2)   ;;  %v1199_v18 = vld [vmem:[%s1649_s1 + $0x40] ss:$8 sps:$4 sm:$0xff] (!%p140_p2)   ;;  %v1201_v20 = vld [vmem:[%s1649_s1 + $0x54] ss:$8 sps:$4 sm:$0xff] (!%p140_p2)  }
   0xc   : > { %745 = vmatpush1.bf16.msra.mxu0 (!%p140_p2), %v1182_v7  ;;  %673 = vmatprep.subr.bf16.mxu1 (!%p140_p2), %v1183_v8  ;;  %v1200_v19 = vld [vmem:[%s1649_s1 + $0x140] ss:$8 sps:$4 sm:$0xff] (!%p140_p2)   ;;  %v1203_v21 = vld [vmem:[%s1649_s1 + $0x154] ss:$8 sps:$4 sm:$0xff] (!%p140_p2)   ;;  %v1205_v22 = vld [vmem:[%s1649_s1 + $0x50] ss:$8 sps:$4 sm:$0xff] (!%p140_p2)  }
   0xd   : > { %746 = vmatprep.subr.bf16.mxu0 %v1185_v9  ;;  %v1206_v23 = vld [vmem:[%s1649_s1 + $0x150] ss:$8 sps:$4 sm:$0xff]   ;;  %v1207_v24 = vld [vmem:[%s1649_s1 + $0x64] ss:$8 sps:$4 sm:$0xff]   ;;  %v1211_v26 = vld [vmem:[%s1649_s1 + $0x60] ss:$8 sps:$4 sm:$0xff]  }
   0xe   : > { %v1209_v25 = vld [vmem:[%s1649_s1 + $0x164] ss:$8 sps:$4 sm:$0xff]   ;;  %v1212_v27 = vld [vmem:[%s1649_s1 + $0x160] ss:$8 sps:$4 sm:$0xff]   ;;  %v1213_v28 = vld [vmem:[%s1649_s1 + $0x74] ss:$8 sps:$4 sm:$0xff]  }
   0xf   : > { %674 = vmatpush1.bf16.msra.mxu1 %v1187_v10  ;;  %v1215_v29 = vld [vmem:[%s1649_s1 + $0x174] ss:$8 sps:$4 sm:$0xff]   ;;  %v1217_v30 = vld [vmem:[%s1649_s1 + $0x70] ss:$8 sps:$4 sm:$0xff]   ;;  %v1219_v32 = vld [vmem:[%s1649_s1 + $0x84] ss:$8 sps:$4 sm:$0xff]  }
  0x10   : > { %747 = vmatpush1.bf16.msra.mxu0 %v1188_v11  ;;  %675 = vmatprep.subr.bf16.mxu1 %v1189_v12  ;;  %v1218_v31 = vld [vmem:[%s1649_s1 + $0x170] ss:$8 sps:$4 sm:$0xff]   ;;  %v1221_v33 = vld [vmem:[%s1649_s1 + $0x184] ss:$8 sps:$4 sm:$0xff]   ;;  %p165_p3 = scmp.lt.s32.totalorder %s996_s24, 15 }
  0x11   : > { %748 = vmatprep.subr.bf16.mxu0 %v1191_v13  ;;  %v1223_v34 = vld [vmem:[%s1649_s1 + $0x80] ss:$8 sps:$4 sm:$0xff]   ;;  %v1225_v36 = vld [vmem:[%s1649_s1 + $0x94] ss:$8 sps:$4 sm:$0xff]   ;;  %v1229_v38 = vld [vmem:[%s1649_s1 + $0x90] ss:$8 sps:$4 sm:$0xff]  }
  0x12   : > { %v1224_v35 = vld [vmem:[%s1649_s1 + $0x180] ss:$8 sps:$4 sm:$0xff]   ;;  %v1227_v37 = vld [vmem:[%s1649_s1 + $0x194] ss:$8 sps:$4 sm:$0xff]   ;;  %s1653_s24 = smov (!%p165_p3, %s996_s24), 15 }
  0x13   : > { %676 = vmatpush1.bf16.msra.mxu1 %v1193_v14  ;;  %v1230_v39 = vld [vmem:[%s1649_s1 + $0x190] ss:$8 sps:$4 sm:$0xff]   ;;  %v1231_v40 = vld [vmem:[%s1649_s1 + $0xa4] ss:$8 sps:$4 sm:$0xff]   ;;  %s1099_s23 = sshll.u32 %s1653_s24, 4 }
  0x14   : > { %749 = vmatpush1.bf16.msra.mxu0 %v1194_v15  ;;  %677 = vmatprep.subr.bf16.mxu1 %v1195_v16  ;;  %v1233_v41 = vld [vmem:[%s1649_s1 + $0x1a4] ss:$8 sps:$4 sm:$0xff]   ;;  %v1235_v42 = vld [vmem:[%s1649_s1 + $0xa0] ss:$8 sps:$4 sm:$0xff]   ;;  %v1237_v44 = vld [vmem:[%s1649_s1 + $0xb4] ss:$8 sps:$4 sm:$0xff]   ;;  %s1502_s13 = scalar_lea.vmem %s1648_s0, %s1099_s23  ;;  %v259_v16 = vlaneseq }
  0x15   : > { %750 = vmatprep.subr.bf16.mxu0 %v1197_v17  ;;  %v1236_v43 = vld [vmem:[%s1649_s1 + $0x1a0] ss:$8 sps:$4 sm:$0xff]   ;;  %v1239_v45 = vld [vmem:[%s1649_s1 + $0x1b4] ss:$8 sps:$4 sm:$0xff]   ;;  %v1241_v46 = vld [vmem:[%s1649_s1 + $0xb0] ss:$8 sps:$4 sm:$0xff]  }
  0x16   : > { %v1242_v47 = vld [vmem:[%s1649_s1 + $0x1b0] ss:$8 sps:$4 sm:$0xff]   ;;  %v1243_v48 = vld [vmem:[%s1649_s1 + $0xc4] ss:$8 sps:$4 sm:$0xff]   ;;  %v1247_v52 = vld [vmem:[%s1649_s1 + $0xc0] ss:$8 sps:$4 sm:$0xff]  }
  0x17   : > { %678 = vmatpush1.bf16.msra.mxu1 %v1199_v18  ;;  %v1269_v49 = vld [vmem:[%s1502_s13 + $0x4] ss:$16 sps:$4 sm:$0xff]   ;;  %v1272_v51 = vld [vmem:[%s1502_s13 + $0xc] ss:$16 sps:$4 sm:$0xff]   ;;  %v1248_v53 = vld [vmem:[%s1649_s1 + $0x1c0] ss:$8 sps:$4 sm:$0xff]  }
  0x18   : > { %751 = vmatpush1.bf16.msra.mxu0 %v1200_v19  ;;  %679 = vmatprep.subr.bf16.mxu1 %v1201_v20  ;;  %v1245_v50 = vld [vmem:[%s1649_s1 + $0x1c4] ss:$8 sps:$4 sm:$0xff]   ;;  %v1249_v54 = vld [vmem:[%s1649_s1 + $0xd4] ss:$8 sps:$4 sm:$0xff]   ;;  %v1253_v56 = vld [vmem:[%s1649_s1 + $0xd0] ss:$8 sps:$4 sm:$0xff]  }
  0x19   : > { %752 = vmatprep.subr.bf16.mxu0 %v1203_v21  ;;  %701 = vmatprep.mubr.bf16.mxu1 %v1269_v49  ;;  %v1251_v55 = vld [vmem:[%s1649_s1 + $0x1d4] ss:$8 sps:$4 sm:$0xff]   ;;  %v1254_v57 = vld [vmem:[%s1649_s1 + $0x1d0] ss:$8 sps:$4 sm:$0xff]   ;;  %v1255_v58 = vld [vmem:[%s1649_s1 + $0xe4] ss:$8 sps:$4 sm:$0xff]  }
  0x1a   : > { %774 = vmatprep.mubr.bf16.mxu0 %v1272_v51  ;;  %v1257_v59 = vld [vmem:[%s1649_s1 + $0x1e4] ss:$8 sps:$4 sm:$0xff]   ;;  %v1259_v60 = vld [vmem:[%s1649_s1 + $0xe0] ss:$8 sps:$4 sm:$0xff]   ;;  %v1261_v62 = vld [vmem:[%s1649_s1 + $0xf4] ss:$8 sps:$4 sm:$0xff]  }
  0x1b   : > { %680 = vmatpush1.bf16.msra.mxu1 %v1205_v22  ;;  %v1260_v61 = vld [vmem:[%s1649_s1 + $0x1e0] ss:$8 sps:$4 sm:$0xff]   ;;  %v1263_v63 = vld [vmem:[%s1649_s1 + $0x1f4] ss:$8 sps:$4 sm:$0xff]   ;;  %v1265_v0 = vld [vmem:[%s1649_s1 + $0xf0] ss:$8 sps:$4 sm:$0xff]  }
  0x1c   : > { %753 = vmatpush1.bf16.msra.mxu0 %v1206_v23  ;;  %681 = vmatprep.subr.bf16.mxu1 %v1207_v24  ;;  %v1266_v1 = vld [vmem:[%s1649_s1 + $0x1f0] ss:$8 sps:$4 sm:$0xff]   ;;  %v1273_v4 = vld [vmem:[%s1502_s13 + $0x24] ss:$16 sps:$4 sm:$0xff]   ;;  %v1275_v5 = vld [vmem:[%s1502_s13 + $0x2c] ss:$16 sps:$4 sm:$0xff]  }
  0x1d   : > { %754 = vmatprep.subr.bf16.mxu0 %v1209_v25  ;;  %v1267_v2 = vld [vmem:[%s1502_s13] ss:$16 sps:$4 sm:$0xff]   ;;  %v1270_v3 = vld [vmem:[%s1502_s13 + $0x8] ss:$16 sps:$4 sm:$0xff]   ;;  %v1279_v8 = vld [vmem:[%s1502_s13 + $0x44] ss:$16 sps:$4 sm:$0xff]  }
  0x1e   : > { %v1277_v6 = vld [vmem:[%s1502_s13 + $0x20] ss:$16 sps:$4 sm:$0xff]   ;;  %v1278_v7 = vld [vmem:[%s1502_s13 + $0x28] ss:$16 sps:$4 sm:$0xff]   ;;  %v1281_v9 = vld [vmem:[%s1502_s13 + $0x4c] ss:$16 sps:$4 sm:$0xff]  }
  0x1f   : > { %682 = vmatpush1.bf16.msra.mxu1 %v1211_v26  ;;  %v1283_v10 = vld [vmem:[%s1502_s13 + $0x40] ss:$16 sps:$4 sm:$0xff]   ;;  %v1284_v11 = vld [vmem:[%s1502_s13 + $0x48] ss:$16 sps:$4 sm:$0xff]   ;;  %v1285_v12 = vld [vmem:[%s1502_s13 + $0x64] ss:$16 sps:$4 sm:$0xff]  }
  0x20   : > { %755 = vmatpush1.bf16.msra.mxu0 %v1212_v27  ;;  %683 = vmatprep.subr.bf16.mxu1 %v1213_v28  ;;  %v1287_v13 = vld [vmem:[%s1502_s13 + $0x6c] ss:$16 sps:$4 sm:$0xff]   ;;  %v1289_v14 = vld [vmem:[%s1502_s13 + $0x60] ss:$16 sps:$4 sm:$0xff]   ;;  %v1290_v15 = vld [vmem:[%s1502_s13 + $0x68] ss:$16 sps:$4 sm:$0xff]  }
  0x21   : > { %756 = vmatprep.subr.bf16.mxu0 %v1215_v29  ;;  %v260_v17 = vshrl.u32 %v259_v16, 7  ;;  %v257_v19 = vld [vmem:[%s1650_s2] sm:$0x3]  ;;  %s1000_s13 = sshll.u32 %s1653_s24, 2 }
  0x22   : > { %s1624_s27 = scalar_lea.vmem %s1651_s3, %s1000_s13 }
  0x23   : > { %684 = vmatpush1.bf16.msra.mxu1 %v1217_v30  ;;  %v261_v18 = vsub.s32 0, %v260_v17  ;;  %v265_v20 = vsub.s32 1, %v260_v17 }
  0x24   : > { %757 = vmatpush1.bf16.msra.mxu0 %v1218_v31  ;;  %685 = vmatprep.subr.bf16.mxu1 %v1219_v32 }
  0x25   : > { %758 = vmatprep.subr.bf16.mxu0 %v1221_v33  ;;  %v1580_v21 = vrot.slane %v257_v19, %v261_v18  ;;  %v1582_v22 = vrot.slane %v257_v19, %v265_v20 }
  0x27   : > { %686 = vmatpush1.bf16.msra.mxu1 %v1223_v34 }
  0x28   : > { %759 = vmatpush1.bf16.msra.mxu0 %v1224_v35  ;;  %687 = vmatprep.subr.bf16.mxu1 %v1225_v36 }
  0x29   : > { %760 = vmatprep.subr.bf16.mxu0 %v1227_v37 }
  0x2b   : > { %688 = vmatpush1.bf16.msra.mxu1 %v1229_v38 }
  0x2c   : > { %761 = vmatpush1.bf16.msra.mxu0 %v1230_v39  ;;  %689 = vmatprep.subr.bf16.mxu1 %v1231_v40 }
  0x2d   : > { %762 = vmatprep.subr.bf16.mxu0 %v1233_v41 }
  0x2f   : > { %690 = vmatpush1.bf16.msra.mxu1 %v1235_v42 }
  0x30   : > { %763 = vmatpush1.bf16.msra.mxu0 %v1236_v43  ;;  %691 = vmatprep.subr.bf16.mxu1 %v1237_v44 }
  0x31   : > { %764 = vmatprep.subr.bf16.mxu0 %v1239_v45 }
  0x33   : > { %692 = vmatpush1.bf16.msra.mxu1 %v1241_v46 }
  0x34   : > { %765 = vmatpush1.bf16.msra.mxu0 %v1242_v47  ;;  %693 = vmatprep.subr.bf16.mxu1 %v1243_v48 }
  0x35   : > { %766 = vmatprep.subr.bf16.mxu0 %v1245_v50 }
  0x37   : > { %694 = vmatpush1.bf16.msra.mxu1 %v1247_v52 }
  0x38   : > { %767 = vmatpush1.bf16.msra.mxu0 %v1248_v53  ;;  %695 = vmatprep.subr.bf16.mxu1 %v1249_v54 }
  0x39   : > { %768 = vmatprep.subr.bf16.mxu0 %v1251_v55 }
  0x3b   : > { %696 = vmatpush1.bf16.msra.mxu1 %v1253_v56 }
  0x3c   : > { %769 = vmatpush1.bf16.msra.mxu0 %v1254_v57  ;;  %697 = vmatprep.subr.bf16.mxu1 %v1255_v58 }
  0x3d   : > { %770 = vmatprep.subr.bf16.mxu0 %v1257_v59 }
  0x3f   : > { %698 = vmatpush1.bf16.msra.mxu1 %v1259_v60 }
  0x40   : > { %771 = vmatpush1.bf16.msra.mxu0 %v1260_v61  ;;  %699 = vmatprep.subr.bf16.mxu1 %v1261_v62 }
  0x41   : > { %772 = vmatprep.subr.bf16.mxu0 %v1263_v63 }
  0x43   : > { %700 = vmatpush1.bf16.msra.mxu1 %v1265_v0 }
  0x44   : > { %773 = vmatpush1.bf16.msra.mxu0 %v1266_v1 }
  0x46   : > { %702 = vmatmul.mubr.bf16.vlgmr.msra.gmra.mrb[0].mxu1 %v1267_v2 }
  0x47   : > { %775 = vmatmul.mubr.bf16.vlgmr.msra.gmra.mrb[0].mxu0 %v1270_v3  ;;  %711 = vmatprep.mubr.bf16.mxu1 %v1273_v4 }
  0x48   : > { %784 = vmatprep.mubr.bf16.mxu0 %v1275_v5 }
  0x4e   : > { %712 = vmatmul.mubr.bf16.gmra.mrb[4].mxu1 %v1277_v6 }
  0x4f   : > { %785 = vmatmul.mubr.bf16.gmra.mrb[4].mxu0 %v1278_v7  ;;  %721 = vmatprep.mubr.bf16.mxu1 %v1279_v8 }
  0x50   : > { %794 = vmatprep.mubr.bf16.mxu0 %v1281_v9 }
  0x56   : > { %722 = vmatmul.mubr.bf16.gmra.mrb[8].mxu1 %v1283_v10 }
  0x57   : > { %795 = vmatmul.mubr.bf16.gmra.mrb[8].mxu0 %v1284_v11  ;;  %731 = vmatprep.mubr.bf16.mxu1 %v1285_v12 }
  0x58   : > { %804 = vmatprep.mubr.bf16.mxu0 %v1287_v13 }
  0x5e   : > { %732 = vmatmul.mubr.bf16.gmra.mrb[12].mxu1 %v1289_v14 }
  0x5f   : > { %805 = vmatmul.mubr.bf16.gmra.mrb[12].mxu0 %v1290_v15 }
 0x119   : > { %v703_v23 = vpop.f32.mrb[0].mxu1 }
 0x11a   : > { %v776_v24 = vpop.f32.mrb[0].mxu0  ;;  %v704_v25 = vadd.f32 %v703_v23, %v1580_v21  ;;  %v705_v26 = vpop.f32.mrb[1].mxu1 }
 0x11b   : > { %v778_v27 = vpop.f32.mrb[1].mxu0  ;;  %v706_v28 = vadd.f32 %v705_v26, %v1582_v22  ;;  %v707_v29 = vpop.f32.mrb[2].mxu1 }
 0x11c   : > { %v780_v30 = vpop.f32.mrb[2].mxu0  ;;  %v1586_v31 = vadd.f32 %v776_v24, %v704_v25  ;;  %v708_v32 = vadd.f32 %v707_v29, %v1580_v21  ;;  %v709_v33 = vpop.f32.mrb[3].mxu1 }
 0x11d   : > { %v782_v34 = vpop.f32.mrb[3].mxu0  ;;  %v779_v35 = vadd.f32 %v778_v27, %v706_v28  ;;  %v710_v36 = vadd.f32 %v709_v33, %v1582_v22 }
 0x11e   : > { %v1590_v37 = vadd.f32 %v780_v30, %v708_v32  ;;  %v823_v27 = vmul.f32 0.2, %v1586_v31  ;;  %vm815_vm0 = vcmp.ge.f32.partialorder %v1586_v31, 0.0 }
 0x11f   : > { %v1081_v38 = vmul.f32 -1.442695, %v779_v35  ;;  %v783_v39 = vadd.f32 %v782_v34, %v710_v36 }
 0x120   : > { %vm816_vm1 = vcmp.ge.f32.partialorder %v1590_v37, 0.0 }
 0x121   : > { %1291 = vpow2.f32 %v1081_v38  ;;  %v1082_v40 = vmul.f32 -1.442695, %v783_v39  ;;  %v713_v41 = vpop.f32.mrb[4].mxu1  ;;  %v824_v39 = vmul.f32 0.2, %v1590_v37 }
 0x122   : > { %v786_v42 = vpop.f32.mrb[4].mxu0  ;;  %v714_v43 = vadd.f32 %v713_v41, %v1580_v21  ;;  %v715_v44 = vpop.f32.mrb[5].mxu1 }
 0x123   : > { %v788_v45 = vpop.f32.mrb[5].mxu0  ;;  %1293 = vpow2.f32 %v1082_v40  ;;  %v716_v46 = vadd.f32 %v715_v44, %v1582_v22  ;;  %v717_v47 = vpop.f32.mrb[6].mxu1  ;;  %v831_v44 = vsel %vm815_vm0, %v1586_v31, %v823_v27 }
 0x124   : > { %v790_v48 = vpop.f32.mrb[6].mxu0  ;;  %v1594_v49 = vadd.f32 %v786_v42, %v714_v43  ;;  %v718_v50 = vadd.f32 %v717_v47, %v1580_v21  ;;  %v719_v51 = vpop.f32.mrb[7].mxu1 }
 0x125   : > { %v792_v52 = vpop.f32.mrb[7].mxu0  ;;  %v789_v53 = vadd.f32 %v788_v45, %v716_v46  ;;  %v720_v54 = vadd.f32 %v719_v51, %v1582_v22 }
 0x126   : > { %v1598_v55 = vadd.f32 %v790_v48, %v718_v50  ;;  %v825_v51 = vmul.f32 0.2, %v1594_v49  ;;  %vm817_vm2 = vcmp.ge.f32.partialorder %v1594_v49, 0.0 }
 0x127   : > { %v1083_v56 = vmul.f32 -1.442695, %v789_v53  ;;  %v793_v57 = vadd.f32 %v792_v52, %v720_v54 }
 0x128   : > { %v826_v54 = vmul.f32 0.2, %v1598_v55  ;;  %vm818_vm3 = vcmp.ge.f32.partialorder %v1598_v55, 0.0 }
 0x129   : > { %1295 = vpow2.f32 %v1083_v56  ;;  %v1084_v58 = vmul.f32 -1.442695, %v793_v57  ;;  %v723_v59 = vpop.f32.mrb[8].mxu1  ;;  %v833_v57 = vsel %vm817_vm2, %v1594_v49, %v825_v51 }
 0x12a   : > { %v796_v60 = vpop.f32.mrb[8].mxu0  ;;  %v724_v61 = vadd.f32 %v723_v59, %v1580_v21  ;;  %v725_v62 = vpop.f32.mrb[9].mxu1 }
 0x12b   : > { %v798_v63 = vpop.f32.mrb[9].mxu0  ;;  %v1292_v0 = vpop.eup %1291  ;;  %1297 = vpow2.f32 %v1084_v58  ;;  %v726_v1 = vadd.f32 %v725_v62, %v1582_v22 }
 0x12c   : > { %v727_v2 = vpop.f32.mrb[10].mxu1  ;;  %v800_v3 = vpop.f32.mrb[10].mxu0  ;;  %v863_v4 = vadd.f32 1.0, %v1292_v0  ;;  %v1602_v5 = vadd.f32 %v796_v60, %v724_v61  ;;  %v834_v60 = vsel %vm818_vm3, %v1598_v55, %v826_v54 }
 0x12d   : > { %v728_v6 = vadd.f32 %v727_v2, %v1580_v21  ;;  %v729_v7 = vpop.f32.mrb[11].mxu1  ;;  %v802_v8 = vpop.f32.mrb[11].mxu0  ;;  %v799_v10 = vadd.f32 %v798_v63, %v726_v1 }
 0x12e   : > { %v1294_v9 = vpop.eup %1293  ;;  %v730_v11 = vadd.f32 %v729_v7, %v1582_v22  ;;  %1299 = vrcp.f32 %v863_v4  ;;  %v827_v63 = vmul.f32 0.2, %v1602_v5  ;;  %vm819_vm4 = vcmp.ge.f32.partialorder %v1602_v5, 0.0 }
 0x12f   : > { %v864_v12 = vadd.f32 1.0, %v1294_v9  ;;  %v1085_v13 = vmul.f32 -1.442695, %v799_v10  ;;  %v1606_v14 = vadd.f32 %v800_v3, %v728_v6 }
 0x130   : > { %v803_v15 = vadd.f32 %v802_v8, %v730_v11  ;;  %v835_v55 = vsel %vm819_vm4, %v1602_v5, %v827_v63 }
 0x131   : > { %1301 = vrcp.f32 %v864_v12  ;;  %v733_v17 = vpop.f32.mrb[12].mxu1  ;;  %v828_v3 = vmul.f32 0.2, %v1606_v14  ;;  %vm820_vm5 = vcmp.ge.f32.partialorder %v1606_v14, 0.0 }
 0x132   : > { %1303 = vpow2.f32 %v1085_v13  ;;  %v1086_v16 = vmul.f32 -1.442695, %v803_v15  ;;  %v734_v18 = vadd.f32 %v733_v17, %v1580_v21  ;;  %v806_v19 = vpop.f32.mrb[12].mxu0  ;;  %v735_v20 = vpop.f32.mrb[13].mxu1 }
 0x133   : > { %v1296_v23 = vpop.eup %1295  ;;  %v736_v24 = vadd.f32 %v735_v20, %v1582_v22  ;;  %v808_v25 = vpop.f32.mrb[13].mxu0  ;;  %v836_v8 = vsel %vm820_vm5, %v1606_v14, %v828_v3 }
 0x134   : > { %1305 = vpow2.f32 %v1086_v16  ;;  %v737_v26 = vpop.f32.mrb[14].mxu1  ;;  %v865_v28 = vadd.f32 1.0, %v1296_v23  ;;  %v1611_v29 = vadd.f32 %v806_v19, %v734_v18  ;;  %v810_v32 = vpop.f32.mrb[14].mxu0 }
 0x135   : > { %v738_v30 = vadd.f32 %v737_v26, %v1580_v21  ;;  %v739_v33 = vpop.f32.mrb[15].mxu1  ;;  %v1298_v34 = vpop.eup %1297  ;;  %v809_v35 = vadd.f32 %v808_v25, %v736_v24 }
 0x136   : > { %v740_v36 = vadd.f32 %v739_v33, %v1582_v22  ;;  %v812_v38 = vpop.f32.mrb[15].mxu0  ;;  %1307 = vrcp.f32 %v865_v28  ;;  %v866_v40 = vadd.f32 1.0, %v1298_v34  ;;  %v832_v22 = vsel %vm816_vm1, %v1590_v37, %v824_v39 }
 0x137   : > { %v1087_v41 = vmul.f32 -1.442695, %v809_v35  ;;  %v811_v42 = vadd.f32 %v810_v32, %v738_v30  ;;  %v829_v10 = vmul.f32 0.2, %v1611_v29  ;;  %vm821_vm6 = vcmp.ge.f32.partialorder %v1611_v29, 0.0 }
 0x138   : > { %v813_v43 = vadd.f32 %v812_v38, %v740_v36  ;;  %v1300_v21 = vpop.eup %1299  ;;  %1309 = vrcp.f32 %v866_v40 }
 0x139   : > { %v887_v45 = vmul.f32 %v1300_v21, %v831_v44  ;;  %1311 = vpow2.f32 %v1087_v41  ;;  %v830_v12 = vmul.f32 0.2, %v811_v42  ;;  %v837_v15 = vsel %vm821_vm6, %v1611_v29, %v829_v10 }
 0x13a   : > { %v1088_v47 = vmul.f32 -1.442695, %v813_v43  ;;  %vm822_vm7 = vcmp.ge.f32.partialorder %v811_v42, 0.0 }
 0x13b   : > { %v1302_v46 = vpop.eup %1301  ;;  %v838_v17 = vsel %vm822_vm7, %v811_v42, %v830_v12 }
 0x13c   : > { %v1304_v48 = vpop.eup %1303  ;;  %v888_v50 = vmul.f32 %v1302_v46, %v832_v22  ;;  %1313 = vpow2.f32 %v1088_v47 }
 0x13d   : > { %v867_v52 = vadd.f32 1.0, %v1304_v48 }
 0x13e   : > { %v1306_v31 = vpop.eup %1305  ;;  %v1111_v53 = vpack.c.bf16 %v888_v50, %v887_v45 }
 0x13f   : > { %1315 = vrcp.f32 %v867_v52  ;;  %v868_v37 = vadd.f32 1.0, %v1306_v31 }
 0x140   : > { %1112 = vst [vmem:[%s1624_s27] sm:$0xff] %v1111_v53   ;;  %v1308_v56 = vpop.eup %1307 }
 0x141   : > { %1317 = vrcp.f32 %v868_v37  ;;  %v889_v58 = vmul.f32 %v1308_v56, %v833_v57 }
 0x142   : > { %v1310_v59 = vpop.eup %1309 }
 0x143   : > { %v1312_v61 = vpop.eup %1311  ;;  %v890_v62 = vmul.f32 %v1310_v59, %v834_v60 }
 0x144   : > { %v869_v0 = vadd.f32 1.0, %v1312_v61 }
 0x145   : > { %v1116_v1 = vpack.c.bf16 %v890_v62, %v889_v58 }
 0x146   : > { %v1314_v2 = vpop.eup %1313  ;;  %1319 = vrcp.f32 %v869_v0 }
 0x147   : > { %1128 = vst [vmem:[%s1624_s27 + $0x8] sm:$0xff] %v1116_v1   ;;  %v870_v49 = vadd.f32 1.0, %v1314_v2 }
 0x149   : > { %v1316_v4 = vpop.eup %1315  ;;  %1321 = vrcp.f32 %v870_v49 }
 0x14a   : > { %v891_v6 = vmul.f32 %v1316_v4, %v835_v55 }
 0x14b   : > { %v1318_v7 = vpop.eup %1317 }
 0x14c   : > { %v892_v9 = vmul.f32 %v1318_v7, %v836_v8 }
 0x14e   : > { %v1121_v11 = vpack.c.bf16 %v892_v9, %v891_v6 }
 0x150   : > { %1129 = vst [vmem:[%s1624_s27 + $0x10] sm:$0xff] %v1121_v11   ;;  %v1320_v13 = vpop.eup %1319 }
 0x151   : > { %v893_v16 = vmul.f32 %v1320_v13, %v837_v15 }
 0x153   : > { %v1322_v5 = vpop.eup %1321 }
 0x154   : > { %v894_v18 = vmul.f32 %v1322_v5, %v838_v17 }
 0x156   : > { %v1126_v19 = vpack.c.bf16 %v894_v18, %v893_v16 }
 0x158   : > { %1130 = vst [vmem:[%s1624_s27 + $0x18] sm:$0xff] %v1126_v19  }
 0x159 PF: > { %s13_s12 = sadd.s32 1, %s1329_s12  }
 0x15a   : > { %p10_p4 = scmp.ge.s32.totalorder %s13_s12, 4  }
 0x15c   :  { %12 = sbr.rel (!%p10_p4) target bundleno = 1 (0x1), region = 62 }

// kernel: _lambda_.38
= control target key start
LH: loop header
LB: loop body
LE: loop exit
PB: predicated region body
PF: predicated region fallthrough
CT: control target
= control target key end

     0   :  { %s1634_s12 = smov 0   ;;  %s1994_s0 = inlined_call_operand.vmem [shape: bf16[128,640], index: 0, kind: input, shape index: {}]   ;;  %s1995_s1 = inlined_call_operand.vmem [shape: bf16[640,256], index: 1, kind: input, shape index: {}]   ;;  %s1996_s2 = inlined_call_operand.vmem [shape: f32[1,256], index: 2, kind: input, shape index: {}]   ;;  %s1997_s3 = inlined_call_operand.vmem [shape: bf16[128,128], index: 3, kind: output, shape index: {}]  }
   0x1 LB: > { %s1193_s13 = sadd.s32 4294967295, %s1611_s12   ;;  %p1197_p0 = scmp.ge.s32.totalorder %s1611_s12, 1  ;;  %s1611_s12 = sphi %s1634_s12, %s13_s12  }
   0x2   : > { %p139_p1 = scmp.lt.s32.totalorder %s1611_s12, 3 }
   0x4   : > { %p140_p2 = pnand %p1197_p0, %p139_p1 }
   0x5   : > { %v1425_v0 = vld [vmem:[%s1995_s1 + $0x4] ss:$8 sps:$4 sm:$0xff] (!%p140_p2)   ;;  %v1429_v2 = vld [vmem:[%s1995_s1] ss:$8 sps:$4 sm:$0xff] (!%p140_p2)   ;;  %v1431_v4 = vld [vmem:[%s1995_s1 + $0x14] ss:$8 sps:$4 sm:$0xff] (!%p140_p2)  }
   0x6   : > { %143 = sbr.rel (%p140_p2) target bundleno = 360 (0x168), region = 32  ;;  %v1427_v1 = vld [vmem:[%s1995_s1 + $0x104] ss:$8 sps:$4 sm:$0xff] (!%p140_p2)   ;;  %798 = vmatprep.subr.bf16.mxu1 (!%p140_p2), %v1425_v0  ;;  %v1430_v3 = vld [vmem:[%s1995_s1 + $0x100] ss:$8 sps:$4 sm:$0xff] (!%p140_p2)   ;;  %s1198_s24 = sshll.u32 (!%p140_p2), %s1193_s13, 3 }
   0x7   : > { %871 = vmatprep.subr.bf16.mxu0 (!%p140_p2), %v1427_v1  ;;  %799 = vmatpush1.bf16.msra.mxu1 (!%p140_p2), %v1429_v2  ;;  %v1433_v5 = vld [vmem:[%s1995_s1 + $0x114] ss:$8 sps:$4 sm:$0xff] (!%p140_p2)   ;;  %v1435_v6 = vld [vmem:[%s1995_s1 + $0x10] ss:$8 sps:$4 sm:$0xff] (!%p140_p2)   ;;  %v1437_v8 = vld [vmem:[%s1995_s1 + $0x24] ss:$8 sps:$4 sm:$0xff] (!%p140_p2)  }
   0x8   : > { %872 = vmatpush1.bf16.msra.mxu0 (!%p140_p2), %v1430_v3  ;;  %800 = vmatprep.subr.bf16.mxu1 (!%p140_p2), %v1431_v4  ;;  %v1436_v7 = vld [vmem:[%s1995_s1 + $0x110] ss:$8 sps:$4 sm:$0xff] (!%p140_p2)   ;;  %v1439_v9 = vld [vmem:[%s1995_s1 + $0x124] ss:$8 sps:$4 sm:$0xff] (!%p140_p2)   ;;  %v1441_v10 = vld [vmem:[%s1995_s1 + $0x20] ss:$8 sps:$4 sm:$0xff] (!%p140_p2)  }
   0x9   : > { %873 = vmatprep.subr.bf16.mxu0 (!%p140_p2), %v1433_v5  ;;  %v1442_v11 = vld [vmem:[%s1995_s1 + $0x120] ss:$8 sps:$4 sm:$0xff] (!%p140_p2)   ;;  %v1443_v12 = vld [vmem:[%s1995_s1 + $0x34] ss:$8 sps:$4 sm:$0xff] (!%p140_p2)   ;;  %v1447_v14 = vld [vmem:[%s1995_s1 + $0x30] ss:$8 sps:$4 sm:$0xff] (!%p140_p2)  }
   0xa   : > { %v1445_v13 = vld [vmem:[%s1995_s1 + $0x134] ss:$8 sps:$4 sm:$0xff] (!%p140_p2)   ;;  %v1448_v15 = vld [vmem:[%s1995_s1 + $0x130] ss:$8 sps:$4 sm:$0xff] (!%p140_p2)   ;;  %v1449_v16 = vld [vmem:[%s1995_s1 + $0x44] ss:$8 sps:$4 sm:$0xff] (!%p140_p2)  }
   0xb   : > { %801 = vmatpush1.bf16.msra.mxu1 (!%p140_p2), %v1435_v6  ;;  %v1451_v17 = vld [vmem:[%s1995_s1 + $0x144] ss:$8 sps:$4 sm:$0xff] (!%p140_p2)   ;;  %v1453_v18 = vld [vmem:[%s1995_s1 + $0x40] ss:$8 sps:$4 sm:$0xff] (!%p140_p2)   ;;  %v1455_v20 = vld [vmem:[%s1995_s1 + $0x54] ss:$8 sps:$4 sm:$0xff] (!%p140_p2)  }
   0xc   : > { %874 = vmatpush1.bf16.msra.mxu0 (!%p140_p2), %v1436_v7  ;;  %802 = vmatprep.subr.bf16.mxu1 (!%p140_p2), %v1437_v8  ;;  %v1454_v19 = vld [vmem:[%s1995_s1 + $0x140] ss:$8 sps:$4 sm:$0xff] (!%p140_p2)   ;;  %v1457_v21 = vld [vmem:[%s1995_s1 + $0x154] ss:$8 sps:$4 sm:$0xff] (!%p140_p2)   ;;  %v1459_v22 = vld [vmem:[%s1995_s1 + $0x50] ss:$8 sps:$4 sm:$0xff] (!%p140_p2)  }
   0xd   : > { %875 = vmatprep.subr.bf16.mxu0 %v1439_v9  ;;  %v1460_v23 = vld [vmem:[%s1995_s1 + $0x150] ss:$8 sps:$4 sm:$0xff]   ;;  %v1461_v24 = vld [vmem:[%s1995_s1 + $0x64] ss:$8 sps:$4 sm:$0xff]   ;;  %v1465_v26 = vld [vmem:[%s1995_s1 + $0x60] ss:$8 sps:$4 sm:$0xff]  }
   0xe   : > { %v1463_v25 = vld [vmem:[%s1995_s1 + $0x164] ss:$8 sps:$4 sm:$0xff]   ;;  %v1466_v27 = vld [vmem:[%s1995_s1 + $0x160] ss:$8 sps:$4 sm:$0xff]   ;;  %v1467_v28 = vld [vmem:[%s1995_s1 + $0x74] ss:$8 sps:$4 sm:$0xff]  }
   0xf   : > { %803 = vmatpush1.bf16.msra.mxu1 %v1441_v10  ;;  %v1469_v29 = vld [vmem:[%s1995_s1 + $0x174] ss:$8 sps:$4 sm:$0xff]   ;;  %v1471_v30 = vld [vmem:[%s1995_s1 + $0x70] ss:$8 sps:$4 sm:$0xff]   ;;  %v1473_v32 = vld [vmem:[%s1995_s1 + $0x84] ss:$8 sps:$4 sm:$0xff]  }
  0x10   : > { %876 = vmatpush1.bf16.msra.mxu0 %v1442_v11  ;;  %804 = vmatprep.subr.bf16.mxu1 %v1443_v12  ;;  %v1472_v31 = vld [vmem:[%s1995_s1 + $0x170] ss:$8 sps:$4 sm:$0xff]   ;;  %p165_p3 = scmp.lt.s32.totalorder %s1198_s24, 15  ;;  %v1475_v33 = vld [vmem:[%s1995_s1 + $0x184] ss:$8 sps:$4 sm:$0xff]  }
  0x11   : > { %877 = vmatprep.subr.bf16.mxu0 %v1445_v13  ;;  %v1477_v34 = vld [vmem:[%s1995_s1 + $0x80] ss:$8 sps:$4 sm:$0xff]   ;;  %v1479_v36 = vld [vmem:[%s1995_s1 + $0x94] ss:$8 sps:$4 sm:$0xff]   ;;  %v1483_v38 = vld [vmem:[%s1995_s1 + $0x90] ss:$8 sps:$4 sm:$0xff]  }
  0x12   : > { %v1478_v35 = vld [vmem:[%s1995_s1 + $0x180] ss:$8 sps:$4 sm:$0xff]   ;;  %s1999_s24 = smov (!%p165_p3, %s1198_s24), 15  ;;  %v1481_v37 = vld [vmem:[%s1995_s1 + $0x194] ss:$8 sps:$4 sm:$0xff]  }
  0x13   : > { %805 = vmatpush1.bf16.msra.mxu1 %v1447_v14  ;;  %v1484_v39 = vld [vmem:[%s1995_s1 + $0x190] ss:$8 sps:$4 sm:$0xff]   ;;  %v1485_v40 = vld [vmem:[%s1995_s1 + $0xa4] ss:$8 sps:$4 sm:$0xff]   ;;  %s1415_s21 = smul.u32 20, %s1999_s24 }
  0x14   : > { %878 = vmatpush1.bf16.msra.mxu0 %v1448_v15  ;;  %806 = vmatprep.subr.bf16.mxu1 %v1449_v16  ;;  %v1487_v41 = vld [vmem:[%s1995_s1 + $0x1a4] ss:$8 sps:$4 sm:$0xff]   ;;  %v1489_v42 = vld [vmem:[%s1995_s1 + $0xa0] ss:$8 sps:$4 sm:$0xff]   ;;  %v1491_v44 = vld [vmem:[%s1995_s1 + $0xb4] ss:$8 sps:$4 sm:$0xff]  }
  0x15   : > { %879 = vmatprep.subr.bf16.mxu0 %v1451_v17  ;;  %v1490_v43 = vld [vmem:[%s1995_s1 + $0x1a0] ss:$8 sps:$4 sm:$0xff]   ;;  %s1785_s13 = scalar_lea.vmem %s1994_s0, %s1415_s21  ;;  %v1493_v45 = vld [vmem:[%s1995_s1 + $0x1b4] ss:$8 sps:$4 sm:$0xff]   ;;  %v1495_v46 = vld [vmem:[%s1995_s1 + $0xb0] ss:$8 sps:$4 sm:$0xff]  }
  0x16   : > { %v1496_v47 = vld [vmem:[%s1995_s1 + $0x1b0] ss:$8 sps:$4 sm:$0xff]   ;;  %v1497_v48 = vld [vmem:[%s1995_s1 + $0xc4] ss:$8 sps:$4 sm:$0xff]   ;;  %v1501_v52 = vld [vmem:[%s1995_s1 + $0xc0] ss:$8 sps:$4 sm:$0xff]  }
  0x17   : > { %807 = vmatpush1.bf16.msra.mxu1 %v1453_v18  ;;  %v1523_v49 = vld [vmem:[%s1785_s13 + $0x4] ss:$20 sps:$4 sm:$0xff]   ;;  %v1526_v51 = vld [vmem:[%s1785_s13 + $0xc] ss:$20 sps:$4 sm:$0xff]   ;;  %v1503_v54 = vld [vmem:[%s1995_s1 + $0xd4] ss:$8 sps:$4 sm:$0xff]  }
  0x18   : > { %880 = vmatpush1.bf16.msra.mxu0 %v1454_v19  ;;  %808 = vmatprep.subr.bf16.mxu1 %v1455_v20  ;;  %v1499_v50 = vld [vmem:[%s1995_s1 + $0x1c4] ss:$8 sps:$4 sm:$0xff]   ;;  %v1502_v53 = vld [vmem:[%s1995_s1 + $0x1c0] ss:$8 sps:$4 sm:$0xff]   ;;  %v1505_v55 = vld [vmem:[%s1995_s1 + $0x1d4] ss:$8 sps:$4 sm:$0xff]  }
  0x19   : > { %881 = vmatprep.subr.bf16.mxu0 %v1457_v21  ;;  %830 = vmatprep.mubr.bf16.mxu1 %v1523_v49  ;;  %v1507_v56 = vld [vmem:[%s1995_s1 + $0xd0] ss:$8 sps:$4 sm:$0xff]   ;;  %v1509_v58 = vld [vmem:[%s1995_s1 + $0xe4] ss:$8 sps:$4 sm:$0xff]   ;;  %v1513_v60 = vld [vmem:[%s1995_s1 + $0xe0] ss:$8 sps:$4 sm:$0xff]  }
  0x1a   : > { %903 = vmatprep.mubr.bf16.mxu0 %v1526_v51  ;;  %v1508_v57 = vld [vmem:[%s1995_s1 + $0x1d0] ss:$8 sps:$4 sm:$0xff]   ;;  %v1511_v59 = vld [vmem:[%s1995_s1 + $0x1e4] ss:$8 sps:$4 sm:$0xff]   ;;  %v1514_v61 = vld [vmem:[%s1995_s1 + $0x1e0] ss:$8 sps:$4 sm:$0xff]  }
  0x1b   : > { %809 = vmatpush1.bf16.msra.mxu1 %v1459_v22  ;;  %v1515_v62 = vld [vmem:[%s1995_s1 + $0xf4] ss:$8 sps:$4 sm:$0xff]   ;;  %v1519_v0 = vld [vmem:[%s1995_s1 + $0xf0] ss:$8 sps:$4 sm:$0xff]   ;;  %v1529_v2 = vld [vmem:[%s1995_s1 + $0x204] ss:$8 sps:$4 sm:$0xff]  }
  0x1c   : > { %882 = vmatpush1.bf16.msra.mxu0 %v1460_v23  ;;  %810 = vmatprep.subr.bf16.mxu1 %v1461_v24  ;;  %v1517_v63 = vld [vmem:[%s1995_s1 + $0x1f4] ss:$8 sps:$4 sm:$0xff]   ;;  %v1520_v1 = vld [vmem:[%s1995_s1 + $0x1f0] ss:$8 sps:$4 sm:$0xff]   ;;  %v1527_v5 = vld [vmem:[%s1995_s1 + $0x200] ss:$8 sps:$4 sm:$0xff]  }
  0x1d   : > { %883 = vmatprep.subr.bf16.mxu0 %v1463_v25  ;;  %v1521_v3 = vld [vmem:[%s1785_s13] ss:$20 sps:$4 sm:$0xff]   ;;  %v1524_v4 = vld [vmem:[%s1785_s13 + $0x8] ss:$20 sps:$4 sm:$0xff]   ;;  %v1530_v9 = vld [vmem:[%s1995_s1 + $0x210] ss:$8 sps:$4 sm:$0xff]  }
  0x1e   : > { %v1532_v6 = vld [vmem:[%s1995_s1 + $0x214] ss:$8 sps:$4 sm:$0xff]   ;;  %v1533_v7 = vld [vmem:[%s1785_s13 + $0x2c] ss:$20 sps:$4 sm:$0xff]   ;;  %v1538_v12 = vld [vmem:[%s1785_s13 + $0x30] ss:$20 sps:$4 sm:$0xff]  }
  0x1f   : > { %811 = vmatpush1.bf16.msra.mxu1 %v1465_v26  ;;  %v1535_v8 = vld [vmem:[%s1785_s13 + $0x34] ss:$20 sps:$4 sm:$0xff]   ;;  %v1541_v10 = vld [vmem:[%s1995_s1 + $0x224] ss:$8 sps:$4 sm:$0xff]   ;;  %v1547_v16 = vld [vmem:[%s1785_s13 + $0x5c] ss:$20 sps:$4 sm:$0xff]  }
  0x20   : > { %884 = vmatpush1.bf16.msra.mxu0 %v1466_v27  ;;  %812 = vmatprep.subr.bf16.mxu1 %v1467_v28  ;;  %v1537_v11 = vld [vmem:[%s1785_s13 + $0x28] ss:$20 sps:$4 sm:$0xff]   ;;  %v1542_v17 = vld [vmem:[%s1995_s1 + $0x230] ss:$8 sps:$4 sm:$0xff]   ;;  %v1553_v18 = vld [vmem:[%s1995_s1 + $0x244] ss:$8 sps:$4 sm:$0xff]  }
  0x21   : > { %885 = vmatprep.subr.bf16.mxu0 %v1469_v29  ;;  %v1539_v13 = vld [vmem:[%s1995_s1 + $0x220] ss:$8 sps:$4 sm:$0xff]   ;;  %v1544_v14 = vld [vmem:[%s1995_s1 + $0x234] ss:$8 sps:$4 sm:$0xff]   ;;  %v1549_v19 = vld [vmem:[%s1785_s13 + $0x50] ss:$20 sps:$4 sm:$0xff]  }
  0x22   : > { %v1545_v15 = vld [vmem:[%s1785_s13 + $0x54] ss:$20 sps:$4 sm:$0xff]   ;;  %v1550_v20 = vld [vmem:[%s1785_s13 + $0x58] ss:$20 sps:$4 sm:$0xff]   ;;  %v1557_v23 = vld [vmem:[%s1785_s13 + $0x7c] ss:$20 sps:$4 sm:$0xff]  }
  0x23   : > { %813 = vmatpush1.bf16.msra.mxu1 %v1471_v30  ;;  %v1551_v21 = vld [vmem:[%s1995_s1 + $0x240] ss:$8 sps:$4 sm:$0xff]   ;;  %v1556_v22 = vld [vmem:[%s1995_s1 + $0x254] ss:$8 sps:$4 sm:$0xff]   ;;  %v1559_v24 = vld [vmem:[%s1785_s13 + $0x84] ss:$20 sps:$4 sm:$0xff]  }
  0x24   : > { %886 = vmatpush1.bf16.msra.mxu0 %v1472_v31  ;;  %814 = vmatprep.subr.bf16.mxu1 %v1473_v32  ;;  %v1554_v25 = vld [vmem:[%s1995_s1 + $0x250] ss:$8 sps:$4 sm:$0xff]   ;;  %v1565_v26 = vld [vmem:[%s1995_s1 + $0x264] ss:$8 sps:$4 sm:$0xff]   ;;  %v1562_v28 = vld [vmem:[%s1785_s13 + $0x80] ss:$20 sps:$4 sm:$0xff]  }
  0x25   : > { %887 = vmatprep.subr.bf16.mxu0 %v1475_v33  ;;  %v1561_v27 = vld [vmem:[%s1785_s13 + $0x78] ss:$20 sps:$4 sm:$0xff]   ;;  %v1563_v29 = vld [vmem:[%s1995_s1 + $0x260] ss:$8 sps:$4 sm:$0xff]   ;;  %v1568_v30 = vld [vmem:[%s1995_s1 + $0x274] ss:$8 sps:$4 sm:$0xff]  }
  0x26   : > { %v1566_v31 = vld [vmem:[%s1995_s1 + $0x270] ss:$8 sps:$4 sm:$0xff]   ;;  %v1613_v32 = vmov 0  }
  0x27   : > { %815 = vmatpush1.bf16.msra.mxu1 %v1477_v34  ;;  %v1569_v33 = vld [vmem:[%s1785_s13 + $0x10] ss:$20 sps:$4 sm:$0xff]   ;;  %v1570_v34 = vld [vmem:[%s1785_s13 + $0x60] ss:$20 sps:$4 sm:$0xff]  }
  0x28   : > { %888 = vmatpush1.bf16.msra.mxu0 %v1478_v35  ;;  %816 = vmatprep.subr.bf16.mxu1 %v1479_v36  ;;  %v1571_v35 = vld [vmem:[%s1785_s13 + $0x38] ss:$20 sps:$4 sm:$0xff]   ;;  %v1572_v36 = vld [vmem:[%s1785_s13 + $0x88] ss:$20 sps:$4 sm:$0xff]   ;;  %s1201_s13 = sshll.u32 %s1999_s24, 2 }
  0x29   : > { %889 = vmatprep.subr.bf16.mxu0 %v1481_v37  ;;  %s175_s8 = scalar_lea.vmem %s1997_s3, %s1201_s13 }
  0x2b   : > { %817 = vmatpush1.bf16.msra.mxu1 %v1483_v38 }
  0x2c   : > { %890 = vmatpush1.bf16.msra.mxu0 %v1484_v39  ;;  %818 = vmatprep.subr.bf16.mxu1 %v1485_v40  ;;  %v284_v40 = vlaneseq }
  0x2d   : > { %891 = vmatprep.subr.bf16.mxu0 %v1487_v41 }
  0x2f   : > { %819 = vmatpush1.bf16.msra.mxu1 %v1489_v42  ;;  %v285_v42 = vshrl.u32 %v284_v40, 7 }
  0x30   : > { %892 = vmatpush1.bf16.msra.mxu0 %v1490_v43  ;;  %820 = vmatprep.subr.bf16.mxu1 %v1491_v44 }
  0x31   : > { %893 = vmatprep.subr.bf16.mxu0 %v1493_v45  ;;  %v290_v49 = vsub.s32 1, %v285_v42 }
  0x33   : > { %821 = vmatpush1.bf16.msra.mxu1 %v1495_v46  ;;  %v286_v46 = vsub.s32 0, %v285_v42 }
  0x34   : > { %894 = vmatpush1.bf16.msra.mxu0 %v1496_v47  ;;  %822 = vmatprep.subr.bf16.mxu1 %v1497_v48  ;;  %v282_v48 = vld [vmem:[%s1996_s2] sm:$0x3] }
  0x35   : > { %895 = vmatprep.subr.bf16.mxu0 %v1499_v50  ;;  %v1923_v50 = vrot.slane %v282_v48, %v286_v46  ;;  %v1925_v51 = vrot.slane %v282_v48, %v290_v49 }
  0x37   : > { %823 = vmatpush1.bf16.msra.mxu1 %v1501_v52 }
  0x38   : > { %896 = vmatpush1.bf16.msra.mxu0 %v1502_v53  ;;  %824 = vmatprep.subr.bf16.mxu1 %v1503_v54 }
  0x39   : > { %897 = vmatprep.subr.bf16.mxu0 %v1505_v55 }
  0x3b   : > { %825 = vmatpush1.bf16.msra.mxu1 %v1507_v56 }
  0x3c   : > { %898 = vmatpush1.bf16.msra.mxu0 %v1508_v57  ;;  %826 = vmatprep.subr.bf16.mxu1 %v1509_v58 }
  0x3d   : > { %899 = vmatprep.subr.bf16.mxu0 %v1511_v59 }
  0x3f   : > { %827 = vmatpush1.bf16.msra.mxu1 %v1513_v60 }
  0x40   : > { %900 = vmatpush1.bf16.msra.mxu0 %v1514_v61  ;;  %828 = vmatprep.subr.bf16.mxu1 %v1515_v62 }
  0x41   : > { %901 = vmatprep.subr.bf16.mxu0 %v1517_v63 }
  0x43   : > { %829 = vmatpush1.bf16.msra.mxu1 %v1519_v0 }
  0x44   : > { %902 = vmatpush1.bf16.msra.mxu0 %v1520_v1  ;;  %1351 = vmatprep.subr.bf16.mxu1 %v1529_v2 }
  0x45   : > { %944 = vmatprep.subr.bf16.mxu0 %v1529_v2 }
  0x46   : > { %831 = vmatmul.mubr.bf16.vlgmr.msra.gmra.mrb[0].mxu1 %v1521_v3 }
  0x47   : > { %904 = vmatmul.mubr.bf16.vlgmr.msra.gmra.mrb[0].mxu0 %v1524_v4  ;;  %1359 = vmatpush1.bf16.msra.mxu1 %v1527_v5 }
  0x48   : > { %945 = vmatpush1.bf16.msra.mxu0 %v1527_v5  ;;  %1352 = vmatprep.subr.bf16.mxu1 %v1532_v6 }
  0x49   : > { %946 = vmatprep.subr.bf16.mxu0 %v1532_v6  ;;  %840 = vmatprep.mubr.bf16.mxu1 %v1533_v7 }
  0x4a   : > { %913 = vmatprep.mubr.bf16.mxu0 %v1535_v8 }
  0x4b   : > { %1360 = vmatpush1.bf16.msra.mxu1 %v1530_v9 }
  0x4c   : > { %947 = vmatpush1.bf16.msra.mxu0 %v1530_v9  ;;  %1353 = vmatprep.subr.bf16.mxu1 %v1541_v10 }
  0x4d   : > { %948 = vmatprep.subr.bf16.mxu0 %v1541_v10 }
  0x4e   : > { %841 = vmatmul.mubr.bf16.gmra.mrb[4].mxu1 %v1537_v11 }
  0x4f   : > { %914 = vmatmul.mubr.bf16.gmra.mrb[4].mxu0 %v1538_v12  ;;  %1361 = vmatpush1.bf16.msra.mxu1 %v1539_v13 }
  0x50   : > { %949 = vmatpush1.bf16.msra.mxu0 %v1539_v13  ;;  %1354 = vmatprep.subr.bf16.mxu1 %v1544_v14 }
  0x51   : > { %950 = vmatprep.subr.bf16.mxu0 %v1544_v14  ;;  %850 = vmatprep.mubr.bf16.mxu1 %v1545_v15 }
  0x52   : > { %923 = vmatprep.mubr.bf16.mxu0 %v1547_v16 }
  0x53   : > { %1362 = vmatpush1.bf16.msra.mxu1 %v1542_v17 }
  0x54   : > { %951 = vmatpush1.bf16.msra.mxu0 %v1542_v17  ;;  %1355 = vmatprep.subr.bf16.mxu1 %v1553_v18 }
  0x55   : > { %952 = vmatprep.subr.bf16.mxu0 %v1553_v18 }
  0x56   : > { %851 = vmatmul.mubr.bf16.gmra.mrb[8].mxu1 %v1549_v19 }
  0x57   : > { %924 = vmatmul.mubr.bf16.gmra.mrb[8].mxu0 %v1550_v20  ;;  %1363 = vmatpush1.bf16.msra.mxu1 %v1551_v21 }
  0x58   : > { %953 = vmatpush1.bf16.msra.mxu0 %v1551_v21  ;;  %1356 = vmatprep.subr.bf16.mxu1 %v1556_v22 }
  0x59   : > { %954 = vmatprep.subr.bf16.mxu0 %v1556_v22  ;;  %860 = vmatprep.mubr.bf16.mxu1 %v1557_v23 }
  0x5a   : > { %933 = vmatprep.mubr.bf16.mxu0 %v1559_v24 }
  0x5b   : > { %1364 = vmatpush1.bf16.msra.mxu1 %v1554_v25 }
  0x5c   : > { %955 = vmatpush1.bf16.msra.mxu0 %v1554_v25  ;;  %1357 = vmatprep.subr.bf16.mxu1 %v1565_v26 }
  0x5d   : > { %956 = vmatprep.subr.bf16.mxu0 %v1565_v26 }
  0x5e   : > { %861 = vmatmul.mubr.bf16.gmra.mrb[12].mxu1 %v1561_v27 }
  0x5f   : > { %934 = vmatmul.mubr.bf16.gmra.mrb[12].mxu0 %v1562_v28  ;;  %1365 = vmatpush1.bf16.msra.mxu1 %v1563_v29 }
  0x60   : > { %957 = vmatpush1.bf16.msra.mxu0 %v1563_v29  ;;  %1358 = vmatprep.subr.bf16.mxu1 %v1568_v30 }
  0x61   : > { %958 = vmatprep.subr.bf16.mxu0 %v1568_v30  ;;  %976 = vmatprep.mubr.bf16.mxu0 %v1613_v32 }
  0x62   : > { %996 = vmatprep.mubr.bf16.mxu1 %v1613_v32 }
  0x63   : > { %1366 = vmatpush1.bf16.msra.mxu1 %v1566_v31 }
  0x64   : > { %959 = vmatpush1.bf16.msra.mxu0 %v1566_v31 }
  0x66   : > { %997 = vmatmul.mubr.bf16.vlgmr.msra.gmra.mrb[16].mxu1 %v1570_v34 }
  0x67   : > { %977 = vmatmul.mubr.bf16.vlgmr.msra.gmra.mrb[0].mxu0 %v1569_v33  ;;  %1006 = vmatprep.mubr.bf16.mxu1 %v1613_v32 }
  0x68   : > { %986 = vmatprep.mubr.bf16.mxu0 %v1613_v32 }
  0x6e   : > { %1007 = vmatmul.mubr.bf16.gmra.mrb[20].mxu1 %v1572_v36 }
  0x6f   : > { %987 = vmatmul.mubr.bf16.gmra.mrb[4].mxu0 %v1571_v35 }
 0x119   : > { %v832_v37 = vpop.f32.mrb[0].mxu1 }
 0x11a   : > { %v834_v38 = vpop.f32.mrb[1].mxu1  ;;  %v833_v20 = vadd.f32 %v832_v37, %v1923_v50 }
 0x11b   : > { %v836_v39 = vpop.f32.mrb[2].mxu1  ;;  %v835_v21 = vadd.f32 %v834_v38, %v1925_v51 }
 0x11c   : > { %v838_v41 = vpop.f32.mrb[3].mxu1  ;;  %v837_v28 = vadd.f32 %v836_v39, %v1923_v50 }
 0x11d   : > { %v839_v33 = vadd.f32 %v838_v41, %v1925_v51 }
 0x121   : > { %v1912_v43 = vpop.f32.mrb[4].mxu1 }
 0x122   : > { %v1914_v44 = vpop.f32.mrb[5].mxu1  ;;  %v843_v39 = vadd.f32 %v1912_v43, %v1923_v50 }
 0x123   : > { %v1916_v45 = vpop.f32.mrb[6].mxu1  ;;  %v845_v41 = vadd.f32 %v1914_v44, %v1925_v51 }
 0x124   : > { %v1918_v47 = vpop.f32.mrb[7].mxu1 }
 0x125   : > { %v849_v44 = vadd.f32 %v1918_v47, %v1925_v51 }
 0x129   : > { %v852_v52 = vpop.f32.mrb[8].mxu1 }
 0x12a   : > { %v925_v53 = vpop.f32.mrb[8].mxu0  ;;  %v853_v54 = vadd.f32 %v852_v52, %v1923_v50  ;;  %v854_v55 = vpop.f32.mrb[9].mxu1 }
 0x12b   : > { %v927_v56 = vpop.f32.mrb[9].mxu0  ;;  %v855_v57 = vadd.f32 %v854_v55, %v1925_v51  ;;  %v856_v58 = vpop.f32.mrb[10].mxu1 }
 0x12c   : > { %v929_v59 = vpop.f32.mrb[10].mxu0  ;;  %v926_v60 = vadd.f32 %v925_v53, %v853_v54  ;;  %v857_v61 = vadd.f32 %v856_v58, %v1923_v50  ;;  %v858_v62 = vpop.f32.mrb[11].mxu1  ;;  %v847_v58 = vadd.f32 %v1916_v45, %v1923_v50 }
 0x12d   : > { %v931_v63 = vpop.f32.mrb[11].mxu0  ;;  %v928_v0 = vadd.f32 %v927_v56, %v855_v57  ;;  %v859_v1 = vadd.f32 %v858_v62, %v1925_v51 }
 0x12e   : > { %v930_v2 = vadd.f32 %v929_v59, %v857_v61 }
 0x12f   : > { %v932_v3 = vadd.f32 %v931_v63, %v859_v1 }
 0x131   : > { %v862_v4 = vpop.f32.mrb[12].mxu1 }
 0x132   : > { %v935_v5 = vpop.f32.mrb[12].mxu0  ;;  %v863_v6 = vadd.f32 %v862_v4, %v1923_v50  ;;  %v864_v7 = vpop.f32.mrb[13].mxu1 }
 0x133   : > { %v937_v8 = vpop.f32.mrb[13].mxu0  ;;  %v865_v9 = vadd.f32 %v864_v7, %v1925_v51  ;;  %v866_v10 = vpop.f32.mrb[14].mxu1 }
 0x134   : > { %v939_v11 = vpop.f32.mrb[14].mxu0  ;;  %v936_v12 = vadd.f32 %v935_v5, %v863_v6  ;;  %v867_v13 = vadd.f32 %v866_v10, %v1923_v50  ;;  %v868_v14 = vpop.f32.mrb[15].mxu1 }
 0x135   : > { %v941_v15 = vpop.f32.mrb[15].mxu0  ;;  %v938_v16 = vadd.f32 %v937_v8, %v865_v9  ;;  %v869_v17 = vadd.f32 %v868_v14, %v1925_v51 }
 0x136   : > { %v940_v18 = vadd.f32 %v939_v11, %v867_v13 }
 0x137   : > { %v942_v19 = vadd.f32 %v941_v15, %v869_v17 }
 0x139   : > { %v998_v23 = vpop.f32.mrb[16].mxu1 }
 0x13a   : > { %v978_v22 = vpop.f32.mrb[0].mxu0  ;;  %v1939_v25 = vadd.f32 %v998_v23, %v926_v60  ;;  %v1000_v27 = vpop.f32.mrb[17].mxu1 }
 0x13b   : > { %v1937_v24 = vadd.f32 %v978_v22, %v833_v20  ;;  %v980_v26 = vpop.f32.mrb[1].mxu0  ;;  %v1001_v30 = vadd.f32 %v1000_v27, %v928_v0  ;;  %v1002_v32 = vpop.f32.mrb[18].mxu1 }
 0x13c   : > { %v1370_v29 = vadd.f32 %v980_v26, %v835_v21  ;;  %v982_v31 = vpop.f32.mrb[2].mxu0  ;;  %v1945_v37 = vadd.f32 %v1002_v32, %v930_v2  ;;  %v1004_v40 = vpop.f32.mrb[19].mxu1  ;;  %vm1021_vm1 = vcmp.ge.f32.partialorder %v1939_v25, 0.0 }
 0x13d   : > { %v1306_v35 = vmul.f32 -1.442695, %v1001_v30  ;;  %v1943_v36 = vadd.f32 %v982_v31, %v837_v28  ;;  %v984_v38 = vpop.f32.mrb[3].mxu0  ;;  %v1005_v46 = vadd.f32 %v1004_v40, %v932_v3  ;;  %v1025_v14 = vmul.f32 0.2, %v1937_v24 }
 0x13e   : > { %v1302_v34 = vmul.f32 -1.442695, %v1370_v29  ;;  %v1374_v42 = vadd.f32 %v984_v38, %v839_v33  ;;  %vm1017_vm0 = vcmp.ge.f32.partialorder %v1937_v24, 0.0  ;;  %v1030_v26 = vmul.f32 0.2, %v1945_v37 }
 0x13f   : > { %v1307_v49 = vmul.f32 -1.442695, %v1005_v46  ;;  %v1026_v20 = vmul.f32 0.2, %v1943_v36  ;;  %v1033_v23 = vsel %vm1017_vm0, %v1937_v24, %v1025_v14  ;;  %vm1018_vm2 = vcmp.ge.f32.partialorder %v1943_v36, 0.0 }
 0x140   : > { %1573 = vpow2.f32 %v1302_v34  ;;  %v1303_v48 = vmul.f32 -1.442695, %v1374_v42  ;;  %vm1022_vm3 = vcmp.ge.f32.partialorder %v1945_v37, 0.0 }
 0x141   : > { %1575 = vpow2.f32 %v1306_v35  ;;  %v1008_v53 = vpop.f32.mrb[20].mxu1  ;;  %v1034_v33 = vsel %vm1018_vm2, %v1943_v36, %v1026_v20  ;;  %v1038_v24 = vsel %vm1022_vm3, %v1945_v37, %v1030_v26 }
 0x142   : > { %v988_v52 = vpop.f32.mrb[4].mxu0  ;;  %1577 = vpow2.f32 %v1303_v48  ;;  %v1953_v55 = vadd.f32 %v1008_v53, %v936_v12  ;;  %v1010_v57 = vpop.f32.mrb[21].mxu1 }
 0x143   : > { %v1951_v54 = vadd.f32 %v988_v52, %v843_v39  ;;  %v990_v56 = vpop.f32.mrb[5].mxu0  ;;  %1579 = vpow2.f32 %v1307_v49  ;;  %v1011_v59 = vadd.f32 %v1010_v57, %v938_v16  ;;  %v1012_v61 = vpop.f32.mrb[22].mxu1  ;;  %v1029_v16 = vmul.f32 0.2, %v1939_v25 }
 0x144   : > { %v1378_v43 = vadd.f32 %v990_v56, %v845_v41  ;;  %v992_v60 = vpop.f32.mrb[6].mxu0  ;;  %v1961_v1 = vadd.f32 %v1012_v61, %v940_v18  ;;  %v1014_v3 = vpop.f32.mrb[23].mxu1  ;;  %v1031_v40 = vmul.f32 0.2, %v1953_v55  ;;  %vm1023_vm5 = vcmp.ge.f32.partialorder %v1953_v55, 0.0 }
 0x145   : > { %v1308_v63 = vmul.f32 -1.442695, %v1011_v59  ;;  %v1959_v0 = vadd.f32 %v992_v60, %v847_v58  ;;  %v994_v2 = vpop.f32.mrb[7].mxu0  ;;  %v1015_v5 = vadd.f32 %v1014_v3, %v942_v19  ;;  %v1037_v29 = vsel %vm1021_vm1, %v1939_v25, %v1029_v16 }
 0x146   : > { %v1304_v62 = vmul.f32 -1.442695, %v1378_v43  ;;  %v1382_v4 = vadd.f32 %v994_v2, %v849_v44  ;;  %v1027_v38 = vmul.f32 0.2, %v1951_v54  ;;  %vm1019_vm4 = vcmp.ge.f32.partialorder %v1951_v54, 0.0 }
 0x147   : > { %v1309_v50 = vmul.f32 -1.442695, %v1015_v5  ;;  %v1028_v36 = vmul.f32 0.2, %v1959_v0  ;;  %vm1020_vm6 = vcmp.ge.f32.partialorder %v1959_v0, 0.0  ;;  %v1039_v41 = vsel %vm1023_vm5, %v1953_v55, %v1031_v40 }
 0x148   : > { %1581 = vpow2.f32 %v1304_v62  ;;  %v1305_v45 = vmul.f32 -1.442695, %v1382_v4  ;;  %v1035_v37 = vsel %vm1019_vm4, %v1951_v54, %v1027_v38  ;;  %v1032_v48 = vmul.f32 0.2, %v1961_v1 }
 0x149   : > { %1583 = vpow2.f32 %v1308_v63  ;;  %vm1024_vm7 = vcmp.ge.f32.partialorder %v1961_v1, 0.0  ;;  %v1036_v57 = vsel %vm1020_vm6, %v1959_v0, %v1028_v36 }
 0x14a   : > { %v1574_v6 = vpop.eup %1573  ;;  %1585 = vpow2.f32 %v1305_v45  ;;  %v1040_v43 = vsel %vm1024_vm7, %v1961_v1, %v1032_v48 }
 0x14b   : > { %v1576_v7 = vpop.eup %1575  ;;  %v1065_v8 = vadd.f32 1.0, %v1574_v6  ;;  %1587 = vpow2.f32 %v1309_v50 }
 0x14c   : > { %v1069_v9 = vadd.f32 1.0, %v1576_v7  ;;  %v1578_v47 = vpop.eup %1577 }
 0x14d   : > { %1589 = vrcp.f32 %v1065_v8  ;;  %v1580_v51 = vpop.eup %1579  ;;  %v1066_v10 = vadd.f32 1.0, %v1578_v47 }
 0x14e   : > { %1591 = vrcp.f32 %v1069_v9  ;;  %v1070_v11 = vadd.f32 1.0, %v1580_v51 }
 0x14f   : > { %1593 = vrcp.f32 %v1066_v10 }
 0x150   : > { %1595 = vrcp.f32 %v1070_v11 }
 0x152   : > { %v1582_v12 = vpop.eup %1581 }
 0x153   : > { %v1584_v13 = vpop.eup %1583  ;;  %v1067_v15 = vadd.f32 1.0, %v1582_v12 }
 0x154   : > { %v1071_v17 = vadd.f32 1.0, %v1584_v13  ;;  %v1586_v18 = vpop.eup %1585 }
 0x155   : > { %1597 = vrcp.f32 %v1067_v15  ;;  %v1588_v19 = vpop.eup %1587  ;;  %v1068_v21 = vadd.f32 1.0, %v1586_v18 }
 0x156   : > { %1599 = vrcp.f32 %v1071_v17  ;;  %v1072_v27 = vadd.f32 1.0, %v1588_v19 }
 0x157   : > { %v1590_v22 = vpop.eup %1589  ;;  %1601 = vrcp.f32 %v1068_v21 }
 0x158   : > { %v1592_v28 = vpop.eup %1591  ;;  %v1089_v30 = vmul.f32 %v1590_v22, %v1033_v23  ;;  %1603 = vrcp.f32 %v1072_v27 }
 0x159   : > { %v1093_v31 = vmul.f32 %v1592_v28, %v1037_v29  ;;  %v1594_v32 = vpop.eup %1593 }
 0x15a   : > { %v1596_v34 = vpop.eup %1595  ;;  %v1090_v35 = vmul.f32 %v1594_v32, %v1034_v33 }
 0x15b   : > { %v1094_v25 = vmul.f32 %v1596_v34, %v1038_v24 }
 0x15c   : > { %v1331_v42 = vpack.c.bf16 %v1090_v35, %v1089_v30 }
 0x15d   : > { %v1341_v46 = vpack.c.bf16 %v1094_v25, %v1093_v31 }
 0x15e   : > { %1332 = vst [vmem:[%s175_s8] sm:$0xff] %v1331_v42  }
 0x15f   : > { %v1598_v39 = vpop.eup %1597  ;;  %1349 = vst [vmem:[%s175_s8 + $0x10] sm:$0xff] %v1341_v46  }
 0x160   : > { %v1600_v49 = vpop.eup %1599  ;;  %v1091_v52 = vmul.f32 %v1598_v39, %v1035_v37 }
 0x161   : > { %v1095_v53 = vmul.f32 %v1600_v49, %v1039_v41  ;;  %v1602_v56 = vpop.eup %1601 }
 0x162   : > { %v1604_v58 = vpop.eup %1603  ;;  %v1092_v59 = vmul.f32 %v1602_v56, %v1036_v57 }
 0x163   : > { %v1096_v54 = vmul.f32 %v1604_v58, %v1040_v43 }
 0x164   : > { %v1336_v60 = vpack.c.bf16 %v1092_v59, %v1091_v52 }
 0x165   : > { %v1346_v61 = vpack.c.bf16 %v1096_v54, %v1095_v53 }
 0x166   : > { %1348 = vst [vmem:[%s175_s8 + $0x8] sm:$0xff] %v1336_v60  }
 0x167   : > { %1350 = vst [vmem:[%s175_s8 + $0x18] sm:$0xff] %v1346_v61  }
 0x168 PF: > { %s13_s12 = sadd.s32 1, %s1611_s12  }
 0x169   : > { %p10_p4 = scmp.ge.s32.totalorder %s13_s12, 4  }
 0x16b   :  { %12 = sbr.rel (!%p10_p4) target bundleno = 1 (0x1), region = 62 }

// kernel: _lambda_.39
= control target key start
LH: loop header
LB: loop body
LE: loop exit
PB: predicated region body
PF: predicated region fallthrough
CT: control target
= control target key end

     0   :  { %s1675_s12 = smov 0   ;;  %s2111_s0 = inlined_call_operand.vmem [shape: bf16[32,1024], index: 0, kind: input, shape index: {}]   ;;  %s2112_s1 = inlined_call_operand.vmem [shape: bf16[1024,256], index: 1, kind: input, shape index: {}]   ;;  %s2113_s2 = inlined_call_operand.vmem [shape: f32[1,256], index: 2, kind: input, shape index: {}]   ;;  %s2114_s3 = inlined_call_operand.vmem [shape: bf16[32,128], index: 3, kind: output, shape index: {}]  }
   0x1 LB: > { %s1263_s13 = sadd.s32 4294967295, %s1653_s12   ;;  %p1267_p0 = scmp.ge.s32.totalorder %s1653_s12, 1  ;;  %s1653_s12 = sphi %s1675_s12, %s13_s12  }
   0x2   : > { %p139_p1 = scmp.lt.s32.totalorder %s1653_s12, 3 }
   0x4   : > { %p140_p2 = pnand %p1267_p0, %p139_p1 }
   0x5   : > { %v1447_v0 = vld [vmem:[%s2112_s1 + $0x4] ss:$8 sps:$4 sm:$0xff] (!%p140_p2)   ;;  %v1451_v2 = vld [vmem:[%s2112_s1] ss:$8 sps:$4 sm:$0xff] (!%p140_p2)   ;;  %v1453_v4 = vld [vmem:[%s2112_s1 + $0x14] ss:$8 sps:$4 sm:$0xff] (!%p140_p2)  }
   0x6   : > { %143 = sbr.rel (%p140_p2) target bundleno = 384 (0x180), region = 32  ;;  %v1449_v1 = vld [vmem:[%s2112_s1 + $0x204] ss:$8 sps:$4 sm:$0xff] (!%p140_p2)   ;;  %1005 = vmatprep.subr.bf16.mxu1 (!%p140_p2), %v1447_v0  ;;  %v1452_v3 = vld [vmem:[%s2112_s1 + $0x200] ss:$8 sps:$4 sm:$0xff] (!%p140_p2)   ;;  %s1268_s24 = sshll.u32 (!%p140_p2), %s1263_s13, 1 }
   0x7   : > { %1091 = vmatprep.subr.bf16.mxu0 (!%p140_p2), %v1449_v1  ;;  %1006 = vmatpush1.bf16.msra.mxu1 (!%p140_p2), %v1451_v2  ;;  %v1455_v5 = vld [vmem:[%s2112_s1 + $0x214] ss:$8 sps:$4 sm:$0xff] (!%p140_p2)   ;;  %v1457_v6 = vld [vmem:[%s2112_s1 + $0x10] ss:$8 sps:$4 sm:$0xff] (!%p140_p2)   ;;  %v1459_v8 = vld [vmem:[%s2112_s1 + $0x24] ss:$8 sps:$4 sm:$0xff] (!%p140_p2)  }
   0x8   : > { %1092 = vmatpush1.bf16.msra.mxu0 (!%p140_p2), %v1452_v3  ;;  %1007 = vmatprep.subr.bf16.mxu1 (!%p140_p2), %v1453_v4  ;;  %v1458_v7 = vld [vmem:[%s2112_s1 + $0x210] ss:$8 sps:$4 sm:$0xff] (!%p140_p2)   ;;  %v1461_v9 = vld [vmem:[%s2112_s1 + $0x224] ss:$8 sps:$4 sm:$0xff] (!%p140_p2)   ;;  %v1463_v10 = vld [vmem:[%s2112_s1 + $0x20] ss:$8 sps:$4 sm:$0xff] (!%p140_p2)  }
   0x9   : > { %1093 = vmatprep.subr.bf16.mxu0 (!%p140_p2), %v1455_v5  ;;  %v1464_v11 = vld [vmem:[%s2112_s1 + $0x220] ss:$8 sps:$4 sm:$0xff] (!%p140_p2)   ;;  %v1465_v12 = vld [vmem:[%s2112_s1 + $0x34] ss:$8 sps:$4 sm:$0xff] (!%p140_p2)   ;;  %v1469_v14 = vld [vmem:[%s2112_s1 + $0x30] ss:$8 sps:$4 sm:$0xff] (!%p140_p2)  }
   0xa   : > { %v1467_v13 = vld [vmem:[%s2112_s1 + $0x234] ss:$8 sps:$4 sm:$0xff] (!%p140_p2)   ;;  %v1470_v15 = vld [vmem:[%s2112_s1 + $0x230] ss:$8 sps:$4 sm:$0xff] (!%p140_p2)   ;;  %v1471_v16 = vld [vmem:[%s2112_s1 + $0x44] ss:$8 sps:$4 sm:$0xff] (!%p140_p2)  }
   0xb   : > { %1008 = vmatpush1.bf16.msra.mxu1 (!%p140_p2), %v1457_v6  ;;  %v1473_v17 = vld [vmem:[%s2112_s1 + $0x244] ss:$8 sps:$4 sm:$0xff] (!%p140_p2)   ;;  %v1475_v18 = vld [vmem:[%s2112_s1 + $0x40] ss:$8 sps:$4 sm:$0xff] (!%p140_p2)   ;;  %v1477_v20 = vld [vmem:[%s2112_s1 + $0x54] ss:$8 sps:$4 sm:$0xff] (!%p140_p2)  }
   0xc   : > { %1094 = vmatpush1.bf16.msra.mxu0 (!%p140_p2), %v1458_v7  ;;  %1009 = vmatprep.subr.bf16.mxu1 (!%p140_p2), %v1459_v8  ;;  %v1476_v19 = vld [vmem:[%s2112_s1 + $0x240] ss:$8 sps:$4 sm:$0xff] (!%p140_p2)   ;;  %v1479_v21 = vld [vmem:[%s2112_s1 + $0x254] ss:$8 sps:$4 sm:$0xff] (!%p140_p2)   ;;  %v1481_v22 = vld [vmem:[%s2112_s1 + $0x50] ss:$8 sps:$4 sm:$0xff] (!%p140_p2)  }
   0xd   : > { %1095 = vmatprep.subr.bf16.mxu0 %v1461_v9  ;;  %v1482_v23 = vld [vmem:[%s2112_s1 + $0x250] ss:$8 sps:$4 sm:$0xff]   ;;  %v1483_v24 = vld [vmem:[%s2112_s1 + $0x64] ss:$8 sps:$4 sm:$0xff]   ;;  %v1487_v26 = vld [vmem:[%s2112_s1 + $0x60] ss:$8 sps:$4 sm:$0xff]  }
   0xe   : > { %v1485_v25 = vld [vmem:[%s2112_s1 + $0x264] ss:$8 sps:$4 sm:$0xff]   ;;  %v1488_v27 = vld [vmem:[%s2112_s1 + $0x260] ss:$8 sps:$4 sm:$0xff]   ;;  %v1489_v28 = vld [vmem:[%s2112_s1 + $0x74] ss:$8 sps:$4 sm:$0xff]  }
   0xf   : > { %1010 = vmatpush1.bf16.msra.mxu1 %v1463_v10  ;;  %v1491_v29 = vld [vmem:[%s2112_s1 + $0x274] ss:$8 sps:$4 sm:$0xff]   ;;  %v1493_v30 = vld [vmem:[%s2112_s1 + $0x70] ss:$8 sps:$4 sm:$0xff]   ;;  %v1495_v32 = vld [vmem:[%s2112_s1 + $0x84] ss:$8 sps:$4 sm:$0xff]  }
  0x10   : > { %1096 = vmatpush1.bf16.msra.mxu0 %v1464_v11  ;;  %1011 = vmatprep.subr.bf16.mxu1 %v1465_v12  ;;  %v1494_v31 = vld [vmem:[%s2112_s1 + $0x270] ss:$8 sps:$4 sm:$0xff]   ;;  %p165_p3 = scmp.lt.s32.totalorder %s1268_s24, 3  ;;  %v1497_v33 = vld [vmem:[%s2112_s1 + $0x284] ss:$8 sps:$4 sm:$0xff]  }
  0x11   : > { %1097 = vmatprep.subr.bf16.mxu0 %v1467_v13  ;;  %v1499_v34 = vld [vmem:[%s2112_s1 + $0x80] ss:$8 sps:$4 sm:$0xff]   ;;  %v1501_v36 = vld [vmem:[%s2112_s1 + $0x94] ss:$8 sps:$4 sm:$0xff]   ;;  %v1505_v38 = vld [vmem:[%s2112_s1 + $0x90] ss:$8 sps:$4 sm:$0xff]  }
  0x12   : > { %v1500_v35 = vld [vmem:[%s2112_s1 + $0x280] ss:$8 sps:$4 sm:$0xff]   ;;  %s2116_s24 = smov (!%p165_p3, %s1268_s24), 3  ;;  %v1503_v37 = vld [vmem:[%s2112_s1 + $0x294] ss:$8 sps:$4 sm:$0xff]  }
  0x13   : > { %1012 = vmatpush1.bf16.msra.mxu1 %v1469_v14  ;;  %v1506_v39 = vld [vmem:[%s2112_s1 + $0x290] ss:$8 sps:$4 sm:$0xff]   ;;  %v1507_v40 = vld [vmem:[%s2112_s1 + $0xa4] ss:$8 sps:$4 sm:$0xff]   ;;  %s1415_s21 = sshll.u32 %s2116_s24, 5  ;;  %s1272_s30 = sshll.u32 %s2116_s24, 2 }
  0x14   : > { %1098 = vmatpush1.bf16.msra.mxu0 %v1470_v15  ;;  %1013 = vmatprep.subr.bf16.mxu1 %v1471_v16  ;;  %v1509_v41 = vld [vmem:[%s2112_s1 + $0x2a4] ss:$8 sps:$4 sm:$0xff]   ;;  %v1511_v42 = vld [vmem:[%s2112_s1 + $0xa0] ss:$8 sps:$4 sm:$0xff]   ;;  %s1823_s4 = scalar_lea.vmem %s2111_s0, %s1415_s21  ;;  %v1513_v44 = vld [vmem:[%s2112_s1 + $0xb4] ss:$8 sps:$4 sm:$0xff]  }
  0x15   : > { %1099 = vmatprep.subr.bf16.mxu0 %v1473_v17  ;;  %v1512_v43 = vld [vmem:[%s2112_s1 + $0x2a0] ss:$8 sps:$4 sm:$0xff]   ;;  %v1515_v45 = vld [vmem:[%s2112_s1 + $0x2b4] ss:$8 sps:$4 sm:$0xff]   ;;  %v1517_v46 = vld [vmem:[%s2112_s1 + $0xb0] ss:$8 sps:$4 sm:$0xff]  }
  0x16   : > { %v1518_v47 = vld [vmem:[%s2112_s1 + $0x2b0] ss:$8 sps:$4 sm:$0xff]   ;;  %v177_v48 = vld [vmem:[%s1823_s4] sm:$0xff]  ;;  %v1525_v58 = vld [vmem:[%s2112_s1 + $0xd4] ss:$8 sps:$4 sm:$0xff]  }
  0x17   : > { %1014 = vmatpush1.bf16.msra.mxu1 %v1475_v18  ;;  %v181_v49 = vld [vmem:[%s1823_s4 + $0x20] sm:$0xff]  ;;  %v179_v53 = vld [vmem:[%s1823_s4 + $0x10] sm:$0xff] }
  0x18   : > { %1100 = vmatpush1.bf16.msra.mxu0 %v1476_v19  ;;  %1015 = vmatprep.subr.bf16.mxu1 %v1477_v20  ;;  %v1519_v50 = vld [vmem:[%s2112_s1 + $0xc4] ss:$8 sps:$4 sm:$0xff]   ;;  %v1274_v52 = vcombine.high %v177_v48, %v181_v49  ;;  %v183_v54 = vld [vmem:[%s1823_s4 + $0x30] sm:$0xff]  ;;  %v1523_v56 = vld [vmem:[%s2112_s1 + $0xc0] ss:$8 sps:$4 sm:$0xff]   ;;  %v1273_v8 = vcombine.low %v177_v48, %v181_v49 }
  0x19   : > { %1101 = vmatprep.subr.bf16.mxu0 %v1479_v21  ;;  %v1521_v51 = vld [vmem:[%s2112_s1 + $0x2c4] ss:$8 sps:$4 sm:$0xff]   ;;  %v1278_v55 = vcombine.high %v179_v53, %v183_v54  ;;  %v1524_v57 = vld [vmem:[%s2112_s1 + $0x2c0] ss:$8 sps:$4 sm:$0xff]   ;;  %v1527_v59 = vld [vmem:[%s2112_s1 + $0x2d4] ss:$8 sps:$4 sm:$0xff]   ;;  %v1277_v10 = vcombine.low %v179_v53, %v183_v54 }
  0x1a   : > { %1037 = vmatprep.mubr.bf16.mxu1 %v1274_v52  ;;  %v1529_v60 = vld [vmem:[%s2112_s1 + $0xd0] ss:$8 sps:$4 sm:$0xff]   ;;  %v1531_v62 = vld [vmem:[%s2112_s1 + $0xe4] ss:$8 sps:$4 sm:$0xff]   ;;  %v1535_v0 = vld [vmem:[%s2112_s1 + $0xe0] ss:$8 sps:$4 sm:$0xff]  }
  0x1b   : > { %1016 = vmatpush1.bf16.msra.mxu1 %v1481_v22  ;;  %1123 = vmatprep.mubr.bf16.mxu0 %v1278_v55  ;;  %v1530_v61 = vld [vmem:[%s2112_s1 + $0x2d0] ss:$8 sps:$4 sm:$0xff]   ;;  %v1533_v63 = vld [vmem:[%s2112_s1 + $0x2e4] ss:$8 sps:$4 sm:$0xff]   ;;  %v1536_v1 = vld [vmem:[%s2112_s1 + $0x2e0] ss:$8 sps:$4 sm:$0xff]  }
  0x1c   : > { %1102 = vmatpush1.bf16.msra.mxu0 %v1482_v23  ;;  %1017 = vmatprep.subr.bf16.mxu1 %v1483_v24  ;;  %v1537_v2 = vld [vmem:[%s2112_s1 + $0xf4] ss:$8 sps:$4 sm:$0xff]   ;;  %v1541_v4 = vld [vmem:[%s2112_s1 + $0xf0] ss:$8 sps:$4 sm:$0xff]   ;;  %v1545_v6 = vld [vmem:[%s2112_s1 + $0x104] ss:$8 sps:$4 sm:$0xff]  }
  0x1d   : > { %1103 = vmatprep.subr.bf16.mxu0 %v1485_v25  ;;  %v1539_v3 = vld [vmem:[%s2112_s1 + $0x2f4] ss:$8 sps:$4 sm:$0xff]   ;;  %v1542_v5 = vld [vmem:[%s2112_s1 + $0x2f0] ss:$8 sps:$4 sm:$0xff]   ;;  %v1548_v7 = vld [vmem:[%s2112_s1 + $0x304] ss:$8 sps:$4 sm:$0xff]  }
  0x1e   : > { %v1543_v9 = vld [vmem:[%s2112_s1 + $0x100] ss:$8 sps:$4 sm:$0xff]   ;;  %v1551_v12 = vld [vmem:[%s2112_s1 + $0x114] ss:$8 sps:$4 sm:$0xff]   ;;  %v1549_v14 = vld [vmem:[%s2112_s1 + $0x110] ss:$8 sps:$4 sm:$0xff]  }
  0x1f   : > { %1018 = vmatpush1.bf16.msra.mxu1 %v1487_v26  ;;  %v1546_v11 = vld [vmem:[%s2112_s1 + $0x300] ss:$8 sps:$4 sm:$0xff]   ;;  %v1554_v13 = vld [vmem:[%s2112_s1 + $0x314] ss:$8 sps:$4 sm:$0xff]   ;;  %v1552_v15 = vld [vmem:[%s2112_s1 + $0x310] ss:$8 sps:$4 sm:$0xff]  }
  0x20   : > { %1104 = vmatpush1.bf16.msra.mxu0 %v1488_v27  ;;  %1019 = vmatprep.subr.bf16.mxu1 %v1489_v28  ;;  %v1557_v16 = vld [vmem:[%s2112_s1 + $0x124] ss:$8 sps:$4 sm:$0xff]   ;;  %v1555_v18 = vld [vmem:[%s2112_s1 + $0x120] ss:$8 sps:$4 sm:$0xff]   ;;  %v1563_v20 = vld [vmem:[%s2112_s1 + $0x134] ss:$8 sps:$4 sm:$0xff]  }
  0x21   : > { %1105 = vmatprep.subr.bf16.mxu0 %v1491_v29  ;;  %v1560_v17 = vld [vmem:[%s2112_s1 + $0x324] ss:$8 sps:$4 sm:$0xff]   ;;  %v1558_v19 = vld [vmem:[%s2112_s1 + $0x320] ss:$8 sps:$4 sm:$0xff]   ;;  %v1566_v21 = vld [vmem:[%s2112_s1 + $0x334] ss:$8 sps:$4 sm:$0xff]  }
  0x22   : > { %v1561_v22 = vld [vmem:[%s2112_s1 + $0x130] ss:$8 sps:$4 sm:$0xff]   ;;  %v1569_v24 = vld [vmem:[%s2112_s1 + $0x144] ss:$8 sps:$4 sm:$0xff]   ;;  %v1567_v26 = vld [vmem:[%s2112_s1 + $0x140] ss:$8 sps:$4 sm:$0xff]  }
  0x23   : > { %1020 = vmatpush1.bf16.msra.mxu1 %v1493_v30  ;;  %v1564_v23 = vld [vmem:[%s2112_s1 + $0x330] ss:$8 sps:$4 sm:$0xff]   ;;  %v1572_v25 = vld [vmem:[%s2112_s1 + $0x344] ss:$8 sps:$4 sm:$0xff]   ;;  %v1570_v27 = vld [vmem:[%s2112_s1 + $0x340] ss:$8 sps:$4 sm:$0xff]  }
  0x24   : > { %1106 = vmatpush1.bf16.msra.mxu0 %v1494_v31  ;;  %1021 = vmatprep.subr.bf16.mxu1 %v1495_v32  ;;  %v1575_v28 = vld [vmem:[%s2112_s1 + $0x154] ss:$8 sps:$4 sm:$0xff]   ;;  %v1573_v30 = vld [vmem:[%s2112_s1 + $0x150] ss:$8 sps:$4 sm:$0xff]   ;;  %v1581_v32 = vld [vmem:[%s2112_s1 + $0x164] ss:$8 sps:$4 sm:$0xff]  }
  0x25   : > { %1107 = vmatprep.subr.bf16.mxu0 %v1497_v33  ;;  %v1578_v29 = vld [vmem:[%s2112_s1 + $0x354] ss:$8 sps:$4 sm:$0xff]   ;;  %v1576_v31 = vld [vmem:[%s2112_s1 + $0x350] ss:$8 sps:$4 sm:$0xff]   ;;  %v1584_v33 = vld [vmem:[%s2112_s1 + $0x364] ss:$8 sps:$4 sm:$0xff]  }
  0x26   : > { %v1591_v48 = vld [vmem:[%s2112_s1 + $0x180] ss:$8 sps:$4 sm:$0xff]   ;;  %v1597_v52 = vld [vmem:[%s2112_s1 + $0x190] ss:$8 sps:$4 sm:$0xff]   ;;  %v1605_v54 = vld [vmem:[%s2112_s1 + $0x1a4] ss:$8 sps:$4 sm:$0xff]  }
  0x27   : > { %1022 = vmatpush1.bf16.msra.mxu1 %v1499_v34  ;;  %v1968_v34 = vld [vmem:[%s1823_s4 + $0x8] sm:$0xff]  ;;  %v1600_v53 = vld [vmem:[%s2112_s1 + $0x390] ss:$8 sps:$4 sm:$0xff]  }
  0x28   : > { %1108 = vmatpush1.bf16.msra.mxu0 %v1500_v35  ;;  %1023 = vmatprep.subr.bf16.mxu1 %v1501_v36  ;;  %v1971_v35 = vld [vmem:[%s1823_s4 + $0x28] sm:$0xff]  ;;  %v1974_v36 = vld [vmem:[%s1823_s4 + $0x18] sm:$0xff] }
  0x29   : > { %1109 = vmatprep.subr.bf16.mxu0 %v1503_v37  ;;  %v1977_v37 = vld [vmem:[%s1823_s4 + $0x38] sm:$0xff]  ;;  %v1594_v49 = vld [vmem:[%s2112_s1 + $0x380] ss:$8 sps:$4 sm:$0xff]   ;;  %v1608_v55 = vld [vmem:[%s2112_s1 + $0x3a4] ss:$8 sps:$4 sm:$0xff]   ;;  %s175_s4 = scalar_lea.vmem %s2114_s3, %s1272_s30 }
  0x2b   : > { %1024 = vmatpush1.bf16.msra.mxu1 %v1505_v38  ;;  %v1579_v38 = vld [vmem:[%s2112_s1 + $0x160] ss:$8 sps:$4 sm:$0xff]  }
  0x2c   : > { %1110 = vmatpush1.bf16.msra.mxu0 %v1506_v39  ;;  %1025 = vmatprep.subr.bf16.mxu1 %v1507_v40  ;;  %v1582_v39 = vld [vmem:[%s2112_s1 + $0x360] ss:$8 sps:$4 sm:$0xff]   ;;  %v1276_v40 = vcombine.high %v1968_v34, %v1971_v35 }
  0x2d   : > { %1111 = vmatprep.subr.bf16.mxu0 %v1509_v41  ;;  %v1587_v41 = vld [vmem:[%s2112_s1 + $0x174] ss:$8 sps:$4 sm:$0xff]  }
  0x2f   : > { %1026 = vmatpush1.bf16.msra.mxu1 %v1511_v42  ;;  %v1590_v42 = vld [vmem:[%s2112_s1 + $0x374] ss:$8 sps:$4 sm:$0xff]  }
  0x30   : > { %1112 = vmatpush1.bf16.msra.mxu0 %v1512_v43  ;;  %1027 = vmatprep.subr.bf16.mxu1 %v1513_v44  ;;  %v1280_v43 = vcombine.high %v1974_v36, %v1977_v37  ;;  %v1585_v44 = vld [vmem:[%s2112_s1 + $0x170] ss:$8 sps:$4 sm:$0xff]  }
  0x31   : > { %1113 = vmatprep.subr.bf16.mxu0 %v1515_v45  ;;  %v1588_v45 = vld [vmem:[%s2112_s1 + $0x370] ss:$8 sps:$4 sm:$0xff]  }
  0x33   : > { %1028 = vmatpush1.bf16.msra.mxu1 %v1517_v46  ;;  %v1593_v46 = vld [vmem:[%s2112_s1 + $0x184] ss:$8 sps:$4 sm:$0xff]  }
  0x34   : > { %1114 = vmatpush1.bf16.msra.mxu0 %v1518_v47  ;;  %1029 = vmatprep.subr.bf16.mxu1 %v1519_v50  ;;  %v1596_v47 = vld [vmem:[%s2112_s1 + $0x384] ss:$8 sps:$4 sm:$0xff]   ;;  %v1599_v50 = vld [vmem:[%s2112_s1 + $0x194] ss:$8 sps:$4 sm:$0xff]  }
  0x35   : > { %1115 = vmatprep.subr.bf16.mxu0 %v1521_v51  ;;  %v1602_v51 = vld [vmem:[%s2112_s1 + $0x394] ss:$8 sps:$4 sm:$0xff]  }
  0x37   : > { %1030 = vmatpush1.bf16.msra.mxu1 %v1523_v56  ;;  %v1603_v56 = vld [vmem:[%s2112_s1 + $0x1a0] ss:$8 sps:$4 sm:$0xff]  }
  0x38   : > { %1116 = vmatpush1.bf16.msra.mxu0 %v1524_v57  ;;  %1031 = vmatprep.subr.bf16.mxu1 %v1525_v58  ;;  %v1606_v57 = vld [vmem:[%s2112_s1 + $0x3a0] ss:$8 sps:$4 sm:$0xff]   ;;  %v1611_v58 = vld [vmem:[%s2112_s1 + $0x1b4] ss:$8 sps:$4 sm:$0xff]  }
  0x39   : > { %1117 = vmatprep.subr.bf16.mxu0 %v1527_v59  ;;  %v1614_v59 = vld [vmem:[%s2112_s1 + $0x3b4] ss:$8 sps:$4 sm:$0xff]  }
  0x3b   : > { %1032 = vmatpush1.bf16.msra.mxu1 %v1529_v60  ;;  %v1609_v60 = vld [vmem:[%s2112_s1 + $0x1b0] ss:$8 sps:$4 sm:$0xff]  }
  0x3c   : > { %1118 = vmatpush1.bf16.msra.mxu0 %v1530_v61  ;;  %1033 = vmatprep.subr.bf16.mxu1 %v1531_v62  ;;  %v1612_v61 = vld [vmem:[%s2112_s1 + $0x3b0] ss:$8 sps:$4 sm:$0xff]   ;;  %v1617_v62 = vld [vmem:[%s2112_s1 + $0x1c4] ss:$8 sps:$4 sm:$0xff]  }
  0x3d   : > { %1119 = vmatprep.subr.bf16.mxu0 %v1533_v63  ;;  %v1620_v63 = vld [vmem:[%s2112_s1 + $0x3c4] ss:$8 sps:$4 sm:$0xff]  }
  0x3f   : > { %1034 = vmatpush1.bf16.msra.mxu1 %v1535_v0  ;;  %v1615_v0 = vld [vmem:[%s2112_s1 + $0x1c0] ss:$8 sps:$4 sm:$0xff]  }
  0x40   : > { %1120 = vmatpush1.bf16.msra.mxu0 %v1536_v1  ;;  %1035 = vmatprep.subr.bf16.mxu1 %v1537_v2  ;;  %v1618_v1 = vld [vmem:[%s2112_s1 + $0x3c0] ss:$8 sps:$4 sm:$0xff]   ;;  %v1623_v2 = vld [vmem:[%s2112_s1 + $0x1d4] ss:$8 sps:$4 sm:$0xff]  }
  0x41   : > { %1121 = vmatprep.subr.bf16.mxu0 %v1539_v3  ;;  %v1626_v3 = vld [vmem:[%s2112_s1 + $0x3d4] ss:$8 sps:$4 sm:$0xff]  }
  0x43   : > { %1036 = vmatpush1.bf16.msra.mxu1 %v1541_v4  ;;  %v1621_v4 = vld [vmem:[%s2112_s1 + $0x1d0] ss:$8 sps:$4 sm:$0xff]  }
  0x44   : > { %1122 = vmatpush1.bf16.msra.mxu0 %v1542_v5  ;;  %1048 = vmatprep.subr.bf16.mxu1 %v1545_v6  ;;  %v1624_v5 = vld [vmem:[%s2112_s1 + $0x3d0] ss:$8 sps:$4 sm:$0xff]   ;;  %v1629_v6 = vld [vmem:[%s2112_s1 + $0x1e4] ss:$8 sps:$4 sm:$0xff]  }
  0x45   : > { %1134 = vmatprep.subr.bf16.mxu0 %v1548_v7  ;;  %v1632_v7 = vld [vmem:[%s2112_s1 + $0x3e4] ss:$8 sps:$4 sm:$0xff]  }
  0x46   : > { %1038 = vmatmul.mubr.bf16.vlgmr.msra.gmra.mrb[0].mxu1 %v1273_v8  ;;  %v1627_v8 = vld [vmem:[%s2112_s1 + $0x1e0] ss:$8 sps:$4 sm:$0xff]  }
  0x47   : > { %1124 = vmatmul.mubr.bf16.vlgmr.msra.gmra.mrb[0].mxu0 %v1277_v10  ;;  %1049 = vmatpush1.bf16.msra.mxu1 %v1543_v9  ;;  %v1630_v9 = vld [vmem:[%s2112_s1 + $0x3e0] ss:$8 sps:$4 sm:$0xff]   ;;  %v1635_v10 = vld [vmem:[%s2112_s1 + $0x1f4] ss:$8 sps:$4 sm:$0xff]  }
  0x48   : > { %1135 = vmatpush1.bf16.msra.mxu0 %v1546_v11  ;;  %1050 = vmatprep.subr.bf16.mxu1 %v1551_v12  ;;  %v1638_v11 = vld [vmem:[%s2112_s1 + $0x3f4] ss:$8 sps:$4 sm:$0xff]   ;;  %v1633_v12 = vld [vmem:[%s2112_s1 + $0x1f0] ss:$8 sps:$4 sm:$0xff]  }
  0x49   : > { %1136 = vmatprep.subr.bf16.mxu0 %v1554_v13  ;;  %1080 = vmatprep.mubr.bf16.mxu1 %v1276_v40  ;;  %v1636_v13 = vld [vmem:[%s2112_s1 + $0x3f0] ss:$8 sps:$4 sm:$0xff]  }
  0x4a   : > { %1166 = vmatprep.mubr.bf16.mxu0 %v1280_v43 }
  0x4b   : > { %1051 = vmatpush1.bf16.msra.mxu1 %v1549_v14  ;;  %v1275_v14 = vcombine.low %v1968_v34, %v1971_v35 }
  0x4c   : > { %1137 = vmatpush1.bf16.msra.mxu0 %v1552_v15  ;;  %1052 = vmatprep.subr.bf16.mxu1 %v1557_v16  ;;  %v1279_v15 = vcombine.low %v1974_v36, %v1977_v37  ;;  %v315_v16 = vlaneseq }
  0x4d   : > { %1138 = vmatprep.subr.bf16.mxu0 %v1560_v17 }
  0x4e   : > { %v316_v17 = vshrl.u32 %v315_v16, 7 }
  0x4f   : > { %1053 = vmatpush1.bf16.msra.mxu1 %v1555_v18 }
  0x50   : > { %1139 = vmatpush1.bf16.msra.mxu0 %v1558_v19  ;;  %1054 = vmatprep.subr.bf16.mxu1 %v1563_v20  ;;  %v317_v18 = vsub.s32 0, %v316_v17  ;;  %v313_v19 = vld [vmem:[%s2113_s2] sm:$0x3]  ;;  %v321_v20 = vsub.s32 1, %v316_v17 }
  0x51   : > { %1140 = vmatprep.subr.bf16.mxu0 %v1566_v21 }
  0x52   : > { %v318_v21 = vrot.slane %v313_v19, %v317_v18 }
  0x53   : > { %1055 = vmatpush1.bf16.msra.mxu1 %v1561_v22  ;;  %v322_v22 = vrot.slane %v313_v19, %v321_v20 }
  0x54   : > { %1141 = vmatpush1.bf16.msra.mxu0 %v1564_v23  ;;  %1056 = vmatprep.subr.bf16.mxu1 %v1569_v24 }
  0x55   : > { %1142 = vmatprep.subr.bf16.mxu0 %v1572_v25 }
  0x57   : > { %1057 = vmatpush1.bf16.msra.mxu1 %v1567_v26 }
  0x58   : > { %1143 = vmatpush1.bf16.msra.mxu0 %v1570_v27  ;;  %1058 = vmatprep.subr.bf16.mxu1 %v1575_v28 }
  0x59   : > { %1144 = vmatprep.subr.bf16.mxu0 %v1578_v29 }
  0x5b   : > { %1059 = vmatpush1.bf16.msra.mxu1 %v1573_v30 }
  0x5c   : > { %1145 = vmatpush1.bf16.msra.mxu0 %v1576_v31  ;;  %1060 = vmatprep.subr.bf16.mxu1 %v1581_v32 }
  0x5d   : > { %1146 = vmatprep.subr.bf16.mxu0 %v1584_v33 }
  0x5f   : > { %1061 = vmatpush1.bf16.msra.mxu1 %v1579_v38 }
  0x60   : > { %1147 = vmatpush1.bf16.msra.mxu0 %v1582_v39  ;;  %1062 = vmatprep.subr.bf16.mxu1 %v1587_v41 }
  0x61   : > { %1148 = vmatprep.subr.bf16.mxu0 %v1590_v42 }
  0x63   : > { %1063 = vmatpush1.bf16.msra.mxu1 %v1585_v44 }
  0x64   : > { %1149 = vmatpush1.bf16.msra.mxu0 %v1588_v45  ;;  %1064 = vmatprep.subr.bf16.mxu1 %v1593_v46 }
  0x65   : > { %1150 = vmatprep.subr.bf16.mxu0 %v1596_v47 }
  0x67   : > { %1065 = vmatpush1.bf16.msra.mxu1 %v1591_v48 }
  0x68   : > { %1151 = vmatpush1.bf16.msra.mxu0 %v1594_v49  ;;  %1066 = vmatprep.subr.bf16.mxu1 %v1599_v50 }
  0x69   : > { %1152 = vmatprep.subr.bf16.mxu0 %v1602_v51 }
  0x6b   : > { %1067 = vmatpush1.bf16.msra.mxu1 %v1597_v52 }
  0x6c   : > { %1153 = vmatpush1.bf16.msra.mxu0 %v1600_v53  ;;  %1068 = vmatprep.subr.bf16.mxu1 %v1605_v54 }
  0x6d   : > { %1154 = vmatprep.subr.bf16.mxu0 %v1608_v55 }
  0x6f   : > { %1069 = vmatpush1.bf16.msra.mxu1 %v1603_v56 }
  0x70   : > { %1155 = vmatpush1.bf16.msra.mxu0 %v1606_v57  ;;  %1070 = vmatprep.subr.bf16.mxu1 %v1611_v58 }
  0x71   : > { %1156 = vmatprep.subr.bf16.mxu0 %v1614_v59 }
  0x73   : > { %1071 = vmatpush1.bf16.msra.mxu1 %v1609_v60 }
  0x74   : > { %1157 = vmatpush1.bf16.msra.mxu0 %v1612_v61  ;;  %1072 = vmatprep.subr.bf16.mxu1 %v1617_v62 }
  0x75   : > { %1158 = vmatprep.subr.bf16.mxu0 %v1620_v63 }
  0x77   : > { %1073 = vmatpush1.bf16.msra.mxu1 %v1615_v0 }
  0x78   : > { %1159 = vmatpush1.bf16.msra.mxu0 %v1618_v1  ;;  %1074 = vmatprep.subr.bf16.mxu1 %v1623_v2 }
  0x79   : > { %1160 = vmatprep.subr.bf16.mxu0 %v1626_v3 }
  0x7b   : > { %1075 = vmatpush1.bf16.msra.mxu1 %v1621_v4 }
  0x7c   : > { %1161 = vmatpush1.bf16.msra.mxu0 %v1624_v5  ;;  %1076 = vmatprep.subr.bf16.mxu1 %v1629_v6 }
  0x7d   : > { %1162 = vmatprep.subr.bf16.mxu0 %v1632_v7 }
  0x7f   : > { %1077 = vmatpush1.bf16.msra.mxu1 %v1627_v8 }
  0x80   : > { %1163 = vmatpush1.bf16.msra.mxu0 %v1630_v9  ;;  %1078 = vmatprep.subr.bf16.mxu1 %v1635_v10 }
  0x81   : > { %1164 = vmatprep.subr.bf16.mxu0 %v1638_v11 }
  0x83   : > { %1079 = vmatpush1.bf16.msra.mxu1 %v1633_v12 }
  0x84   : > { %1165 = vmatpush1.bf16.msra.mxu0 %v1636_v13 }
  0x86   : > { %1081 = vmatmul.mubr.bf16.vlgmr.msra.gmra.mrb[0].mxu1 %v1275_v14 }
  0x87   : > { %1167 = vmatmul.mubr.bf16.vlgmr.msra.gmra.mrb[0].mxu0 %v1279_v15 }
 0x159   : > { %v1082_v23 = vpop.f32.mrb[0].mxu1 }
 0x15a   : > { %v1168_v24 = vpop.f32.mrb[0].mxu0  ;;  %v1423_v25 = vadd.f32 %v1082_v23, %v318_v21  ;;  %v1084_v26 = vpop.f32.mrb[1].mxu1 }
 0x15b   : > { %v1170_v27 = vpop.f32.mrb[1].mxu0  ;;  %v1425_v28 = vadd.f32 %v1084_v26, %v322_v22  ;;  %v1086_v29 = vpop.f32.mrb[2].mxu1 }
 0x15c   : > { %v1172_v30 = vpop.f32.mrb[2].mxu0  ;;  %v1424_v31 = vadd.f32 %v1423_v25, %v1168_v24  ;;  %v1427_v32 = vadd.f32 %v1086_v29, %v318_v21  ;;  %v1088_v33 = vpop.f32.mrb[3].mxu1 }
 0x15d   : > { %v1174_v34 = vpop.f32.mrb[3].mxu0  ;;  %v1426_v35 = vadd.f32 %v1425_v28, %v1170_v27  ;;  %v1429_v36 = vadd.f32 %v1088_v33, %v322_v22 }
 0x15e   : > { %v1428_v37 = vadd.f32 %v1427_v32, %v1172_v30  ;;  %v1179_v45 = vmul.f32 0.2, %v1424_v31  ;;  %vm1177_vm0 = vcmp.ge.f32.partialorder %v1424_v31, 0.0 }
 0x15f   : > { %v1409_v38 = vmul.f32 -1.442695, %v1426_v35  ;;  %v1430_v39 = vadd.f32 %v1429_v36, %v1174_v34 }
 0x160   : > { %v1180_v46 = vmul.f32 0.2, %v1428_v37  ;;  %vm1178_vm1 = vcmp.ge.f32.partialorder %v1428_v37, 0.0  ;;  %v1181_v48 = vsel %vm1177_vm0, %v1424_v31, %v1179_v45 }
 0x161   : > { %1639 = vpow2.f32 %v1409_v38  ;;  %v1410_v40 = vmul.f32 -1.442695, %v1430_v39 }
 0x162   : > { %v1182_v51 = vsel %vm1178_vm1, %v1428_v37, %v1180_v46 }
 0x163   : > { %1641 = vpow2.f32 %v1410_v40 }
 0x16b   : > { %v1640_v41 = vpop.eup %1639 }
 0x16c   : > { %v1189_v42 = vadd.f32 1.0, %v1640_v41 }
 0x16d   : > { %v1642_v43 = vpop.eup %1641 }
 0x16e   : > { %1643 = vrcp.f32 %v1189_v42  ;;  %v1190_v44 = vadd.f32 1.0, %v1642_v43 }
 0x170   : > { %1645 = vrcp.f32 %v1190_v44 }
 0x178   : > { %v1644_v47 = vpop.eup %1643 }
 0x179   : > { %v1195_v49 = vmul.f32 %v1644_v47, %v1181_v48 }
 0x17a   : > { %v1646_v50 = vpop.eup %1645 }
 0x17b   : > { %v1196_v52 = vmul.f32 %v1646_v50, %v1182_v51 }
 0x17d   : > { %v1421_v53 = vpack.c.bf16 %v1196_v52, %v1195_v49 }
 0x17f   : > { %1422 = vst [vmem:[%s175_s4] sm:$0xff] %v1421_v53  }
 0x180 PF: > { %s13_s12 = sadd.s32 1, %s1653_s12  }
 0x181   : > { %p10_p4 = scmp.ge.s32.totalorder %s13_s12, 4  }
 0x183   :  { %12 = sbr.rel (!%p10_p4) target bundleno = 1 (0x1), region = 62 }

// kernel: _lambda_.40
= control target key start
LH: loop header
LB: loop body
LE: loop exit
PB: predicated region body
PF: predicated region fallthrough
CT: control target
= control target key end

     0   :  { %s1882_s12 = smov 0   ;;  %s2351_s0 = inlined_call_operand.vmem [shape: bf16[32,1152], index: 0, kind: input, shape index: {}]   ;;  %s2352_s1 = inlined_call_operand.vmem [shape: bf16[1152,256], index: 1, kind: input, shape index: {}]   ;;  %s2353_s2 = inlined_call_operand.vmem [shape: f32[1,256], index: 2, kind: input, shape index: {}]   ;;  %s2354_s3 = inlined_call_operand.vmem [shape: bf16[32,128], index: 3, kind: output, shape index: {}]  }
   0x1 LB: > { %s1411_s13 = sadd.s32 4294967295, %s1859_s12   ;;  %p1415_p0 = scmp.ge.s32.totalorder %s1859_s12, 1  ;;  %s1859_s12 = sphi %s1882_s12, %s13_s12  }
   0x2   : > { %p139_p1 = scmp.lt.s32.totalorder %s1859_s12, 3 }
   0x4   : > { %p140_p2 = pnand %p1415_p0, %p139_p1 }
   0x5   : > { %v1616_v0 = vld [vmem:[%s2352_s1 + $0x4] ss:$8 sps:$4 sm:$0xff] (!%p140_p2)   ;;  %v1620_v2 = vld [vmem:[%s2352_s1] ss:$8 sps:$4 sm:$0xff] (!%p140_p2)   ;;  %v1622_v4 = vld [vmem:[%s2352_s1 + $0x14] ss:$8 sps:$4 sm:$0xff] (!%p140_p2)  }
   0x6   : > { %143 = sbr.rel (%p140_p2) target bundleno = 415 (0x19f), region = 32  ;;  %v1618_v1 = vld [vmem:[%s2352_s1 + $0x204] ss:$8 sps:$4 sm:$0xff] (!%p140_p2)   ;;  %1110 = vmatprep.subr.bf16.mxu1 (!%p140_p2), %v1616_v0  ;;  %v1621_v3 = vld [vmem:[%s2352_s1 + $0x200] ss:$8 sps:$4 sm:$0xff] (!%p140_p2)   ;;  %s1416_s24 = sshll.u32 (!%p140_p2), %s1411_s13, 1 }
   0x7   : > { %1196 = vmatprep.subr.bf16.mxu0 (!%p140_p2), %v1618_v1  ;;  %1111 = vmatpush1.bf16.msra.mxu1 (!%p140_p2), %v1620_v2  ;;  %v1624_v5 = vld [vmem:[%s2352_s1 + $0x214] ss:$8 sps:$4 sm:$0xff] (!%p140_p2)   ;;  %v1626_v6 = vld [vmem:[%s2352_s1 + $0x10] ss:$8 sps:$4 sm:$0xff] (!%p140_p2)   ;;  %v1628_v8 = vld [vmem:[%s2352_s1 + $0x24] ss:$8 sps:$4 sm:$0xff] (!%p140_p2)  }
   0x8   : > { %1197 = vmatpush1.bf16.msra.mxu0 (!%p140_p2), %v1621_v3  ;;  %1112 = vmatprep.subr.bf16.mxu1 (!%p140_p2), %v1622_v4  ;;  %v1627_v7 = vld [vmem:[%s2352_s1 + $0x210] ss:$8 sps:$4 sm:$0xff] (!%p140_p2)   ;;  %v1630_v9 = vld [vmem:[%s2352_s1 + $0x224] ss:$8 sps:$4 sm:$0xff] (!%p140_p2)   ;;  %v1632_v10 = vld [vmem:[%s2352_s1 + $0x20] ss:$8 sps:$4 sm:$0xff] (!%p140_p2)  }
   0x9   : > { %1198 = vmatprep.subr.bf16.mxu0 (!%p140_p2), %v1624_v5  ;;  %v1633_v11 = vld [vmem:[%s2352_s1 + $0x220] ss:$8 sps:$4 sm:$0xff] (!%p140_p2)   ;;  %v1634_v12 = vld [vmem:[%s2352_s1 + $0x34] ss:$8 sps:$4 sm:$0xff] (!%p140_p2)   ;;  %v1638_v14 = vld [vmem:[%s2352_s1 + $0x30] ss:$8 sps:$4 sm:$0xff] (!%p140_p2)  }
   0xa   : > { %v1636_v13 = vld [vmem:[%s2352_s1 + $0x234] ss:$8 sps:$4 sm:$0xff] (!%p140_p2)   ;;  %v1639_v15 = vld [vmem:[%s2352_s1 + $0x230] ss:$8 sps:$4 sm:$0xff] (!%p140_p2)   ;;  %v1640_v16 = vld [vmem:[%s2352_s1 + $0x44] ss:$8 sps:$4 sm:$0xff] (!%p140_p2)  }
   0xb   : > { %1113 = vmatpush1.bf16.msra.mxu1 (!%p140_p2), %v1626_v6  ;;  %v1642_v17 = vld [vmem:[%s2352_s1 + $0x244] ss:$8 sps:$4 sm:$0xff] (!%p140_p2)   ;;  %v1644_v18 = vld [vmem:[%s2352_s1 + $0x40] ss:$8 sps:$4 sm:$0xff] (!%p140_p2)   ;;  %v1646_v20 = vld [vmem:[%s2352_s1 + $0x54] ss:$8 sps:$4 sm:$0xff] (!%p140_p2)  }
   0xc   : > { %1199 = vmatpush1.bf16.msra.mxu0 (!%p140_p2), %v1627_v7  ;;  %1114 = vmatprep.subr.bf16.mxu1 (!%p140_p2), %v1628_v8  ;;  %v1645_v19 = vld [vmem:[%s2352_s1 + $0x240] ss:$8 sps:$4 sm:$0xff] (!%p140_p2)   ;;  %v1648_v21 = vld [vmem:[%s2352_s1 + $0x254] ss:$8 sps:$4 sm:$0xff] (!%p140_p2)   ;;  %v1650_v22 = vld [vmem:[%s2352_s1 + $0x50] ss:$8 sps:$4 sm:$0xff] (!%p140_p2)  }
   0xd   : > { %1200 = vmatprep.subr.bf16.mxu0 %v1630_v9  ;;  %v1651_v23 = vld [vmem:[%s2352_s1 + $0x250] ss:$8 sps:$4 sm:$0xff]   ;;  %v1652_v24 = vld [vmem:[%s2352_s1 + $0x64] ss:$8 sps:$4 sm:$0xff]   ;;  %v1656_v26 = vld [vmem:[%s2352_s1 + $0x60] ss:$8 sps:$4 sm:$0xff]  }
   0xe   : > { %v1654_v25 = vld [vmem:[%s2352_s1 + $0x264] ss:$8 sps:$4 sm:$0xff]   ;;  %v1657_v27 = vld [vmem:[%s2352_s1 + $0x260] ss:$8 sps:$4 sm:$0xff]   ;;  %v1658_v28 = vld [vmem:[%s2352_s1 + $0x74] ss:$8 sps:$4 sm:$0xff]  }
   0xf   : > { %1115 = vmatpush1.bf16.msra.mxu1 %v1632_v10  ;;  %v1660_v29 = vld [vmem:[%s2352_s1 + $0x274] ss:$8 sps:$4 sm:$0xff]   ;;  %v1662_v30 = vld [vmem:[%s2352_s1 + $0x70] ss:$8 sps:$4 sm:$0xff]   ;;  %v1664_v32 = vld [vmem:[%s2352_s1 + $0x84] ss:$8 sps:$4 sm:$0xff]  }
  0x10   : > { %1201 = vmatpush1.bf16.msra.mxu0 %v1633_v11  ;;  %1116 = vmatprep.subr.bf16.mxu1 %v1634_v12  ;;  %v1663_v31 = vld [vmem:[%s2352_s1 + $0x270] ss:$8 sps:$4 sm:$0xff]   ;;  %p165_p3 = scmp.lt.s32.totalorder %s1416_s24, 3  ;;  %v1666_v33 = vld [vmem:[%s2352_s1 + $0x284] ss:$8 sps:$4 sm:$0xff]  }
  0x11   : > { %1202 = vmatprep.subr.bf16.mxu0 %v1636_v13  ;;  %v1668_v34 = vld [vmem:[%s2352_s1 + $0x80] ss:$8 sps:$4 sm:$0xff]   ;;  %v1670_v36 = vld [vmem:[%s2352_s1 + $0x94] ss:$8 sps:$4 sm:$0xff]   ;;  %v1674_v38 = vld [vmem:[%s2352_s1 + $0x90] ss:$8 sps:$4 sm:$0xff]  }
  0x12   : > { %v1669_v35 = vld [vmem:[%s2352_s1 + $0x280] ss:$8 sps:$4 sm:$0xff]   ;;  %s2356_s24 = smov (!%p165_p3, %s1416_s24), 3  ;;  %v1672_v37 = vld [vmem:[%s2352_s1 + $0x294] ss:$8 sps:$4 sm:$0xff]  }
  0x13   : > { %1117 = vmatpush1.bf16.msra.mxu1 %v1638_v14  ;;  %v1675_v39 = vld [vmem:[%s2352_s1 + $0x290] ss:$8 sps:$4 sm:$0xff]   ;;  %v1676_v40 = vld [vmem:[%s2352_s1 + $0xa4] ss:$8 sps:$4 sm:$0xff]   ;;  %s1606_s21 = smul.u32 36, %s2356_s24 }
  0x14   : > { %1203 = vmatpush1.bf16.msra.mxu0 %v1639_v15  ;;  %1118 = vmatprep.subr.bf16.mxu1 %v1640_v16  ;;  %v1678_v41 = vld [vmem:[%s2352_s1 + $0x2a4] ss:$8 sps:$4 sm:$0xff]   ;;  %v1680_v42 = vld [vmem:[%s2352_s1 + $0xa0] ss:$8 sps:$4 sm:$0xff]   ;;  %v1682_v44 = vld [vmem:[%s2352_s1 + $0xb4] ss:$8 sps:$4 sm:$0xff]  }
  0x15   : > { %1204 = vmatprep.subr.bf16.mxu0 %v1642_v17  ;;  %v1681_v43 = vld [vmem:[%s2352_s1 + $0x2a0] ss:$8 sps:$4 sm:$0xff]   ;;  %s2033_s13 = scalar_lea.vmem %s2351_s0, %s1606_s21  ;;  %v1684_v45 = vld [vmem:[%s2352_s1 + $0x2b4] ss:$8 sps:$4 sm:$0xff]   ;;  %v1686_v46 = vld [vmem:[%s2352_s1 + $0xb0] ss:$8 sps:$4 sm:$0xff]  }
  0x16   : > { %v1687_v47 = vld [vmem:[%s2352_s1 + $0x2b0] ss:$8 sps:$4 sm:$0xff]   ;;  %v1714_v48 = vld [vmem:[%s2033_s13 + $0x4] ss:$36 sps:$4 sm:$0xff]   ;;  %v1694_v54 = vld [vmem:[%s2352_s1 + $0xd4] ss:$8 sps:$4 sm:$0xff]  }
  0x17   : > { %1119 = vmatpush1.bf16.msra.mxu1 %v1644_v18  ;;  %v1688_v49 = vld [vmem:[%s2352_s1 + $0xc4] ss:$8 sps:$4 sm:$0xff]   ;;  %1142 = vmatprep.mubr.bf16.mxu1 %v1714_v48  ;;  %v1720_v51 = vld [vmem:[%s2033_s13 + $0x14] ss:$36 sps:$4 sm:$0xff]   ;;  %v1692_v52 = vld [vmem:[%s2352_s1 + $0xc0] ss:$8 sps:$4 sm:$0xff]  }
  0x18   : > { %1205 = vmatpush1.bf16.msra.mxu0 %v1645_v19  ;;  %1120 = vmatprep.subr.bf16.mxu1 %v1646_v20  ;;  %v1690_v50 = vld [vmem:[%s2352_s1 + $0x2c4] ss:$8 sps:$4 sm:$0xff]   ;;  %v1693_v53 = vld [vmem:[%s2352_s1 + $0x2c0] ss:$8 sps:$4 sm:$0xff]   ;;  %v1696_v55 = vld [vmem:[%s2352_s1 + $0x2d4] ss:$8 sps:$4 sm:$0xff]  }
  0x19   : > { %1206 = vmatprep.subr.bf16.mxu0 %v1648_v21  ;;  %1228 = vmatprep.mubr.bf16.mxu0 %v1720_v51  ;;  %v1698_v56 = vld [vmem:[%s2352_s1 + $0xd0] ss:$8 sps:$4 sm:$0xff]   ;;  %v1700_v58 = vld [vmem:[%s2352_s1 + $0xe4] ss:$8 sps:$4 sm:$0xff]   ;;  %v1704_v60 = vld [vmem:[%s2352_s1 + $0xe0] ss:$8 sps:$4 sm:$0xff]  }
  0x1a   : > { %v1699_v57 = vld [vmem:[%s2352_s1 + $0x2d0] ss:$8 sps:$4 sm:$0xff]   ;;  %v1702_v59 = vld [vmem:[%s2352_s1 + $0x2e4] ss:$8 sps:$4 sm:$0xff]   ;;  %v1705_v61 = vld [vmem:[%s2352_s1 + $0x2e0] ss:$8 sps:$4 sm:$0xff]  }
  0x1b   : > { %1121 = vmatpush1.bf16.msra.mxu1 %v1650_v22  ;;  %v1706_v62 = vld [vmem:[%s2352_s1 + $0xf4] ss:$8 sps:$4 sm:$0xff]   ;;  %v1710_v0 = vld [vmem:[%s2352_s1 + $0xf0] ss:$8 sps:$4 sm:$0xff]   ;;  %v1717_v2 = vld [vmem:[%s2352_s1 + $0x104] ss:$8 sps:$4 sm:$0xff]  }
  0x1c   : > { %1207 = vmatpush1.bf16.msra.mxu0 %v1651_v23  ;;  %1122 = vmatprep.subr.bf16.mxu1 %v1652_v24  ;;  %v1708_v63 = vld [vmem:[%s2352_s1 + $0x2f4] ss:$8 sps:$4 sm:$0xff]   ;;  %v1711_v1 = vld [vmem:[%s2352_s1 + $0x2f0] ss:$8 sps:$4 sm:$0xff]   ;;  %v1723_v3 = vld [vmem:[%s2352_s1 + $0x304] ss:$8 sps:$4 sm:$0xff]  }
  0x1d   : > { %1208 = vmatprep.subr.bf16.mxu0 %v1654_v25  ;;  %v1712_v4 = vld [vmem:[%s2033_s13] ss:$36 sps:$4 sm:$0xff]   ;;  %v1718_v6 = vld [vmem:[%s2033_s13 + $0x10] ss:$36 sps:$4 sm:$0xff]  }
  0x1e   : > { %v1715_v5 = vld [vmem:[%s2352_s1 + $0x100] ss:$8 sps:$4 sm:$0xff]   ;;  %v1726_v8 = vld [vmem:[%s2352_s1 + $0x114] ss:$8 sps:$4 sm:$0xff]   ;;  %v1724_v10 = vld [vmem:[%s2352_s1 + $0x110] ss:$8 sps:$4 sm:$0xff]  }
  0x1f   : > { %1123 = vmatpush1.bf16.msra.mxu1 %v1656_v26  ;;  %v1721_v7 = vld [vmem:[%s2352_s1 + $0x300] ss:$8 sps:$4 sm:$0xff]   ;;  %v1729_v9 = vld [vmem:[%s2352_s1 + $0x314] ss:$8 sps:$4 sm:$0xff]   ;;  %v1727_v11 = vld [vmem:[%s2352_s1 + $0x310] ss:$8 sps:$4 sm:$0xff]  }
  0x20   : > { %1209 = vmatpush1.bf16.msra.mxu0 %v1657_v27  ;;  %1124 = vmatprep.subr.bf16.mxu1 %v1658_v28  ;;  %v1732_v12 = vld [vmem:[%s2352_s1 + $0x124] ss:$8 sps:$4 sm:$0xff]   ;;  %v1730_v14 = vld [vmem:[%s2352_s1 + $0x120] ss:$8 sps:$4 sm:$0xff]   ;;  %v1738_v16 = vld [vmem:[%s2352_s1 + $0x134] ss:$8 sps:$4 sm:$0xff]  }
  0x21   : > { %1210 = vmatprep.subr.bf16.mxu0 %v1660_v29  ;;  %v1735_v13 = vld [vmem:[%s2352_s1 + $0x324] ss:$8 sps:$4 sm:$0xff]   ;;  %v1733_v15 = vld [vmem:[%s2352_s1 + $0x320] ss:$8 sps:$4 sm:$0xff]   ;;  %v1741_v17 = vld [vmem:[%s2352_s1 + $0x334] ss:$8 sps:$4 sm:$0xff]  }
  0x22   : > { %v1736_v18 = vld [vmem:[%s2352_s1 + $0x130] ss:$8 sps:$4 sm:$0xff]   ;;  %v1744_v20 = vld [vmem:[%s2352_s1 + $0x144] ss:$8 sps:$4 sm:$0xff]   ;;  %v1742_v22 = vld [vmem:[%s2352_s1 + $0x140] ss:$8 sps:$4 sm:$0xff]  }
  0x23   : > { %1125 = vmatpush1.bf16.msra.mxu1 %v1662_v30  ;;  %v1739_v19 = vld [vmem:[%s2352_s1 + $0x330] ss:$8 sps:$4 sm:$0xff]   ;;  %v1747_v21 = vld [vmem:[%s2352_s1 + $0x344] ss:$8 sps:$4 sm:$0xff]   ;;  %v1745_v23 = vld [vmem:[%s2352_s1 + $0x340] ss:$8 sps:$4 sm:$0xff]  }
  0x24   : > { %1211 = vmatpush1.bf16.msra.mxu0 %v1663_v31  ;;  %1126 = vmatprep.subr.bf16.mxu1 %v1664_v32  ;;  %v1750_v24 = vld [vmem:[%s2352_s1 + $0x154] ss:$8 sps:$4 sm:$0xff]   ;;  %v1748_v26 = vld [vmem:[%s2352_s1 + $0x150] ss:$8 sps:$4 sm:$0xff]   ;;  %v1756_v28 = vld [vmem:[%s2352_s1 + $0x164] ss:$8 sps:$4 sm:$0xff]  }
  0x25   : > { %1212 = vmatprep.subr.bf16.mxu0 %v1666_v33  ;;  %v1753_v25 = vld [vmem:[%s2352_s1 + $0x354] ss:$8 sps:$4 sm:$0xff]   ;;  %v1751_v27 = vld [vmem:[%s2352_s1 + $0x350] ss:$8 sps:$4 sm:$0xff]   ;;  %v1759_v29 = vld [vmem:[%s2352_s1 + $0x364] ss:$8 sps:$4 sm:$0xff]  }
  0x26   : > { %v1754_v30 = vld [vmem:[%s2352_s1 + $0x160] ss:$8 sps:$4 sm:$0xff]   ;;  %v1762_v32 = vld [vmem:[%s2352_s1 + $0x174] ss:$8 sps:$4 sm:$0xff]  }
  0x27   : > { %1127 = vmatpush1.bf16.msra.mxu1 %v1668_v34  ;;  %v1757_v31 = vld [vmem:[%s2352_s1 + $0x360] ss:$8 sps:$4 sm:$0xff]   ;;  %v1765_v33 = vld [vmem:[%s2352_s1 + $0x374] ss:$8 sps:$4 sm:$0xff]   ;;  %v1816_v34 = vld [vmem:[%s2033_s13 + $0xc] ss:$36 sps:$4 sm:$0xff]  }
  0x28   : > { %1213 = vmatpush1.bf16.msra.mxu0 %v1669_v35  ;;  %1128 = vmatprep.subr.bf16.mxu1 %v1670_v36  ;;  %v1819_v35 = vld [vmem:[%s2033_s13 + $0x1c] ss:$36 sps:$4 sm:$0xff]   ;;  %v1760_v36 = vld [vmem:[%s2352_s1 + $0x170] ss:$8 sps:$4 sm:$0xff]  }
  0x29   : > { %1214 = vmatprep.subr.bf16.mxu0 %v1672_v37  ;;  %v1763_v37 = vld [vmem:[%s2352_s1 + $0x370] ss:$8 sps:$4 sm:$0xff]   ;;  %v1778_v48 = vld [vmem:[%s2352_s1 + $0x1a0] ss:$8 sps:$4 sm:$0xff]   ;;  %v1789_v51 = vld [vmem:[%s2352_s1 + $0x3b4] ss:$8 sps:$4 sm:$0xff]  }
  0x2b   : > { %1129 = vmatpush1.bf16.msra.mxu1 %v1674_v38  ;;  %v1768_v38 = vld [vmem:[%s2352_s1 + $0x184] ss:$8 sps:$4 sm:$0xff]  }
  0x2c   : > { %1215 = vmatpush1.bf16.msra.mxu0 %v1675_v39  ;;  %1130 = vmatprep.subr.bf16.mxu1 %v1676_v40  ;;  %v1771_v39 = vld [vmem:[%s2352_s1 + $0x384] ss:$8 sps:$4 sm:$0xff]   ;;  %v1766_v40 = vld [vmem:[%s2352_s1 + $0x180] ss:$8 sps:$4 sm:$0xff]  }
  0x2d   : > { %1216 = vmatprep.subr.bf16.mxu0 %v1678_v41  ;;  %v1769_v41 = vld [vmem:[%s2352_s1 + $0x380] ss:$8 sps:$4 sm:$0xff]  }
  0x2f   : > { %1131 = vmatpush1.bf16.msra.mxu1 %v1680_v42  ;;  %v1774_v42 = vld [vmem:[%s2352_s1 + $0x194] ss:$8 sps:$4 sm:$0xff]  }
  0x30   : > { %1217 = vmatpush1.bf16.msra.mxu0 %v1681_v43  ;;  %1132 = vmatprep.subr.bf16.mxu1 %v1682_v44  ;;  %v1777_v43 = vld [vmem:[%s2352_s1 + $0x394] ss:$8 sps:$4 sm:$0xff]   ;;  %v1772_v44 = vld [vmem:[%s2352_s1 + $0x190] ss:$8 sps:$4 sm:$0xff]  }
  0x31   : > { %1218 = vmatprep.subr.bf16.mxu0 %v1684_v45  ;;  %v1775_v45 = vld [vmem:[%s2352_s1 + $0x390] ss:$8 sps:$4 sm:$0xff]  }
  0x33   : > { %1133 = vmatpush1.bf16.msra.mxu1 %v1686_v46  ;;  %v1780_v46 = vld [vmem:[%s2352_s1 + $0x1a4] ss:$8 sps:$4 sm:$0xff]  }
  0x34   : > { %1219 = vmatpush1.bf16.msra.mxu0 %v1687_v47  ;;  %1134 = vmatprep.subr.bf16.mxu1 %v1688_v49  ;;  %v1783_v47 = vld [vmem:[%s2352_s1 + $0x3a4] ss:$8 sps:$4 sm:$0xff]   ;;  %v1781_v49 = vld [vmem:[%s2352_s1 + $0x3a0] ss:$8 sps:$4 sm:$0xff]  }
  0x35   : > { %1220 = vmatprep.subr.bf16.mxu0 %v1690_v50  ;;  %v1786_v50 = vld [vmem:[%s2352_s1 + $0x1b4] ss:$8 sps:$4 sm:$0xff]  }
  0x37   : > { %1135 = vmatpush1.bf16.msra.mxu1 %v1692_v52  ;;  %v1784_v52 = vld [vmem:[%s2352_s1 + $0x1b0] ss:$8 sps:$4 sm:$0xff]  }
  0x38   : > { %1221 = vmatpush1.bf16.msra.mxu0 %v1693_v53  ;;  %1136 = vmatprep.subr.bf16.mxu1 %v1694_v54  ;;  %v1787_v53 = vld [vmem:[%s2352_s1 + $0x3b0] ss:$8 sps:$4 sm:$0xff]   ;;  %v1792_v54 = vld [vmem:[%s2352_s1 + $0x1c4] ss:$8 sps:$4 sm:$0xff]  }
  0x39   : > { %1222 = vmatprep.subr.bf16.mxu0 %v1696_v55  ;;  %v1795_v55 = vld [vmem:[%s2352_s1 + $0x3c4] ss:$8 sps:$4 sm:$0xff]  }
  0x3b   : > { %1137 = vmatpush1.bf16.msra.mxu1 %v1698_v56  ;;  %v1790_v56 = vld [vmem:[%s2352_s1 + $0x1c0] ss:$8 sps:$4 sm:$0xff]  }
  0x3c   : > { %1223 = vmatpush1.bf16.msra.mxu0 %v1699_v57  ;;  %1138 = vmatprep.subr.bf16.mxu1 %v1700_v58  ;;  %v1793_v57 = vld [vmem:[%s2352_s1 + $0x3c0] ss:$8 sps:$4 sm:$0xff]   ;;  %v1798_v58 = vld [vmem:[%s2352_s1 + $0x1d4] ss:$8 sps:$4 sm:$0xff]  }
  0x3d   : > { %1224 = vmatprep.subr.bf16.mxu0 %v1702_v59  ;;  %v1801_v59 = vld [vmem:[%s2352_s1 + $0x3d4] ss:$8 sps:$4 sm:$0xff]  }
  0x3f   : > { %1139 = vmatpush1.bf16.msra.mxu1 %v1704_v60  ;;  %v1796_v60 = vld [vmem:[%s2352_s1 + $0x1d0] ss:$8 sps:$4 sm:$0xff]  }
  0x40   : > { %1225 = vmatpush1.bf16.msra.mxu0 %v1705_v61  ;;  %1140 = vmatprep.subr.bf16.mxu1 %v1706_v62  ;;  %v1799_v61 = vld [vmem:[%s2352_s1 + $0x3d0] ss:$8 sps:$4 sm:$0xff]   ;;  %v1804_v62 = vld [vmem:[%s2352_s1 + $0x1e4] ss:$8 sps:$4 sm:$0xff]  }
  0x41   : > { %1226 = vmatprep.subr.bf16.mxu0 %v1708_v63  ;;  %v1807_v63 = vld [vmem:[%s2352_s1 + $0x3e4] ss:$8 sps:$4 sm:$0xff]  }
  0x43   : > { %1141 = vmatpush1.bf16.msra.mxu1 %v1710_v0  ;;  %v1802_v0 = vld [vmem:[%s2352_s1 + $0x1e0] ss:$8 sps:$4 sm:$0xff]  }
  0x44   : > { %1227 = vmatpush1.bf16.msra.mxu0 %v1711_v1  ;;  %1153 = vmatprep.subr.bf16.mxu1 %v1717_v2  ;;  %v1805_v1 = vld [vmem:[%s2352_s1 + $0x3e0] ss:$8 sps:$4 sm:$0xff]   ;;  %v1810_v2 = vld [vmem:[%s2352_s1 + $0x1f4] ss:$8 sps:$4 sm:$0xff]  }
  0x45   : > { %1239 = vmatprep.subr.bf16.mxu0 %v1723_v3  ;;  %v1813_v3 = vld [vmem:[%s2352_s1 + $0x3f4] ss:$8 sps:$4 sm:$0xff]  }
  0x46   : > { %1143 = vmatmul.mubr.bf16.vlgmr.msra.gmra.mrb[0].mxu1 %v1712_v4  ;;  %v1808_v4 = vld [vmem:[%s2352_s1 + $0x1f0] ss:$8 sps:$4 sm:$0xff]  }
  0x47   : > { %1229 = vmatmul.mubr.bf16.vlgmr.msra.gmra.mrb[0].mxu0 %v1718_v6  ;;  %1154 = vmatpush1.bf16.msra.mxu1 %v1715_v5  ;;  %v1811_v5 = vld [vmem:[%s2352_s1 + $0x3f0] ss:$8 sps:$4 sm:$0xff]   ;;  %v1822_v6 = vld [vmem:[%s2352_s1 + $0x404] ss:$8 sps:$4 sm:$0xff]  }
  0x48   : > { %1240 = vmatpush1.bf16.msra.mxu0 %v1721_v7  ;;  %1155 = vmatprep.subr.bf16.mxu1 %v1726_v8  ;;  %v1814_v7 = vld [vmem:[%s2033_s13 + $0x8] ss:$36 sps:$4 sm:$0xff]   ;;  %v1817_v8 = vld [vmem:[%s2033_s13 + $0x18] ss:$36 sps:$4 sm:$0xff]  }
  0x49   : > { %1241 = vmatprep.subr.bf16.mxu0 %v1729_v9  ;;  %1185 = vmatprep.mubr.bf16.mxu1 %v1816_v34  ;;  %v1820_v9 = vld [vmem:[%s2352_s1 + $0x400] ss:$8 sps:$4 sm:$0xff]  }
  0x4a   : > { %1271 = vmatprep.mubr.bf16.mxu0 %v1819_v35 }
  0x4b   : > { %1156 = vmatpush1.bf16.msra.mxu1 %v1724_v10  ;;  %v1825_v10 = vld [vmem:[%s2352_s1 + $0x414] ss:$8 sps:$4 sm:$0xff]  }
  0x4c   : > { %1242 = vmatpush1.bf16.msra.mxu0 %v1727_v11  ;;  %1157 = vmatprep.subr.bf16.mxu1 %v1732_v12  ;;  %v1823_v11 = vld [vmem:[%s2352_s1 + $0x410] ss:$8 sps:$4 sm:$0xff]   ;;  %v1861_v12 = vmov 0  }
  0x4d   : > { %1243 = vmatprep.subr.bf16.mxu0 %v1735_v13  ;;  %v1828_v13 = vld [vmem:[%s2352_s1 + $0x424] ss:$8 sps:$4 sm:$0xff]  }
  0x4f   : > { %1158 = vmatpush1.bf16.msra.mxu1 %v1730_v14  ;;  %v1826_v14 = vld [vmem:[%s2352_s1 + $0x420] ss:$8 sps:$4 sm:$0xff]  }
  0x50   : > { %1244 = vmatpush1.bf16.msra.mxu0 %v1733_v15  ;;  %1159 = vmatprep.subr.bf16.mxu1 %v1738_v16  ;;  %v1831_v15 = vld [vmem:[%s2352_s1 + $0x434] ss:$8 sps:$4 sm:$0xff]   ;;  %v1829_v16 = vld [vmem:[%s2352_s1 + $0x430] ss:$8 sps:$4 sm:$0xff]  }
  0x51   : > { %1245 = vmatprep.subr.bf16.mxu0 %v1741_v17  ;;  %v1834_v17 = vld [vmem:[%s2352_s1 + $0x444] ss:$8 sps:$4 sm:$0xff]  }
  0x53   : > { %1160 = vmatpush1.bf16.msra.mxu1 %v1736_v18  ;;  %v1832_v18 = vld [vmem:[%s2352_s1 + $0x440] ss:$8 sps:$4 sm:$0xff]  }
  0x54   : > { %1246 = vmatpush1.bf16.msra.mxu0 %v1739_v19  ;;  %1161 = vmatprep.subr.bf16.mxu1 %v1744_v20  ;;  %v1837_v19 = vld [vmem:[%s2352_s1 + $0x454] ss:$8 sps:$4 sm:$0xff]   ;;  %v1835_v20 = vld [vmem:[%s2352_s1 + $0x450] ss:$8 sps:$4 sm:$0xff]  }
  0x55   : > { %1247 = vmatprep.subr.bf16.mxu0 %v1747_v21  ;;  %v1840_v21 = vld [vmem:[%s2352_s1 + $0x464] ss:$8 sps:$4 sm:$0xff]  }
  0x57   : > { %1162 = vmatpush1.bf16.msra.mxu1 %v1742_v22  ;;  %v1838_v22 = vld [vmem:[%s2352_s1 + $0x460] ss:$8 sps:$4 sm:$0xff]  }
  0x58   : > { %1248 = vmatpush1.bf16.msra.mxu0 %v1745_v23  ;;  %1163 = vmatprep.subr.bf16.mxu1 %v1750_v24  ;;  %v1843_v23 = vld [vmem:[%s2352_s1 + $0x474] ss:$8 sps:$4 sm:$0xff]   ;;  %v1841_v24 = vld [vmem:[%s2352_s1 + $0x470] ss:$8 sps:$4 sm:$0xff]  }
  0x59   : > { %1249 = vmatprep.subr.bf16.mxu0 %v1753_v25  ;;  %v1844_v25 = vld [vmem:[%s2033_s13 + $0x20] ss:$36 sps:$4 sm:$0xff]   ;;  %s1419_s13 = sshll.u32 %s2356_s24, 2 }
  0x5a   : > { %s175_s18 = scalar_lea.vmem %s2354_s3, %s1419_s13 }
  0x5b   : > { %1164 = vmatpush1.bf16.msra.mxu1 %v1748_v26 }
  0x5c   : > { %1250 = vmatpush1.bf16.msra.mxu0 %v1751_v27  ;;  %1165 = vmatprep.subr.bf16.mxu1 %v1756_v28 }
  0x5d   : > { %1251 = vmatprep.subr.bf16.mxu0 %v1759_v29 }
  0x5f   : > { %1166 = vmatpush1.bf16.msra.mxu1 %v1754_v30  ;;  %v334_v30 = vlaneseq }
  0x60   : > { %1252 = vmatpush1.bf16.msra.mxu0 %v1757_v31  ;;  %1167 = vmatprep.subr.bf16.mxu1 %v1762_v32 }
  0x61   : > { %1253 = vmatprep.subr.bf16.mxu0 %v1765_v33  ;;  %v335_v31 = vshrl.u32 %v334_v30, 7  ;;  %v332_v33 = vld [vmem:[%s2353_s2] sm:$0x3] }
  0x63   : > { %1168 = vmatpush1.bf16.msra.mxu1 %v1760_v36  ;;  %v336_v32 = vsub.s32 0, %v335_v31  ;;  %v340_v34 = vsub.s32 1, %v335_v31 }
  0x64   : > { %1254 = vmatpush1.bf16.msra.mxu0 %v1763_v37  ;;  %1169 = vmatprep.subr.bf16.mxu1 %v1768_v38 }
  0x65   : > { %1255 = vmatprep.subr.bf16.mxu0 %v1771_v39  ;;  %v337_v35 = vrot.slane %v332_v33, %v336_v32  ;;  %v341_v36 = vrot.slane %v332_v33, %v340_v34 }
  0x67   : > { %1170 = vmatpush1.bf16.msra.mxu1 %v1766_v40 }
  0x68   : > { %1256 = vmatpush1.bf16.msra.mxu0 %v1769_v41  ;;  %1171 = vmatprep.subr.bf16.mxu1 %v1774_v42 }
  0x69   : > { %1257 = vmatprep.subr.bf16.mxu0 %v1777_v43 }
  0x6b   : > { %1172 = vmatpush1.bf16.msra.mxu1 %v1772_v44 }
  0x6c   : > { %1258 = vmatpush1.bf16.msra.mxu0 %v1775_v45  ;;  %1173 = vmatprep.subr.bf16.mxu1 %v1780_v46 }
  0x6d   : > { %1259 = vmatprep.subr.bf16.mxu0 %v1783_v47 }
  0x6f   : > { %1174 = vmatpush1.bf16.msra.mxu1 %v1778_v48 }
  0x70   : > { %1260 = vmatpush1.bf16.msra.mxu0 %v1781_v49  ;;  %1175 = vmatprep.subr.bf16.mxu1 %v1786_v50 }
  0x71   : > { %1261 = vmatprep.subr.bf16.mxu0 %v1789_v51 }
  0x73   : > { %1176 = vmatpush1.bf16.msra.mxu1 %v1784_v52 }
  0x74   : > { %1262 = vmatpush1.bf16.msra.mxu0 %v1787_v53  ;;  %1177 = vmatprep.subr.bf16.mxu1 %v1792_v54 }
  0x75   : > { %1263 = vmatprep.subr.bf16.mxu0 %v1795_v55 }
  0x77   : > { %1178 = vmatpush1.bf16.msra.mxu1 %v1790_v56 }
  0x78   : > { %1264 = vmatpush1.bf16.msra.mxu0 %v1793_v57  ;;  %1179 = vmatprep.subr.bf16.mxu1 %v1798_v58 }
  0x79   : > { %1265 = vmatprep.subr.bf16.mxu0 %v1801_v59 }
  0x7b   : > { %1180 = vmatpush1.bf16.msra.mxu1 %v1796_v60 }
  0x7c   : > { %1266 = vmatpush1.bf16.msra.mxu0 %v1799_v61  ;;  %1181 = vmatprep.subr.bf16.mxu1 %v1804_v62 }
  0x7d   : > { %1267 = vmatprep.subr.bf16.mxu0 %v1807_v63 }
  0x7f   : > { %1182 = vmatpush1.bf16.msra.mxu1 %v1802_v0 }
  0x80   : > { %1268 = vmatpush1.bf16.msra.mxu0 %v1805_v1  ;;  %1183 = vmatprep.subr.bf16.mxu1 %v1810_v2 }
  0x81   : > { %1269 = vmatprep.subr.bf16.mxu0 %v1813_v3 }
  0x83   : > { %1184 = vmatpush1.bf16.msra.mxu1 %v1808_v4 }
  0x84   : > { %1270 = vmatpush1.bf16.msra.mxu0 %v1811_v5 }
  0x85   : > { %1282 = vmatprep.subr.bf16.mxu0 %v1822_v6 }
  0x86   : > { %1186 = vmatmul.mubr.bf16.vlgmr.msra.gmra.mrb[0].mxu1 %v1814_v7 }
  0x87   : > { %1272 = vmatmul.mubr.bf16.vlgmr.msra.gmra.mrb[0].mxu0 %v1817_v8 }
  0x88   : > { %1283 = vmatpush1.bf16.msra.mxu0 %v1820_v9  ;;  %1314 = vmatprep.mubr.bf16.mxu0 %v1861_v12 }
  0x89   : > { %1284 = vmatprep.subr.bf16.mxu0 %v1825_v10 }
  0x8c   : > { %1285 = vmatpush1.bf16.msra.mxu0 %v1823_v11 }
  0x8d   : > { %1286 = vmatprep.subr.bf16.mxu0 %v1828_v13 }
  0x90   : > { %1287 = vmatpush1.bf16.msra.mxu0 %v1826_v14 }
  0x91   : > { %1288 = vmatprep.subr.bf16.mxu0 %v1831_v15 }
  0x94   : > { %1289 = vmatpush1.bf16.msra.mxu0 %v1829_v16 }
  0x95   : > { %1290 = vmatprep.subr.bf16.mxu0 %v1834_v17 }
  0x98   : > { %1291 = vmatpush1.bf16.msra.mxu0 %v1832_v18 }
  0x99   : > { %1292 = vmatprep.subr.bf16.mxu0 %v1837_v19 }
  0x9c   : > { %1293 = vmatpush1.bf16.msra.mxu0 %v1835_v20 }
  0x9d   : > { %1294 = vmatprep.subr.bf16.mxu0 %v1840_v21 }
  0xa0   : > { %1295 = vmatpush1.bf16.msra.mxu0 %v1838_v22 }
  0xa1   : > { %1296 = vmatprep.subr.bf16.mxu0 %v1843_v23 }
  0xa4   : > { %1297 = vmatpush1.bf16.msra.mxu0 %v1841_v24 }
  0xa7   : > { %1315 = vmatmul.mubr.bf16.vlgmr.msra.gmra.mrb[0].mxu0 %v1844_v25 }
 0x159   : > { %v1187_v26 = vpop.f32.mrb[0].mxu1 }
 0x15a   : > { %v1189_v27 = vpop.f32.mrb[1].mxu1  ;;  %v1586_v37 = vadd.f32 %v1187_v26, %v337_v35 }
 0x15b   : > { %v1191_v28 = vpop.f32.mrb[2].mxu1  ;;  %v1588_v38 = vadd.f32 %v1189_v27, %v341_v36 }
 0x15c   : > { %v1193_v29 = vpop.f32.mrb[3].mxu1  ;;  %v1590_v40 = vadd.f32 %v1191_v28, %v337_v35 }
 0x15d   : > { %v1592_v43 = vadd.f32 %v1193_v29, %v341_v36 }
 0x17a   : > { %v1316_v39 = vpop.f32.mrb[0].mxu0 }
 0x17b   : > { %v1587_v41 = vadd.f32 %v1586_v37, %v1316_v39  ;;  %v1318_v42 = vpop.f32.mrb[1].mxu0 }
 0x17c   : > { %v1589_v44 = vadd.f32 %v1588_v38, %v1318_v42  ;;  %v1320_v45 = vpop.f32.mrb[2].mxu0 }
 0x17d   : > { %v1591_v46 = vadd.f32 %v1590_v40, %v1320_v45  ;;  %v1322_v47 = vpop.f32.mrb[3].mxu0  ;;  %v1327_v55 = vmul.f32 0.2, %v1587_v41  ;;  %vm1325_vm0 = vcmp.ge.f32.partialorder %v1587_v41, 0.0 }
 0x17e   : > { %v1573_v48 = vmul.f32 -1.442695, %v1589_v44  ;;  %v1593_v49 = vadd.f32 %v1592_v43, %v1322_v47 }
 0x17f   : > { %v1328_v56 = vmul.f32 0.2, %v1591_v46  ;;  %vm1326_vm1 = vcmp.ge.f32.partialorder %v1591_v46, 0.0  ;;  %v1329_v58 = vsel %vm1325_vm0, %v1587_v41, %v1327_v55 }
 0x180   : > { %1845 = vpow2.f32 %v1573_v48  ;;  %v1574_v50 = vmul.f32 -1.442695, %v1593_v49 }
 0x181   : > { %v1330_v61 = vsel %vm1326_vm1, %v1591_v46, %v1328_v56 }
 0x182   : > { %1847 = vpow2.f32 %v1574_v50 }
 0x18a   : > { %v1846_v51 = vpop.eup %1845 }
 0x18b   : > { %v1337_v52 = vadd.f32 1.0, %v1846_v51 }
 0x18c   : > { %v1848_v53 = vpop.eup %1847 }
 0x18d   : > { %1849 = vrcp.f32 %v1337_v52  ;;  %v1338_v54 = vadd.f32 1.0, %v1848_v53 }
 0x18f   : > { %1851 = vrcp.f32 %v1338_v54 }
 0x197   : > { %v1850_v57 = vpop.eup %1849 }
 0x198   : > { %v1343_v59 = vmul.f32 %v1850_v57, %v1329_v58 }
 0x199   : > { %v1852_v60 = vpop.eup %1851 }
 0x19a   : > { %v1344_v62 = vmul.f32 %v1852_v60, %v1330_v61 }
 0x19c   : > { %v1584_v63 = vpack.c.bf16 %v1344_v62, %v1343_v59 }
 0x19e   : > { %1585 = vst [vmem:[%s175_s18] sm:$0xff] %v1584_v63  }
 0x19f PF: > { %s13_s12 = sadd.s32 1, %s1859_s12  }
 0x1a0   : > { %p10_p4 = scmp.ge.s32.totalorder %s13_s12, 4  }
 0x1a2   :  { %12 = sbr.rel (!%p10_p4) target bundleno = 1 (0x1), region = 62 }

// kernel: _lambda_.48
= control target key start
LH: loop header
LB: loop body
LE: loop exit
PB: predicated region body
PF: predicated region fallthrough
CT: control target
= control target key end

     0   :  { %s2492_s12 = smov 0   ;;  %s3060_s0 = inlined_call_operand.vmem [shape: bf16[128,1152], index: 0, kind: input, shape index: {}]   ;;  %s3061_s1 = inlined_call_operand.vmem [shape: bf16[1152,256], index: 1, kind: input, shape index: {}]   ;;  %s3062_s2 = inlined_call_operand.vmem [shape: f32[1,256], index: 2, kind: input, shape index: {}]   ;;  %s3063_s3 = inlined_call_operand.vmem [shape: bf16[128,128], index: 3, kind: output, shape index: {}]  }
   0x1 LB: > { %s1819_s13 = sadd.s32 4294967295, %s2469_s12   ;;  %p1823_p0 = scmp.ge.s32.totalorder %s2469_s12, 1  ;;  %s2469_s12 = sphi %s2492_s12, %s13_s12  }
   0x2   : > { %p139_p1 = scmp.lt.s32.totalorder %s2469_s12, 3 }
   0x4   : > { %p140_p2 = pnand %p1823_p0, %p139_p1 }
   0x5   : > { %v2163_v0 = vld [vmem:[%s3061_s1 + $0x4] ss:$8 sps:$4 sm:$0xff] (!%p140_p2)   ;;  %v2167_v2 = vld [vmem:[%s3061_s1] ss:$8 sps:$4 sm:$0xff] (!%p140_p2)   ;;  %v2169_v4 = vld [vmem:[%s3061_s1 + $0x14] ss:$8 sps:$4 sm:$0xff] (!%p140_p2)  }
   0x6   : > { %143 = sbr.rel (%p140_p2) target bundleno = 424 (0x1a8), region = 32  ;;  %v2165_v1 = vld [vmem:[%s3061_s1 + $0x204] ss:$8 sps:$4 sm:$0xff] (!%p140_p2)   ;;  %1278 = vmatprep.subr.bf16.mxu1 (!%p140_p2), %v2163_v0  ;;  %v2168_v3 = vld [vmem:[%s3061_s1 + $0x200] ss:$8 sps:$4 sm:$0xff] (!%p140_p2)   ;;  %s1824_s24 = sshll.u32 (!%p140_p2), %s1819_s13, 3 }
   0x7   : > { %1424 = vmatprep.subr.bf16.mxu0 (!%p140_p2), %v2165_v1  ;;  %1279 = vmatpush1.bf16.msra.mxu1 (!%p140_p2), %v2167_v2  ;;  %v2171_v5 = vld [vmem:[%s3061_s1 + $0x214] ss:$8 sps:$4 sm:$0xff] (!%p140_p2)   ;;  %v2173_v6 = vld [vmem:[%s3061_s1 + $0x10] ss:$8 sps:$4 sm:$0xff] (!%p140_p2)   ;;  %v2175_v8 = vld [vmem:[%s3061_s1 + $0x24] ss:$8 sps:$4 sm:$0xff] (!%p140_p2)  }
   0x8   : > { %1425 = vmatpush1.bf16.msra.mxu0 (!%p140_p2), %v2168_v3  ;;  %1280 = vmatprep.subr.bf16.mxu1 (!%p140_p2), %v2169_v4  ;;  %v2174_v7 = vld [vmem:[%s3061_s1 + $0x210] ss:$8 sps:$4 sm:$0xff] (!%p140_p2)   ;;  %v2177_v9 = vld [vmem:[%s3061_s1 + $0x224] ss:$8 sps:$4 sm:$0xff] (!%p140_p2)   ;;  %v2179_v10 = vld [vmem:[%s3061_s1 + $0x20] ss:$8 sps:$4 sm:$0xff] (!%p140_p2)  }
   0x9   : > { %1426 = vmatprep.subr.bf16.mxu0 (!%p140_p2), %v2171_v5  ;;  %v2180_v11 = vld [vmem:[%s3061_s1 + $0x220] ss:$8 sps:$4 sm:$0xff] (!%p140_p2)   ;;  %v2181_v12 = vld [vmem:[%s3061_s1 + $0x34] ss:$8 sps:$4 sm:$0xff] (!%p140_p2)   ;;  %v2185_v14 = vld [vmem:[%s3061_s1 + $0x30] ss:$8 sps:$4 sm:$0xff] (!%p140_p2)  }
   0xa   : > { %v2183_v13 = vld [vmem:[%s3061_s1 + $0x234] ss:$8 sps:$4 sm:$0xff] (!%p140_p2)   ;;  %v2186_v15 = vld [vmem:[%s3061_s1 + $0x230] ss:$8 sps:$4 sm:$0xff] (!%p140_p2)   ;;  %v2187_v16 = vld [vmem:[%s3061_s1 + $0x44] ss:$8 sps:$4 sm:$0xff] (!%p140_p2)  }
   0xb   : > { %1281 = vmatpush1.bf16.msra.mxu1 (!%p140_p2), %v2173_v6  ;;  %v2189_v17 = vld [vmem:[%s3061_s1 + $0x244] ss:$8 sps:$4 sm:$0xff] (!%p140_p2)   ;;  %v2191_v18 = vld [vmem:[%s3061_s1 + $0x40] ss:$8 sps:$4 sm:$0xff] (!%p140_p2)   ;;  %v2193_v20 = vld [vmem:[%s3061_s1 + $0x54] ss:$8 sps:$4 sm:$0xff] (!%p140_p2)  }
   0xc   : > { %1427 = vmatpush1.bf16.msra.mxu0 (!%p140_p2), %v2174_v7  ;;  %1282 = vmatprep.subr.bf16.mxu1 (!%p140_p2), %v2175_v8  ;;  %v2192_v19 = vld [vmem:[%s3061_s1 + $0x240] ss:$8 sps:$4 sm:$0xff] (!%p140_p2)   ;;  %v2195_v21 = vld [vmem:[%s3061_s1 + $0x254] ss:$8 sps:$4 sm:$0xff] (!%p140_p2)   ;;  %v2197_v22 = vld [vmem:[%s3061_s1 + $0x50] ss:$8 sps:$4 sm:$0xff] (!%p140_p2)  }
   0xd   : > { %1428 = vmatprep.subr.bf16.mxu0 %v2177_v9  ;;  %v2198_v23 = vld [vmem:[%s3061_s1 + $0x250] ss:$8 sps:$4 sm:$0xff]   ;;  %v2199_v24 = vld [vmem:[%s3061_s1 + $0x64] ss:$8 sps:$4 sm:$0xff]   ;;  %v2203_v26 = vld [vmem:[%s3061_s1 + $0x60] ss:$8 sps:$4 sm:$0xff]  }
   0xe   : > { %v2201_v25 = vld [vmem:[%s3061_s1 + $0x264] ss:$8 sps:$4 sm:$0xff]   ;;  %v2204_v27 = vld [vmem:[%s3061_s1 + $0x260] ss:$8 sps:$4 sm:$0xff]   ;;  %v2205_v28 = vld [vmem:[%s3061_s1 + $0x74] ss:$8 sps:$4 sm:$0xff]  }
   0xf   : > { %1283 = vmatpush1.bf16.msra.mxu1 %v2179_v10  ;;  %v2207_v29 = vld [vmem:[%s3061_s1 + $0x274] ss:$8 sps:$4 sm:$0xff]   ;;  %v2209_v30 = vld [vmem:[%s3061_s1 + $0x70] ss:$8 sps:$4 sm:$0xff]   ;;  %v2211_v32 = vld [vmem:[%s3061_s1 + $0x84] ss:$8 sps:$4 sm:$0xff]  }
  0x10   : > { %1429 = vmatpush1.bf16.msra.mxu0 %v2180_v11  ;;  %1284 = vmatprep.subr.bf16.mxu1 %v2181_v12  ;;  %v2210_v31 = vld [vmem:[%s3061_s1 + $0x270] ss:$8 sps:$4 sm:$0xff]   ;;  %p165_p3 = scmp.lt.s32.totalorder %s1824_s24, 15  ;;  %v2213_v33 = vld [vmem:[%s3061_s1 + $0x284] ss:$8 sps:$4 sm:$0xff]  }
  0x11   : > { %1430 = vmatprep.subr.bf16.mxu0 %v2183_v13  ;;  %v2215_v34 = vld [vmem:[%s3061_s1 + $0x80] ss:$8 sps:$4 sm:$0xff]   ;;  %v2217_v36 = vld [vmem:[%s3061_s1 + $0x94] ss:$8 sps:$4 sm:$0xff]   ;;  %v2221_v38 = vld [vmem:[%s3061_s1 + $0x90] ss:$8 sps:$4 sm:$0xff]  }
  0x12   : > { %v2216_v35 = vld [vmem:[%s3061_s1 + $0x280] ss:$8 sps:$4 sm:$0xff]   ;;  %s3065_s24 = smov (!%p165_p3, %s1824_s24), 15  ;;  %v2219_v37 = vld [vmem:[%s3061_s1 + $0x294] ss:$8 sps:$4 sm:$0xff]  }
  0x13   : > { %1285 = vmatpush1.bf16.msra.mxu1 %v2185_v14  ;;  %v2222_v39 = vld [vmem:[%s3061_s1 + $0x290] ss:$8 sps:$4 sm:$0xff]   ;;  %v2223_v40 = vld [vmem:[%s3061_s1 + $0xa4] ss:$8 sps:$4 sm:$0xff]   ;;  %s2153_s21 = smul.u32 36, %s3065_s24 }
  0x14   : > { %1431 = vmatpush1.bf16.msra.mxu0 %v2186_v15  ;;  %1286 = vmatprep.subr.bf16.mxu1 %v2187_v16  ;;  %v2225_v41 = vld [vmem:[%s3061_s1 + $0x2a4] ss:$8 sps:$4 sm:$0xff]   ;;  %v2227_v42 = vld [vmem:[%s3061_s1 + $0xa0] ss:$8 sps:$4 sm:$0xff]   ;;  %v2229_v44 = vld [vmem:[%s3061_s1 + $0xb4] ss:$8 sps:$4 sm:$0xff]  }
  0x15   : > { %1432 = vmatprep.subr.bf16.mxu0 %v2189_v17  ;;  %v2228_v43 = vld [vmem:[%s3061_s1 + $0x2a0] ss:$8 sps:$4 sm:$0xff]   ;;  %s2643_s13 = scalar_lea.vmem %s3060_s0, %s2153_s21  ;;  %v2231_v45 = vld [vmem:[%s3061_s1 + $0x2b4] ss:$8 sps:$4 sm:$0xff]   ;;  %v2233_v46 = vld [vmem:[%s3061_s1 + $0xb0] ss:$8 sps:$4 sm:$0xff]  }
  0x16   : > { %v2234_v47 = vld [vmem:[%s3061_s1 + $0x2b0] ss:$8 sps:$4 sm:$0xff]   ;;  %v2261_v48 = vld [vmem:[%s2643_s13 + $0x4] ss:$36 sps:$4 sm:$0xff]   ;;  %v2241_v54 = vld [vmem:[%s3061_s1 + $0xd4] ss:$8 sps:$4 sm:$0xff]  }
  0x17   : > { %1287 = vmatpush1.bf16.msra.mxu1 %v2191_v18  ;;  %v2235_v49 = vld [vmem:[%s3061_s1 + $0xc4] ss:$8 sps:$4 sm:$0xff]   ;;  %1310 = vmatprep.mubr.bf16.mxu1 %v2261_v48  ;;  %v2267_v51 = vld [vmem:[%s2643_s13 + $0x14] ss:$36 sps:$4 sm:$0xff]   ;;  %v2239_v52 = vld [vmem:[%s3061_s1 + $0xc0] ss:$8 sps:$4 sm:$0xff]  }
  0x18   : > { %1433 = vmatpush1.bf16.msra.mxu0 %v2192_v19  ;;  %1288 = vmatprep.subr.bf16.mxu1 %v2193_v20  ;;  %v2237_v50 = vld [vmem:[%s3061_s1 + $0x2c4] ss:$8 sps:$4 sm:$0xff]   ;;  %v2240_v53 = vld [vmem:[%s3061_s1 + $0x2c0] ss:$8 sps:$4 sm:$0xff]   ;;  %v2243_v55 = vld [vmem:[%s3061_s1 + $0x2d4] ss:$8 sps:$4 sm:$0xff]  }
  0x19   : > { %1434 = vmatprep.subr.bf16.mxu0 %v2195_v21  ;;  %1456 = vmatprep.mubr.bf16.mxu0 %v2267_v51  ;;  %v2245_v56 = vld [vmem:[%s3061_s1 + $0xd0] ss:$8 sps:$4 sm:$0xff]   ;;  %v2247_v58 = vld [vmem:[%s3061_s1 + $0xe4] ss:$8 sps:$4 sm:$0xff]   ;;  %v2251_v60 = vld [vmem:[%s3061_s1 + $0xe0] ss:$8 sps:$4 sm:$0xff]  }
  0x1a   : > { %v2246_v57 = vld [vmem:[%s3061_s1 + $0x2d0] ss:$8 sps:$4 sm:$0xff]   ;;  %v2249_v59 = vld [vmem:[%s3061_s1 + $0x2e4] ss:$8 sps:$4 sm:$0xff]   ;;  %v2252_v61 = vld [vmem:[%s3061_s1 + $0x2e0] ss:$8 sps:$4 sm:$0xff]  }
  0x1b   : > { %1289 = vmatpush1.bf16.msra.mxu1 %v2197_v22  ;;  %v2253_v62 = vld [vmem:[%s3061_s1 + $0xf4] ss:$8 sps:$4 sm:$0xff]   ;;  %v2257_v0 = vld [vmem:[%s3061_s1 + $0xf0] ss:$8 sps:$4 sm:$0xff]   ;;  %v2264_v2 = vld [vmem:[%s3061_s1 + $0x104] ss:$8 sps:$4 sm:$0xff]  }
  0x1c   : > { %1435 = vmatpush1.bf16.msra.mxu0 %v2198_v23  ;;  %1290 = vmatprep.subr.bf16.mxu1 %v2199_v24  ;;  %v2255_v63 = vld [vmem:[%s3061_s1 + $0x2f4] ss:$8 sps:$4 sm:$0xff]   ;;  %v2258_v1 = vld [vmem:[%s3061_s1 + $0x2f0] ss:$8 sps:$4 sm:$0xff]   ;;  %v2270_v3 = vld [vmem:[%s3061_s1 + $0x304] ss:$8 sps:$4 sm:$0xff]  }
  0x1d   : > { %1436 = vmatprep.subr.bf16.mxu0 %v2201_v25  ;;  %v2259_v4 = vld [vmem:[%s2643_s13] ss:$36 sps:$4 sm:$0xff]   ;;  %v2265_v6 = vld [vmem:[%s2643_s13 + $0x10] ss:$36 sps:$4 sm:$0xff]   ;;  %v2329_v20 = vld [vmem:[%s2643_s13 + $0x48] ss:$36 sps:$4 sm:$0xff]  }
  0x1e   : > { %v2262_v5 = vld [vmem:[%s3061_s1 + $0x100] ss:$8 sps:$4 sm:$0xff]   ;;  %v2273_v8 = vld [vmem:[%s3061_s1 + $0x114] ss:$8 sps:$4 sm:$0xff]   ;;  %v2271_v10 = vld [vmem:[%s3061_s1 + $0x110] ss:$8 sps:$4 sm:$0xff]  }
  0x1f   : > { %1291 = vmatpush1.bf16.msra.mxu1 %v2203_v26  ;;  %v2268_v7 = vld [vmem:[%s3061_s1 + $0x300] ss:$8 sps:$4 sm:$0xff]   ;;  %v2276_v9 = vld [vmem:[%s3061_s1 + $0x314] ss:$8 sps:$4 sm:$0xff]   ;;  %v2274_v11 = vld [vmem:[%s3061_s1 + $0x310] ss:$8 sps:$4 sm:$0xff]  }
  0x20   : > { %1437 = vmatpush1.bf16.msra.mxu0 %v2204_v27  ;;  %1292 = vmatprep.subr.bf16.mxu1 %v2205_v28  ;;  %v2279_v12 = vld [vmem:[%s3061_s1 + $0x124] ss:$8 sps:$4 sm:$0xff]   ;;  %v2277_v14 = vld [vmem:[%s3061_s1 + $0x120] ss:$8 sps:$4 sm:$0xff]   ;;  %v2285_v16 = vld [vmem:[%s3061_s1 + $0x134] ss:$8 sps:$4 sm:$0xff]  }
  0x21   : > { %1438 = vmatprep.subr.bf16.mxu0 %v2207_v29  ;;  %v2282_v13 = vld [vmem:[%s3061_s1 + $0x324] ss:$8 sps:$4 sm:$0xff]   ;;  %v2280_v15 = vld [vmem:[%s3061_s1 + $0x320] ss:$8 sps:$4 sm:$0xff]   ;;  %v2288_v17 = vld [vmem:[%s3061_s1 + $0x334] ss:$8 sps:$4 sm:$0xff]  }
  0x22   : > { %v2325_v18 = vld [vmem:[%s2643_s13 + $0x4c] ss:$36 sps:$4 sm:$0xff]   ;;  %v2327_v19 = vld [vmem:[%s2643_s13 + $0x5c] ss:$36 sps:$4 sm:$0xff]  }
  0x23   : > { %1293 = vmatpush1.bf16.msra.mxu1 %v2209_v30  ;;  %v2283_v21 = vld [vmem:[%s3061_s1 + $0x130] ss:$8 sps:$4 sm:$0xff]   ;;  %v2291_v24 = vld [vmem:[%s3061_s1 + $0x144] ss:$8 sps:$4 sm:$0xff]   ;;  %v2289_v26 = vld [vmem:[%s3061_s1 + $0x140] ss:$8 sps:$4 sm:$0xff]  }
  0x24   : > { %1439 = vmatpush1.bf16.msra.mxu0 %v2210_v31  ;;  %1294 = vmatprep.subr.bf16.mxu1 %v2211_v32  ;;  %v2286_v22 = vld [vmem:[%s3061_s1 + $0x330] ss:$8 sps:$4 sm:$0xff]   ;;  %v2294_v25 = vld [vmem:[%s3061_s1 + $0x344] ss:$8 sps:$4 sm:$0xff]   ;;  %v2292_v27 = vld [vmem:[%s3061_s1 + $0x340] ss:$8 sps:$4 sm:$0xff]  }
  0x25   : > { %1440 = vmatprep.subr.bf16.mxu0 %v2213_v33  ;;  %v2333_v23 = vld [vmem:[%s2643_s13 + $0x58] ss:$36 sps:$4 sm:$0xff]   ;;  %v2345_v31 = vld [vmem:[%s2643_s13 + $0xa4] ss:$36 sps:$4 sm:$0xff]   ;;  %v2347_v32 = vld [vmem:[%s2643_s13 + $0x90] ss:$36 sps:$4 sm:$0xff]  }
  0x26   : > { %v2297_v28 = vld [vmem:[%s3061_s1 + $0x154] ss:$8 sps:$4 sm:$0xff]   ;;  %v2295_v33 = vld [vmem:[%s3061_s1 + $0x150] ss:$8 sps:$4 sm:$0xff]   ;;  %v2315_v48 = vld [vmem:[%s3061_s1 + $0x184] ss:$8 sps:$4 sm:$0xff]  }
  0x27   : > { %1295 = vmatpush1.bf16.msra.mxu1 %v2215_v34  ;;  %v2300_v29 = vld [vmem:[%s3061_s1 + $0x354] ss:$8 sps:$4 sm:$0xff]   ;;  %v2298_v34 = vld [vmem:[%s3061_s1 + $0x350] ss:$8 sps:$4 sm:$0xff]   ;;  %v2316_v51 = vld [vmem:[%s3061_s1 + $0x380] ss:$8 sps:$4 sm:$0xff]  }
  0x28   : > { %1441 = vmatpush1.bf16.msra.mxu0 %v2216_v35  ;;  %1296 = vmatprep.subr.bf16.mxu1 %v2217_v36  ;;  %v2343_v30 = vld [vmem:[%s2643_s13 + $0x94] ss:$36 sps:$4 sm:$0xff]   ;;  %v2351_v35 = vld [vmem:[%s2643_s13 + $0xa0] ss:$36 sps:$4 sm:$0xff]  }
  0x29   : > { %1442 = vmatprep.subr.bf16.mxu0 %v2219_v37  ;;  %v2303_v36 = vld [vmem:[%s3061_s1 + $0x164] ss:$8 sps:$4 sm:$0xff]  }
  0x2a   : > { %v2306_v37 = vld [vmem:[%s3061_s1 + $0x364] ss:$8 sps:$4 sm:$0xff]  }
  0x2b   : > { %1297 = vmatpush1.bf16.msra.mxu1 %v2221_v38  ;;  %v2301_v38 = vld [vmem:[%s3061_s1 + $0x160] ss:$8 sps:$4 sm:$0xff]  }
  0x2c   : > { %1443 = vmatpush1.bf16.msra.mxu0 %v2222_v39  ;;  %1298 = vmatprep.subr.bf16.mxu1 %v2223_v40  ;;  %v2304_v39 = vld [vmem:[%s3061_s1 + $0x360] ss:$8 sps:$4 sm:$0xff]   ;;  %v2309_v40 = vld [vmem:[%s3061_s1 + $0x174] ss:$8 sps:$4 sm:$0xff]  }
  0x2d   : > { %1444 = vmatprep.subr.bf16.mxu0 %v2225_v41  ;;  %v2312_v41 = vld [vmem:[%s3061_s1 + $0x374] ss:$8 sps:$4 sm:$0xff]  }
  0x2f   : > { %1299 = vmatpush1.bf16.msra.mxu1 %v2227_v42  ;;  %v2361_v42 = vld [vmem:[%s2643_s13 + $0xdc] ss:$36 sps:$4 sm:$0xff]  }
  0x30   : > { %1445 = vmatpush1.bf16.msra.mxu0 %v2228_v43  ;;  %1300 = vmatprep.subr.bf16.mxu1 %v2229_v44  ;;  %v2363_v43 = vld [vmem:[%s2643_s13 + $0xec] ss:$36 sps:$4 sm:$0xff]   ;;  %v2365_v44 = vld [vmem:[%s2643_s13 + $0xd8] ss:$36 sps:$4 sm:$0xff]  }
  0x31   : > { %1446 = vmatprep.subr.bf16.mxu0 %v2231_v45  ;;  %v2307_v45 = vld [vmem:[%s3061_s1 + $0x170] ss:$8 sps:$4 sm:$0xff]  }
  0x33   : > { %1301 = vmatpush1.bf16.msra.mxu1 %v2233_v46  ;;  %v2310_v46 = vld [vmem:[%s3061_s1 + $0x370] ss:$8 sps:$4 sm:$0xff]  }
  0x34   : > { %1447 = vmatpush1.bf16.msra.mxu0 %v2234_v47  ;;  %1302 = vmatprep.subr.bf16.mxu1 %v2235_v49  ;;  %v2369_v47 = vld [vmem:[%s2643_s13 + $0xe8] ss:$36 sps:$4 sm:$0xff]  }
  0x35   : > { %1448 = vmatprep.subr.bf16.mxu0 %v2237_v50  ;;  %v2318_v49 = vld [vmem:[%s3061_s1 + $0x384] ss:$8 sps:$4 sm:$0xff]   ;;  %v2313_v50 = vld [vmem:[%s3061_s1 + $0x180] ss:$8 sps:$4 sm:$0xff]  }
  0x37   : > { %1303 = vmatpush1.bf16.msra.mxu1 %v2239_v52  ;;  %v2321_v52 = vld [vmem:[%s3061_s1 + $0x194] ss:$8 sps:$4 sm:$0xff]  }
  0x38   : > { %1449 = vmatpush1.bf16.msra.mxu0 %v2240_v53  ;;  %1304 = vmatprep.subr.bf16.mxu1 %v2241_v54  ;;  %v2324_v53 = vld [vmem:[%s3061_s1 + $0x394] ss:$8 sps:$4 sm:$0xff]   ;;  %v2381_v54 = vld [vmem:[%s2643_s13 + $0xc] ss:$36 sps:$4 sm:$0xff]  }
  0x39   : > { %1450 = vmatprep.subr.bf16.mxu0 %v2243_v55  ;;  %v2384_v55 = vld [vmem:[%s2643_s13 + $0x1c] ss:$36 sps:$4 sm:$0xff]  }
  0x3b   : > { %1305 = vmatpush1.bf16.msra.mxu1 %v2245_v56  ;;  %v2319_v56 = vld [vmem:[%s3061_s1 + $0x190] ss:$8 sps:$4 sm:$0xff]  }
  0x3c   : > { %1451 = vmatpush1.bf16.msra.mxu0 %v2246_v57  ;;  %1306 = vmatprep.subr.bf16.mxu1 %v2247_v58  ;;  %v2322_v57 = vld [vmem:[%s3061_s1 + $0x390] ss:$8 sps:$4 sm:$0xff]   ;;  %v2332_v58 = vld [vmem:[%s3061_s1 + $0x1a4] ss:$8 sps:$4 sm:$0xff]  }
  0x3d   : > { %1452 = vmatprep.subr.bf16.mxu0 %v2249_v59  ;;  %v2336_v59 = vld [vmem:[%s3061_s1 + $0x3a4] ss:$8 sps:$4 sm:$0xff]  }
  0x3f   : > { %1307 = vmatpush1.bf16.msra.mxu1 %v2251_v60  ;;  %v2330_v60 = vld [vmem:[%s3061_s1 + $0x1a0] ss:$8 sps:$4 sm:$0xff]  }
  0x40   : > { %1453 = vmatpush1.bf16.msra.mxu0 %v2252_v61  ;;  %1308 = vmatprep.subr.bf16.mxu1 %v2253_v62  ;;  %v2334_v61 = vld [vmem:[%s3061_s1 + $0x3a0] ss:$8 sps:$4 sm:$0xff]   ;;  %v2339_v62 = vld [vmem:[%s3061_s1 + $0x1b4] ss:$8 sps:$4 sm:$0xff]  }
  0x41   : > { %1454 = vmatprep.subr.bf16.mxu0 %v2255_v63  ;;  %v2342_v63 = vld [vmem:[%s3061_s1 + $0x3b4] ss:$8 sps:$4 sm:$0xff]  }
  0x43   : > { %1309 = vmatpush1.bf16.msra.mxu1 %v2257_v0  ;;  %v2337_v0 = vld [vmem:[%s3061_s1 + $0x1b0] ss:$8 sps:$4 sm:$0xff]  }
  0x44   : > { %1455 = vmatpush1.bf16.msra.mxu0 %v2258_v1  ;;  %1351 = vmatprep.subr.bf16.mxu1 %v2264_v2  ;;  %v2340_v1 = vld [vmem:[%s3061_s1 + $0x3b0] ss:$8 sps:$4 sm:$0xff]   ;;  %v2350_v2 = vld [vmem:[%s3061_s1 + $0x1c4] ss:$8 sps:$4 sm:$0xff]  }
  0x45   : > { %1497 = vmatprep.subr.bf16.mxu0 %v2270_v3  ;;  %v2354_v3 = vld [vmem:[%s3061_s1 + $0x3c4] ss:$8 sps:$4 sm:$0xff]  }
  0x46   : > { %1311 = vmatmul.mubr.bf16.vlgmr.msra.gmra.mrb[0].mxu1 %v2259_v4  ;;  %v2348_v4 = vld [vmem:[%s3061_s1 + $0x1c0] ss:$8 sps:$4 sm:$0xff]  }
  0x47   : > { %1457 = vmatmul.mubr.bf16.vlgmr.msra.gmra.mrb[0].mxu0 %v2265_v6  ;;  %1352 = vmatpush1.bf16.msra.mxu1 %v2262_v5  ;;  %v2352_v5 = vld [vmem:[%s3061_s1 + $0x3c0] ss:$8 sps:$4 sm:$0xff]   ;;  %v2357_v6 = vld [vmem:[%s3061_s1 + $0x1d4] ss:$8 sps:$4 sm:$0xff]  }
  0x48   : > { %1498 = vmatpush1.bf16.msra.mxu0 %v2268_v7  ;;  %1353 = vmatprep.subr.bf16.mxu1 %v2273_v8  ;;  %v2360_v7 = vld [vmem:[%s3061_s1 + $0x3d4] ss:$8 sps:$4 sm:$0xff]   ;;  %v2355_v8 = vld [vmem:[%s3061_s1 + $0x1d0] ss:$8 sps:$4 sm:$0xff]  }
  0x49   : > { %1499 = vmatprep.subr.bf16.mxu0 %v2276_v9  ;;  %1320 = vmatprep.mubr.bf16.mxu1 %v2325_v18  ;;  %v2358_v9 = vld [vmem:[%s3061_s1 + $0x3d0] ss:$8 sps:$4 sm:$0xff]   ;;  %v2387_v18 = vld [vmem:[%s3061_s1 + $0x404] ss:$8 sps:$4 sm:$0xff]  }
  0x4a   : > { %1466 = vmatprep.mubr.bf16.mxu0 %v2327_v19  ;;  %v2379_v19 = vld [vmem:[%s2643_s13 + $0x8] ss:$36 sps:$4 sm:$0xff]  }
  0x4b   : > { %1354 = vmatpush1.bf16.msra.mxu1 %v2271_v10  ;;  %v2368_v10 = vld [vmem:[%s3061_s1 + $0x1e4] ss:$8 sps:$4 sm:$0xff]  }
  0x4c   : > { %1500 = vmatpush1.bf16.msra.mxu0 %v2274_v11  ;;  %1355 = vmatprep.subr.bf16.mxu1 %v2279_v12  ;;  %v2372_v11 = vld [vmem:[%s3061_s1 + $0x3e4] ss:$8 sps:$4 sm:$0xff]   ;;  %v2366_v12 = vld [vmem:[%s3061_s1 + $0x1e0] ss:$8 sps:$4 sm:$0xff]  }
  0x4d   : > { %1501 = vmatprep.subr.bf16.mxu0 %v2282_v13  ;;  %v2370_v13 = vld [vmem:[%s3061_s1 + $0x3e0] ss:$8 sps:$4 sm:$0xff]  }
  0x4e   : > { %1321 = vmatmul.mubr.bf16.gmra.mrb[4].mxu1 %v2329_v20  ;;  %v2382_v20 = vld [vmem:[%s2643_s13 + $0x18] ss:$36 sps:$4 sm:$0xff]  }
  0x4f   : > { %1356 = vmatpush1.bf16.msra.mxu1 %v2277_v14  ;;  %1467 = vmatmul.mubr.bf16.gmra.mrb[4].mxu0 %v2333_v23  ;;  %v2375_v14 = vld [vmem:[%s3061_s1 + $0x1f4] ss:$8 sps:$4 sm:$0xff]  }
  0x50   : > { %1502 = vmatpush1.bf16.msra.mxu0 %v2280_v15  ;;  %1357 = vmatprep.subr.bf16.mxu1 %v2285_v16  ;;  %v2378_v15 = vld [vmem:[%s3061_s1 + $0x3f4] ss:$8 sps:$4 sm:$0xff]   ;;  %v2373_v16 = vld [vmem:[%s3061_s1 + $0x1f0] ss:$8 sps:$4 sm:$0xff]  }
  0x51   : > { %1503 = vmatprep.subr.bf16.mxu0 %v2288_v17  ;;  %1330 = vmatprep.mubr.bf16.mxu1 %v2343_v30  ;;  %v2376_v17 = vld [vmem:[%s3061_s1 + $0x3f0] ss:$8 sps:$4 sm:$0xff]   ;;  %v2402_v30 = vld [vmem:[%s3061_s1 + $0x434] ss:$8 sps:$4 sm:$0xff]  }
  0x52   : > { %1476 = vmatprep.mubr.bf16.mxu0 %v2345_v31  ;;  %v2391_v23 = vld [vmem:[%s2643_s13 + $0x54] ss:$36 sps:$4 sm:$0xff]   ;;  %v2403_v31 = vld [vmem:[%s2643_s13 + $0x9c] ss:$36 sps:$4 sm:$0xff]  }
  0x53   : > { %1358 = vmatpush1.bf16.msra.mxu1 %v2283_v21  ;;  %v2385_v21 = vld [vmem:[%s3061_s1 + $0x400] ss:$8 sps:$4 sm:$0xff]  }
  0x54   : > { %1504 = vmatpush1.bf16.msra.mxu0 %v2286_v22  ;;  %1359 = vmatprep.subr.bf16.mxu1 %v2291_v24  ;;  %v2390_v22 = vld [vmem:[%s3061_s1 + $0x414] ss:$8 sps:$4 sm:$0xff]   ;;  %v2393_v24 = vld [vmem:[%s2643_s13 + $0x64] ss:$36 sps:$4 sm:$0xff]  }
  0x55   : > { %1505 = vmatprep.subr.bf16.mxu0 %v2294_v25  ;;  %v2388_v25 = vld [vmem:[%s3061_s1 + $0x410] ss:$8 sps:$4 sm:$0xff]  }
  0x56   : > { %1331 = vmatmul.mubr.bf16.gmra.mrb[8].mxu1 %v2347_v32  ;;  %v2405_v32 = vld [vmem:[%s2643_s13 + $0xac] ss:$36 sps:$4 sm:$0xff]  }
  0x57   : > { %1360 = vmatpush1.bf16.msra.mxu1 %v2289_v26  ;;  %1477 = vmatmul.mubr.bf16.gmra.mrb[8].mxu0 %v2351_v35  ;;  %v2399_v26 = vld [vmem:[%s3061_s1 + $0x424] ss:$8 sps:$4 sm:$0xff]   ;;  %v2407_v35 = vld [vmem:[%s2643_s13 + $0x98] ss:$36 sps:$4 sm:$0xff]  }
  0x58   : > { %1506 = vmatpush1.bf16.msra.mxu0 %v2292_v27  ;;  %1361 = vmatprep.subr.bf16.mxu1 %v2297_v28  ;;  %v2395_v27 = vld [vmem:[%s2643_s13 + $0x50] ss:$36 sps:$4 sm:$0xff]   ;;  %v2396_v28 = vld [vmem:[%s2643_s13 + $0x60] ss:$36 sps:$4 sm:$0xff]  }
  0x59   : > { %1507 = vmatprep.subr.bf16.mxu0 %v2300_v29  ;;  %1340 = vmatprep.mubr.bf16.mxu1 %v2361_v42  ;;  %v2397_v29 = vld [vmem:[%s3061_s1 + $0x420] ss:$8 sps:$4 sm:$0xff]   ;;  %v2423_v42 = vld [vmem:[%s3061_s1 + $0x464] ss:$8 sps:$4 sm:$0xff]  }
  0x5a   : > { %1486 = vmatprep.mubr.bf16.mxu0 %v2363_v43  ;;  %v2419_v43 = vld [vmem:[%s2643_s13 + $0xe0] ss:$36 sps:$4 sm:$0xff]  }
  0x5b   : > { %1362 = vmatpush1.bf16.msra.mxu1 %v2295_v33  ;;  %v2400_v33 = vld [vmem:[%s3061_s1 + $0x430] ss:$8 sps:$4 sm:$0xff]  }
  0x5c   : > { %1508 = vmatpush1.bf16.msra.mxu0 %v2298_v34  ;;  %1363 = vmatprep.subr.bf16.mxu1 %v2303_v36  ;;  %v2411_v34 = vld [vmem:[%s3061_s1 + $0x444] ss:$8 sps:$4 sm:$0xff]  }
  0x5d   : > { %1509 = vmatprep.subr.bf16.mxu0 %v2306_v37  ;;  %v2408_v36 = vld [vmem:[%s2643_s13 + $0xa8] ss:$36 sps:$4 sm:$0xff]  }
  0x5e   : > { %1341 = vmatmul.mubr.bf16.gmra.mrb[12].mxu1 %v2365_v44  ;;  %v2409_v37 = vld [vmem:[%s3061_s1 + $0x440] ss:$8 sps:$4 sm:$0xff]   ;;  %v2420_v44 = vld [vmem:[%s2643_s13 + $0xf0] ss:$36 sps:$4 sm:$0xff]  }
  0x5f   : > { %1364 = vmatpush1.bf16.msra.mxu1 %v2301_v38  ;;  %1487 = vmatmul.mubr.bf16.gmra.mrb[12].mxu0 %v2369_v47  ;;  %v2414_v38 = vld [vmem:[%s3061_s1 + $0x454] ss:$8 sps:$4 sm:$0xff]   ;;  %v2424_v47 = vld [vmem:[%s3061_s1 + $0x470] ss:$8 sps:$4 sm:$0xff]  }
  0x60   : > { %1510 = vmatpush1.bf16.msra.mxu0 %v2304_v39  ;;  %1365 = vmatprep.subr.bf16.mxu1 %v2309_v40  ;;  %v2415_v39 = vld [vmem:[%s2643_s13 + $0xe4] ss:$36 sps:$4 sm:$0xff]   ;;  %v2417_v40 = vld [vmem:[%s2643_s13 + $0xf4] ss:$36 sps:$4 sm:$0xff]  }
  0x61   : > { %1511 = vmatprep.subr.bf16.mxu0 %v2312_v41  ;;  %1383 = vmatprep.mubr.bf16.mxu1 %v2381_v54  ;;  %v2412_v41 = vld [vmem:[%s3061_s1 + $0x450] ss:$8 sps:$4 sm:$0xff]  }
  0x62   : > { %1529 = vmatprep.mubr.bf16.mxu0 %v2384_v55 }
  0x63   : > { %1366 = vmatpush1.bf16.msra.mxu1 %v2307_v45  ;;  %v2421_v45 = vld [vmem:[%s3061_s1 + $0x460] ss:$8 sps:$4 sm:$0xff]  }
  0x64   : > { %1512 = vmatpush1.bf16.msra.mxu0 %v2310_v46  ;;  %1367 = vmatprep.subr.bf16.mxu1 %v2315_v48  ;;  %v2426_v46 = vld [vmem:[%s3061_s1 + $0x474] ss:$8 sps:$4 sm:$0xff]   ;;  %v2471_v48 = vmov 0  }
  0x65   : > { %1513 = vmatprep.subr.bf16.mxu0 %v2318_v49  ;;  %v2427_v49 = vld [vmem:[%s2643_s13 + $0x20] ss:$36 sps:$4 sm:$0xff]  }
  0x67   : > { %1368 = vmatpush1.bf16.msra.mxu1 %v2313_v50  ;;  %v2428_v50 = vld [vmem:[%s2643_s13 + $0xb0] ss:$36 sps:$4 sm:$0xff]  }
  0x68   : > { %1514 = vmatpush1.bf16.msra.mxu0 %v2316_v51  ;;  %1369 = vmatprep.subr.bf16.mxu1 %v2321_v52  ;;  %v2429_v51 = vld [vmem:[%s2643_s13 + $0x68] ss:$36 sps:$4 sm:$0xff]   ;;  %v2430_v52 = vld [vmem:[%s2643_s13 + $0xf8] ss:$36 sps:$4 sm:$0xff]   ;;  %s1827_s13 = sshll.u32 %s3065_s24, 2 }
  0x69   : > { %1515 = vmatprep.subr.bf16.mxu0 %v2324_v53  ;;  %s175_s18 = scalar_lea.vmem %s3063_s3, %s1827_s13 }
  0x6b   : > { %1370 = vmatpush1.bf16.msra.mxu1 %v2319_v56  ;;  %v364_v56 = vlaneseq }
  0x6c   : > { %1516 = vmatpush1.bf16.msra.mxu0 %v2322_v57  ;;  %1371 = vmatprep.subr.bf16.mxu1 %v2332_v58 }
  0x6d   : > { %1517 = vmatprep.subr.bf16.mxu0 %v2336_v59  ;;  %v365_v58 = vshrl.u32 %v364_v56, 7 }
  0x6f   : > { %1372 = vmatpush1.bf16.msra.mxu1 %v2330_v60 }
  0x70   : > { %1518 = vmatpush1.bf16.msra.mxu0 %v2334_v61  ;;  %1373 = vmatprep.subr.bf16.mxu1 %v2339_v62  ;;  %v366_v62 = vsub.s32 0, %v365_v58 }
  0x71   : > { %1519 = vmatprep.subr.bf16.mxu0 %v2342_v63 }
  0x73   : > { %1374 = vmatpush1.bf16.msra.mxu1 %v2337_v0  ;;  %v362_v0 = vld [vmem:[%s3062_s2] sm:$0x3] }
  0x74   : > { %1520 = vmatpush1.bf16.msra.mxu0 %v2340_v1  ;;  %1375 = vmatprep.subr.bf16.mxu1 %v2350_v2  ;;  %v370_v1 = vsub.s32 1, %v365_v58  ;;  %v2989_v2 = vrot.slane %v362_v0, %v366_v62 }
  0x75   : > { %1521 = vmatprep.subr.bf16.mxu0 %v2354_v3 }
  0x76   : > { %v2991_v3 = vrot.slane %v362_v0, %v370_v1 }
  0x77   : > { %1376 = vmatpush1.bf16.msra.mxu1 %v2348_v4 }
  0x78   : > { %1522 = vmatpush1.bf16.msra.mxu0 %v2352_v5  ;;  %1377 = vmatprep.subr.bf16.mxu1 %v2357_v6 }
  0x79   : > { %1523 = vmatprep.subr.bf16.mxu0 %v2360_v7 }
  0x7b   : > { %1378 = vmatpush1.bf16.msra.mxu1 %v2355_v8 }
  0x7c   : > { %1524 = vmatpush1.bf16.msra.mxu0 %v2358_v9  ;;  %1379 = vmatprep.subr.bf16.mxu1 %v2368_v10 }
  0x7d   : > { %1525 = vmatprep.subr.bf16.mxu0 %v2372_v11 }
  0x7f   : > { %1380 = vmatpush1.bf16.msra.mxu1 %v2366_v12 }
  0x80   : > { %1526 = vmatpush1.bf16.msra.mxu0 %v2370_v13  ;;  %1381 = vmatprep.subr.bf16.mxu1 %v2375_v14 }
  0x81   : > { %1527 = vmatprep.subr.bf16.mxu0 %v2378_v15 }
  0x83   : > { %1382 = vmatpush1.bf16.msra.mxu1 %v2373_v16 }
  0x84   : > { %1528 = vmatpush1.bf16.msra.mxu0 %v2376_v17  ;;  %2057 = vmatprep.subr.bf16.mxu1 %v2387_v18 }
  0x85   : > { %1570 = vmatprep.subr.bf16.mxu0 %v2387_v18 }
  0x86   : > { %1384 = vmatmul.mubr.bf16.vlgmr.msra.gmra.mrb[0].mxu1 %v2379_v19 }
  0x87   : > { %1530 = vmatmul.mubr.bf16.vlgmr.msra.gmra.mrb[0].mxu0 %v2382_v20  ;;  %2065 = vmatpush1.bf16.msra.mxu1 %v2385_v21 }
  0x88   : > { %1571 = vmatpush1.bf16.msra.mxu0 %v2385_v21  ;;  %2058 = vmatprep.subr.bf16.mxu1 %v2390_v22 }
  0x89   : > { %1572 = vmatprep.subr.bf16.mxu0 %v2390_v22  ;;  %1393 = vmatprep.mubr.bf16.mxu1 %v2391_v23 }
  0x8a   : > { %1539 = vmatprep.mubr.bf16.mxu0 %v2393_v24 }
  0x8b   : > { %2066 = vmatpush1.bf16.msra.mxu1 %v2388_v25 }
  0x8c   : > { %1573 = vmatpush1.bf16.msra.mxu0 %v2388_v25  ;;  %2059 = vmatprep.subr.bf16.mxu1 %v2399_v26 }
  0x8d   : > { %1574 = vmatprep.subr.bf16.mxu0 %v2399_v26 }
  0x8e   : > { %1394 = vmatmul.mubr.bf16.gmra.mrb[4].mxu1 %v2395_v27 }
  0x8f   : > { %1540 = vmatmul.mubr.bf16.gmra.mrb[4].mxu0 %v2396_v28  ;;  %2067 = vmatpush1.bf16.msra.mxu1 %v2397_v29 }
  0x90   : > { %1575 = vmatpush1.bf16.msra.mxu0 %v2397_v29  ;;  %2060 = vmatprep.subr.bf16.mxu1 %v2402_v30 }
  0x91   : > { %1576 = vmatprep.subr.bf16.mxu0 %v2402_v30  ;;  %1403 = vmatprep.mubr.bf16.mxu1 %v2403_v31 }
  0x92   : > { %1549 = vmatprep.mubr.bf16.mxu0 %v2405_v32 }
  0x93   : > { %2068 = vmatpush1.bf16.msra.mxu1 %v2400_v33 }
  0x94   : > { %1577 = vmatpush1.bf16.msra.mxu0 %v2400_v33  ;;  %2061 = vmatprep.subr.bf16.mxu1 %v2411_v34 }
  0x95   : > { %1578 = vmatprep.subr.bf16.mxu0 %v2411_v34 }
  0x96   : > { %1404 = vmatmul.mubr.bf16.gmra.mrb[8].mxu1 %v2407_v35 }
  0x97   : > { %1550 = vmatmul.mubr.bf16.gmra.mrb[8].mxu0 %v2408_v36  ;;  %2069 = vmatpush1.bf16.msra.mxu1 %v2409_v37 }
  0x98   : > { %1579 = vmatpush1.bf16.msra.mxu0 %v2409_v37  ;;  %2062 = vmatprep.subr.bf16.mxu1 %v2414_v38 }
  0x99   : > { %1580 = vmatprep.subr.bf16.mxu0 %v2414_v38  ;;  %1413 = vmatprep.mubr.bf16.mxu1 %v2415_v39 }
  0x9a   : > { %1559 = vmatprep.mubr.bf16.mxu0 %v2417_v40 }
  0x9b   : > { %2070 = vmatpush1.bf16.msra.mxu1 %v2412_v41 }
  0x9c   : > { %1581 = vmatpush1.bf16.msra.mxu0 %v2412_v41  ;;  %2063 = vmatprep.subr.bf16.mxu1 %v2423_v42 }
  0x9d   : > { %1582 = vmatprep.subr.bf16.mxu0 %v2423_v42 }
  0x9e   : > { %1414 = vmatmul.mubr.bf16.gmra.mrb[12].mxu1 %v2419_v43 }
  0x9f   : > { %1560 = vmatmul.mubr.bf16.gmra.mrb[12].mxu0 %v2420_v44  ;;  %2071 = vmatpush1.bf16.msra.mxu1 %v2421_v45 }
  0xa0   : > { %1583 = vmatpush1.bf16.msra.mxu0 %v2421_v45  ;;  %2064 = vmatprep.subr.bf16.mxu1 %v2426_v46 }
  0xa1   : > { %1584 = vmatprep.subr.bf16.mxu0 %v2426_v46  ;;  %1602 = vmatprep.mubr.bf16.mxu0 %v2471_v48 }
  0xa2   : > { %1622 = vmatprep.mubr.bf16.mxu1 %v2471_v48 }
  0xa3   : > { %2072 = vmatpush1.bf16.msra.mxu1 %v2424_v47 }
  0xa4   : > { %1585 = vmatpush1.bf16.msra.mxu0 %v2424_v47 }
  0xa6   : > { %1623 = vmatmul.mubr.bf16.vlgmr.msra.gmra.mrb[16].mxu1 %v2428_v50 }
  0xa7   : > { %1603 = vmatmul.mubr.bf16.vlgmr.msra.gmra.mrb[0].mxu0 %v2427_v49  ;;  %1632 = vmatprep.mubr.bf16.mxu1 %v2471_v48 }
  0xa8   : > { %1612 = vmatprep.mubr.bf16.mxu0 %v2471_v48 }
  0xae   : > { %1633 = vmatmul.mubr.bf16.gmra.mrb[20].mxu1 %v2430_v52 }
  0xaf   : > { %1613 = vmatmul.mubr.bf16.gmra.mrb[4].mxu0 %v2429_v51 }
 0x159   : > { %v1385_v53 = vpop.f32.mrb[0].mxu1 }
 0x15a   : > { %v1387_v54 = vpop.f32.mrb[1].mxu1  ;;  %v2073_v36 = vadd.f32 %v1385_v53, %v2989_v2 }
 0x15b   : > { %v1389_v55 = vpop.f32.mrb[2].mxu1  ;;  %v2075_v37 = vadd.f32 %v1387_v54, %v2991_v3 }
 0x15c   : > { %v1391_v57 = vpop.f32.mrb[3].mxu1  ;;  %v2077_v44 = vadd.f32 %v1389_v55, %v2989_v2 }
 0x15d   : > { %v2079_v49 = vadd.f32 %v1391_v57, %v2991_v3 }
 0x161   : > { %v2978_v59 = vpop.f32.mrb[4].mxu1 }
 0x162   : > { %v2980_v60 = vpop.f32.mrb[5].mxu1  ;;  %v2081_v55 = vadd.f32 %v2978_v59, %v2989_v2 }
 0x163   : > { %v2982_v61 = vpop.f32.mrb[6].mxu1  ;;  %v2083_v57 = vadd.f32 %v2980_v60, %v2991_v3 }
 0x164   : > { %v2984_v63 = vpop.f32.mrb[7].mxu1 }
 0x165   : > { %v2087_v60 = vadd.f32 %v2984_v63, %v2991_v3 }
 0x169   : > { %v1405_v4 = vpop.f32.mrb[8].mxu1 }
 0x16a   : > { %v1551_v5 = vpop.f32.mrb[8].mxu0  ;;  %v2089_v6 = vadd.f32 %v1405_v4, %v2989_v2  ;;  %v1407_v7 = vpop.f32.mrb[9].mxu1 }
 0x16b   : > { %v1553_v8 = vpop.f32.mrb[9].mxu0  ;;  %v2092_v9 = vadd.f32 %v1407_v7, %v2991_v3  ;;  %v1409_v10 = vpop.f32.mrb[10].mxu1 }
 0x16c   : > { %v1555_v11 = vpop.f32.mrb[10].mxu0  ;;  %v2090_v12 = vadd.f32 %v2089_v6, %v1551_v5  ;;  %v2095_v13 = vadd.f32 %v1409_v10, %v2989_v2  ;;  %v1411_v14 = vpop.f32.mrb[11].mxu1  ;;  %v2085_v10 = vadd.f32 %v2982_v61, %v2989_v2 }
 0x16d   : > { %v1557_v15 = vpop.f32.mrb[11].mxu0  ;;  %v2093_v16 = vadd.f32 %v2092_v9, %v1553_v8  ;;  %v2098_v17 = vadd.f32 %v1411_v14, %v2991_v3 }
 0x16e   : > { %v2096_v18 = vadd.f32 %v2095_v13, %v1555_v11 }
 0x16f   : > { %v2099_v19 = vadd.f32 %v2098_v17, %v1557_v15 }
 0x171   : > { %v1415_v20 = vpop.f32.mrb[12].mxu1 }
 0x172   : > { %v1561_v21 = vpop.f32.mrb[12].mxu0  ;;  %v2101_v22 = vadd.f32 %v1415_v20, %v2989_v2  ;;  %v1417_v23 = vpop.f32.mrb[13].mxu1 }
 0x173   : > { %v1563_v24 = vpop.f32.mrb[13].mxu0  ;;  %v2104_v25 = vadd.f32 %v1417_v23, %v2991_v3  ;;  %v1419_v26 = vpop.f32.mrb[14].mxu1 }
 0x174   : > { %v1565_v27 = vpop.f32.mrb[14].mxu0  ;;  %v2102_v28 = vadd.f32 %v2101_v22, %v1561_v21  ;;  %v2107_v29 = vadd.f32 %v1419_v26, %v2989_v2  ;;  %v1421_v30 = vpop.f32.mrb[15].mxu1 }
 0x175   : > { %v1567_v31 = vpop.f32.mrb[15].mxu0  ;;  %v2105_v32 = vadd.f32 %v2104_v25, %v1563_v24  ;;  %v2110_v33 = vadd.f32 %v1421_v30, %v2991_v3 }
 0x176   : > { %v2108_v34 = vadd.f32 %v2107_v29, %v1565_v27 }
 0x177   : > { %v2111_v35 = vadd.f32 %v2110_v33, %v1567_v31 }
 0x179   : > { %v1624_v39 = vpop.f32.mrb[16].mxu1 }
 0x17a   : > { %v1604_v38 = vpop.f32.mrb[0].mxu0  ;;  %v3005_v41 = vadd.f32 %v2090_v12, %v1624_v39  ;;  %v1626_v43 = vpop.f32.mrb[17].mxu1 }
 0x17b   : > { %v3003_v40 = vadd.f32 %v2073_v36, %v1604_v38  ;;  %v1606_v42 = vpop.f32.mrb[1].mxu0  ;;  %v2094_v46 = vadd.f32 %v2093_v16, %v1626_v43  ;;  %v1628_v48 = vpop.f32.mrb[18].mxu1 }
 0x17c   : > { %v2076_v45 = vadd.f32 %v2075_v37, %v1606_v42  ;;  %v1608_v47 = vpop.f32.mrb[2].mxu0  ;;  %v3011_v53 = vadd.f32 %v2096_v18, %v1628_v48  ;;  %v1630_v56 = vpop.f32.mrb[19].mxu1  ;;  %vm1647_vm1 = vcmp.ge.f32.partialorder %v3005_v41, 0.0 }
 0x17d   : > { %v2012_v51 = vmul.f32 -1.442695, %v2094_v46  ;;  %v3009_v52 = vadd.f32 %v2077_v44, %v1608_v47  ;;  %v1610_v54 = vpop.f32.mrb[3].mxu0  ;;  %v2100_v62 = vadd.f32 %v2099_v19, %v1630_v56  ;;  %v1651_v30 = vmul.f32 0.2, %v3003_v40 }
 0x17e   : > { %v2008_v50 = vmul.f32 -1.442695, %v2076_v45  ;;  %v2080_v58 = vadd.f32 %v2079_v49, %v1610_v54  ;;  %vm1643_vm0 = vcmp.ge.f32.partialorder %v3003_v40, 0.0  ;;  %v1656_v42 = vmul.f32 0.2, %v3011_v53 }
 0x17f   : > { %v2013_v1 = vmul.f32 -1.442695, %v2100_v62  ;;  %v1652_v36 = vmul.f32 0.2, %v3009_v52  ;;  %v1659_v39 = vsel %vm1643_vm0, %v3003_v40, %v1651_v30  ;;  %vm1644_vm2 = vcmp.ge.f32.partialorder %v3009_v52, 0.0 }
 0x180   : > { %2431 = vpow2.f32 %v2008_v50  ;;  %v2009_v0 = vmul.f32 -1.442695, %v2080_v58  ;;  %vm1648_vm3 = vcmp.ge.f32.partialorder %v3011_v53, 0.0 }
 0x181   : > { %2433 = vpow2.f32 %v2012_v51  ;;  %v1634_v5 = vpop.f32.mrb[20].mxu1  ;;  %v1660_v49 = vsel %vm1644_vm2, %v3009_v52, %v1652_v36  ;;  %v1664_v40 = vsel %vm1648_vm3, %v3011_v53, %v1656_v42 }
 0x182   : > { %v1614_v4 = vpop.f32.mrb[4].mxu0  ;;  %2435 = vpow2.f32 %v2009_v0  ;;  %v3019_v7 = vadd.f32 %v2102_v28, %v1634_v5  ;;  %v1636_v9 = vpop.f32.mrb[21].mxu1 }
 0x183   : > { %v3017_v6 = vadd.f32 %v2081_v55, %v1614_v4  ;;  %v1616_v8 = vpop.f32.mrb[5].mxu0  ;;  %2437 = vpow2.f32 %v2013_v1  ;;  %v2106_v11 = vadd.f32 %v2105_v32, %v1636_v9  ;;  %v1638_v13 = vpop.f32.mrb[22].mxu1  ;;  %v1655_v32 = vmul.f32 0.2, %v3005_v41 }
 0x184   : > { %v2084_v59 = vadd.f32 %v2083_v57, %v1616_v8  ;;  %v1618_v12 = vpop.f32.mrb[6].mxu0  ;;  %v3027_v17 = vadd.f32 %v2108_v34, %v1638_v13  ;;  %v1640_v19 = vpop.f32.mrb[23].mxu1  ;;  %v1657_v56 = vmul.f32 0.2, %v3019_v7  ;;  %vm1649_vm5 = vcmp.ge.f32.partialorder %v3019_v7, 0.0 }
 0x185   : > { %v2014_v15 = vmul.f32 -1.442695, %v2106_v11  ;;  %v3025_v16 = vadd.f32 %v2085_v10, %v1618_v12  ;;  %v1620_v18 = vpop.f32.mrb[7].mxu0  ;;  %v2112_v21 = vadd.f32 %v2111_v35, %v1640_v19  ;;  %v1663_v45 = vsel %vm1647_vm1, %v3005_v41, %v1655_v32 }
 0x186   : > { %v2010_v14 = vmul.f32 -1.442695, %v2084_v59  ;;  %v2088_v20 = vadd.f32 %v2087_v60, %v1620_v18  ;;  %v1653_v54 = vmul.f32 0.2, %v3017_v6  ;;  %vm1645_vm4 = vcmp.ge.f32.partialorder %v3017_v6, 0.0 }
 0x187   : > { %v2015_v2 = vmul.f32 -1.442695, %v2112_v21  ;;  %v1654_v52 = vmul.f32 0.2, %v3025_v16  ;;  %vm1646_vm6 = vcmp.ge.f32.partialorder %v3025_v16, 0.0  ;;  %v1665_v57 = vsel %vm1649_vm5, %v3019_v7, %v1657_v56 }
 0x188   : > { %2439 = vpow2.f32 %v2010_v14  ;;  %v2011_v61 = vmul.f32 -1.442695, %v2088_v20  ;;  %v1661_v53 = vsel %vm1645_vm4, %v3017_v6, %v1653_v54  ;;  %v1658_v0 = vmul.f32 0.2, %v3027_v17 }
 0x189   : > { %2441 = vpow2.f32 %v2014_v15  ;;  %vm1650_vm7 = vcmp.ge.f32.partialorder %v3027_v17, 0.0  ;;  %v1662_v9 = vsel %vm1646_vm6, %v3025_v16, %v1654_v52 }
 0x18a   : > { %v2432_v22 = vpop.eup %2431  ;;  %2443 = vpow2.f32 %v2011_v61  ;;  %v1666_v59 = vsel %vm1650_vm7, %v3027_v17, %v1658_v0 }
 0x18b   : > { %v2434_v23 = vpop.eup %2433  ;;  %v1691_v24 = vadd.f32 1.0, %v2432_v22  ;;  %2445 = vpow2.f32 %v2015_v2 }
 0x18c   : > { %v1695_v25 = vadd.f32 1.0, %v2434_v23  ;;  %v2436_v63 = vpop.eup %2435 }
 0x18d   : > { %2447 = vrcp.f32 %v1691_v24  ;;  %v2438_v3 = vpop.eup %2437  ;;  %v1692_v26 = vadd.f32 1.0, %v2436_v63 }
 0x18e   : > { %2449 = vrcp.f32 %v1695_v25  ;;  %v1696_v27 = vadd.f32 1.0, %v2438_v3 }
 0x18f   : > { %2451 = vrcp.f32 %v1692_v26 }
 0x190   : > { %2453 = vrcp.f32 %v1696_v27 }
 0x192   : > { %v2440_v28 = vpop.eup %2439 }
 0x193   : > { %v2442_v29 = vpop.eup %2441  ;;  %v1693_v31 = vadd.f32 1.0, %v2440_v28 }
 0x194   : > { %v1697_v33 = vadd.f32 1.0, %v2442_v29  ;;  %v2444_v34 = vpop.eup %2443 }
 0x195   : > { %2455 = vrcp.f32 %v1693_v31  ;;  %v2446_v35 = vpop.eup %2445  ;;  %v1694_v37 = vadd.f32 1.0, %v2444_v34 }
 0x196   : > { %2457 = vrcp.f32 %v1697_v33  ;;  %v1698_v43 = vadd.f32 1.0, %v2446_v35 }
 0x197   : > { %v2448_v38 = vpop.eup %2447  ;;  %2459 = vrcp.f32 %v1694_v37 }
 0x198   : > { %v2450_v44 = vpop.eup %2449  ;;  %v1715_v46 = vmul.f32 %v2448_v38, %v1659_v39  ;;  %2461 = vrcp.f32 %v1698_v43 }
 0x199   : > { %v1719_v47 = vmul.f32 %v2450_v44, %v1663_v45  ;;  %v2452_v48 = vpop.eup %2451 }
 0x19a   : > { %v2454_v50 = vpop.eup %2453  ;;  %v1716_v51 = vmul.f32 %v2452_v48, %v1660_v49 }
 0x19b   : > { %v1720_v41 = vmul.f32 %v2454_v50, %v1664_v40 }
 0x19c   : > { %v2037_v58 = vpack.c.bf16 %v1716_v51, %v1715_v46 }
 0x19d   : > { %v2047_v62 = vpack.c.bf16 %v1720_v41, %v1719_v47 }
 0x19e   : > { %2038 = vst [vmem:[%s175_s18] sm:$0xff] %v2037_v58  }
 0x19f   : > { %v2456_v55 = vpop.eup %2455  ;;  %2055 = vst [vmem:[%s175_s18 + $0x10] sm:$0xff] %v2047_v62  }
 0x1a0   : > { %v2458_v1 = vpop.eup %2457  ;;  %v1717_v4 = vmul.f32 %v2456_v55, %v1661_v53 }
 0x1a1   : > { %v1721_v5 = vmul.f32 %v2458_v1, %v1665_v57  ;;  %v2460_v8 = vpop.eup %2459 }
 0x1a2   : > { %v2462_v10 = vpop.eup %2461  ;;  %v1718_v11 = vmul.f32 %v2460_v8, %v1662_v9 }
 0x1a3   : > { %v1722_v6 = vmul.f32 %v2462_v10, %v1666_v59 }
 0x1a4   : > { %v2042_v12 = vpack.c.bf16 %v1718_v11, %v1717_v4 }
 0x1a5   : > { %v2052_v13 = vpack.c.bf16 %v1722_v6, %v1721_v5 }
 0x1a6   : > { %2054 = vst [vmem:[%s175_s18 + $0x8] sm:$0xff] %v2042_v12  }
 0x1a7   : > { %2056 = vst [vmem:[%s175_s18 + $0x18] sm:$0xff] %v2052_v13  }
 0x1a8 PF: > { %s13_s12 = sadd.s32 1, %s2469_s12  }
 0x1a9   : > { %p10_p4 = scmp.ge.s32.totalorder %s13_s12, 4  }
 0x1ab   :  { %12 = sbr.rel (!%p10_p4) target bundleno = 1 (0x1), region = 62 }

// kernel: _lambda_.50
= control target key start
LH: loop header
LB: loop body
LE: loop exit
PB: predicated region body
PF: predicated region fallthrough
CT: control target
= control target key end

     0   :  { %s3282_s12 = smov 0   ;;  %s4090_s0 = inlined_call_operand.vmem [shape: bf16[512,640], index: 0, kind: input, shape index: {}]   ;;  %s4091_s1 = inlined_call_operand.vmem [shape: bf16[640,256], index: 1, kind: input, shape index: {}]   ;;  %s4092_s2 = inlined_call_operand.vmem [shape: f32[1,256], index: 2, kind: input, shape index: {}]   ;;  %s4093_s3 = inlined_call_operand.vmem [shape: bf16[512,128], index: 3, kind: output, shape index: {}]  }
   0x1 LB: > { %s2297_s13 = sadd.s32 4294967295, %s3259_s12   ;;  %p2301_p0 = scmp.ge.s32.totalorder %s3259_s12, 1  ;;  %s3259_s12 = sphi %s3282_s12, %s13_s12  }
   0x2   : > { %p139_p1 = scmp.lt.s32.totalorder %s3259_s12, 3 }
   0x4   : > { %p140_p2 = pnand %p2301_p0, %p139_p1 }
   0x5   : > { %v2893_v0 = vld [vmem:[%s4091_s1 + $0x4] ss:$8 sps:$4 sm:$0xff] (!%p140_p2)   ;;  %v2897_v2 = vld [vmem:[%s4091_s1] ss:$8 sps:$4 sm:$0xff] (!%p140_p2)   ;;  %v2899_v4 = vld [vmem:[%s4091_s1 + $0x14] ss:$8 sps:$4 sm:$0xff] (!%p140_p2)  }
   0x6   : > { %143 = sbr.rel (%p140_p2) target bundleno = 505 (0x1f9), region = 32  ;;  %v3296_v1 = vld [vmem:[%s4091_s1 + $0x104] ss:$8 sps:$4 sm:$0xff] (!%p140_p2)   ;;  %1182 = vmatprep.subr.bf16.mxu1 (!%p140_p2), %v2893_v0  ;;  %v3304_v3 = vld [vmem:[%s4091_s1 + $0x100] ss:$8 sps:$4 sm:$0xff] (!%p140_p2)   ;;  %s2302_s24 = sshll.u32 (!%p140_p2), %s2297_s13, 5 }
   0x7   : > { %1375 = vmatprep.subr.bf16.mxu0 (!%p140_p2), %v3296_v1  ;;  %1183 = vmatpush1.bf16.msra.mxu1 (!%p140_p2), %v2897_v2  ;;  %v3314_v5 = vld [vmem:[%s4091_s1 + $0x114] ss:$8 sps:$4 sm:$0xff] (!%p140_p2)   ;;  %v2903_v6 = vld [vmem:[%s4091_s1 + $0x10] ss:$8 sps:$4 sm:$0xff] (!%p140_p2)   ;;  %v2905_v8 = vld [vmem:[%s4091_s1 + $0x24] ss:$8 sps:$4 sm:$0xff] (!%p140_p2)  }
   0x8   : > { %1376 = vmatpush1.bf16.msra.mxu0 (!%p140_p2), %v3304_v3  ;;  %1184 = vmatprep.subr.bf16.mxu1 (!%p140_p2), %v2899_v4  ;;  %v3322_v7 = vld [vmem:[%s4091_s1 + $0x110] ss:$8 sps:$4 sm:$0xff] (!%p140_p2)   ;;  %v3331_v9 = vld [vmem:[%s4091_s1 + $0x124] ss:$8 sps:$4 sm:$0xff] (!%p140_p2)   ;;  %v2909_v10 = vld [vmem:[%s4091_s1 + $0x20] ss:$8 sps:$4 sm:$0xff] (!%p140_p2)  }
   0x9   : > { %1377 = vmatprep.subr.bf16.mxu0 (!%p140_p2), %v3314_v5  ;;  %v3339_v11 = vld [vmem:[%s4091_s1 + $0x120] ss:$8 sps:$4 sm:$0xff] (!%p140_p2)   ;;  %v2911_v12 = vld [vmem:[%s4091_s1 + $0x34] ss:$8 sps:$4 sm:$0xff] (!%p140_p2)   ;;  %v2915_v14 = vld [vmem:[%s4091_s1 + $0x30] ss:$8 sps:$4 sm:$0xff] (!%p140_p2)  }
   0xa   : > { %v3349_v13 = vld [vmem:[%s4091_s1 + $0x134] ss:$8 sps:$4 sm:$0xff] (!%p140_p2)   ;;  %v3358_v15 = vld [vmem:[%s4091_s1 + $0x130] ss:$8 sps:$4 sm:$0xff] (!%p140_p2)   ;;  %v2917_v16 = vld [vmem:[%s4091_s1 + $0x44] ss:$8 sps:$4 sm:$0xff] (!%p140_p2)  }
   0xb   : > { %1185 = vmatpush1.bf16.msra.mxu1 (!%p140_p2), %v2903_v6  ;;  %v3367_v17 = vld [vmem:[%s4091_s1 + $0x144] ss:$8 sps:$4 sm:$0xff] (!%p140_p2)   ;;  %v2921_v18 = vld [vmem:[%s4091_s1 + $0x40] ss:$8 sps:$4 sm:$0xff] (!%p140_p2)   ;;  %v2923_v20 = vld [vmem:[%s4091_s1 + $0x54] ss:$8 sps:$4 sm:$0xff] (!%p140_p2)  }
   0xc   : > { %1378 = vmatpush1.bf16.msra.mxu0 (!%p140_p2), %v3322_v7  ;;  %1186 = vmatprep.subr.bf16.mxu1 (!%p140_p2), %v2905_v8  ;;  %v3375_v19 = vld [vmem:[%s4091_s1 + $0x140] ss:$8 sps:$4 sm:$0xff] (!%p140_p2)   ;;  %v3385_v21 = vld [vmem:[%s4091_s1 + $0x154] ss:$8 sps:$4 sm:$0xff] (!%p140_p2)   ;;  %v2927_v22 = vld [vmem:[%s4091_s1 + $0x50] ss:$8 sps:$4 sm:$0xff] (!%p140_p2)  }
   0xd   : > { %1379 = vmatprep.subr.bf16.mxu0 %v3331_v9  ;;  %v3394_v23 = vld [vmem:[%s4091_s1 + $0x150] ss:$8 sps:$4 sm:$0xff]   ;;  %v2929_v24 = vld [vmem:[%s4091_s1 + $0x64] ss:$8 sps:$4 sm:$0xff]   ;;  %v2933_v26 = vld [vmem:[%s4091_s1 + $0x60] ss:$8 sps:$4 sm:$0xff]  }
   0xe   : > { %v3403_v25 = vld [vmem:[%s4091_s1 + $0x164] ss:$8 sps:$4 sm:$0xff]   ;;  %v3411_v27 = vld [vmem:[%s4091_s1 + $0x160] ss:$8 sps:$4 sm:$0xff]   ;;  %v2935_v28 = vld [vmem:[%s4091_s1 + $0x74] ss:$8 sps:$4 sm:$0xff]  }
   0xf   : > { %1187 = vmatpush1.bf16.msra.mxu1 %v2909_v10  ;;  %v3421_v29 = vld [vmem:[%s4091_s1 + $0x174] ss:$8 sps:$4 sm:$0xff]   ;;  %v2939_v30 = vld [vmem:[%s4091_s1 + $0x70] ss:$8 sps:$4 sm:$0xff]   ;;  %v2941_v32 = vld [vmem:[%s4091_s1 + $0x84] ss:$8 sps:$4 sm:$0xff]  }
  0x10   : > { %1380 = vmatpush1.bf16.msra.mxu0 %v3339_v11  ;;  %1188 = vmatprep.subr.bf16.mxu1 %v2911_v12  ;;  %v3432_v31 = vld [vmem:[%s4091_s1 + $0x170] ss:$8 sps:$4 sm:$0xff]   ;;  %p165_p3 = scmp.lt.s32.totalorder %s2302_s24, 63  ;;  %v3441_v33 = vld [vmem:[%s4091_s1 + $0x184] ss:$8 sps:$4 sm:$0xff]  }
  0x11   : > { %1381 = vmatprep.subr.bf16.mxu0 %v3349_v13  ;;  %v2945_v34 = vld [vmem:[%s4091_s1 + $0x80] ss:$8 sps:$4 sm:$0xff]   ;;  %v2947_v36 = vld [vmem:[%s4091_s1 + $0x94] ss:$8 sps:$4 sm:$0xff]   ;;  %v2951_v38 = vld [vmem:[%s4091_s1 + $0x90] ss:$8 sps:$4 sm:$0xff]  }
  0x12   : > { %v3449_v35 = vld [vmem:[%s4091_s1 + $0x180] ss:$8 sps:$4 sm:$0xff]   ;;  %s4095_s24 = smov (!%p165_p3, %s2302_s24), 63  ;;  %v3461_v37 = vld [vmem:[%s4091_s1 + $0x194] ss:$8 sps:$4 sm:$0xff]  }
  0x13   : > { %1189 = vmatpush1.bf16.msra.mxu1 %v2915_v14  ;;  %v3470_v39 = vld [vmem:[%s4091_s1 + $0x190] ss:$8 sps:$4 sm:$0xff]   ;;  %v2953_v40 = vld [vmem:[%s4091_s1 + $0xa4] ss:$8 sps:$4 sm:$0xff]   ;;  %s2883_s21 = smul.u32 20, %s4095_s24  ;;  %s2305_s4 = sshll.u32 %s4095_s24, 2 }
  0x14   : > { %1382 = vmatpush1.bf16.msra.mxu0 %v3358_v15  ;;  %1190 = vmatprep.subr.bf16.mxu1 %v2917_v16  ;;  %v3480_v41 = vld [vmem:[%s4091_s1 + $0x1a4] ss:$8 sps:$4 sm:$0xff]   ;;  %v2957_v42 = vld [vmem:[%s4091_s1 + $0xa0] ss:$8 sps:$4 sm:$0xff]   ;;  %v2959_v44 = vld [vmem:[%s4091_s1 + $0xb4] ss:$8 sps:$4 sm:$0xff]   ;;  %s3872_s24 = scalar_lea.vmem %s4093_s3, %s2305_s4 }
  0x15   : > { %1383 = vmatprep.subr.bf16.mxu0 %v3367_v17  ;;  %v3488_v43 = vld [vmem:[%s4091_s1 + $0x1a0] ss:$8 sps:$4 sm:$0xff]   ;;  %s3497_s5 = scalar_lea.vmem %s4090_s0, %s2883_s21  ;;  %v3503_v45 = vld [vmem:[%s4091_s1 + $0x1b4] ss:$8 sps:$4 sm:$0xff]   ;;  %v2963_v46 = vld [vmem:[%s4091_s1 + $0xb0] ss:$8 sps:$4 sm:$0xff]  }
  0x16   : > { %v3511_v47 = vld [vmem:[%s4091_s1 + $0x1b0] ss:$8 sps:$4 sm:$0xff]   ;;  %v2965_v48 = vld [vmem:[%s4091_s1 + $0xc4] ss:$8 sps:$4 sm:$0xff]   ;;  %v2969_v52 = vld [vmem:[%s4091_s1 + $0xc0] ss:$8 sps:$4 sm:$0xff]  }
  0x17   : > { %1191 = vmatpush1.bf16.msra.mxu1 %v2921_v18  ;;  %v2991_v49 = vld [vmem:[%s3497_s5 + $0x4] ss:$20 sps:$4 sm:$0xff]   ;;  %v2994_v51 = vld [vmem:[%s3497_s5 + $0xc] ss:$20 sps:$4 sm:$0xff]   ;;  %v2971_v54 = vld [vmem:[%s4091_s1 + $0xd4] ss:$8 sps:$4 sm:$0xff]  }
  0x18   : > { %1384 = vmatpush1.bf16.msra.mxu0 %v3375_v19  ;;  %1192 = vmatprep.subr.bf16.mxu1 %v2923_v20  ;;  %v3521_v50 = vld [vmem:[%s4091_s1 + $0x1c4] ss:$8 sps:$4 sm:$0xff]   ;;  %v3532_v53 = vld [vmem:[%s4091_s1 + $0x1c0] ss:$8 sps:$4 sm:$0xff]   ;;  %v3541_v55 = vld [vmem:[%s4091_s1 + $0x1d4] ss:$8 sps:$4 sm:$0xff]  }
  0x19   : > { %1385 = vmatprep.subr.bf16.mxu0 %v3385_v21  ;;  %1214 = vmatprep.mubr.bf16.mxu1 %v2991_v49  ;;  %v2975_v56 = vld [vmem:[%s4091_s1 + $0xd0] ss:$8 sps:$4 sm:$0xff]   ;;  %v2977_v58 = vld [vmem:[%s4091_s1 + $0xe4] ss:$8 sps:$4 sm:$0xff]   ;;  %v2981_v60 = vld [vmem:[%s4091_s1 + $0xe0] ss:$8 sps:$4 sm:$0xff]  }
  0x1a   : > { %1407 = vmatprep.mubr.bf16.mxu0 %v2994_v51  ;;  %v3550_v57 = vld [vmem:[%s4091_s1 + $0x1d0] ss:$8 sps:$4 sm:$0xff]   ;;  %v3559_v59 = vld [vmem:[%s4091_s1 + $0x1e4] ss:$8 sps:$4 sm:$0xff]   ;;  %v3568_v61 = vld [vmem:[%s4091_s1 + $0x1e0] ss:$8 sps:$4 sm:$0xff]  }
  0x1b   : > { %1193 = vmatpush1.bf16.msra.mxu1 %v2927_v22  ;;  %v2983_v62 = vld [vmem:[%s4091_s1 + $0xf4] ss:$8 sps:$4 sm:$0xff]   ;;  %v2987_v0 = vld [vmem:[%s4091_s1 + $0xf0] ss:$8 sps:$4 sm:$0xff]   ;;  %v2997_v4 = vld [vmem:[%s4091_s1 + $0x204] ss:$8 sps:$4 sm:$0xff]  }
  0x1c   : > { %1386 = vmatpush1.bf16.msra.mxu0 %v3394_v23  ;;  %1194 = vmatprep.subr.bf16.mxu1 %v2929_v24  ;;  %v3577_v63 = vld [vmem:[%s4091_s1 + $0x1f4] ss:$8 sps:$4 sm:$0xff]   ;;  %v3586_v2 = vld [vmem:[%s4091_s1 + $0x1f0] ss:$8 sps:$4 sm:$0xff]   ;;  %v2995_v10 = vld [vmem:[%s4091_s1 + $0x200] ss:$8 sps:$4 sm:$0xff]  }
  0x1d   : > { %1387 = vmatprep.subr.bf16.mxu0 %v3403_v25  ;;  %v2989_v6 = vld [vmem:[%s3497_s5] ss:$20 sps:$4 sm:$0xff]   ;;  %v2992_v8 = vld [vmem:[%s3497_s5 + $0x8] ss:$20 sps:$4 sm:$0xff]   ;;  %v3004_v18 = vld [vmem:[%s4091_s1 + $0x210] ss:$8 sps:$4 sm:$0xff]  }
  0x1e   : > { %v2998_v12 = vld [vmem:[%s3497_s5 + $0x2c] ss:$20 sps:$4 sm:$0xff]   ;;  %v3000_v14 = vld [vmem:[%s3497_s5 + $0x34] ss:$20 sps:$4 sm:$0xff]   ;;  %v3003_v22 = vld [vmem:[%s3497_s5 + $0x30] ss:$20 sps:$4 sm:$0xff]  }
  0x1f   : > { %1195 = vmatpush1.bf16.msra.mxu1 %v2933_v26  ;;  %v3006_v16 = vld [vmem:[%s4091_s1 + $0x214] ss:$8 sps:$4 sm:$0xff]   ;;  %v3013_v26 = vld [vmem:[%s4091_s1 + $0x220] ss:$8 sps:$4 sm:$0xff]  }
  0x20   : > { %1388 = vmatpush1.bf16.msra.mxu0 %v3411_v27  ;;  %1196 = vmatprep.subr.bf16.mxu1 %v2935_v28  ;;  %v3002_v20 = vld [vmem:[%s3497_s5 + $0x28] ss:$20 sps:$4 sm:$0xff]   ;;  %v3033_v28 = vld [vmem:[%s4091_s1 + $0x244] ss:$8 sps:$4 sm:$0xff]  }
  0x21   : > { %1389 = vmatprep.subr.bf16.mxu0 %v3421_v29  ;;  %v3009_v24 = vld [vmem:[%s3497_s5 + $0x5c] ss:$20 sps:$4 sm:$0xff]   ;;  %v3043_v49 = vld [vmem:[%s3497_s5 + $0xf4] ss:$20 sps:$4 sm:$0xff]  }
  0x22   : > { %v3045_v51 = vld [vmem:[%s3497_s5 + $0xfc] ss:$20 sps:$4 sm:$0xff]  }
  0x23   : > { %1197 = vmatpush1.bf16.msra.mxu1 %v2939_v30  ;;  %v3012_v30 = vld [vmem:[%s3497_s5 + $0x58] ss:$20 sps:$4 sm:$0xff]  }
  0x24   : > { %1390 = vmatpush1.bf16.msra.mxu0 %v3432_v31  ;;  %1198 = vmatprep.subr.bf16.mxu1 %v2941_v32  ;;  %v3016_v32 = vld [vmem:[%s3497_s5 + $0x7c] ss:$20 sps:$4 sm:$0xff]  }
  0x25   : > { %1391 = vmatprep.subr.bf16.mxu0 %v3441_v33 }
  0x27   : > { %1199 = vmatpush1.bf16.msra.mxu1 %v2945_v34  ;;  %v3018_v34 = vld [vmem:[%s3497_s5 + $0x84] ss:$20 sps:$4 sm:$0xff]  }
  0x28   : > { %1392 = vmatpush1.bf16.msra.mxu0 %v3449_v35  ;;  %1200 = vmatprep.subr.bf16.mxu1 %v2947_v36  ;;  %v3040_v36 = vld [vmem:[%s4091_s1 + $0x250] ss:$8 sps:$4 sm:$0xff]  }
  0x29   : > { %1393 = vmatprep.subr.bf16.mxu0 %v3461_v37 }
  0x2b   : > { %1201 = vmatpush1.bf16.msra.mxu1 %v2951_v38  ;;  %v3021_v38 = vld [vmem:[%s3497_s5 + $0x80] ss:$20 sps:$4 sm:$0xff]  }
  0x2c   : > { %1394 = vmatpush1.bf16.msra.mxu0 %v3470_v39  ;;  %1202 = vmatprep.subr.bf16.mxu1 %v2953_v40  ;;  %v3025_v40 = vld [vmem:[%s3497_s5 + $0xa4] ss:$20 sps:$4 sm:$0xff]  }
  0x2d   : > { %1395 = vmatprep.subr.bf16.mxu0 %v3480_v41 }
  0x2f   : > { %1203 = vmatpush1.bf16.msra.mxu1 %v2957_v42  ;;  %v3027_v42 = vld [vmem:[%s3497_s5 + $0xac] ss:$20 sps:$4 sm:$0xff]  }
  0x30   : > { %1396 = vmatpush1.bf16.msra.mxu0 %v3488_v43  ;;  %1204 = vmatprep.subr.bf16.mxu1 %v2959_v44  ;;  %v3029_v44 = vld [vmem:[%s3497_s5 + $0xa0] ss:$20 sps:$4 sm:$0xff]  }
  0x31   : > { %1397 = vmatprep.subr.bf16.mxu0 %v3503_v45 }
  0x33   : > { %1205 = vmatpush1.bf16.msra.mxu1 %v2963_v46  ;;  %v3034_v46 = vld [vmem:[%s3497_s5 + $0xcc] ss:$20 sps:$4 sm:$0xff]  }
  0x34   : > { %1398 = vmatpush1.bf16.msra.mxu0 %v3511_v47  ;;  %1206 = vmatprep.subr.bf16.mxu1 %v2965_v48  ;;  %v3036_v48 = vld [vmem:[%s3497_s5 + $0xd4] ss:$20 sps:$4 sm:$0xff]  }
  0x35   : > { %1399 = vmatprep.subr.bf16.mxu0 %v3521_v50 }
  0x37   : > { %1207 = vmatpush1.bf16.msra.mxu1 %v2969_v52  ;;  %v3065_v52 = vld [vmem:[%s3497_s5 + $0x16c] ss:$20 sps:$4 sm:$0xff]  }
  0x38   : > { %1400 = vmatpush1.bf16.msra.mxu0 %v3532_v53  ;;  %1208 = vmatprep.subr.bf16.mxu1 %v2971_v54  ;;  %v3068_v54 = vld [vmem:[%s3497_s5 + $0x38] ss:$20 sps:$4 sm:$0xff]  }
  0x39   : > { %1401 = vmatprep.subr.bf16.mxu0 %v3541_v55 }
  0x3b   : > { %1209 = vmatpush1.bf16.msra.mxu1 %v2975_v56  ;;  %v3071_v56 = vld [vmem:[%s3497_s5 + $0x190] ss:$20 sps:$4 sm:$0xff]  }
  0x3c   : > { %1402 = vmatpush1.bf16.msra.mxu0 %v3550_v57  ;;  %1210 = vmatprep.subr.bf16.mxu1 %v2977_v58  ;;  %v3073_v58 = vld [vmem:[%s3497_s5 + $0x1bc] ss:$20 sps:$4 sm:$0xff]  }
  0x3d   : > { %1403 = vmatprep.subr.bf16.mxu0 %v3559_v59 }
  0x3f   : > { %1211 = vmatpush1.bf16.msra.mxu1 %v2981_v60  ;;  %v3076_v60 = vld [vmem:[%s3497_s5 + $0x88] ss:$20 sps:$4 sm:$0xff]  }
  0x40   : > { %1404 = vmatpush1.bf16.msra.mxu0 %v3568_v61  ;;  %1212 = vmatprep.subr.bf16.mxu1 %v2983_v62  ;;  %v3079_v62 = vld [vmem:[%s3497_s5 + $0x1e0] ss:$20 sps:$4 sm:$0xff]  }
  0x41   : > { %1405 = vmatprep.subr.bf16.mxu0 %v3577_v63 }
  0x43   : > { %1213 = vmatpush1.bf16.msra.mxu1 %v2987_v0  ;;  %v3081_v0 = vld [vmem:[%s3497_s5 + $0x20c] ss:$20 sps:$4 sm:$0xff]  }
  0x44   : > { %1406 = vmatpush1.bf16.msra.mxu0 %v3586_v2  ;;  %2659 = vmatprep.subr.bf16.mxu1 %v3296_v1  ;;  %v3015_v1 = vld [vmem:[%s4091_s1 + $0x224] ss:$8 sps:$4 sm:$0xff]  }
  0x45   : > { %1568 = vmatprep.subr.bf16.mxu0 %v2997_v4  ;;  %v3084_v4 = vld [vmem:[%s3497_s5 + $0xd8] ss:$20 sps:$4 sm:$0xff]  }
  0x46   : > { %1215 = vmatmul.mubr.bf16.vlgmr.msra.gmra.mrb[0].mxu1 %v2989_v6  ;;  %v3085_v6 = vld [vmem:[%s3497_s5 + $0x234] ss:$20 sps:$4 sm:$0xff]  }
  0x47   : > { %1408 = vmatmul.mubr.bf16.vlgmr.msra.gmra.mrb[0].mxu0 %v2992_v8  ;;  %2675 = vmatpush1.bf16.msra.mxu1 %v3304_v3  ;;  %v3007_v3 = vld [vmem:[%s3497_s5 + $0x54] ss:$20 sps:$4 sm:$0xff]   ;;  %v3087_v8 = vld [vmem:[%s3497_s5 + $0x230] ss:$20 sps:$4 sm:$0xff]  }
  0x48   : > { %1569 = vmatpush1.bf16.msra.mxu0 %v2995_v10  ;;  %1224 = vmatprep.mubr.bf16.mxu1 %v2998_v12  ;;  %v3088_v10 = vld [vmem:[%s3497_s5 + $0x100] ss:$20 sps:$4 sm:$0xff]   ;;  %v3089_v12 = vld [vmem:[%s3497_s5 + $0x25c] ss:$20 sps:$4 sm:$0xff]  }
  0x49   : > { %1417 = vmatprep.mubr.bf16.mxu0 %v3000_v14  ;;  %2660 = vmatprep.subr.bf16.mxu1 %v3314_v5  ;;  %v3024_v5 = vld [vmem:[%s4091_s1 + $0x234] ss:$8 sps:$4 sm:$0xff]   ;;  %v3091_v14 = vld [vmem:[%s3497_s5 + $0x258] ss:$20 sps:$4 sm:$0xff]  }
  0x4a   : > { %1570 = vmatprep.subr.bf16.mxu0 %v3006_v16  ;;  %v3092_v16 = vld [vmem:[%s3497_s5 + $0x128] ss:$20 sps:$4 sm:$0xff]  }
  0x4b   : > { %2676 = vmatpush1.bf16.msra.mxu1 %v3322_v7  ;;  %v3011_v7 = vld [vmem:[%s3497_s5 + $0x50] ss:$20 sps:$4 sm:$0xff]  }
  0x4c   : > { %1571 = vmatpush1.bf16.msra.mxu0 %v3004_v18  ;;  %2661 = vmatprep.subr.bf16.mxu1 %v3331_v9  ;;  %v3022_v9 = vld [vmem:[%s4091_s1 + $0x230] ss:$8 sps:$4 sm:$0xff]   ;;  %v3095_v18 = vld [vmem:[%s3497_s5 + $0x14c] ss:$20 sps:$4 sm:$0xff]  }
  0x4d   : > { %1572 = vmatprep.subr.bf16.mxu0 %v3015_v1  ;;  %v3093_v1 = vld [vmem:[%s3497_s5 + $0x148] ss:$20 sps:$4 sm:$0xff]  }
  0x4e   : > { %1225 = vmatmul.mubr.bf16.gmra.mrb[4].mxu1 %v3002_v20  ;;  %v3096_v20 = vld [vmem:[%s3497_s5 + $0x150] ss:$20 sps:$4 sm:$0xff]  }
  0x4f   : > { %1418 = vmatmul.mubr.bf16.gmra.mrb[4].mxu0 %v3003_v22  ;;  %1234 = vmatprep.mubr.bf16.mxu1 %v3007_v3  ;;  %v3097_v22 = vld [vmem:[%s3497_s5 + $0x174] ss:$20 sps:$4 sm:$0xff]   ;;  %v3099_v3 = vld [vmem:[%s3497_s5 + $0x170] ss:$20 sps:$4 sm:$0xff]  }
  0x50   : > { %1427 = vmatprep.mubr.bf16.mxu0 %v3009_v24  ;;  %2677 = vmatpush1.bf16.msra.mxu1 %v3339_v11  ;;  %v3031_v11 = vld [vmem:[%s4091_s1 + $0x240] ss:$8 sps:$4 sm:$0xff]   ;;  %v3100_v24 = vld [vmem:[%s3497_s5 + $0x178] ss:$20 sps:$4 sm:$0xff]  }
  0x51   : > { %1573 = vmatpush1.bf16.msra.mxu0 %v3013_v26  ;;  %2662 = vmatprep.subr.bf16.mxu1 %v3349_v13  ;;  %v3042_v13 = vld [vmem:[%s4091_s1 + $0x254] ss:$8 sps:$4 sm:$0xff]  }
  0x52   : > { %1574 = vmatprep.subr.bf16.mxu0 %v3024_v5  ;;  %v3101_v26 = vld [vmem:[%s3497_s5 + $0x19c] ss:$20 sps:$4 sm:$0xff]   ;;  %v3103_v5 = vld [vmem:[%s3497_s5 + $0x198] ss:$20 sps:$4 sm:$0xff]  }
  0x54   : > { %2678 = vmatpush1.bf16.msra.mxu1 %v3358_v15  ;;  %v3020_v15 = vld [vmem:[%s3497_s5 + $0x78] ss:$20 sps:$4 sm:$0xff]  }
  0x55   : > { %1575 = vmatpush1.bf16.msra.mxu0 %v3022_v9  ;;  %2663 = vmatprep.subr.bf16.mxu1 %v3367_v17  ;;  %v3051_v17 = vld [vmem:[%s4091_s1 + $0x264] ss:$8 sps:$4 sm:$0xff]  }
  0x56   : > { %1576 = vmatprep.subr.bf16.mxu0 %v3033_v28  ;;  %1235 = vmatmul.mubr.bf16.gmra.mrb[8].mxu1 %v3011_v7  ;;  %v3104_v7 = vld [vmem:[%s3497_s5 + $0x1a0] ss:$20 sps:$4 sm:$0xff]   ;;  %v3105_v9 = vld [vmem:[%s3497_s5 + $0x1c4] ss:$20 sps:$4 sm:$0xff]  }
  0x57   : > { %1428 = vmatmul.mubr.bf16.gmra.mrb[8].mxu0 %v3012_v30  ;;  %1244 = vmatprep.mubr.bf16.mxu1 %v3016_v32  ;;  %v3107_v28 = vld [vmem:[%s3497_s5 + $0x1c0] ss:$20 sps:$4 sm:$0xff]   ;;  %v3108_v30 = vld [vmem:[%s3497_s5 + $0x1c8] ss:$20 sps:$4 sm:$0xff]  }
  0x58   : > { %1437 = vmatprep.mubr.bf16.mxu0 %v3018_v34  ;;  %2679 = vmatpush1.bf16.msra.mxu1 %v3375_v19  ;;  %v3049_v19 = vld [vmem:[%s4091_s1 + $0x260] ss:$8 sps:$4 sm:$0xff]  }
  0x59   : > { %1577 = vmatpush1.bf16.msra.mxu0 %v3031_v11  ;;  %2664 = vmatprep.subr.bf16.mxu1 %v3385_v21  ;;  %v3060_v21 = vld [vmem:[%s4091_s1 + $0x274] ss:$8 sps:$4 sm:$0xff]   ;;  %v3109_v32 = vld [vmem:[%s3497_s5 + $0x1ec] ss:$20 sps:$4 sm:$0xff]   ;;  %v3112_v11 = vld [vmem:[%s3497_s5 + $0x1f0] ss:$20 sps:$4 sm:$0xff]  }
  0x5a   : > { %1578 = vmatprep.subr.bf16.mxu0 %v3042_v13  ;;  %v3111_v34 = vld [vmem:[%s3497_s5 + $0x1e8] ss:$20 sps:$4 sm:$0xff]  }
  0x5b   : > { %v3113_v13 = vld [vmem:[%s3497_s5 + $0x214] ss:$20 sps:$4 sm:$0xff]  }
  0x5c   : > { %2680 = vmatpush1.bf16.msra.mxu1 %v3394_v23  ;;  %v3058_v23 = vld [vmem:[%s4091_s1 + $0x270] ss:$8 sps:$4 sm:$0xff]  }
  0x5d   : > { %1579 = vmatpush1.bf16.msra.mxu0 %v3040_v36  ;;  %2665 = vmatprep.subr.bf16.mxu1 %v3403_v25  ;;  %v3030_v25 = vld [vmem:[%s3497_s5 + $0xa8] ss:$20 sps:$4 sm:$0xff]   ;;  %v3116_v36 = vld [vmem:[%s3497_s5 + $0x218] ss:$20 sps:$4 sm:$0xff]  }
  0x5e   : > { %1580 = vmatprep.subr.bf16.mxu0 %v3051_v17  ;;  %1245 = vmatmul.mubr.bf16.gmra.mrb[12].mxu1 %v3020_v15  ;;  %v3115_v15 = vld [vmem:[%s3497_s5 + $0x210] ss:$20 sps:$4 sm:$0xff]  }
  0x5f   : > { %1438 = vmatmul.mubr.bf16.gmra.mrb[12].mxu0 %v3021_v38  ;;  %1254 = vmatprep.mubr.bf16.mxu1 %v3025_v40  ;;  %v3117_v17 = vld [vmem:[%s3497_s5 + $0x23c] ss:$20 sps:$4 sm:$0xff]   ;;  %v3119_v38 = vld [vmem:[%s3497_s5 + $0x238] ss:$20 sps:$4 sm:$0xff]   ;;  %v3120_v40 = vld [vmem:[%s3497_s5 + $0x240] ss:$20 sps:$4 sm:$0xff]  }
  0x60   : > { %1447 = vmatprep.mubr.bf16.mxu0 %v3027_v42  ;;  %2681 = vmatpush1.bf16.msra.mxu1 %v3411_v27  ;;  %v3038_v27 = vld [vmem:[%s3497_s5 + $0xc8] ss:$20 sps:$4 sm:$0xff]   ;;  %v3121_v42 = vld [vmem:[%s3497_s5 + $0x264] ss:$20 sps:$4 sm:$0xff]  }
  0x61   : > { %1581 = vmatpush1.bf16.msra.mxu0 %v3049_v19  ;;  %2666 = vmatprep.subr.bf16.mxu1 %v3421_v29  ;;  %v3039_v29 = vld [vmem:[%s3497_s5 + $0xd0] ss:$20 sps:$4 sm:$0xff]   ;;  %v3123_v19 = vld [vmem:[%s3497_s5 + $0x260] ss:$20 sps:$4 sm:$0xff]  }
  0x62   : > { %1582 = vmatprep.subr.bf16.mxu0 %v3060_v21  ;;  %v3124_v21 = vld [vmem:[%s3497_s5 + $0x268] ss:$20 sps:$4 sm:$0xff]  }
  0x64   : > { %2682 = vmatpush1.bf16.msra.mxu1 %v3432_v31  ;;  %v3047_v31 = vld [vmem:[%s3497_s5 + $0xf0] ss:$20 sps:$4 sm:$0xff]  }
  0x65   : > { %1583 = vmatpush1.bf16.msra.mxu0 %v3058_v23  ;;  %2667 = vmatprep.subr.bf16.mxu1 %v3441_v33  ;;  %v3048_v33 = vld [vmem:[%s3497_s5 + $0xf8] ss:$20 sps:$4 sm:$0xff]  }
  0x66   : > { %1255 = vmatmul.mubr.bf16.gmra.mrb[16].mxu1 %v3029_v44 }
  0x67   : > { %1448 = vmatmul.mubr.bf16.gmra.mrb[16].mxu0 %v3030_v25  ;;  %1264 = vmatprep.mubr.bf16.mxu1 %v3034_v46 }
  0x68   : > { %1457 = vmatprep.mubr.bf16.mxu0 %v3036_v48  ;;  %2683 = vmatpush1.bf16.msra.mxu1 %v3449_v35  ;;  %v3052_v35 = vld [vmem:[%s3497_s5 + $0x11c] ss:$20 sps:$4 sm:$0xff]  }
  0x69   : > { %2668 = vmatprep.subr.bf16.mxu1 %v3461_v37  ;;  %v3054_v37 = vld [vmem:[%s3497_s5 + $0x124] ss:$20 sps:$4 sm:$0xff]  }
  0x6c   : > { %2684 = vmatpush1.bf16.msra.mxu1 %v3470_v39  ;;  %v3056_v39 = vld [vmem:[%s3497_s5 + $0x118] ss:$20 sps:$4 sm:$0xff]  }
  0x6d   : > { %2669 = vmatprep.subr.bf16.mxu1 %v3480_v41  ;;  %v3057_v41 = vld [vmem:[%s3497_s5 + $0x120] ss:$20 sps:$4 sm:$0xff]  }
  0x6e   : > { %1265 = vmatmul.mubr.bf16.gmra.mrb[20].mxu1 %v3038_v27 }
  0x6f   : > { %1458 = vmatmul.mubr.bf16.gmra.mrb[20].mxu0 %v3039_v29  ;;  %1274 = vmatprep.mubr.bf16.mxu1 %v3043_v49 }
  0x70   : > { %1467 = vmatprep.mubr.bf16.mxu0 %v3045_v51  ;;  %2685 = vmatpush1.bf16.msra.mxu1 %v3488_v43  ;;  %v3061_v43 = vld [vmem:[%s3497_s5 + $0x144] ss:$20 sps:$4 sm:$0xff]  }
  0x71   : > { %2670 = vmatprep.subr.bf16.mxu1 %v3503_v45  ;;  %v3261_v45 = vmov 0  }
  0x74   : > { %2686 = vmatpush1.bf16.msra.mxu1 %v3511_v47  ;;  %v3063_v47 = vld [vmem:[%s3497_s5 + $0x140] ss:$20 sps:$4 sm:$0xff]  }
  0x75   : > { %2671 = vmatprep.subr.bf16.mxu1 %v3521_v50  ;;  %v3064_v50 = vld [vmem:[%s3497_s5 + $0x10] ss:$20 sps:$4 sm:$0xff]  }
  0x76   : > { %1275 = vmatmul.mubr.bf16.gmra.mrb[24].mxu1 %v3047_v31 }
  0x77   : > { %1468 = vmatmul.mubr.bf16.gmra.mrb[24].mxu0 %v3048_v33  ;;  %1284 = vmatprep.mubr.bf16.mxu1 %v3052_v35 }
  0x78   : > { %1477 = vmatprep.mubr.bf16.mxu0 %v3054_v37  ;;  %2687 = vmatpush1.bf16.msra.mxu1 %v3532_v53  ;;  %v3067_v53 = vld [vmem:[%s3497_s5 + $0x168] ss:$20 sps:$4 sm:$0xff]  }
  0x79   : > { %2672 = vmatprep.subr.bf16.mxu1 %v3541_v55  ;;  %v3069_v55 = vld [vmem:[%s3497_s5 + $0x194] ss:$20 sps:$4 sm:$0xff]  }
  0x7c   : > { %2688 = vmatpush1.bf16.msra.mxu1 %v3550_v57  ;;  %v3072_v57 = vld [vmem:[%s3497_s5 + $0x60] ss:$20 sps:$4 sm:$0xff]  }
  0x7d   : > { %2673 = vmatprep.subr.bf16.mxu1 %v3559_v59  ;;  %v3075_v59 = vld [vmem:[%s3497_s5 + $0x1b8] ss:$20 sps:$4 sm:$0xff]  }
  0x7e   : > { %1285 = vmatmul.mubr.bf16.gmra.mrb[28].mxu1 %v3056_v39 }
  0x7f   : > { %1478 = vmatmul.mubr.bf16.gmra.mrb[28].mxu0 %v3057_v41  ;;  %1294 = vmatprep.mubr.bf16.mxu1 %v3061_v43 }
  0x80   : > { %1600 = vmatprep.mubr.bf16.mxu0 %v3261_v45  ;;  %2689 = vmatpush1.bf16.msra.mxu1 %v3568_v61  ;;  %v3077_v61 = vld [vmem:[%s3497_s5 + $0x1e4] ss:$20 sps:$4 sm:$0xff]  }
  0x81   : > { %2674 = vmatprep.subr.bf16.mxu1 %v3577_v63  ;;  %v3080_v63 = vld [vmem:[%s3497_s5 + $0xb0] ss:$20 sps:$4 sm:$0xff]  }
  0x84   : > { %2690 = vmatpush1.bf16.msra.mxu1 %v3586_v2  ;;  %v3083_v2 = vld [vmem:[%s3497_s5 + $0x208] ss:$20 sps:$4 sm:$0xff]  }
  0x86   : > { %1295 = vmatmul.mubr.bf16.gmra.mrb[32].mxu1 %v3063_v47 }
  0x87   : > { %1601 = vmatmul.mubr.bf16.vlgmr.msra.gmra.mrb[0].mxu0 %v3064_v50  ;;  %1304 = vmatprep.mubr.bf16.mxu1 %v3065_v52 }
  0x88   : > { %1610 = vmatprep.mubr.bf16.mxu0 %v3261_v45 }
  0x8e   : > { %1305 = vmatmul.mubr.bf16.gmra.mrb[36].mxu1 %v3067_v53 }
  0x8f   : > { %1611 = vmatmul.mubr.bf16.gmra.mrb[4].mxu0 %v3068_v54  ;;  %1314 = vmatprep.mubr.bf16.mxu1 %v3069_v55 }
  0x90   : > { %1620 = vmatprep.mubr.bf16.mxu0 %v3261_v45 }
  0x96   : > { %1315 = vmatmul.mubr.bf16.gmra.mrb[40].mxu1 %v3071_v56 }
  0x97   : > { %1621 = vmatmul.mubr.bf16.gmra.mrb[8].mxu0 %v3072_v57  ;;  %1324 = vmatprep.mubr.bf16.mxu1 %v3073_v58  ;;  %v356_v57 = vlaneseq }
  0x98   : > { %1630 = vmatprep.mubr.bf16.mxu0 %v3261_v45 }
  0x9e   : > { %1325 = vmatmul.mubr.bf16.gmra.mrb[44].mxu1 %v3075_v59 }
  0x9f   : > { %1631 = vmatmul.mubr.bf16.gmra.mrb[12].mxu0 %v3076_v60  ;;  %1334 = vmatprep.mubr.bf16.mxu1 %v3077_v61  ;;  %v357_v61 = vshrl.u32 %v356_v57, 7 }
  0xa0   : > { %1640 = vmatprep.mubr.bf16.mxu0 %v3261_v45 }
  0xa6   : > { %1335 = vmatmul.mubr.bf16.gmra.mrb[48].mxu1 %v3079_v62 }
  0xa7   : > { %1641 = vmatmul.mubr.bf16.gmra.mrb[16].mxu0 %v3080_v63  ;;  %1344 = vmatprep.mubr.bf16.mxu1 %v3081_v0  ;;  %v358_v63 = vsub.s32 0, %v357_v61  ;;  %v354_v0 = vld [vmem:[%s4092_s2] sm:$0x3] }
  0xa8   : > { %1650 = vmatprep.mubr.bf16.mxu0 %v3261_v45 }
  0xae   : > { %1345 = vmatmul.mubr.bf16.gmra.mrb[52].mxu1 %v3083_v2  ;;  %v362_v2 = vsub.s32 1, %v357_v61 }
  0xaf   : > { %1651 = vmatmul.mubr.bf16.gmra.mrb[20].mxu0 %v3084_v4  ;;  %1354 = vmatprep.mubr.bf16.mxu1 %v3085_v6 }
  0xb0   : > { %1660 = vmatprep.mubr.bf16.mxu0 %v3261_v45 }
  0xb6   : > { %1355 = vmatmul.mubr.bf16.gmra.mrb[56].mxu1 %v3087_v8 }
  0xb7   : > { %1661 = vmatmul.mubr.bf16.gmra.mrb[24].mxu0 %v3088_v10  ;;  %1364 = vmatprep.mubr.bf16.mxu1 %v3089_v12  ;;  %v3811_v10 = vrot.slane %v354_v0, %v358_v63 }
  0xb8   : > { %1670 = vmatprep.mubr.bf16.mxu0 %v3261_v45 }
  0xbe   : > { %1365 = vmatmul.mubr.bf16.gmra.mrb[60].mxu1 %v3091_v14  ;;  %v3815_v14 = vrot.slane %v354_v0, %v362_v2 }
  0xbf   : > { %1671 = vmatmul.mubr.bf16.gmra.mrb[28].mxu0 %v3092_v16  ;;  %1487 = vmatprep.mubr.bf16.mxu1 %v3095_v18 }
  0xc0   : > { %1680 = vmatprep.mubr.bf16.mxu0 %v3261_v45 }
  0xc6   : > { %1488 = vmatmul.mubr.bf16.vlgmr.msra.gmra.mrb[32].mxu1 %v3093_v1 }
  0xc7   : > { %1681 = vmatmul.mubr.bf16.gmra.mrb[32].mxu0 %v3096_v20  ;;  %1497 = vmatprep.mubr.bf16.mxu1 %v3097_v22 }
  0xc8   : > { %1690 = vmatprep.mubr.bf16.mxu0 %v3261_v45 }
  0xce   : > { %1498 = vmatmul.mubr.bf16.gmra.mrb[36].mxu1 %v3099_v3 }
  0xcf   : > { %1691 = vmatmul.mubr.bf16.gmra.mrb[36].mxu0 %v3100_v24  ;;  %1507 = vmatprep.mubr.bf16.mxu1 %v3101_v26 }
  0xd0   : > { %1700 = vmatprep.mubr.bf16.mxu0 %v3261_v45 }
  0xd6   : > { %1508 = vmatmul.mubr.bf16.gmra.mrb[40].mxu1 %v3103_v5 }
  0xd7   : > { %1701 = vmatmul.mubr.bf16.gmra.mrb[40].mxu0 %v3104_v7  ;;  %1517 = vmatprep.mubr.bf16.mxu1 %v3105_v9 }
  0xd8   : > { %1710 = vmatprep.mubr.bf16.mxu0 %v3261_v45 }
  0xde   : > { %1518 = vmatmul.mubr.bf16.gmra.mrb[44].mxu1 %v3107_v28 }
  0xdf   : > { %1711 = vmatmul.mubr.bf16.gmra.mrb[44].mxu0 %v3108_v30  ;;  %1527 = vmatprep.mubr.bf16.mxu1 %v3109_v32 }
  0xe0   : > { %1720 = vmatprep.mubr.bf16.mxu0 %v3261_v45 }
  0xe6   : > { %1528 = vmatmul.mubr.bf16.gmra.mrb[48].mxu1 %v3111_v34 }
  0xe7   : > { %1721 = vmatmul.mubr.bf16.gmra.mrb[48].mxu0 %v3112_v11  ;;  %1537 = vmatprep.mubr.bf16.mxu1 %v3113_v13 }
  0xe8   : > { %1730 = vmatprep.mubr.bf16.mxu0 %v3261_v45 }
  0xee   : > { %1538 = vmatmul.mubr.bf16.gmra.mrb[52].mxu1 %v3115_v15 }
  0xef   : > { %1731 = vmatmul.mubr.bf16.gmra.mrb[52].mxu0 %v3116_v36  ;;  %1547 = vmatprep.mubr.bf16.mxu1 %v3117_v17 }
  0xf0   : > { %1740 = vmatprep.mubr.bf16.mxu0 %v3261_v45 }
  0xf6   : > { %1548 = vmatmul.mubr.bf16.gmra.mrb[56].mxu1 %v3119_v38 }
  0xf7   : > { %1741 = vmatmul.mubr.bf16.gmra.mrb[56].mxu0 %v3120_v40  ;;  %1557 = vmatprep.mubr.bf16.mxu1 %v3121_v42 }
  0xf8   : > { %1750 = vmatprep.mubr.bf16.mxu0 %v3261_v45 }
  0xfe   : > { %1558 = vmatmul.mubr.bf16.gmra.mrb[60].mxu1 %v3123_v19 }
  0xff   : > { %1751 = vmatmul.mubr.bf16.gmra.mrb[60].mxu0 %v3124_v21 }
 0x119   : > { %v1216_v23 = vpop.f32.mrb[0].mxu1 }
 0x11a   : > { %v1218_v44 = vpop.f32.mrb[1].mxu1  ;;  %v1217_v16 = vadd.f32 %v1216_v23, %v3811_v10 }
 0x11b   : > { %v1220_v25 = vpop.f32.mrb[2].mxu1  ;;  %v1219_v18 = vadd.f32 %v1218_v44, %v3815_v14 }
 0x11c   : > { %v1222_v46 = vpop.f32.mrb[3].mxu1  ;;  %v1221_v20 = vadd.f32 %v1220_v25, %v3811_v10 }
 0x11d   : > { %v1223_v24 = vadd.f32 %v1222_v46, %v3815_v14 }
 0x121   : > { %v1226_v48 = vpop.f32.mrb[4].mxu1 }
 0x122   : > { %v1228_v27 = vpop.f32.mrb[5].mxu1  ;;  %v1227_v34 = vadd.f32 %v1226_v48, %v3811_v10 }
 0x123   : > { %v1230_v29 = vpop.f32.mrb[6].mxu1  ;;  %v1229_v11 = vadd.f32 %v1228_v27, %v3815_v14 }
 0x124   : > { %v1232_v49 = vpop.f32.mrb[7].mxu1  ;;  %v1231_v15 = vadd.f32 %v1230_v29, %v3811_v10 }
 0x125   : > { %v1233_v38 = vadd.f32 %v1232_v49, %v3815_v14 }
 0x129   : > { %v1236_v51 = vpop.f32.mrb[8].mxu1 }
 0x12a   : > { %v3764_v31 = vpop.f32.mrb[9].mxu1  ;;  %v1237_v46 = vadd.f32 %v1236_v51, %v3811_v10 }
 0x12b   : > { %v3766_v33 = vpop.f32.mrb[10].mxu1  ;;  %v1239_v27 = vadd.f32 %v3764_v31, %v3815_v14 }
 0x12c   : > { %v3768_v35 = vpop.f32.mrb[11].mxu1  ;;  %v1241_v0 = vadd.f32 %v3766_v33, %v3811_v10 }
 0x12d   : > { %v1243_v2 = vadd.f32 %v3768_v35, %v3815_v14 }
 0x131   : > { %v3770_v37 = vpop.f32.mrb[12].mxu1 }
 0x132   : > { %v3772_v39 = vpop.f32.mrb[13].mxu1 }
 0x133   : > { %v3774_v41 = vpop.f32.mrb[14].mxu1  ;;  %v1249_v33 = vadd.f32 %v3772_v39, %v3815_v14 }
 0x134   : > { %v3776_v43 = vpop.f32.mrb[15].mxu1 }
 0x139   : > { %v3778_v45 = vpop.f32.mrb[16].mxu1 }
 0x13a   : > { %v3780_v47 = vpop.f32.mrb[17].mxu1 }
 0x13b   : > { %v3782_v50 = vpop.f32.mrb[18].mxu1 }
 0x13c   : > { %v3784_v52 = vpop.f32.mrb[19].mxu1 }
 0x141   : > { %v3786_v53 = vpop.f32.mrb[20].mxu1 }
 0x142   : > { %v3788_v54 = vpop.f32.mrb[21].mxu1 }
 0x143   : > { %v3790_v55 = vpop.f32.mrb[22].mxu1 }
 0x144   : > { %v3792_v56 = vpop.f32.mrb[23].mxu1 }
 0x149   : > { %v3794_v58 = vpop.f32.mrb[24].mxu1 }
 0x14a   : > { %v3796_v59 = vpop.f32.mrb[25].mxu1 }
 0x14b   : > { %v3798_v60 = vpop.f32.mrb[26].mxu1 }
 0x14c   : > { %v3800_v62 = vpop.f32.mrb[27].mxu1 }
 0x151   : > { %v3805_v4 = vpop.f32.mrb[28].mxu1 }
 0x152   : > { %v3807_v6 = vpop.f32.mrb[29].mxu1 }
 0x153   : > { %v3809_v8 = vpop.f32.mrb[30].mxu1 }
 0x154   : > { %v3813_v12 = vpop.f32.mrb[31].mxu1 }
 0x15a   : > { %v1602_v1 = vpop.f32.mrb[0].mxu0 }
 0x15b   : > { %v3820_v22 = vadd.f32 %v1602_v1, %v1217_v16  ;;  %v1604_v3 = vpop.f32.mrb[1].mxu0 }
 0x15c   : > { %v2694_v26 = vadd.f32 %v1604_v3, %v1219_v18  ;;  %v1606_v5 = vpop.f32.mrb[2].mxu0 }
 0x15d   : > { %v3823_v7 = vadd.f32 %v1606_v5, %v1221_v20  ;;  %v1608_v9 = vpop.f32.mrb[3].mxu0  ;;  %vm1761_vm0 = vcmp.ge.f32.partialorder %v3820_v22, 0.0 }
 0x15e   : > { %v2466_v28 = vmul.f32 -1.442695, %v2694_v26  ;;  %v2698_v30 = vadd.f32 %v1608_v9, %v1223_v24  ;;  %v1247_v26 = vadd.f32 %v3770_v37, %v3811_v10  ;;  %v1793_v9 = vmul.f32 0.2, %v3820_v22 }
 0x15f   : > { %vm1762_vm1 = vcmp.ge.f32.partialorder %v3823_v7, 0.0 }
 0x160   : > { %3125 = vpow2.f32 %v2466_v28  ;;  %v2467_v32 = vmul.f32 -1.442695, %v2698_v30 }
 0x162   : > { %3127 = vpow2.f32 %v2467_v32  ;;  %v1612_v13 = vpop.f32.mrb[4].mxu0 }
 0x163   : > { %v3828_v36 = vadd.f32 %v1612_v13, %v1227_v34  ;;  %v1614_v17 = vpop.f32.mrb[5].mxu0  ;;  %v1253_v13 = vadd.f32 %v3776_v43, %v3815_v14 }
 0x164   : > { %v2702_v40 = vadd.f32 %v1614_v17, %v1229_v11  ;;  %v1616_v42 = vpop.f32.mrb[6].mxu0  ;;  %v1251_v11 = vadd.f32 %v3774_v41, %v3811_v10 }
 0x165   : > { %v3831_v19 = vadd.f32 %v1616_v42, %v1231_v15  ;;  %v1618_v21 = vpop.f32.mrb[7].mxu0  ;;  %v1794_v15 = vmul.f32 0.2, %v3823_v7  ;;  %vm1763_vm2 = vcmp.ge.f32.partialorder %v3828_v36, 0.0 }
 0x166   : > { %v2468_v23 = vmul.f32 -1.442695, %v2702_v40  ;;  %v2706_v44 = vadd.f32 %v1618_v21, %v1233_v38 }
 0x167   : > { %vm1764_vm3 = vcmp.ge.f32.partialorder %v3831_v19, 0.0 }
 0x168   : > { %3129 = vpow2.f32 %v2468_v23  ;;  %v2469_v25 = vmul.f32 -1.442695, %v2706_v44  ;;  %v1825_v23 = vsel %vm1761_vm0, %v3820_v22, %v1793_v9  ;;  %v1267_v9 = vadd.f32 %v3786_v53, %v3811_v10 }
 0x16a   : > { %v3126_v48 = vpop.eup %3125  ;;  %3131 = vpow2.f32 %v2469_v25  ;;  %v1622_v29 = vpop.f32.mrb[8].mxu0  ;;  %v1257_v25 = vadd.f32 %v3778_v45, %v3811_v10  ;;  %v1795_v45 = vmul.f32 0.2, %v3828_v36 }
 0x16b   : > { %v1953_v57 = vadd.f32 1.0, %v3126_v48  ;;  %v3836_v61 = vadd.f32 %v1622_v29, %v1237_v46  ;;  %v1624_v49 = vpop.f32.mrb[9].mxu0  ;;  %v1826_v46 = vsel %vm1762_vm1, %v3823_v7, %v1794_v15  ;;  %v1259_v29 = vadd.f32 %v3780_v47, %v3815_v14 }
 0x16c   : > { %v3128_v63 = vpop.eup %3127  ;;  %v2710_v16 = vadd.f32 %v1624_v49, %v1239_v27  ;;  %v1626_v18 = vpop.f32.mrb[10].mxu0  ;;  %v1263_v47 = vadd.f32 %v3784_v52, %v3815_v14  ;;  %v1827_v52 = vsel %vm1763_vm2, %v3828_v36, %v1795_v45  ;;  %v1279_v45 = vadd.f32 %v3796_v59, %v3815_v14 }
 0x16d   : > { %3133 = vrcp.f32 %v1953_v57  ;;  %v1954_v51 = vadd.f32 1.0, %v3128_v63  ;;  %v1628_v1 = vpop.f32.mrb[11].mxu0  ;;  %v3842_v31 = vadd.f32 %v1626_v18, %v1241_v0  ;;  %v1261_v57 = vadd.f32 %v3782_v50, %v3811_v10 }
 0x16e   : > { %v2470_v20 = vmul.f32 -1.442695, %v2710_v16  ;;  %v2714_v3 = vadd.f32 %v1628_v1, %v1243_v2  ;;  %v1797_v36 = vmul.f32 0.2, %v3836_v61  ;;  %vm1765_vm4 = vcmp.ge.f32.partialorder %v3836_v61, 0.0 }
 0x16f   : > { %3135 = vrcp.f32 %v1954_v51  ;;  %v1796_v51 = vmul.f32 0.2, %v3831_v19  ;;  %vm1766_vm5 = vcmp.ge.f32.partialorder %v3842_v31, 0.0 }
 0x170   : > { %3137 = vpow2.f32 %v2470_v20  ;;  %v2471_v24 = vmul.f32 -1.442695, %v2714_v3 }
 0x172   : > { %v3130_v5 = vpop.eup %3129  ;;  %3139 = vpow2.f32 %v2471_v24  ;;  %v1632_v35 = vpop.f32.mrb[12].mxu0 }
 0x173   : > { %v1955_v28 = vadd.f32 1.0, %v3130_v5  ;;  %v3849_v30 = vadd.f32 %v1632_v35, %v1247_v26  ;;  %v1634_v32 = vpop.f32.mrb[13].mxu0 }
 0x174   : > { %v3132_v34 = vpop.eup %3131  ;;  %v2718_v37 = vadd.f32 %v1634_v32, %v1249_v33  ;;  %v1636_v39 = vpop.f32.mrb[14].mxu0 }
 0x175   : > { %3141 = vrcp.f32 %v1955_v28  ;;  %v1956_v17 = vadd.f32 1.0, %v3132_v34  ;;  %v1638_v38 = vpop.f32.mrb[15].mxu0  ;;  %v3858_v42 = vadd.f32 %v1636_v39, %v1251_v11  ;;  %v1828_v28 = vsel %vm1764_vm3, %v3831_v19, %v1796_v51 }
 0x176   : > { %v2472_v40 = vmul.f32 -1.442695, %v2718_v37  ;;  %v2722_v21 = vadd.f32 %v1638_v38, %v1253_v13  ;;  %v1269_v11 = vadd.f32 %v3788_v54, %v3815_v14  ;;  %v1271_v13 = vadd.f32 %v3790_v55, %v3811_v10 }
 0x177   : > { %v3134_v41 = vpop.eup %3133  ;;  %3143 = vrcp.f32 %v1956_v17  ;;  %v1273_v19 = vadd.f32 %v3792_v56, %v3815_v14  ;;  %v1798_v55 = vmul.f32 0.2, %v3842_v31  ;;  %v1829_v56 = vsel %vm1765_vm4, %v3836_v61, %v1797_v36 }
 0x178   : > { %v2049_v43 = vmul.f32 %v3134_v41, %v1825_v23  ;;  %3145 = vpow2.f32 %v2472_v40  ;;  %v2473_v48 = vmul.f32 -1.442695, %v2722_v21  ;;  %v1281_v61 = vadd.f32 %v3798_v60, %v3811_v10 }
 0x179   : > { %v3136_v44 = vpop.eup %3135  ;;  %vm1767_vm6 = vcmp.ge.f32.partialorder %v3849_v30, 0.0  ;;  %v1800_v60 = vmul.f32 0.2, %v3858_v42  ;;  %vm1768_vm7 = vcmp.ge.f32.partialorder %v3858_v42, 0.0 }
 0x17a   : > { %v3138_v27 = vpop.eup %3137  ;;  %v2050_v49 = vmul.f32 %v3136_v44, %v1826_v46  ;;  %v1642_v22 = vpop.f32.mrb[16].mxu0  ;;  %3147 = vpow2.f32 %v2473_v48 }
 0x17b   : > { %v1957_v63 = vadd.f32 1.0, %v3138_v27  ;;  %v3875_v7 = vadd.f32 %v1642_v22, %v1257_v25  ;;  %v1644_v0 = vpop.f32.mrb[17].mxu0 }
 0x17c   : > { %v3140_v2 = vpop.eup %3139  ;;  %v2567_v50 = vpack.c.bf16 %v2050_v49, %v2049_v43  ;;  %v2726_v16 = vadd.f32 %v1644_v0, %v1259_v29  ;;  %v1646_v18 = vpop.f32.mrb[18].mxu0  ;;  %v1830_v49 = vsel %vm1766_vm5, %v3842_v31, %v1798_v55  ;;  %v1283_v31 = vadd.f32 %v3800_v62, %v3815_v14 }
 0x17d   : > { %3149 = vrcp.f32 %v1957_v63  ;;  %v1958_v1 = vadd.f32 1.0, %v3140_v2  ;;  %v1648_v20 = vpop.f32.mrb[19].mxu0  ;;  %v3883_v24 = vadd.f32 %v1646_v18, %v1261_v57  ;;  %v1277_v57 = vadd.f32 %v3794_v58, %v3811_v10 }
 0x17e   : > { %2568 = vst [vmem:[%s3872_s24] sm:$0xff] %v2567_v50   ;;  %v2474_v3 = vmul.f32 -1.442695, %v2726_v16  ;;  %v2730_v26 = vadd.f32 %v1648_v20, %v1263_v47  ;;  %v1799_v2 = vmul.f32 0.2, %v3849_v30  ;;  %vm1769_vm8 = vcmp.ge.f32.partialorder %v3875_v7, 0.0 }
 0x17f   : > { %v3142_v5 = vpop.eup %3141  ;;  %3151 = vrcp.f32 %v1958_v1  ;;  %vm1770_vm9 = vcmp.ge.f32.partialorder %v3883_v24, 0.0 }
 0x180   : > { %v2051_v33 = vmul.f32 %v3142_v5, %v1827_v52  ;;  %3153 = vpow2.f32 %v2474_v3  ;;  %v2475_v32 = vmul.f32 -1.442695, %v2730_v26 }
 0x181   : > { %v3144_v35 = vpop.eup %3143 }
 0x182   : > { %v3146_v34 = vpop.eup %3145  ;;  %v2052_v37 = vmul.f32 %v3144_v35, %v1828_v28  ;;  %v1652_v39 = vpop.f32.mrb[20].mxu0  ;;  %3155 = vpow2.f32 %v2475_v32  ;;  %v1289_v32 = vadd.f32 %v3807_v6, %v3815_v14 }
 0x183   : > { %v1959_v15 = vadd.f32 1.0, %v3146_v34  ;;  %v3894_v17 = vadd.f32 %v1652_v39, %v1267_v9  ;;  %v1654_v53 = vpop.f32.mrb[21].mxu0  ;;  %v1287_v9 = vadd.f32 %v3805_v4, %v3811_v10  ;;  %v1832_v34 = vsel %vm1768_vm7, %v3858_v42, %v1800_v60 }
 0x184   : > { %v2572_v38 = vpack.c.bf16 %v2052_v37, %v2051_v33  ;;  %v2734_v54 = vadd.f32 %v1654_v53, %v1269_v11  ;;  %v1656_v40 = vpop.f32.mrb[22].mxu0  ;;  %v3148_v21 = vpop.eup %3147  ;;  %v1831_v33 = vsel %vm1767_vm6, %v3849_v30, %v1799_v2  ;;  %v1291_v30 = vadd.f32 %v3809_v8, %v3811_v10 }
 0x185   : > { %3157 = vrcp.f32 %v1959_v15  ;;  %v3900_v41 = vadd.f32 %v1656_v40, %v1271_v13  ;;  %v1658_v23 = vpop.f32.mrb[23].mxu0  ;;  %v1960_v43 = vadd.f32 1.0, %v3148_v21  ;;  %v1801_v39 = vmul.f32 0.2, %v3875_v7 }
 0x186   : > { %2644 = vst [vmem:[%s3872_s24 + $0x8] sm:$0xff] %v2572_v38   ;;  %v2476_v44 = vmul.f32 -1.442695, %v2734_v54  ;;  %v2738_v25 = vadd.f32 %v1658_v23, %v1273_v19  ;;  %v1293_v53 = vadd.f32 %v3813_v12, %v3815_v14  ;;  %v1802_v54 = vmul.f32 0.2, %v3883_v24 }
 0x187   : > { %v3150_v46 = vpop.eup %3149  ;;  %3159 = vrcp.f32 %v1960_v43  ;;  %vm1771_vm10 = vcmp.ge.f32.partialorder %v3894_v17, 0.0  ;;  %vm1772_vm11 = vcmp.ge.f32.partialorder %v3900_v41, 0.0 }
 0x188   : > { %v2053_v48 = vmul.f32 %v3150_v46, %v1829_v56  ;;  %v2477_v27 = vmul.f32 -1.442695, %v2738_v25  ;;  %3161 = vpow2.f32 %v2476_v44  ;;  %v1833_v44 = vsel %vm1769_vm8, %v3875_v7, %v1801_v39 }
 0x189   : > { %v3152_v29 = vpop.eup %3151  ;;  %v1834_v56 = vsel %vm1770_vm9, %v3883_v24, %v1802_v54 }
 0x18a   : > { %v3154_v22 = vpop.eup %3153  ;;  %v2054_v63 = vmul.f32 %v3152_v29, %v1830_v49  ;;  %3163 = vpow2.f32 %v2477_v27  ;;  %v1662_v0 = vpop.f32.mrb[24].mxu0  ;;  %v1803_v49 = vmul.f32 0.2, %v3894_v17 }
 0x18b   : > { %v1961_v47 = vadd.f32 1.0, %v3154_v22  ;;  %v3913_v50 = vadd.f32 %v1662_v0, %v1277_v57  ;;  %v1664_v58 = vpop.f32.mrb[25].mxu0  ;;  %v1804_v0 = vmul.f32 0.2, %v3900_v41 }
 0x18c   : > { %v2577_v16 = vpack.c.bf16 %v2054_v63, %v2053_v48  ;;  %v2742_v59 = vadd.f32 %v1664_v58, %v1279_v45  ;;  %v1666_v18 = vpop.f32.mrb[26].mxu0  ;;  %v3156_v51 = vpop.eup %3155 }
 0x18d   : > { %3165 = vrcp.f32 %v1961_v47  ;;  %v3918_v1 = vadd.f32 %v1666_v18, %v1281_v61  ;;  %v1668_v20 = vpop.f32.mrb[27].mxu0  ;;  %v1962_v3 = vadd.f32 1.0, %v3156_v51  ;;  %vm1773_vm12 = vcmp.ge.f32.partialorder %v3913_v50, 0.0 }
 0x18e   : > { %2645 = vst [vmem:[%s3872_s24 + $0x10] sm:$0xff] %v2577_v16   ;;  %v2478_v26 = vmul.f32 -1.442695, %v2742_v59  ;;  %v2746_v5 = vadd.f32 %v1668_v20, %v1283_v31 }
 0x18f   : > { %v3158_v52 = vpop.eup %3157  ;;  %3167 = vrcp.f32 %v1962_v3  ;;  %vm1774_vm13 = vcmp.ge.f32.partialorder %v3918_v1, 0.0 }
 0x190   : > { %v2055_v62 = vmul.f32 %v3158_v52, %v1831_v33  ;;  %v2479_v35 = vmul.f32 -1.442695, %v2746_v5  ;;  %3169 = vpow2.f32 %v2478_v26  ;;  %v1835_v5 = vsel %vm1771_vm10, %v3894_v17, %v1803_v49 }
 0x191   : > { %v3160_v28 = vpop.eup %3159 }
 0x192   : > { %3171 = vpow2.f32 %v2479_v35  ;;  %v1672_v11 = vpop.f32.mrb[28].mxu0  ;;  %v3162_v13 = vpop.eup %3161  ;;  %v2056_v37 = vmul.f32 %v3160_v28, %v1832_v34 }
 0x193   : > { %v3932_v36 = vadd.f32 %v1672_v11, %v1287_v9  ;;  %v1674_v15 = vpop.f32.mrb[29].mxu0  ;;  %v1963_v6 = vadd.f32 1.0, %v3162_v13  ;;  %v1836_v9 = vsel %vm1772_vm11, %v3900_v41, %v1804_v0 }
 0x194   : > { %v3164_v4 = vpop.eup %3163  ;;  %v2750_v42 = vadd.f32 %v1674_v15, %v1289_v32  ;;  %v1676_v19 = vpop.f32.mrb[30].mxu0  ;;  %v2582_v38 = vpack.c.bf16 %v2056_v37, %v2055_v62 }
 0x195   : > { %v1964_v8 = vadd.f32 1.0, %v3164_v4  ;;  %v1678_v40 = vpop.f32.mrb[31].mxu0  ;;  %3173 = vrcp.f32 %v1963_v6  ;;  %v3938_v55 = vadd.f32 %v1676_v19, %v1291_v30  ;;  %v1805_v4 = vmul.f32 0.2, %v3913_v50 }
 0x196   : > { %v2480_v21 = vmul.f32 -1.442695, %v2750_v42  ;;  %v2754_v23 = vadd.f32 %v1678_v40, %v1293_v53  ;;  %2646 = vst [vmem:[%s3872_s24 + $0x18] sm:$0xff] %v2582_v38   ;;  %v1806_v19 = vmul.f32 0.2, %v3918_v1  ;;  %vm1775_vm14 = vcmp.ge.f32.partialorder %v3932_v36, 0.0 }
 0x197   : > { %v3166_v43 = vpop.eup %3165  ;;  %3175 = vrcp.f32 %v1964_v8  ;;  %vm1776_vm15 = vcmp.ge.f32.partialorder %v3938_v55, 0.0 }
 0x198   : > { %v2057_v12 = vmul.f32 %v3166_v43, %v1833_v44  ;;  %3177 = vpow2.f32 %v2480_v21  ;;  %v2481_v25 = vmul.f32 -1.442695, %v2754_v23 }
 0x199   : > { %v3168_v46 = vpop.eup %3167  ;;  %v1489_v48 = vpop.f32.mrb[32].mxu1 }
 0x19a   : > { %v1682_v27 = vpop.f32.mrb[32].mxu0  ;;  %v3170_v29 = vpop.eup %3169  ;;  %v2058_v57 = vmul.f32 %v3168_v46, %v1834_v56  ;;  %3179 = vpow2.f32 %v2481_v25  ;;  %v2755_v22 = vadd.f32 %v1489_v48, %v3811_v10  ;;  %v1837_v25 = vsel %vm1773_vm12, %v3913_v50, %v1805_v4 }
 0x19b   : > { %v1491_v45 = vpop.f32.mrb[33].mxu1  ;;  %v1684_v7 = vpop.f32.mrb[33].mxu0  ;;  %v1965_v61 = vadd.f32 1.0, %v3170_v29  ;;  %v1838_v29 = vsel %vm1774_vm13, %v3918_v1, %v1806_v19 }
 0x19c   : > { %v3172_v63 = vpop.eup %3171  ;;  %v2757_v24 = vadd.f32 %v1491_v45, %v3815_v14  ;;  %v1493_v2 = vpop.f32.mrb[34].mxu1  ;;  %v2587_v58 = vpack.c.bf16 %v2058_v57, %v2057_v12  ;;  %v3949_v16 = vadd.f32 %v2755_v22, %v1682_v27 }
 0x19d   : > { %v1686_v47 = vpop.f32.mrb[34].mxu0  ;;  %v1966_v31 = vadd.f32 1.0, %v3172_v63  ;;  %v2759_v59 = vadd.f32 %v1493_v2, %v3811_v10  ;;  %v1495_v18 = vpop.f32.mrb[35].mxu1  ;;  %3181 = vrcp.f32 %v1965_v61 }
 0x19e   : > { %v1688_v51 = vpop.f32.mrb[35].mxu0  ;;  %v2758_v20 = vadd.f32 %v2757_v24, %v1684_v7  ;;  %v2761_v60 = vadd.f32 %v1495_v18, %v3815_v14  ;;  %2647 = vst [vmem:[%s3872_s24 + $0x20] sm:$0xff] %v2587_v58   ;;  %v1807_v7 = vmul.f32 0.2, %v3932_v36  ;;  %v1809_v4 = vmul.f32 0.2, %v3949_v16 }
 0x19f   : > { %3183 = vrcp.f32 %v1966_v31  ;;  %v3955_v3 = vadd.f32 %v2759_v59, %v1686_v47  ;;  %v3174_v26 = vpop.eup %3173  ;;  %vm1777_vm0 = vcmp.ge.f32.partialorder %v3949_v16, 0.0 }
 0x1a0   : > { %v2482_v52 = vmul.f32 -1.442695, %v2758_v20  ;;  %v2762_v33 = vadd.f32 %v2761_v60, %v1688_v51  ;;  %v2059_v35 = vmul.f32 %v3174_v26, %v1835_v5  ;;  %v1808_v60 = vmul.f32 0.2, %v3938_v55 }
 0x1a1   : > { %v3176_v62 = vpop.eup %3175  ;;  %v1499_v11 = vpop.f32.mrb[36].mxu1  ;;  %vm1778_vm1 = vcmp.ge.f32.partialorder %v3955_v3, 0.0 }
 0x1a2   : > { %v3178_v28 = vpop.eup %3177  ;;  %v2060_v32 = vmul.f32 %v3176_v62, %v1836_v9  ;;  %3185 = vpow2.f32 %v2482_v52  ;;  %v2483_v34 = vmul.f32 -1.442695, %v2762_v33  ;;  %v1692_v13 = vpop.f32.mrb[36].mxu0  ;;  %v2763_v37 = vadd.f32 %v1499_v11, %v3811_v10 }
 0x1a3   : > { %v1967_v30 = vadd.f32 1.0, %v3178_v28  ;;  %v1501_v39 = vpop.f32.mrb[37].mxu1  ;;  %v1694_v17 = vpop.f32.mrb[37].mxu0  ;;  %v1839_v33 = vsel %vm1775_vm14, %v3932_v36, %v1807_v7  ;;  %v1840_v11 = vsel %vm1776_vm15, %v3938_v55, %v1808_v60 }
 0x1a4   : > { %v2592_v15 = vpack.c.bf16 %v2060_v32, %v2059_v35  ;;  %3187 = vpow2.f32 %v2483_v34  ;;  %v2765_v41 = vadd.f32 %v1501_v39, %v3815_v14  ;;  %v1503_v53 = vpop.f32.mrb[38].mxu1  ;;  %v1696_v6 = vpop.f32.mrb[38].mxu0  ;;  %v3966_v38 = vadd.f32 %v2763_v37, %v1692_v13 }
 0x1a5   : > { %v3180_v42 = vpop.eup %3179  ;;  %3189 = vrcp.f32 %v1967_v30  ;;  %v2767_v54 = vadd.f32 %v1503_v53, %v3811_v10  ;;  %v1505_v8 = vpop.f32.mrb[39].mxu1 }
 0x1a6   : > { %v1698_v40 = vpop.f32.mrb[39].mxu0  ;;  %2648 = vst [vmem:[%s3872_s24 + $0x28] sm:$0xff] %v2592_v15   ;;  %v1968_v21 = vadd.f32 1.0, %v3180_v42  ;;  %v2766_v23 = vadd.f32 %v2765_v41, %v1694_v17  ;;  %v2769_v43 = vadd.f32 %v1505_v8, %v3815_v14  ;;  %vm1779_vm2 = vcmp.ge.f32.partialorder %v3966_v38, 0.0 }
 0x1a7   : > { %v3972_v44 = vadd.f32 %v2767_v54, %v1696_v6  ;;  %v3182_v12 = vpop.eup %3181 }
 0x1a8   : > { %3191 = vrcp.f32 %v1968_v21  ;;  %v2484_v46 = vmul.f32 -1.442695, %v2766_v23  ;;  %v2770_v56 = vadd.f32 %v2769_v43, %v1698_v40  ;;  %v2061_v27 = vmul.f32 %v3182_v12, %v1837_v25 }
 0x1a9   : > { %v3184_v48 = vpop.eup %3183  ;;  %v1509_v22 = vpop.f32.mrb[40].mxu1  ;;  %v1810_v25 = vmul.f32 0.2, %v3955_v3  ;;  %vm1780_vm3 = vcmp.ge.f32.partialorder %v3972_v44, 0.0 }
 0x1aa   : > { %v2062_v57 = vmul.f32 %v3184_v48, %v1838_v29  ;;  %3193 = vpow2.f32 %v2484_v46  ;;  %v2485_v49 = vmul.f32 -1.442695, %v2770_v56  ;;  %v1702_v45 = vpop.f32.mrb[40].mxu0  ;;  %v2771_v63 = vadd.f32 %v1509_v22, %v3811_v10  ;;  %v1511_v0 = vpop.f32.mrb[41].mxu1 }
 0x1ab   : > { %v1704_v61 = vpop.f32.mrb[41].mxu0  ;;  %v2773_v2 = vadd.f32 %v1511_v0, %v3815_v14  ;;  %v1513_v1 = vpop.f32.mrb[42].mxu1 }
 0x1ac   : > { %v3186_v50 = vpop.eup %3185  ;;  %v2597_v24 = vpack.c.bf16 %v2062_v57, %v2061_v27  ;;  %3195 = vpow2.f32 %v2485_v49  ;;  %v1706_v47 = vpop.f32.mrb[42].mxu0  ;;  %v3982_v31 = vadd.f32 %v2771_v63, %v1702_v45  ;;  %v2775_v59 = vadd.f32 %v1513_v1, %v3811_v10 }
 0x1ad   : > { %v1969_v58 = vadd.f32 1.0, %v3186_v50  ;;  %v1515_v18 = vpop.f32.mrb[43].mxu1  ;;  %v1708_v51 = vpop.f32.mrb[43].mxu0  ;;  %v2774_v26 = vadd.f32 %v2773_v2, %v1704_v61  ;;  %v1841_v57 = vsel %vm1777_vm0, %v3949_v16, %v1809_v4  ;;  %v1842_v63 = vsel %vm1778_vm1, %v3955_v3, %v1810_v25 }
 0x1ae   : > { %v3188_v20 = vpop.eup %3187  ;;  %2649 = vst [vmem:[%s3872_s24 + $0x30] sm:$0xff] %v2597_v24   ;;  %v2777_v5 = vadd.f32 %v1515_v18, %v3815_v14  ;;  %v3992_v28 = vadd.f32 %v2775_v59, %v1706_v47  ;;  %v1811_v47 = vmul.f32 0.2, %v3966_v38  ;;  %vm1781_vm4 = vcmp.ge.f32.partialorder %v3982_v31, 0.0 }
 0x1af   : > { %v3190_v52 = vpop.eup %3189  ;;  %3197 = vrcp.f32 %v1969_v58  ;;  %v1970_v62 = vadd.f32 1.0, %v3188_v20  ;;  %v2486_v9 = vmul.f32 -1.442695, %v2774_v26 }
 0x1b0   : > { %v2063_v35 = vmul.f32 %v3190_v52, %v1839_v33  ;;  %v2778_v32 = vadd.f32 %v2777_v5, %v1708_v51  ;;  %vm1782_vm5 = vcmp.ge.f32.partialorder %v3992_v28, 0.0 }
 0x1b1   : > { %3199 = vrcp.f32 %v1970_v62  ;;  %v1519_v30 = vpop.f32.mrb[44].mxu1  ;;  %v1812_v62 = vmul.f32 0.2, %v3972_v44 }
 0x1b2   : > { %v3192_v34 = vpop.eup %3191  ;;  %3201 = vpow2.f32 %v2486_v9  ;;  %v2487_v13 = vmul.f32 -1.442695, %v2778_v32  ;;  %v2779_v39 = vadd.f32 %v1519_v30, %v3811_v10  ;;  %v1712_v36 = vpop.f32.mrb[44].mxu0 }
 0x1b3   : > { %v2064_v37 = vmul.f32 %v3192_v34, %v1840_v11  ;;  %v1521_v17 = vpop.f32.mrb[45].mxu1  ;;  %v1714_v53 = vpop.f32.mrb[45].mxu0 }
 0x1b4   : > { %v3194_v15 = vpop.eup %3193  ;;  %3203 = vpow2.f32 %v2487_v13  ;;  %v2781_v41 = vadd.f32 %v1521_v17, %v3815_v14  ;;  %v1523_v6 = vpop.f32.mrb[46].mxu1  ;;  %v3998_v55 = vadd.f32 %v2779_v39, %v1712_v36  ;;  %v1843_v13 = vsel %vm1779_vm2, %v3966_v38, %v1811_v47 }
 0x1b5   : > { %v2602_v42 = vpack.c.bf16 %v2064_v37, %v2063_v35  ;;  %v1971_v19 = vadd.f32 1.0, %v3194_v15  ;;  %v2783_v54 = vadd.f32 %v1523_v6, %v3811_v10  ;;  %v1716_v8 = vpop.f32.mrb[46].mxu0  ;;  %v1525_v40 = vpop.f32.mrb[47].mxu1  ;;  %v1844_v17 = vsel %vm1780_vm3, %v3972_v44, %v1812_v62 }
 0x1b6   : > { %v3196_v21 = vpop.eup %3195  ;;  %v2782_v23 = vadd.f32 %v2781_v41, %v1714_v53  ;;  %v2785_v43 = vadd.f32 %v1525_v40, %v3815_v14  ;;  %v1718_v12 = vpop.f32.mrb[47].mxu0  ;;  %vm1783_vm6 = vcmp.ge.f32.partialorder %v3998_v55, 0.0 }
 0x1b7   : > { %2650 = vst [vmem:[%s3872_s24 + $0x38] sm:$0xff] %v2602_v42   ;;  %3205 = vrcp.f32 %v1971_v19  ;;  %v1972_v46 = vadd.f32 1.0, %v3196_v21  ;;  %v4006_v48 = vadd.f32 %v2783_v54, %v1716_v8  ;;  %v1813_v19 = vmul.f32 0.2, %v3982_v31 }
 0x1b8   : > { %v2488_v56 = vmul.f32 -1.442695, %v2782_v23  ;;  %v2786_v27 = vadd.f32 %v2785_v43, %v1718_v12 }
 0x1b9   : > { %v3198_v29 = vpop.eup %3197  ;;  %3207 = vrcp.f32 %v1972_v46  ;;  %v1529_v22 = vpop.f32.mrb[48].mxu1  ;;  %vm1784_vm7 = vcmp.ge.f32.partialorder %v4006_v48, 0.0 }
 0x1ba   : > { %v2065_v49 = vmul.f32 %v3198_v29, %v1841_v57  ;;  %3209 = vpow2.f32 %v2488_v56  ;;  %v1722_v45 = vpop.f32.mrb[48].mxu0  ;;  %v2489_v0 = vmul.f32 -1.442695, %v2786_v27  ;;  %v2787_v61 = vadd.f32 %v1529_v22, %v3811_v10  ;;  %v1531_v50 = vpop.f32.mrb[49].mxu1 }
 0x1bb   : > { %v3200_v7 = vpop.eup %3199  ;;  %v1724_v24 = vpop.f32.mrb[49].mxu0  ;;  %v2789_v58 = vadd.f32 %v1531_v50, %v3815_v14  ;;  %v1814_v27 = vmul.f32 0.2, %v3992_v28 }
 0x1bc   : > { %v3202_v2 = vpop.eup %3201  ;;  %v2066_v1 = vmul.f32 %v3200_v7, %v1842_v63  ;;  %v1533_v16 = vpop.f32.mrb[50].mxu1  ;;  %3211 = vpow2.f32 %v2489_v0  ;;  %v4013_v51 = vadd.f32 %v2787_v61, %v1722_v45  ;;  %v1845_v7 = vsel %vm1781_vm4, %v3982_v31, %v1813_v19 }
 0x1bd   : > { %v1726_v59 = vpop.f32.mrb[50].mxu0  ;;  %v1973_v18 = vadd.f32 1.0, %v3202_v2  ;;  %v2791_v3 = vadd.f32 %v1533_v16, %v3811_v10  ;;  %v1535_v20 = vpop.f32.mrb[51].mxu1  ;;  %v2790_v52 = vadd.f32 %v2789_v58, %v1724_v24  ;;  %v1846_v2 = vsel %vm1782_vm5, %v3992_v28, %v1814_v27 }
 0x1be   : > { %v1728_v60 = vpop.f32.mrb[51].mxu0  ;;  %v3204_v26 = vpop.eup %3203  ;;  %v2607_v5 = vpack.c.bf16 %v2066_v1, %v2065_v49  ;;  %v2793_v33 = vadd.f32 %v1535_v20, %v3815_v14  ;;  %v1815_v20 = vmul.f32 0.2, %v3998_v55  ;;  %vm1785_vm8 = vcmp.ge.f32.partialorder %v4013_v51, 0.0 }
 0x1bf   : > { %3213 = vrcp.f32 %v1973_v18  ;;  %v1974_v35 = vadd.f32 1.0, %v3204_v26  ;;  %v2490_v9 = vmul.f32 -1.442695, %v2790_v52  ;;  %v4021_v32 = vadd.f32 %v2791_v3, %v1726_v59 }
 0x1c0   : > { %2651 = vst [vmem:[%s3872_s24 + $0x40] sm:$0xff] %v2607_v5   ;;  %v2794_v34 = vadd.f32 %v2793_v33, %v1728_v60 }
 0x1c1   : > { %v3206_v11 = vpop.eup %3205  ;;  %3215 = vrcp.f32 %v1974_v35  ;;  %v1539_v37 = vpop.f32.mrb[52].mxu1  ;;  %vm1786_vm9 = vcmp.ge.f32.partialorder %v4021_v32, 0.0 }
 0x1c2   : > { %v2067_v30 = vmul.f32 %v3206_v11, %v1843_v13  ;;  %3217 = vpow2.f32 %v2490_v9  ;;  %v1732_v39 = vpop.f32.mrb[52].mxu0  ;;  %v2491_v15 = vmul.f32 -1.442695, %v2794_v34  ;;  %v2795_v4 = vadd.f32 %v1539_v37, %v3811_v10  ;;  %v1541_v41 = vpop.f32.mrb[53].mxu1 }
 0x1c3   : > { %v3208_v36 = vpop.eup %3207  ;;  %v1734_v53 = vpop.f32.mrb[53].mxu0  ;;  %v2797_v54 = vadd.f32 %v1541_v41, %v3815_v14  ;;  %v1816_v11 = vmul.f32 0.2, %v4006_v48 }
 0x1c4   : > { %v3210_v6 = vpop.eup %3209  ;;  %v2068_v42 = vmul.f32 %v3208_v36, %v1844_v17  ;;  %v1543_v38 = vpop.f32.mrb[54].mxu1  ;;  %3219 = vpow2.f32 %v2491_v15  ;;  %v4028_v21 = vadd.f32 %v2795_v4, %v1732_v39  ;;  %v1847_v36 = vsel %vm1783_vm6, %v3998_v55, %v1815_v20 }
 0x1c5   : > { %v1736_v8 = vpop.f32.mrb[54].mxu0  ;;  %v1975_v40 = vadd.f32 1.0, %v3210_v6  ;;  %v2799_v44 = vadd.f32 %v1543_v38, %v3811_v10  ;;  %v1545_v23 = vpop.f32.mrb[55].mxu1  ;;  %v2798_v25 = vadd.f32 %v2797_v54, %v1734_v53  ;;  %v1848_v54 = vsel %vm1784_vm7, %v4006_v48, %v1816_v11 }
 0x1c6   : > { %v1738_v43 = vpop.f32.mrb[55].mxu0  ;;  %v2612_v12 = vpack.c.bf16 %v2068_v42, %v2067_v30  ;;  %v2801_v46 = vadd.f32 %v1545_v23, %v3815_v14  ;;  %v3212_v56 = vpop.eup %3211  ;;  %v1817_v23 = vmul.f32 0.2, %v4013_v51  ;;  %vm1787_vm10 = vcmp.ge.f32.partialorder %v4028_v21, 0.0 }
 0x1c7   : > { %3221 = vrcp.f32 %v1975_v40  ;;  %v4034_v29 = vadd.f32 %v2799_v44, %v1736_v8  ;;  %v1976_v57 = vadd.f32 1.0, %v3212_v56  ;;  %v2492_v49 = vmul.f32 -1.442695, %v2798_v25 }
 0x1c8   : > { %2652 = vst [vmem:[%s3872_s24 + $0x48] sm:$0xff] %v2612_v12   ;;  %v2802_v22 = vadd.f32 %v2801_v46, %v1738_v43 }
 0x1c9   : > { %v3214_v45 = vpop.eup %3213  ;;  %3223 = vrcp.f32 %v1976_v57  ;;  %v1549_v61 = vpop.f32.mrb[56].mxu1  ;;  %vm1788_vm11 = vcmp.ge.f32.partialorder %v4034_v29, 0.0 }
 0x1ca   : > { %v2069_v63 = vmul.f32 %v3214_v45, %v1845_v7  ;;  %v2493_v0 = vmul.f32 -1.442695, %v2802_v22  ;;  %v1742_v50 = vpop.f32.mrb[56].mxu0  ;;  %3225 = vpow2.f32 %v2492_v49  ;;  %v2803_v1 = vadd.f32 %v1549_v61, %v3811_v10  ;;  %v1551_v47 = vpop.f32.mrb[57].mxu1 }
 0x1cb   : > { %v3216_v24 = vpop.eup %3215  ;;  %v1744_v58 = vpop.f32.mrb[57].mxu0  ;;  %v2805_v18 = vadd.f32 %v1551_v47, %v3815_v14  ;;  %v1818_v22 = vmul.f32 0.2, %v4021_v32 }
 0x1cc   : > { %v3218_v16 = vpop.eup %3217  ;;  %v2070_v59 = vmul.f32 %v3216_v24, %v1846_v2  ;;  %3227 = vpow2.f32 %v2493_v0  ;;  %v1553_v31 = vpop.f32.mrb[58].mxu1  ;;  %v4043_v26 = vadd.f32 %v2803_v1, %v1742_v50 }
 0x1cd   : > { %v1746_v3 = vpop.f32.mrb[58].mxu0  ;;  %v1977_v60 = vadd.f32 1.0, %v3218_v16  ;;  %v2807_v28 = vadd.f32 %v1553_v31, %v3811_v10  ;;  %v1555_v5 = vpop.f32.mrb[59].mxu1  ;;  %v2806_v62 = vadd.f32 %v2805_v18, %v1744_v58  ;;  %v1850_v2 = vsel %vm1786_vm9, %v4021_v32, %v1818_v22 }
 0x1ce   : > { %v1748_v52 = vpop.f32.mrb[59].mxu0  ;;  %v2617_v33 = vpack.c.bf16 %v2070_v59, %v2069_v63  ;;  %v2809_v35 = vadd.f32 %v1555_v5, %v3815_v14  ;;  %v3220_v9 = vpop.eup %3219  ;;  %v1819_v16 = vmul.f32 0.2, %v4028_v21  ;;  %vm1789_vm12 = vcmp.ge.f32.partialorder %v4043_v26, 0.0 }
 0x1cf   : > { %3229 = vrcp.f32 %v1977_v60  ;;  %v4048_v34 = vadd.f32 %v2807_v28, %v1746_v3  ;;  %v1978_v13 = vadd.f32 1.0, %v3220_v9  ;;  %v2494_v30 = vmul.f32 -1.442695, %v2806_v62 }
 0x1d0   : > { %2653 = vst [vmem:[%s3872_s24 + $0x50] sm:$0xff] %v2617_v33   ;;  %v2810_v37 = vadd.f32 %v2809_v35, %v1748_v52  ;;  %v1851_v3 = vsel %vm1787_vm10, %v4028_v21, %v1819_v16  ;;  %v1821_v35 = vmul.f32 0.2, %v4043_v26 }
 0x1d1   : > { %v3222_v39 = vpop.eup %3221  ;;  %3231 = vrcp.f32 %v1978_v13  ;;  %v1559_v4 = vpop.f32.mrb[60].mxu1  ;;  %v1822_v11 = vmul.f32 0.2, %v4048_v34  ;;  %vm1790_vm13 = vcmp.ge.f32.partialorder %v4048_v34, 0.0 }
 0x1d2   : > { %v2071_v17 = vmul.f32 %v3222_v39, %v1847_v36  ;;  %v2495_v15 = vmul.f32 -1.442695, %v2810_v37  ;;  %v1752_v41 = vpop.f32.mrb[60].mxu0  ;;  %3233 = vpow2.f32 %v2494_v30  ;;  %v2811_v53 = vadd.f32 %v1559_v4, %v3811_v10  ;;  %v1561_v6 = vpop.f32.mrb[61].mxu1 }
 0x1d3   : > { %v1754_v42 = vpop.f32.mrb[61].mxu0  ;;  %v3224_v19 = vpop.eup %3223  ;;  %v2813_v38 = vadd.f32 %v1561_v6, %v3815_v14  ;;  %v1854_v39 = vsel %vm1790_vm13, %v4048_v34, %v1822_v11 }
 0x1d4   : > { %3235 = vpow2.f32 %v2495_v15  ;;  %v1563_v8 = vpop.f32.mrb[62].mxu1  ;;  %v1756_v55 = vpop.f32.mrb[62].mxu0  ;;  %v2072_v44 = vmul.f32 %v3224_v19, %v1848_v54  ;;  %v4058_v43 = vadd.f32 %v2811_v53, %v1752_v41 }
 0x1d5   : > { %v3226_v40 = vpop.eup %3225  ;;  %v2815_v12 = vadd.f32 %v1563_v8, %v3811_v10  ;;  %v1565_v25 = vpop.f32.mrb[63].mxu1  ;;  %v2814_v27 = vadd.f32 %v2813_v38, %v1754_v42  ;;  %v1849_v10 = vsel %vm1785_vm8, %v4013_v51, %v1817_v23  ;;  %v1820_v51 = vmul.f32 0.2, %v4034_v29 }
 0x1d6   : > { %v1758_v46 = vpop.f32.mrb[63].mxu0  ;;  %v3228_v56 = vpop.eup %3227  ;;  %v1979_v48 = vadd.f32 1.0, %v3226_v40  ;;  %v2817_v57 = vadd.f32 %v1565_v25, %v3815_v14  ;;  %v2622_v49 = vpack.c.bf16 %v2072_v44, %v2071_v17  ;;  %v1823_v17 = vmul.f32 0.2, %v4058_v43 }
 0x1d7   : > { %v1980_v45 = vadd.f32 1.0, %v3228_v56  ;;  %v2496_v7 = vmul.f32 -1.442695, %v2814_v27  ;;  %v2816_v63 = vadd.f32 %v2815_v12, %v1756_v55  ;;  %v1852_v28 = vsel %vm1788_vm11, %v4034_v29, %v1820_v51 }
 0x1d8   : > { %3237 = vrcp.f32 %v1979_v48  ;;  %v2818_v0 = vadd.f32 %v2817_v57, %v1758_v46  ;;  %2654 = vst [vmem:[%s3872_s24 + $0x58] sm:$0xff] %v2622_v49   ;;  %v1853_v29 = vsel %vm1789_vm12, %v4043_v26, %v1821_v35  ;;  %vm1791_vm14 = vcmp.ge.f32.partialorder %v4058_v43, 0.0 }
 0x1d9   : > { %v3230_v61 = vpop.eup %3229  ;;  %3239 = vrcp.f32 %v1980_v45  ;;  %v1824_v4 = vmul.f32 0.2, %v2816_v63  ;;  %v1855_v53 = vsel %vm1791_vm14, %v4058_v43, %v1823_v17  ;;  %vm1792_vm15 = vcmp.ge.f32.partialorder %v2816_v63, 0.0 }
 0x1da   : > { %v2073_v50 = vmul.f32 %v3230_v61, %v1849_v10  ;;  %3241 = vpow2.f32 %v2496_v7  ;;  %v2497_v24 = vmul.f32 -1.442695, %v2818_v0 }
 0x1db   : > { %v3232_v14 = vpop.eup %3231  ;;  %v1856_v42 = vsel %vm1792_vm15, %v2816_v63, %v1824_v4 }
 0x1dc   : > { %v3234_v1 = vpop.eup %3233  ;;  %v2074_v47 = vmul.f32 %v3232_v14, %v1850_v2  ;;  %3243 = vpow2.f32 %v2497_v24 }
 0x1dd   : > { %v1981_v59 = vadd.f32 1.0, %v3234_v1 }
 0x1de   : > { %v3236_v58 = vpop.eup %3235  ;;  %v2627_v18 = vpack.c.bf16 %v2074_v47, %v2073_v50 }
 0x1df   : > { %v1982_v31 = vadd.f32 1.0, %v3236_v58  ;;  %3245 = vrcp.f32 %v1981_v59 }
 0x1e0   : > { %2655 = vst [vmem:[%s3872_s24 + $0x60] sm:$0xff] %v2627_v18  }
 0x1e1   : > { %3247 = vrcp.f32 %v1982_v31 }
 0x1e2   : > { %v3238_v32 = vpop.eup %3237 }
 0x1e3   : > { %v3240_v20 = vpop.eup %3239  ;;  %v2075_v60 = vmul.f32 %v3238_v32, %v1851_v3 }
 0x1e4   : > { %v3242_v5 = vpop.eup %3241  ;;  %v2076_v52 = vmul.f32 %v3240_v20, %v1852_v28 }
 0x1e5   : > { %v1983_v33 = vadd.f32 1.0, %v3242_v5 }
 0x1e6   : > { %v2632_v62 = vpack.c.bf16 %v2076_v52, %v2075_v60  ;;  %v3244_v9 = vpop.eup %3243 }
 0x1e7   : > { %3249 = vrcp.f32 %v1983_v33  ;;  %v1984_v21 = vadd.f32 1.0, %v3244_v9 }
 0x1e8   : > { %2656 = vst [vmem:[%s3872_s24 + $0x68] sm:$0xff] %v2632_v62  }
 0x1e9   : > { %v3246_v13 = vpop.eup %3245  ;;  %3251 = vrcp.f32 %v1984_v21 }
 0x1ea   : > { %v2077_v37 = vmul.f32 %v3246_v13, %v1853_v29 }
 0x1eb   : > { %v3248_v30 = vpop.eup %3247 }
 0x1ec   : > { %v2078_v36 = vmul.f32 %v3248_v30, %v1854_v39 }
 0x1ee   : > { %v2637_v15 = vpack.c.bf16 %v2078_v36, %v2077_v37 }
 0x1f0   : > { %2657 = vst [vmem:[%s3872_s24 + $0x70] sm:$0xff] %v2637_v15  }
 0x1f1   : > { %v3250_v41 = vpop.eup %3249 }
 0x1f2   : > { %v2079_v6 = vmul.f32 %v3250_v41, %v1855_v53 }
 0x1f3   : > { %v3252_v26 = vpop.eup %3251 }
 0x1f4   : > { %v2080_v19 = vmul.f32 %v3252_v26, %v1856_v42 }
 0x1f6   : > { %v2642_v54 = vpack.c.bf16 %v2080_v19, %v2079_v6 }
 0x1f8   : > { %2658 = vst [vmem:[%s3872_s24 + $0x78] sm:$0xff] %v2642_v54  }
 0x1f9 PF: > { %s13_s12 = sadd.s32 1, %s3259_s12  }
 0x1fa   : > { %p10_p4 = scmp.ge.s32.totalorder %s13_s12, 4  }
 0x1fc   :  { %12 = sbr.rel (!%p10_p4) target bundleno = 1 (0x1), region = 62 }

// kernel: _lambda_.51
= control target key start
LH: loop header
LB: loop body
LE: loop exit
PB: predicated region body
PF: predicated region fallthrough
CT: control target
= control target key end

     0   :  { %s2449_s12 = smov 0   ;;  %s3094_s0 = inlined_call_operand.vmem [shape: bf16[512,384], index: 0, kind: input, shape index: {}]   ;;  %s3095_s1 = inlined_call_operand.vmem [shape: bf16[384,256], index: 1, kind: input, shape index: {}]   ;;  %s3096_s2 = inlined_call_operand.vmem [shape: f32[1,256], index: 2, kind: input, shape index: {}]   ;;  %s3097_s3 = inlined_call_operand.vmem [shape: bf16[512,128], index: 3, kind: output, shape index: {}]  }
   0x1 LB: > { %s1720_s13 = sadd.s32 4294967295, %s2426_s12   ;;  %p1724_p0 = scmp.ge.s32.totalorder %s2426_s12, 1  ;;  %s2426_s12 = sphi %s2449_s12, %s13_s12  }
   0x2   : > { %p139_p1 = scmp.lt.s32.totalorder %s2426_s12, 3 }
   0x4   : > { %p140_p2 = pnand %p1724_p0, %p139_p1 }
   0x5   : > { %v2156_v0 = vld [vmem:[%s3095_s1 + $0x4] ss:$8 sps:$4 sm:$0xff] (!%p140_p2)   ;;  %v2158_v1 = vld [vmem:[%s3095_s1] ss:$8 sps:$4 sm:$0xff] (!%p140_p2)   ;;  %v2428_v2 = vmov (!%p140_p2), 0   ;;  %s1725_s11 = sshll.u32 (!%p140_p2), %s1720_s13, 5 }
   0x6   : > { %143 = sbr.rel (%p140_p2) target bundleno = 440 (0x1b8), region = 32  ;;  %1023 = vmatprep.mubr.bf16.mxu0 (!%p140_p2), %v2428_v2  ;;  %798 = vmatprep.subr.bf16.mxu1 (!%p140_p2), %v2156_v0  ;;  %v2159_v3 = vld [vmem:[%s3095_s1 + $0x14] ss:$8 sps:$4 sm:$0xff] (!%p140_p2)   ;;  %v2161_v4 = vld [vmem:[%s3095_s1 + $0x10] ss:$8 sps:$4 sm:$0xff] (!%p140_p2)   ;;  %p165_p3 = scmp.lt.s32.totalorder (!%p140_p2), %s1725_s11, 63 }
   0x7   : > { %799 = vmatpush1.bf16.msra.mxu1 (!%p140_p2), %v2158_v1  ;;  %v2162_v5 = vld [vmem:[%s3095_s1 + $0x24] ss:$8 sps:$4 sm:$0xff] (!%p140_p2)   ;;  %v2164_v6 = vld [vmem:[%s3095_s1 + $0x20] ss:$8 sps:$4 sm:$0xff] (!%p140_p2)   ;;  %v2165_v7 = vld [vmem:[%s3095_s1 + $0x34] ss:$8 sps:$4 sm:$0xff] (!%p140_p2)  }
   0x8   : > { %800 = vmatprep.subr.bf16.mxu1 (!%p140_p2), %v2159_v3  ;;  %v2167_v8 = vld [vmem:[%s3095_s1 + $0x30] ss:$8 sps:$4 sm:$0xff] (!%p140_p2)   ;;  %v2180_v9 = vld [vmem:[%s3095_s1 + $0x104] ss:$8 sps:$4 sm:$0xff] (!%p140_p2)   ;;  %v2184_v11 = vld [vmem:[%s3095_s1 + $0x100] ss:$8 sps:$4 sm:$0xff] (!%p140_p2)  }
   0x9   : > { %v2168_v10 = vld [vmem:[%s3095_s1 + $0x44] ss:$8 sps:$4 sm:$0xff] (!%p140_p2)   ;;  %991 = vmatprep.subr.bf16.mxu0 (!%p140_p2), %v2180_v9  ;;  %v2186_v12 = vld [vmem:[%s3095_s1 + $0x114] ss:$8 sps:$4 sm:$0xff] (!%p140_p2)   ;;  %v2170_v13 = vld [vmem:[%s3095_s1 + $0x40] ss:$8 sps:$4 sm:$0xff] (!%p140_p2)  }
   0xa   : > { %992 = vmatpush1.bf16.msra.mxu0 (!%p140_p2), %v2184_v11  ;;  %v2171_v14 = vld [vmem:[%s3095_s1 + $0x54] ss:$8 sps:$4 sm:$0xff] (!%p140_p2)   ;;  %v2190_v15 = vld [vmem:[%s3095_s1 + $0x110] ss:$8 sps:$4 sm:$0xff] (!%p140_p2)   ;;  %v2192_v16 = vld [vmem:[%s3095_s1 + $0x124] ss:$8 sps:$4 sm:$0xff] (!%p140_p2)  }
   0xb   : > { %801 = vmatpush1.bf16.msra.mxu1 (!%p140_p2), %v2161_v4  ;;  %993 = vmatprep.subr.bf16.mxu0 (!%p140_p2), %v2186_v12  ;;  %v2173_v17 = vld [vmem:[%s3095_s1 + $0x50] ss:$8 sps:$4 sm:$0xff] (!%p140_p2)   ;;  %v2196_v18 = vld [vmem:[%s3095_s1 + $0x120] ss:$8 sps:$4 sm:$0xff] (!%p140_p2)   ;;  %v2198_v19 = vld [vmem:[%s3095_s1 + $0x134] ss:$8 sps:$4 sm:$0xff] (!%p140_p2)  }
   0xc   : > { %802 = vmatprep.subr.bf16.mxu1 (!%p140_p2), %v2162_v5  ;;  %v2174_v20 = vld [vmem:[%s3095_s1 + $0x64] ss:$8 sps:$4 sm:$0xff] (!%p140_p2)   ;;  %v2202_v21 = vld [vmem:[%s3095_s1 + $0x130] ss:$8 sps:$4 sm:$0xff] (!%p140_p2)   ;;  %v2176_v22 = vld [vmem:[%s3095_s1 + $0x60] ss:$8 sps:$4 sm:$0xff] (!%p140_p2)  }
   0xd   : > { %s3099_s11 = smov (!%p165_p3, %s1725_s11), 63  ;;  %v2204_v23 = vld [vmem:[%s3095_s1 + $0x144] ss:$8 sps:$4 sm:$0xff]   ;;  %v2177_v24 = vld [vmem:[%s3095_s1 + $0x74] ss:$8 sps:$4 sm:$0xff]  }
   0xe   : > { %994 = vmatpush1.bf16.msra.mxu0 %v2190_v15  ;;  %v2179_v25 = vld [vmem:[%s3095_s1 + $0x70] ss:$8 sps:$4 sm:$0xff]   ;;  %v2208_v26 = vld [vmem:[%s3095_s1 + $0x140] ss:$8 sps:$4 sm:$0xff]   ;;  %s2146_s17 = smul.u32 12, %s3099_s11 }
   0xf   : > { %803 = vmatpush1.bf16.msra.mxu1 %v2164_v6  ;;  %995 = vmatprep.subr.bf16.mxu0 %v2192_v16  ;;  %v2210_v27 = vld [vmem:[%s3095_s1 + $0x154] ss:$8 sps:$4 sm:$0xff]   ;;  %v2182_v28 = vld [vmem:[%s3095_s1 + $0x84] ss:$8 sps:$4 sm:$0xff]   ;;  %v2214_v29 = vld [vmem:[%s3095_s1 + $0x150] ss:$8 sps:$4 sm:$0xff]  }
  0x10   : > { %804 = vmatprep.subr.bf16.mxu1 %v2165_v7  ;;  %s2551_s25 = scalar_lea.vmem %s3094_s0, %s2146_s17  ;;  %v2185_v30 = vld [vmem:[%s3095_s1 + $0x80] ss:$8 sps:$4 sm:$0xff]   ;;  %v2216_v31 = vld [vmem:[%s3095_s1 + $0x164] ss:$8 sps:$4 sm:$0xff]   ;;  %v2188_v32 = vld [vmem:[%s3095_s1 + $0x94] ss:$8 sps:$4 sm:$0xff]  }
  0x11   : > { %v2191_v33 = vld [vmem:[%s3095_s1 + $0x90] ss:$8 sps:$4 sm:$0xff]   ;;  %v2220_v35 = vld [vmem:[%s3095_s1 + $0x160] ss:$8 sps:$4 sm:$0xff]   ;;  %v2222_v36 = vld [vmem:[%s3095_s1 + $0x174] ss:$8 sps:$4 sm:$0xff]  }
  0x12   : > { %996 = vmatpush1.bf16.msra.mxu0 %v2196_v18  ;;  %v2230_v34 = vld [vmem:[%s2551_s25 + $0x4] ss:$12 sps:$4 sm:$0xff]   ;;  %v2197_v39 = vld [vmem:[%s3095_s1 + $0xa0] ss:$8 sps:$4 sm:$0xff]   ;;  %v2200_v40 = vld [vmem:[%s3095_s1 + $0xb4] ss:$8 sps:$4 sm:$0xff]  }
  0x13   : > { %805 = vmatpush1.bf16.msra.mxu1 %v2167_v8  ;;  %997 = vmatprep.subr.bf16.mxu0 %v2198_v19  ;;  %v2194_v37 = vld [vmem:[%s3095_s1 + $0xa4] ss:$8 sps:$4 sm:$0xff]   ;;  %v2226_v38 = vld [vmem:[%s3095_s1 + $0x170] ss:$8 sps:$4 sm:$0xff]   ;;  %v2231_v41 = vld [vmem:[%s2551_s25 + $0x8] ss:$12 sps:$4 sm:$0xff]  }
  0x14   : > { %806 = vmatprep.subr.bf16.mxu1 %v2168_v10  ;;  %830 = vmatprep.mubr.bf16.mxu1 %v2230_v34  ;;  %v2203_v42 = vld [vmem:[%s3095_s1 + $0xb0] ss:$8 sps:$4 sm:$0xff]   ;;  %v2206_v43 = vld [vmem:[%s3095_s1 + $0xc4] ss:$8 sps:$4 sm:$0xff]   ;;  %v2209_v44 = vld [vmem:[%s3095_s1 + $0xc0] ss:$8 sps:$4 sm:$0xff]  }
  0x15   : > { %v2212_v45 = vld [vmem:[%s3095_s1 + $0xd4] ss:$8 sps:$4 sm:$0xff]   ;;  %v2234_v46 = vld [vmem:[%s2551_s25 + $0x20] ss:$12 sps:$4 sm:$0xff]   ;;  %v2215_v47 = vld [vmem:[%s3095_s1 + $0xd0] ss:$8 sps:$4 sm:$0xff]  }
  0x16   : > { %998 = vmatpush1.bf16.msra.mxu0 %v2202_v21  ;;  %v2218_v48 = vld [vmem:[%s3095_s1 + $0xe4] ss:$8 sps:$4 sm:$0xff]   ;;  %v2221_v49 = vld [vmem:[%s3095_s1 + $0xe0] ss:$8 sps:$4 sm:$0xff]   ;;  %v2224_v50 = vld [vmem:[%s3095_s1 + $0xf4] ss:$8 sps:$4 sm:$0xff]  }
  0x17   : > { %807 = vmatpush1.bf16.msra.mxu1 %v2170_v13  ;;  %999 = vmatprep.subr.bf16.mxu0 %v2204_v23  ;;  %v2238_v51 = vld [vmem:[%s2551_s25 + $0x38] ss:$12 sps:$4 sm:$0xff]   ;;  %v2228_v53 = vld [vmem:[%s2551_s25] ss:$12 sps:$4 sm:$0xff]   ;;  %v2232_v54 = vld [vmem:[%s2551_s25 + $0x1c] ss:$12 sps:$4 sm:$0xff]  }
  0x18   : > { %808 = vmatprep.subr.bf16.mxu1 %v2171_v14  ;;  %v2227_v52 = vld [vmem:[%s3095_s1 + $0xf0] ss:$8 sps:$4 sm:$0xff]   ;;  %v2236_v57 = vld [vmem:[%s2551_s25 + $0x34] ss:$12 sps:$4 sm:$0xff]   ;;  %v2248_v3 = vld [vmem:[%s2551_s25 + $0x7c] ss:$12 sps:$4 sm:$0xff]  }
  0x19   : > { %v2242_v55 = vld [vmem:[%s2551_s25 + $0x50] ss:$12 sps:$4 sm:$0xff]   ;;  %v2235_v56 = vld [vmem:[%s2551_s25 + $0x18] ss:$12 sps:$4 sm:$0xff]   ;;  %v2246_v58 = vld [vmem:[%s2551_s25 + $0x68] ss:$12 sps:$4 sm:$0xff]  }
  0x1a   : > { %1000 = vmatpush1.bf16.msra.mxu0 %v2208_v26  ;;  %v2239_v59 = vld [vmem:[%s2551_s25 + $0x30] ss:$12 sps:$4 sm:$0xff]   ;;  %v2240_v60 = vld [vmem:[%s2551_s25 + $0x4c] ss:$12 sps:$4 sm:$0xff]   ;;  %v2243_v62 = vld [vmem:[%s2551_s25 + $0x48] ss:$12 sps:$4 sm:$0xff]  }
  0x1b   : > { %809 = vmatpush1.bf16.msra.mxu1 %v2173_v17  ;;  %1001 = vmatprep.subr.bf16.mxu0 %v2210_v27  ;;  %v2250_v61 = vld [vmem:[%s2551_s25 + $0x80] ss:$12 sps:$4 sm:$0xff]   ;;  %v2244_v63 = vld [vmem:[%s2551_s25 + $0x64] ss:$12 sps:$4 sm:$0xff]   ;;  %v2262_v7 = vld [vmem:[%s2551_s25 + $0xc8] ss:$12 sps:$4 sm:$0xff]  }
  0x1c   : > { %810 = vmatprep.subr.bf16.mxu1 %v2174_v20  ;;  %v2254_v0 = vld [vmem:[%s2551_s25 + $0x98] ss:$12 sps:$4 sm:$0xff]   ;;  %v2247_v1 = vld [vmem:[%s2551_s25 + $0x60] ss:$12 sps:$4 sm:$0xff]   ;;  %v2258_v4 = vld [vmem:[%s2551_s25 + $0xb0] ss:$12 sps:$4 sm:$0xff]  }
  0x1d   : > { %v2251_v5 = vld [vmem:[%s2551_s25 + $0x78] ss:$12 sps:$4 sm:$0xff]   ;;  %v2252_v6 = vld [vmem:[%s2551_s25 + $0x94] ss:$12 sps:$4 sm:$0xff]   ;;  %v2255_v8 = vld [vmem:[%s2551_s25 + $0x90] ss:$12 sps:$4 sm:$0xff]  }
  0x1e   : > { %1002 = vmatpush1.bf16.msra.mxu0 %v2214_v29  ;;  %v2256_v9 = vld [vmem:[%s2551_s25 + $0xac] ss:$12 sps:$4 sm:$0xff]   ;;  %v2259_v11 = vld [vmem:[%s2551_s25 + $0xa8] ss:$12 sps:$4 sm:$0xff]   ;;  %v2260_v12 = vld [vmem:[%s2551_s25 + $0xc4] ss:$12 sps:$4 sm:$0xff]  }
  0x1f   : > { %811 = vmatpush1.bf16.msra.mxu1 %v2176_v22  ;;  %1003 = vmatprep.subr.bf16.mxu0 %v2216_v31  ;;  %v2266_v10 = vld [vmem:[%s2551_s25 + $0xe0] ss:$12 sps:$4 sm:$0xff]   ;;  %v2270_v13 = vld [vmem:[%s2551_s25 + $0xf8] ss:$12 sps:$4 sm:$0xff]   ;;  %v2264_v15 = vld [vmem:[%s2551_s25 + $0xdc] ss:$12 sps:$4 sm:$0xff]  }
  0x20   : > { %812 = vmatprep.subr.bf16.mxu1 %v2177_v24  ;;  %v2263_v14 = vld [vmem:[%s2551_s25 + $0xc0] ss:$12 sps:$4 sm:$0xff]   ;;  %v2274_v16 = vld [vmem:[%s2551_s25 + $0x110] ss:$12 sps:$4 sm:$0xff]   ;;  %v2267_v17 = vld [vmem:[%s2551_s25 + $0xd8] ss:$12 sps:$4 sm:$0xff]  }
  0x21   : > { %v2268_v18 = vld [vmem:[%s2551_s25 + $0xf4] ss:$12 sps:$4 sm:$0xff]   ;;  %v2271_v20 = vld [vmem:[%s2551_s25 + $0xf0] ss:$12 sps:$4 sm:$0xff]   ;;  %v2272_v21 = vld [vmem:[%s2551_s25 + $0x10c] ss:$12 sps:$4 sm:$0xff]  }
  0x22   : > { %1004 = vmatpush1.bf16.msra.mxu0 %v2220_v35  ;;  %v2278_v19 = vld [vmem:[%s2551_s25 + $0x128] ss:$12 sps:$4 sm:$0xff]   ;;  %v2282_v22 = vld [vmem:[%s2551_s25 + $0x140] ss:$12 sps:$4 sm:$0xff]   ;;  %v2276_v24 = vld [vmem:[%s2551_s25 + $0x124] ss:$12 sps:$4 sm:$0xff]  }
  0x23   : > { %813 = vmatpush1.bf16.msra.mxu1 %v2179_v25  ;;  %1005 = vmatprep.subr.bf16.mxu0 %v2222_v36  ;;  %v2275_v23 = vld [vmem:[%s2551_s25 + $0x108] ss:$12 sps:$4 sm:$0xff]   ;;  %v2286_v25 = vld [vmem:[%s2551_s25 + $0x158] ss:$12 sps:$4 sm:$0xff]   ;;  %v2279_v26 = vld [vmem:[%s2551_s25 + $0x120] ss:$12 sps:$4 sm:$0xff]  }
  0x24   : > { %814 = vmatprep.subr.bf16.mxu1 %v2182_v28  ;;  %v2280_v27 = vld [vmem:[%s2551_s25 + $0x13c] ss:$12 sps:$4 sm:$0xff]   ;;  %v2283_v29 = vld [vmem:[%s2551_s25 + $0x138] ss:$12 sps:$4 sm:$0xff]  }
  0x25   : > { %v2290_v28 = vld [vmem:[%s2551_s25 + $0x170] ss:$12 sps:$4 sm:$0xff]  }
  0x26   : > { %1006 = vmatpush1.bf16.msra.mxu0 %v2226_v38  ;;  %v2287_v31 = vld [vmem:[%s2551_s25 + $0x150] ss:$12 sps:$4 sm:$0xff]  }
  0x27   : > { %815 = vmatpush1.bf16.msra.mxu1 %v2185_v30  ;;  %v2284_v30 = vld [vmem:[%s2551_s25 + $0x154] ss:$12 sps:$4 sm:$0xff]  }
  0x28   : > { %816 = vmatprep.subr.bf16.mxu1 %v2188_v32  ;;  %v2288_v32 = vld [vmem:[%s2551_s25 + $0x16c] ss:$12 sps:$4 sm:$0xff]  }
  0x29   : > { %1024 = vmatmul.mubr.bf16.vlgmr.msra.gmra.mrb[0].mxu0 %v2231_v41 }
  0x2a   : > { %1033 = vmatprep.mubr.bf16.mxu0 %v2428_v2 }
  0x2b   : > { %817 = vmatpush1.bf16.msra.mxu1 %v2191_v33  ;;  %v2291_v33 = vld [vmem:[%s2551_s25 + $0x168] ss:$12 sps:$4 sm:$0xff]   ;;  %s1728_s25 = sshll.u32 %s3099_s11, 2 }
  0x2c   : > { %818 = vmatprep.subr.bf16.mxu1 %v2194_v37  ;;  %s2761_s11 = scalar_lea.vmem %s3097_s3, %s1728_s25 }
  0x2f   : > { %819 = vmatpush1.bf16.msra.mxu1 %v2197_v39 }
  0x30   : > { %820 = vmatprep.subr.bf16.mxu1 %v2200_v40 }
  0x31   : > { %1034 = vmatmul.mubr.bf16.gmra.mrb[4].mxu0 %v2234_v46 }
  0x32   : > { %1043 = vmatprep.mubr.bf16.mxu0 %v2428_v2 }
  0x33   : > { %821 = vmatpush1.bf16.msra.mxu1 %v2203_v42 }
  0x34   : > { %822 = vmatprep.subr.bf16.mxu1 %v2206_v43 }
  0x37   : > { %823 = vmatpush1.bf16.msra.mxu1 %v2209_v44  ;;  %v290_v44 = vld [vmem:[%s3096_s2] sm:$0x3] }
  0x38   : > { %824 = vmatprep.subr.bf16.mxu1 %v2212_v45 }
  0x39   : > { %1044 = vmatmul.mubr.bf16.gmra.mrb[8].mxu0 %v2238_v51 }
  0x3a   : > { %1053 = vmatprep.mubr.bf16.mxu0 %v2428_v2 }
  0x3b   : > { %825 = vmatpush1.bf16.msra.mxu1 %v2215_v47 }
  0x3c   : > { %826 = vmatprep.subr.bf16.mxu1 %v2218_v48 }
  0x3f   : > { %827 = vmatpush1.bf16.msra.mxu1 %v2221_v49 }
  0x40   : > { %828 = vmatprep.subr.bf16.mxu1 %v2224_v50 }
  0x41   : > { %1054 = vmatmul.mubr.bf16.gmra.mrb[12].mxu0 %v2242_v55 }
  0x42   : > { %1063 = vmatprep.mubr.bf16.mxu0 %v2428_v2 }
  0x43   : > { %829 = vmatpush1.bf16.msra.mxu1 %v2227_v52 }
  0x46   : > { %831 = vmatmul.mubr.bf16.vlgmr.msra.gmra.mrb[0].mxu1 %v2228_v53 }
  0x47   : > { %840 = vmatprep.mubr.bf16.mxu1 %v2232_v54 }
  0x49   : > { %1064 = vmatmul.mubr.bf16.gmra.mrb[16].mxu0 %v2246_v58 }
  0x4a   : > { %1073 = vmatprep.mubr.bf16.mxu0 %v2428_v2 }
  0x4e   : > { %841 = vmatmul.mubr.bf16.gmra.mrb[4].mxu1 %v2235_v56 }
  0x4f   : > { %850 = vmatprep.mubr.bf16.mxu1 %v2236_v57 }
  0x51   : > { %1074 = vmatmul.mubr.bf16.gmra.mrb[20].mxu0 %v2250_v61 }
  0x52   : > { %1083 = vmatprep.mubr.bf16.mxu0 %v2428_v2 }
  0x56   : > { %851 = vmatmul.mubr.bf16.gmra.mrb[8].mxu1 %v2239_v59 }
  0x57   : > { %860 = vmatprep.mubr.bf16.mxu1 %v2240_v60 }
  0x59   : > { %1084 = vmatmul.mubr.bf16.gmra.mrb[24].mxu0 %v2254_v0 }
  0x5a   : > { %1093 = vmatprep.mubr.bf16.mxu0 %v2428_v2 }
  0x5e   : > { %861 = vmatmul.mubr.bf16.gmra.mrb[12].mxu1 %v2243_v62 }
  0x5f   : > { %870 = vmatprep.mubr.bf16.mxu1 %v2244_v63 }
  0x61   : > { %1094 = vmatmul.mubr.bf16.gmra.mrb[28].mxu0 %v2258_v4 }
  0x62   : > { %1103 = vmatprep.mubr.bf16.mxu0 %v2428_v2 }
  0x66   : > { %871 = vmatmul.mubr.bf16.gmra.mrb[16].mxu1 %v2247_v1 }
  0x67   : > { %880 = vmatprep.mubr.bf16.mxu1 %v2248_v3 }
  0x69   : > { %1104 = vmatmul.mubr.bf16.gmra.mrb[32].mxu0 %v2262_v7 }
  0x6a   : > { %1113 = vmatprep.mubr.bf16.mxu0 %v2428_v2 }
  0x6e   : > { %881 = vmatmul.mubr.bf16.gmra.mrb[20].mxu1 %v2251_v5 }
  0x6f   : > { %890 = vmatprep.mubr.bf16.mxu1 %v2252_v6 }
  0x71   : > { %1114 = vmatmul.mubr.bf16.gmra.mrb[36].mxu0 %v2266_v10 }
  0x72   : > { %1123 = vmatprep.mubr.bf16.mxu0 %v2428_v2 }
  0x76   : > { %891 = vmatmul.mubr.bf16.gmra.mrb[24].mxu1 %v2255_v8 }
  0x77   : > { %900 = vmatprep.mubr.bf16.mxu1 %v2256_v9 }
  0x79   : > { %1124 = vmatmul.mubr.bf16.gmra.mrb[40].mxu0 %v2270_v13 }
  0x7a   : > { %1133 = vmatprep.mubr.bf16.mxu0 %v2428_v2 }
  0x7e   : > { %901 = vmatmul.mubr.bf16.gmra.mrb[28].mxu1 %v2259_v11 }
  0x7f   : > { %910 = vmatprep.mubr.bf16.mxu1 %v2260_v12 }
  0x81   : > { %1134 = vmatmul.mubr.bf16.gmra.mrb[44].mxu0 %v2274_v16 }
  0x82   : > { %1143 = vmatprep.mubr.bf16.mxu0 %v2428_v2 }
  0x86   : > { %911 = vmatmul.mubr.bf16.gmra.mrb[32].mxu1 %v2263_v14 }
  0x87   : > { %920 = vmatprep.mubr.bf16.mxu1 %v2264_v15 }
  0x89   : > { %1144 = vmatmul.mubr.bf16.gmra.mrb[48].mxu0 %v2278_v19 }
  0x8a   : > { %1153 = vmatprep.mubr.bf16.mxu0 %v2428_v2 }
  0x8e   : > { %921 = vmatmul.mubr.bf16.gmra.mrb[36].mxu1 %v2267_v17 }
  0x8f   : > { %930 = vmatprep.mubr.bf16.mxu1 %v2268_v18 }
  0x91   : > { %1154 = vmatmul.mubr.bf16.gmra.mrb[52].mxu0 %v2282_v22 }
  0x92   : > { %1163 = vmatprep.mubr.bf16.mxu0 %v2428_v2 }
  0x96   : > { %931 = vmatmul.mubr.bf16.gmra.mrb[40].mxu1 %v2271_v20 }
  0x97   : > { %940 = vmatprep.mubr.bf16.mxu1 %v2272_v21 }
  0x99   : > { %1164 = vmatmul.mubr.bf16.gmra.mrb[56].mxu0 %v2286_v25 }
  0x9a   : > { %1173 = vmatprep.mubr.bf16.mxu0 %v2428_v2  ;;  %v292_v2 = vlaneseq }
  0x9c   : > { %v293_v40 = vshrl.u32 %v292_v2, 7 }
  0x9e   : > { %941 = vmatmul.mubr.bf16.gmra.mrb[44].mxu1 %v2275_v23  ;;  %v294_v43 = vsub.s32 0, %v293_v40  ;;  %v298_v45 = vsub.s32 1, %v293_v40 }
  0x9f   : > { %950 = vmatprep.mubr.bf16.mxu1 %v2276_v24 }
  0xa0   : > { %v2676_v48 = vrot.slane %v290_v44, %v294_v43  ;;  %v2678_v50 = vrot.slane %v290_v44, %v298_v45 }
  0xa1   : > { %1174 = vmatmul.mubr.bf16.gmra.mrb[60].mxu0 %v2290_v28 }
  0xa6   : > { %951 = vmatmul.mubr.bf16.gmra.mrb[48].mxu1 %v2279_v26 }
  0xa7   : > { %960 = vmatprep.mubr.bf16.mxu1 %v2280_v27 }
  0xae   : > { %961 = vmatmul.mubr.bf16.gmra.mrb[52].mxu1 %v2283_v29 }
  0xaf   : > { %970 = vmatprep.mubr.bf16.mxu1 %v2284_v30 }
  0xb6   : > { %971 = vmatmul.mubr.bf16.gmra.mrb[56].mxu1 %v2287_v31 }
  0xb7   : > { %980 = vmatprep.mubr.bf16.mxu1 %v2288_v32 }
  0xbe   : > { %981 = vmatmul.mubr.bf16.gmra.mrb[60].mxu1 %v2291_v33 }
  0xfc   : > { %v1025_v34 = vpop.f32.mrb[0].mxu0 }
  0xfd   : > { %v1027_v35 = vpop.f32.mrb[1].mxu0 }
  0xfe   : > { %v1029_v36 = vpop.f32.mrb[2].mxu0 }
  0xff   : > { %v1031_v37 = vpop.f32.mrb[3].mxu0 }
 0x104   : > { %v1035_v38 = vpop.f32.mrb[4].mxu0 }
 0x105   : > { %v1037_v39 = vpop.f32.mrb[5].mxu0 }
 0x106   : > { %v1039_v41 = vpop.f32.mrb[6].mxu0 }
 0x107   : > { %v1041_v42 = vpop.f32.mrb[7].mxu0 }
 0x10c   : > { %v1045_v46 = vpop.f32.mrb[8].mxu0 }
 0x10d   : > { %v1047_v47 = vpop.f32.mrb[9].mxu0 }
 0x10e   : > { %v1049_v49 = vpop.f32.mrb[10].mxu0 }
 0x10f   : > { %v1051_v51 = vpop.f32.mrb[11].mxu0 }
 0x114   : > { %v2685_v60 = vpop.f32.mrb[12].mxu0 }
 0x115   : > { %v2688_v63 = vpop.f32.mrb[13].mxu0 }
 0x116   : > { %v2692_v1 = vpop.f32.mrb[14].mxu0 }
 0x117   : > { %v2694_v5 = vpop.f32.mrb[15].mxu0 }
 0x119   : > { %v832_v52 = vpop.f32.mrb[0].mxu1 }
 0x11a   : > { %v833_v53 = vadd.f32 %v832_v52, %v2676_v48  ;;  %v834_v54 = vpop.f32.mrb[1].mxu1 }
 0x11b   : > { %v835_v55 = vadd.f32 %v834_v54, %v2678_v50  ;;  %v836_v56 = vpop.f32.mrb[2].mxu1 }
 0x11c   : > { %v2682_v57 = vadd.f32 %v1025_v34, %v833_v53  ;;  %v837_v58 = vadd.f32 %v836_v56, %v2676_v48  ;;  %v838_v59 = vpop.f32.mrb[3].mxu1  ;;  %v2701_v15 = vpop.f32.mrb[16].mxu0 }
 0x11d   : > { %v1028_v61 = vadd.f32 %v1027_v35, %v835_v55  ;;  %v839_v62 = vadd.f32 %v838_v59, %v2678_v50  ;;  %v2704_v18 = vpop.f32.mrb[17].mxu0 }
 0x11e   : > { %v2690_v0 = vadd.f32 %v1029_v36, %v837_v58  ;;  %v2708_v20 = vpop.f32.mrb[18].mxu0  ;;  %v1216_v56 = vmul.f32 0.2, %v2682_v57  ;;  %vm1184_vm0 = vcmp.ge.f32.partialorder %v2682_v57, 0.0 }
 0x11f   : > { %v1825_v3 = vmul.f32 -1.442695, %v1028_v61  ;;  %v1032_v4 = vadd.f32 %v1031_v37, %v839_v62  ;;  %v2710_v23 = vpop.f32.mrb[19].mxu0 }
 0x120   : > { %vm1185_vm1 = vcmp.ge.f32.partialorder %v2690_v0, 0.0 }
 0x121   : > { %2292 = vpow2.f32 %v1825_v3  ;;  %v1826_v6 = vmul.f32 -1.442695, %v1032_v4  ;;  %v842_v7 = vpop.f32.mrb[4].mxu1 }
 0x122   : > { %v843_v8 = vadd.f32 %v842_v7, %v2676_v48  ;;  %v844_v9 = vpop.f32.mrb[5].mxu1  ;;  %v1217_v7 = vmul.f32 0.2, %v2690_v0 }
 0x123   : > { %2294 = vpow2.f32 %v1826_v6  ;;  %v845_v10 = vadd.f32 %v844_v9, %v2678_v50  ;;  %v846_v11 = vpop.f32.mrb[6].mxu1 }
 0x124   : > { %v2698_v12 = vadd.f32 %v1035_v38, %v843_v8  ;;  %v847_v13 = vadd.f32 %v846_v11, %v2676_v48  ;;  %v848_v14 = vpop.f32.mrb[7].mxu1  ;;  %v2717_v35 = vpop.f32.mrb[20].mxu0 }
 0x125   : > { %v1038_v16 = vadd.f32 %v1037_v39, %v845_v10  ;;  %v849_v17 = vadd.f32 %v848_v14, %v2678_v50  ;;  %v2720_v38 = vpop.f32.mrb[21].mxu0  ;;  %v1248_v14 = vsel %vm1184_vm0, %v2682_v57, %v1216_v56 }
 0x126   : > { %v2706_v19 = vadd.f32 %v1039_v41, %v847_v13  ;;  %v2722_v40 = vpop.f32.mrb[22].mxu0  ;;  %vm1186_vm2 = vcmp.ge.f32.partialorder %v2698_v12, 0.0 }
 0x127   : > { %v1827_v21 = vmul.f32 -1.442695, %v1038_v16  ;;  %v1042_v22 = vadd.f32 %v1041_v42, %v849_v17  ;;  %v2726_v44 = vpop.f32.mrb[23].mxu0 }
 0x128   : > { %vm1187_vm3 = vcmp.ge.f32.partialorder %v2706_v19, 0.0 }
 0x129   : > { %2296 = vpow2.f32 %v1827_v21  ;;  %v1828_v24 = vmul.f32 -1.442695, %v1042_v22  ;;  %v852_v25 = vpop.f32.mrb[8].mxu1  ;;  %v1249_v22 = vsel %vm1185_vm1, %v2690_v0, %v1217_v7 }
 0x12a   : > { %v853_v26 = vadd.f32 %v852_v25, %v2676_v48  ;;  %v854_v27 = vpop.f32.mrb[9].mxu1 }
 0x12b   : > { %v2293_v28 = vpop.eup %2292  ;;  %2298 = vpow2.f32 %v1828_v24  ;;  %v855_v29 = vadd.f32 %v854_v27, %v2678_v50  ;;  %v856_v30 = vpop.f32.mrb[10].mxu1 }
 0x12c   : > { %v1376_v31 = vadd.f32 1.0, %v2293_v28  ;;  %v2714_v32 = vadd.f32 %v1045_v46, %v853_v26  ;;  %v857_v33 = vadd.f32 %v856_v30, %v2676_v48  ;;  %v858_v34 = vpop.f32.mrb[11].mxu1  ;;  %v2735_v61 = vpop.f32.mrb[24].mxu0 }
 0x12d   : > { %v2295_v36 = vpop.eup %2294  ;;  %v1048_v37 = vadd.f32 %v1047_v47, %v855_v29  ;;  %v859_v2 = vadd.f32 %v858_v34, %v2678_v50  ;;  %v2740_v6 = vpop.f32.mrb[25].mxu0 }
 0x12e   : > { %2300 = vrcp.f32 %v1376_v31  ;;  %v1377_v39 = vadd.f32 1.0, %v2295_v36  ;;  %v2724_v42 = vadd.f32 %v1049_v49, %v857_v33  ;;  %v2743_v8 = vpop.f32.mrb[26].mxu0  ;;  %vm1188_vm4 = vcmp.ge.f32.partialorder %v2714_v32, 0.0 }
 0x12f   : > { %v1829_v41 = vmul.f32 -1.442695, %v1048_v37  ;;  %v1052_v43 = vadd.f32 %v1051_v51, %v859_v2 }
 0x130   : > { %2302 = vrcp.f32 %v1377_v39  ;;  %vm1189_vm5 = vcmp.ge.f32.partialorder %v2724_v42, 0.0 }
 0x131   : > { %2304 = vpow2.f32 %v1829_v41  ;;  %v1830_v45 = vmul.f32 -1.442695, %v1052_v43  ;;  %v862_v46 = vpop.f32.mrb[12].mxu1  ;;  %v1219_v41 = vmul.f32 0.2, %v2706_v19 }
 0x132   : > { %v863_v47 = vadd.f32 %v862_v46, %v2676_v48  ;;  %v864_v52 = vpop.f32.mrb[13].mxu1 }
 0x133   : > { %v2297_v53 = vpop.eup %2296  ;;  %2306 = vpow2.f32 %v1830_v45  ;;  %v865_v54 = vadd.f32 %v864_v52, %v2678_v50  ;;  %v866_v55 = vpop.f32.mrb[14].mxu1 }
 0x134   : > { %v1378_v58 = vadd.f32 1.0, %v2297_v53  ;;  %v2732_v49 = vadd.f32 %v2685_v60, %v863_v47  ;;  %v867_v51 = vadd.f32 %v866_v55, %v2676_v48  ;;  %v868_v59 = vpop.f32.mrb[15].mxu1 }
 0x135   : > { %v2299_v62 = vpop.eup %2298  ;;  %v1058_v3 = vadd.f32 %v2688_v63, %v865_v54  ;;  %v869_v4 = vadd.f32 %v868_v59, %v2678_v50  ;;  %v2750_v63 = vpop.f32.mrb[27].mxu0 }
 0x136   : > { %2308 = vrcp.f32 %v1378_v58  ;;  %v1379_v60 = vadd.f32 1.0, %v2299_v62  ;;  %v2747_v10 = vadd.f32 %v2692_v1, %v867_v51  ;;  %v2767_v33 = vpop.f32.mrb[28].mxu0  ;;  %v1251_v58 = vsel %vm1187_vm3, %v2706_v19, %v1219_v41 }
 0x137   : > { %v1831_v9 = vmul.f32 -1.442695, %v1058_v3  ;;  %v1062_v11 = vadd.f32 %v2694_v5, %v869_v4  ;;  %v1218_v5 = vmul.f32 0.2, %v2698_v12  ;;  %v2772_v39 = vpop.f32.mrb[29].mxu0  ;;  %vm1190_vm6 = vcmp.ge.f32.partialorder %v2732_v49, 0.0 }
 0x138   : > { %v2301_v13 = vpop.eup %2300  ;;  %2310 = vrcp.f32 %v1379_v60  ;;  %v2775_v43 = vpop.f32.mrb[30].mxu0  ;;  %vm1191_vm7 = vcmp.ge.f32.partialorder %v2747_v10, 0.0 }
 0x139   : > { %v1472_v16 = vmul.f32 %v2301_v13, %v1248_v14  ;;  %2312 = vpow2.f32 %v1831_v9  ;;  %v872_v17 = vpop.f32.mrb[16].mxu1  ;;  %v1832_v24 = vmul.f32 -1.442695, %v1062_v11  ;;  %v1250_v53 = vsel %vm1186_vm2, %v2698_v12, %v1218_v5 }
 0x13a   : > { %v2303_v21 = vpop.eup %2302  ;;  %v873_v25 = vadd.f32 %v872_v17, %v2676_v48  ;;  %v874_v1 = vpop.f32.mrb[17].mxu1 }
 0x13b   : > { %v2305_v26 = vpop.eup %2304  ;;  %v1473_v27 = vmul.f32 %v2303_v21, %v1249_v22  ;;  %v875_v28 = vadd.f32 %v874_v1, %v2678_v50  ;;  %v876_v29 = vpop.f32.mrb[18].mxu1  ;;  %2314 = vpow2.f32 %v1832_v24  ;;  %v1221_v22 = vmul.f32 0.2, %v2724_v42 }
 0x13c   : > { %v1380_v57 = vadd.f32 1.0, %v2305_v26  ;;  %v2764_v0 = vadd.f32 %v2701_v15, %v873_v25  ;;  %v877_v30 = vadd.f32 %v876_v29, %v2676_v48  ;;  %v878_v31 = vpop.f32.mrb[19].mxu1 }
 0x13d   : > { %v2307_v34 = vpop.eup %2306  ;;  %v1926_v36 = vpack.c.bf16 %v1473_v27, %v1472_v16  ;;  %v1068_v37 = vadd.f32 %v2704_v18, %v875_v28  ;;  %v879_v2 = vadd.f32 %v878_v31, %v2678_v50  ;;  %v2783_v18 = vpop.f32.mrb[31].mxu0 }
 0x13e   : > { %2316 = vrcp.f32 %v1380_v57  ;;  %v1381_v15 = vadd.f32 1.0, %v2307_v34  ;;  %v2780_v46 = vadd.f32 %v2708_v20, %v877_v30  ;;  %v2794_v11 = vpop.f32.mrb[32].mxu0  ;;  %v1253_v30 = vsel %vm1189_vm5, %v2724_v42, %v1221_v22 }
 0x13f   : > { %1927 = vst [vmem:[%s2761_s11] sm:$0xff] %v1926_v36   ;;  %v1833_v45 = vmul.f32 -1.442695, %v1068_v37  ;;  %v1072_v47 = vadd.f32 %v2710_v23, %v879_v2  ;;  %v1220_v23 = vmul.f32 0.2, %v2714_v32  ;;  %v2799_v17 = vpop.f32.mrb[33].mxu0  ;;  %vm1192_vm8 = vcmp.ge.f32.partialorder %v2764_v0, 0.0 }
 0x140   : > { %v2309_v52 = vpop.eup %2308  ;;  %2318 = vrcp.f32 %v1381_v15  ;;  %v2805_v24 = vpop.f32.mrb[34].mxu0  ;;  %vm1193_vm9 = vcmp.ge.f32.partialorder %v2780_v46, 0.0 }
 0x141   : > { %v1474_v54 = vmul.f32 %v2309_v52, %v1250_v53  ;;  %2320 = vpow2.f32 %v1833_v45  ;;  %v882_v55 = vpop.f32.mrb[20].mxu1  ;;  %v1834_v51 = vmul.f32 -1.442695, %v1072_v47  ;;  %v2810_v26 = vpop.f32.mrb[35].mxu0  ;;  %v1252_v5 = vsel %vm1188_vm4, %v2714_v32, %v1220_v23 }
 0x142   : > { %v2311_v56 = vpop.eup %2310  ;;  %v883_v59 = vadd.f32 %v882_v55, %v2676_v48  ;;  %v884_v62 = vpop.f32.mrb[21].mxu1  ;;  %v1222_v32 = vmul.f32 0.2, %v2732_v49 }
 0x143   : > { %v2313_v20 = vpop.eup %2312  ;;  %v1475_v3 = vmul.f32 %v2311_v56, %v1251_v58  ;;  %v885_v4 = vadd.f32 %v884_v62, %v2678_v50  ;;  %v886_v7 = vpop.f32.mrb[22].mxu1  ;;  %2322 = vpow2.f32 %v1834_v51  ;;  %v1223_v51 = vmul.f32 0.2, %v2747_v10 }
 0x144   : > { %v1382_v60 = vadd.f32 1.0, %v2313_v20  ;;  %v2791_v12 = vadd.f32 %v2717_v35, %v883_v59  ;;  %v887_v9 = vadd.f32 %v886_v7, %v2676_v48  ;;  %v888_v19 = vpop.f32.mrb[23].mxu1  ;;  %v2823_v47 = vpop.f32.mrb[36].mxu0  ;;  %v1254_v23 = vsel %vm1190_vm6, %v2732_v49, %v1222_v32 }
 0x145   : > { %v1931_v13 = vpack.c.bf16 %v1475_v3, %v1474_v54  ;;  %v1078_v14 = vadd.f32 %v2720_v38, %v885_v4  ;;  %v889_v16 = vadd.f32 %v888_v19, %v2678_v50  ;;  %v2315_v21 = vpop.eup %2314  ;;  %v2828_v55 = vpop.f32.mrb[37].mxu0  ;;  %v1224_v49 = vmul.f32 0.2, %v2764_v0 }
 0x146   : > { %2324 = vrcp.f32 %v1382_v60  ;;  %v2803_v35 = vadd.f32 %v2722_v40, %v887_v9  ;;  %v1383_v25 = vadd.f32 1.0, %v2315_v21  ;;  %vm1194_vm10 = vcmp.ge.f32.partialorder %v2791_v12, 0.0 }
 0x147   : > { %2003 = vst [vmem:[%s2761_s11 + $0x8] sm:$0xff] %v1931_v13   ;;  %v1835_v1 = vmul.f32 -1.442695, %v1078_v14  ;;  %v1082_v38 = vadd.f32 %v2726_v44, %v889_v16  ;;  %v1255_v13 = vsel %vm1191_vm7, %v2747_v10, %v1223_v51 }
 0x148   : > { %v2317_v27 = vpop.eup %2316  ;;  %2326 = vrcp.f32 %v1383_v25  ;;  %vm1195_vm11 = vcmp.ge.f32.partialorder %v2803_v35, 0.0 }
 0x149   : > { %v1476_v28 = vmul.f32 %v2317_v27, %v1252_v5  ;;  %v1836_v40 = vmul.f32 -1.442695, %v1082_v38  ;;  %v892_v29 = vpop.f32.mrb[24].mxu1  ;;  %2328 = vpow2.f32 %v1835_v1 }
 0x14a   : > { %v2319_v57 = vpop.eup %2318  ;;  %v893_v31 = vadd.f32 %v892_v29, %v2676_v48  ;;  %v894_v34 = vpop.f32.mrb[25].mxu1 }
 0x14b   : > { %v2321_v36 = vpop.eup %2320  ;;  %v1477_v44 = vmul.f32 %v2319_v57, %v1253_v30  ;;  %2330 = vpow2.f32 %v1836_v40  ;;  %v895_v37 = vadd.f32 %v894_v34, %v2678_v50  ;;  %v896_v2 = vpop.f32.mrb[26].mxu1 }
 0x14c   : > { %v1384_v41 = vadd.f32 1.0, %v2321_v36  ;;  %v2820_v15 = vadd.f32 %v2735_v61, %v893_v31  ;;  %v897_v45 = vadd.f32 %v896_v2, %v2676_v48  ;;  %v898_v42 = vpop.f32.mrb[27].mxu1  ;;  %v2833_v61 = vpop.f32.mrb[38].mxu0 }
 0x14d   : > { %v1936_v52 = vpack.c.bf16 %v1477_v44, %v1476_v28  ;;  %v1088_v53 = vadd.f32 %v2740_v6, %v895_v37  ;;  %v899_v54 = vadd.f32 %v898_v42, %v2678_v50  ;;  %v2323_v56 = vpop.eup %2322  ;;  %v2838_v3 = vpop.f32.mrb[39].mxu0  ;;  %v1256_v37 = vsel %vm1192_vm8, %v2764_v0, %v1224_v49 }
 0x14e   : > { %2332 = vrcp.f32 %v1384_v41  ;;  %v2831_v58 = vadd.f32 %v2743_v8, %v897_v45  ;;  %v1385_v59 = vadd.f32 1.0, %v2323_v56  ;;  %v2850_v38 = vpop.f32.mrb[40].mxu0  ;;  %vm1196_vm12 = vcmp.ge.f32.partialorder %v2820_v15, 0.0 }
 0x14f   : > { %2004 = vst [vmem:[%s2761_s11 + $0x10] sm:$0xff] %v1936_v52   ;;  %v1837_v62 = vmul.f32 -1.442695, %v1088_v53  ;;  %v1092_v20 = vadd.f32 %v2750_v63, %v899_v54  ;;  %v2855_v40 = vpop.f32.mrb[41].mxu0 }
 0x150   : > { %v2325_v6 = vpop.eup %2324  ;;  %2334 = vrcp.f32 %v1385_v59  ;;  %v2858_v30 = vpop.f32.mrb[42].mxu0  ;;  %vm1197_vm13 = vcmp.ge.f32.partialorder %v2831_v58, 0.0 }
 0x151   : > { %v1478_v4 = vmul.f32 %v2325_v6, %v1254_v23  ;;  %v1838_v8 = vmul.f32 -1.442695, %v1092_v20  ;;  %v902_v7 = vpop.f32.mrb[28].mxu1  ;;  %2336 = vpow2.f32 %v1837_v62  ;;  %v2864_v44 = vpop.f32.mrb[43].mxu0 }
 0x152   : > { %v903_v60 = vadd.f32 %v902_v7, %v2676_v48  ;;  %v904_v9 = vpop.f32.mrb[29].mxu1  ;;  %v2327_v19 = vpop.eup %2326 }
 0x153   : > { %2338 = vpow2.f32 %v1838_v8  ;;  %v905_v63 = vadd.f32 %v904_v9, %v2678_v50  ;;  %v906_v14 = vpop.f32.mrb[30].mxu1  ;;  %v2329_v16 = vpop.eup %2328  ;;  %v1479_v21 = vmul.f32 %v2327_v19, %v1255_v13 }
 0x154   : > { %v2847_v22 = vadd.f32 %v2767_v33, %v903_v60  ;;  %v907_v25 = vadd.f32 %v906_v14, %v2676_v48  ;;  %v908_v1 = vpop.f32.mrb[31].mxu1  ;;  %v1386_v10 = vadd.f32 1.0, %v2329_v16  ;;  %v1225_v33 = vmul.f32 0.2, %v2780_v46  ;;  %v2879_v62 = vpop.f32.mrb[44].mxu0 }
 0x155   : > { %v2331_v27 = vpop.eup %2330  ;;  %v1098_v5 = vadd.f32 %v2772_v39, %v905_v63  ;;  %v909_v28 = vadd.f32 %v908_v1, %v2678_v50  ;;  %v1941_v29 = vpack.c.bf16 %v1479_v21, %v1478_v4  ;;  %v2884_v8 = vpop.f32.mrb[45].mxu0 }
 0x156   : > { %v1387_v57 = vadd.f32 1.0, %v2331_v27  ;;  %2340 = vrcp.f32 %v1386_v10  ;;  %v2861_v34 = vadd.f32 %v2775_v43, %v907_v25  ;;  %v2888_v9 = vpop.f32.mrb[46].mxu0  ;;  %vm1198_vm14 = vcmp.ge.f32.partialorder %v2847_v22, 0.0 }
 0x157   : > { %v1839_v31 = vmul.f32 -1.442695, %v1098_v5  ;;  %v1102_v36 = vadd.f32 %v2783_v18, %v909_v28  ;;  %2005 = vst [vmem:[%s2761_s11 + $0x18] sm:$0xff] %v1941_v29   ;;  %v1257_v18 = vsel %vm1193_vm9, %v2780_v46, %v1225_v33  ;;  %v1226_v46 = vmul.f32 0.2, %v2791_v12 }
 0x158   : > { %v2333_v39 = vpop.eup %2332  ;;  %2342 = vrcp.f32 %v1387_v57  ;;  %vm1199_vm15 = vcmp.ge.f32.partialorder %v2861_v34, 0.0 }
 0x159   : > { %v1480_v2 = vmul.f32 %v2333_v39, %v1256_v37  ;;  %2344 = vpow2.f32 %v1839_v31  ;;  %v912_v32 = vpop.f32.mrb[32].mxu1  ;;  %v1840_v41 = vmul.f32 -1.442695, %v1102_v36  ;;  %v1258_v16 = vsel %vm1194_vm10, %v2791_v12, %v1226_v46 }
 0x15a   : > { %v913_v43 = vadd.f32 %v912_v32, %v2676_v48  ;;  %v914_v45 = vpop.f32.mrb[33].mxu1  ;;  %v2335_v42 = vpop.eup %2334  ;;  %v1228_v39 = vmul.f32 0.2, %v2820_v15 }
 0x15b   : > { %v915_v52 = vadd.f32 %v914_v45, %v2678_v50  ;;  %v916_v53 = vpop.f32.mrb[34].mxu1  ;;  %v2337_v54 = vpop.eup %2336  ;;  %v1481_v0 = vmul.f32 %v2335_v42, %v1257_v18  ;;  %2346 = vpow2.f32 %v1840_v41 }
 0x15c   : > { %v2876_v56 = vadd.f32 %v2794_v11, %v913_v43  ;;  %v917_v51 = vadd.f32 %v916_v53, %v2676_v48  ;;  %v918_v59 = vpop.f32.mrb[35].mxu1  ;;  %v1388_v6 = vadd.f32 1.0, %v2337_v54  ;;  %v1227_v11 = vmul.f32 0.2, %v2803_v35 }
 0x15d   : > { %v2339_v20 = vpop.eup %2338  ;;  %v1108_v23 = vadd.f32 %v2799_v17, %v915_v52  ;;  %v919_v4 = vadd.f32 %v918_v59, %v2678_v50  ;;  %v1946_v7 = vpack.c.bf16 %v1481_v0, %v1480_v2  ;;  %v2894_v17 = vpop.f32.mrb[47].mxu0  ;;  %v1260_v54 = vsel %vm1196_vm12, %v2820_v15, %v1228_v39 }
 0x15e   : > { %v1389_v60 = vadd.f32 1.0, %v2339_v20  ;;  %2348 = vrcp.f32 %v1388_v6  ;;  %v2891_v13 = vadd.f32 %v2805_v24, %v917_v51  ;;  %v1259_v24 = vsel %vm1195_vm11, %v2803_v35, %v1227_v11  ;;  %v2909_v36 = vpop.f32.mrb[48].mxu0 }
 0x15f   : > { %v1841_v19 = vmul.f32 -1.442695, %v1108_v23  ;;  %v1112_v63 = vadd.f32 %v2810_v26, %v919_v4  ;;  %2006 = vst [vmem:[%s2761_s11 + $0x20] sm:$0xff] %v1946_v7   ;;  %v2914_v32 = vpop.f32.mrb[49].mxu0  ;;  %v1230_v15 = vmul.f32 0.2, %v2847_v22 }
 0x160   : > { %2350 = vrcp.f32 %v1389_v60  ;;  %v2341_v14 = vpop.eup %2340  ;;  %v2921_v45 = vpop.f32.mrb[50].mxu0  ;;  %vm1200_vm0 = vcmp.ge.f32.partialorder %v2876_v56, 0.0  ;;  %vm1201_vm1 = vcmp.ge.f32.partialorder %v2891_v13, 0.0 }
 0x161   : > { %2352 = vpow2.f32 %v1841_v19  ;;  %v1842_v21 = vmul.f32 -1.442695, %v1112_v63  ;;  %v922_v49 = vpop.f32.mrb[36].mxu1  ;;  %v1482_v1 = vmul.f32 %v2341_v14, %v1258_v16  ;;  %v2926_v52 = vpop.f32.mrb[51].mxu0 }
 0x162   : > { %v2343_v25 = vpop.eup %2342  ;;  %v923_v26 = vadd.f32 %v922_v49, %v2676_v48  ;;  %v924_v27 = vpop.f32.mrb[37].mxu1 }
 0x163   : > { %v2345_v10 = vpop.eup %2344  ;;  %v1483_v5 = vmul.f32 %v2343_v25, %v1259_v24  ;;  %2354 = vpow2.f32 %v1842_v21  ;;  %v925_v28 = vadd.f32 %v924_v27, %v2678_v50  ;;  %v926_v29 = vpop.f32.mrb[38].mxu1 }
 0x164   : > { %v1390_v33 = vadd.f32 1.0, %v2345_v10  ;;  %v2906_v12 = vadd.f32 %v2823_v47, %v923_v26  ;;  %v927_v57 = vadd.f32 %v926_v29, %v2676_v48  ;;  %v928_v31 = vpop.f32.mrb[39].mxu1  ;;  %v1229_v47 = vmul.f32 0.2, %v2831_v58  ;;  %v2937_v63 = vpop.f32.mrb[52].mxu0 }
 0x165   : > { %v1951_v35 = vpack.c.bf16 %v1483_v5, %v1482_v1  ;;  %v1118_v37 = vadd.f32 %v2828_v55, %v925_v28  ;;  %v929_v2 = vadd.f32 %v928_v31, %v2678_v50  ;;  %v2347_v41 = vpop.eup %2346  ;;  %v2942_v25 = vpop.f32.mrb[53].mxu0  ;;  %v1262_v28 = vsel %vm1198_vm14, %v2847_v22, %v1230_v15 }
 0x166   : > { %2356 = vrcp.f32 %v1390_v33  ;;  %v2919_v43 = vadd.f32 %v2833_v61, %v927_v57  ;;  %v1391_v42 = vadd.f32 1.0, %v2347_v41  ;;  %v1261_v20 = vsel %vm1197_vm13, %v2831_v58, %v1229_v47  ;;  %v2944_v24 = vpop.f32.mrb[54].mxu0 }
 0x167   : > { %2007 = vst [vmem:[%s2761_s11 + $0x28] sm:$0xff] %v1951_v35   ;;  %v1843_v55 = vmul.f32 -1.442695, %v1118_v37  ;;  %v1122_v18 = vadd.f32 %v2838_v3, %v929_v2  ;;  %v2952_v5 = vpop.f32.mrb[55].mxu0  ;;  %vm1202_vm2 = vcmp.ge.f32.partialorder %v2906_v12, 0.0 }
 0x168   : > { %v2349_v53 = vpop.eup %2348  ;;  %2358 = vrcp.f32 %v1391_v42  ;;  %vm1203_vm3 = vcmp.ge.f32.partialorder %v2919_v43, 0.0 }
 0x169   : > { %v1844_v0 = vmul.f32 -1.442695, %v1122_v18  ;;  %v932_v51 = vpop.f32.mrb[40].mxu1  ;;  %v1484_v61 = vmul.f32 %v2349_v53, %v1260_v54  ;;  %2360 = vpow2.f32 %v1843_v55 }
 0x16a   : > { %v2351_v59 = vpop.eup %2350  ;;  %v933_v46 = vadd.f32 %v932_v51, %v2676_v48  ;;  %v934_v6 = vpop.f32.mrb[41].mxu1 }
 0x16b   : > { %v2353_v23 = vpop.eup %2352  ;;  %v1485_v4 = vmul.f32 %v2351_v59, %v1261_v20  ;;  %2362 = vpow2.f32 %v1844_v0  ;;  %v935_v3 = vadd.f32 %v934_v6, %v2678_v50  ;;  %v936_v7 = vpop.f32.mrb[42].mxu1 }
 0x16c   : > { %v1392_v11 = vadd.f32 1.0, %v2353_v23  ;;  %v2934_v60 = vadd.f32 %v2850_v38, %v933_v46  ;;  %v937_v19 = vadd.f32 %v936_v7, %v2676_v48  ;;  %v938_v58 = vpop.f32.mrb[43].mxu1  ;;  %v1231_v38 = vmul.f32 0.2, %v2861_v34  ;;  %v2964_v18 = vpop.f32.mrb[56].mxu0 }
 0x16d   : > { %v2355_v14 = vpop.eup %2354  ;;  %v1956_v16 = vpack.c.bf16 %v1485_v4, %v1484_v61  ;;  %v1128_v21 = vadd.f32 %v2855_v40, %v935_v3  ;;  %v939_v49 = vadd.f32 %v938_v58, %v2678_v50  ;;  %v2969_v51 = vpop.f32.mrb[57].mxu0 }
 0x16e   : > { %2364 = vrcp.f32 %v1392_v11  ;;  %v1393_v1 = vadd.f32 1.0, %v2355_v14  ;;  %v2949_v27 = vadd.f32 %v2858_v30, %v937_v19  ;;  %v1263_v30 = vsel %vm1199_vm15, %v2861_v34, %v1231_v38  ;;  %v2973_v20 = vpop.f32.mrb[58].mxu0 }
 0x16f   : > { %2008 = vst [vmem:[%s2761_s11 + $0x30] sm:$0xff] %v1956_v16   ;;  %v1845_v26 = vmul.f32 -1.442695, %v1128_v21  ;;  %v1132_v10 = vadd.f32 %v2864_v44, %v939_v49  ;;  %v1232_v44 = vmul.f32 0.2, %v2876_v56  ;;  %vm1204_vm4 = vcmp.ge.f32.partialorder %v2934_v60, 0.0 }
 0x170   : > { %v2357_v40 = vpop.eup %2356  ;;  %2366 = vrcp.f32 %v1393_v1  ;;  %vm1205_vm5 = vcmp.ge.f32.partialorder %v2949_v27, 0.0 }
 0x171   : > { %v1486_v29 = vmul.f32 %v2357_v40, %v1262_v28  ;;  %2368 = vpow2.f32 %v1845_v26  ;;  %v942_v33 = vpop.f32.mrb[44].mxu1  ;;  %v1846_v57 = vmul.f32 -1.442695, %v1132_v10  ;;  %v1264_v3 = vsel %vm1200_vm0, %v2876_v56, %v1232_v44 }
 0x172   : > { %v943_v31 = vadd.f32 %v942_v33, %v2676_v48  ;;  %v944_v35 = vpop.f32.mrb[45].mxu1  ;;  %v2359_v39 = vpop.eup %2358  ;;  %v1234_v40 = vmul.f32 0.2, %v2906_v12 }
 0x173   : > { %v945_v37 = vadd.f32 %v944_v35, %v2678_v50  ;;  %v946_v2 = vpop.f32.mrb[46].mxu1  ;;  %v2361_v41 = vpop.eup %2360  ;;  %v1487_v22 = vmul.f32 %v2359_v39, %v1263_v30  ;;  %2370 = vpow2.f32 %v1846_v57 }
 0x174   : > { %v2961_v47 = vadd.f32 %v2879_v62, %v943_v31  ;;  %v947_v42 = vadd.f32 %v946_v2, %v2676_v48  ;;  %v948_v55 = vpop.f32.mrb[47].mxu1  ;;  %v1394_v34 = vadd.f32 1.0, %v2361_v41  ;;  %v1233_v62 = vmul.f32 0.2, %v2891_v13 }
 0x175   : > { %v2363_v53 = vpop.eup %2362  ;;  %v1138_v54 = vadd.f32 %v2884_v8, %v945_v37  ;;  %v949_v0 = vadd.f32 %v948_v55, %v2678_v50  ;;  %v1961_v59 = vpack.c.bf16 %v1487_v22, %v1486_v29  ;;  %v2979_v8 = vpop.f32.mrb[59].mxu0  ;;  %v1266_v2 = vsel %vm1202_vm2, %v2906_v12, %v1234_v40 }
 0x176   : > { %v1395_v61 = vadd.f32 1.0, %v2363_v53  ;;  %2372 = vrcp.f32 %v1394_v34  ;;  %v2976_v6 = vadd.f32 %v2888_v9, %v947_v42  ;;  %v1265_v9 = vsel %vm1201_vm1, %v2891_v13, %v1233_v62  ;;  %v2994_v10 = vpop.f32.mrb[60].mxu0 }
 0x177   : > { %v1847_v46 = vmul.f32 -1.442695, %v1138_v54  ;;  %v1142_v23 = vadd.f32 %v2894_v17, %v949_v0  ;;  %2009 = vst [vmem:[%s2761_s11 + $0x38] sm:$0xff] %v1961_v59   ;;  %v2999_v33 = vpop.f32.mrb[61].mxu0  ;;  %v1236_v12 = vmul.f32 0.2, %v2934_v60 }
 0x178   : > { %v2365_v4 = vpop.eup %2364  ;;  %2374 = vrcp.f32 %v1395_v61  ;;  %v3006_v35 = vpop.f32.mrb[62].mxu0  ;;  %vm1206_vm6 = vcmp.ge.f32.partialorder %v2961_v47, 0.0  ;;  %vm1207_vm7 = vcmp.ge.f32.partialorder %v2976_v6, 0.0 }
 0x179   : > { %v1488_v7 = vmul.f32 %v2365_v4, %v1264_v3  ;;  %2376 = vpow2.f32 %v1847_v46  ;;  %v952_v15 = vpop.f32.mrb[48].mxu1  ;;  %v1848_v19 = vmul.f32 -1.442695, %v1142_v23  ;;  %v3011_v44 = vpop.f32.mrb[63].mxu0 }
 0x17a   : > { %v2367_v11 = vpop.eup %2366  ;;  %v953_v17 = vadd.f32 %v952_v15, %v2676_v48  ;;  %v954_v58 = vpop.f32.mrb[49].mxu1 }
 0x17b   : > { %v2369_v14 = vpop.eup %2368  ;;  %v1489_v16 = vmul.f32 %v2367_v11, %v1265_v9  ;;  %v955_v21 = vadd.f32 %v954_v58, %v2678_v50  ;;  %v956_v49 = vpop.f32.mrb[50].mxu1  ;;  %2378 = vpow2.f32 %v1848_v19  ;;  %v1237_v11 = vmul.f32 0.2, %v2949_v27 }
 0x17c   : > { %v1396_v1 = vadd.f32 1.0, %v2369_v14  ;;  %v2991_v56 = vadd.f32 %v2909_v36, %v953_v17  ;;  %v957_v38 = vadd.f32 %v956_v49, %v2676_v48  ;;  %v958_v26 = vpop.f32.mrb[51].mxu1  ;;  %v1235_v36 = vmul.f32 0.2, %v2919_v43 }
 0x17d   : > { %v1966_v13 = vpack.c.bf16 %v1489_v16, %v1488_v7  ;;  %v1148_v28 = vadd.f32 %v2914_v32, %v955_v21  ;;  %v959_v29 = vadd.f32 %v958_v26, %v2678_v50  ;;  %v2371_v57 = vpop.eup %2370  ;;  %v1268_v58 = vsel %vm1204_vm4, %v2934_v60, %v1236_v12 }
 0x17e   : > { %2380 = vrcp.f32 %v1396_v1  ;;  %v3004_v31 = vadd.f32 %v2921_v45, %v957_v38  ;;  %v1397_v39 = vadd.f32 1.0, %v2371_v57  ;;  %v1267_v55 = vsel %vm1203_vm3, %v2919_v43, %v1235_v36 }
 0x17f   : > { %2010 = vst [vmem:[%s2761_s11 + $0x40] sm:$0xff] %v1966_v13   ;;  %v1849_v32 = vmul.f32 -1.442695, %v1148_v28  ;;  %v1152_v30 = vadd.f32 %v2926_v52, %v959_v29  ;;  %v1269_v1 = vsel %vm1205_vm5, %v2949_v27, %v1237_v11  ;;  %v1238_v60 = vmul.f32 0.2, %v2961_v47 }
 0x180   : > { %v2373_v37 = vpop.eup %2372  ;;  %2382 = vrcp.f32 %v1397_v39  ;;  %vm1208_vm8 = vcmp.ge.f32.partialorder %v2991_v56, 0.0  ;;  %vm1209_vm9 = vcmp.ge.f32.partialorder %v3004_v31, 0.0 }
 0x181   : > { %v1850_v41 = vmul.f32 -1.442695, %v1152_v30  ;;  %v962_v22 = vpop.f32.mrb[52].mxu1  ;;  %v1490_v45 = vmul.f32 %v2373_v37, %v1266_v2  ;;  %2384 = vpow2.f32 %v1849_v32  ;;  %v1239_v30 = vmul.f32 0.2, %v2976_v6 }
 0x182   : > { %v2375_v42 = vpop.eup %2374  ;;  %v963_v53 = vadd.f32 %v962_v22, %v2676_v48  ;;  %v964_v34 = vpop.f32.mrb[53].mxu1 }
 0x183   : > { %v2377_v54 = vpop.eup %2376  ;;  %v1491_v0 = vmul.f32 %v2375_v42, %v1267_v55  ;;  %2386 = vpow2.f32 %v1850_v41  ;;  %v965_v52 = vadd.f32 %v964_v34, %v2678_v50  ;;  %v966_v59 = vpop.f32.mrb[54].mxu1  ;;  %v1270_v42 = vsel %vm1206_vm6, %v2961_v47, %v1238_v60 }
 0x184   : > { %v1398_v62 = vadd.f32 1.0, %v2377_v54  ;;  %v3019_v61 = vadd.f32 %v2937_v63, %v963_v53  ;;  %v967_v46 = vadd.f32 %v966_v59, %v2676_v48  ;;  %v968_v43 = vpop.f32.mrb[55].mxu1 }
 0x185   : > { %v1971_v23 = vpack.c.bf16 %v1491_v0, %v1490_v45  ;;  %v1158_v4 = vadd.f32 %v2942_v25, %v965_v52  ;;  %v969_v3 = vadd.f32 %v968_v43, %v2678_v50  ;;  %v2379_v7 = vpop.eup %2378  ;;  %v1240_v43 = vmul.f32 0.2, %v2991_v56 }
 0x186   : > { %2388 = vrcp.f32 %v1398_v62  ;;  %v3026_v15 = vadd.f32 %v2944_v24, %v967_v46  ;;  %v1399_v63 = vadd.f32 1.0, %v2379_v7  ;;  %v1241_v7 = vmul.f32 0.2, %v3004_v31 }
 0x187   : > { %2011 = vst [vmem:[%s2761_s11 + $0x48] sm:$0xff] %v1971_v23   ;;  %v1851_v9 = vmul.f32 -1.442695, %v1158_v4  ;;  %v1162_v19 = vadd.f32 %v2952_v5, %v969_v3  ;;  %vm1210_vm10 = vcmp.ge.f32.partialorder %v3019_v61, 0.0 }
 0x188   : > { %v2381_v17 = vpop.eup %2380  ;;  %2390 = vrcp.f32 %v1399_v63  ;;  %vm1211_vm11 = vcmp.ge.f32.partialorder %v3026_v15, 0.0 }
 0x189   : > { %v1492_v25 = vmul.f32 %v2381_v17, %v1268_v58  ;;  %v1852_v14 = vmul.f32 -1.442695, %v1162_v19  ;;  %v972_v16 = vpop.f32.mrb[56].mxu1  ;;  %2392 = vpow2.f32 %v1851_v9  ;;  %v1273_v58 = vsel %vm1209_vm9, %v3004_v31, %v1241_v7 }
 0x18a   : > { %v973_v24 = vadd.f32 %v972_v16, %v2676_v48  ;;  %v974_v21 = vpop.f32.mrb[57].mxu1  ;;  %v2383_v49 = vpop.eup %2382 }
 0x18b   : > { %2394 = vpow2.f32 %v1852_v14  ;;  %v975_v38 = vadd.f32 %v974_v21, %v2678_v50  ;;  %v976_v5 = vpop.f32.mrb[58].mxu1  ;;  %v2385_v26 = vpop.eup %2384  ;;  %v1493_v13 = vmul.f32 %v2383_v49, %v1269_v1  ;;  %v1243_v21 = vmul.f32 0.2, %v3026_v15 }
 0x18c   : > { %v3038_v40 = vadd.f32 %v2964_v18, %v973_v24  ;;  %v977_v28 = vadd.f32 %v976_v5, %v2676_v48  ;;  %v978_v29 = vpop.f32.mrb[59].mxu1  ;;  %v1400_v36 = vadd.f32 1.0, %v2385_v26 }
 0x18d   : > { %v2387_v57 = vpop.eup %2386  ;;  %v1168_v27 = vadd.f32 %v2969_v51, %v975_v38  ;;  %v979_v39 = vadd.f32 %v978_v29, %v2678_v50  ;;  %v1976_v32 = vpack.c.bf16 %v1493_v13, %v1492_v25  ;;  %v1275_v5 = vsel %vm1211_vm11, %v3026_v15, %v1243_v21 }
 0x18e   : > { %v1401_v37 = vadd.f32 1.0, %v2387_v57  ;;  %2396 = vrcp.f32 %v1400_v36  ;;  %v3046_v18 = vadd.f32 %v2973_v20, %v977_v28  ;;  %v1271_v20 = vsel %vm1207_vm7, %v2976_v6, %v1239_v30 }
 0x18f   : > { %v1853_v2 = vmul.f32 -1.442695, %v1168_v27  ;;  %v1172_v41 = vadd.f32 %v2979_v8, %v979_v39  ;;  %2012 = vst [vmem:[%s2761_s11 + $0x50] sm:$0xff] %v1976_v32   ;;  %v1244_v60 = vmul.f32 0.2, %v3038_v40  ;;  %vm1212_vm12 = vcmp.ge.f32.partialorder %v3038_v40, 0.0 }
 0x190   : > { %v2389_v22 = vpop.eup %2388  ;;  %2398 = vrcp.f32 %v1401_v37  ;;  %vm1213_vm13 = vcmp.ge.f32.partialorder %v3046_v18, 0.0 }
 0x191   : > { %v1494_v51 = vmul.f32 %v2389_v22, %v1270_v42  ;;  %2400 = vpow2.f32 %v1853_v2  ;;  %v982_v45 = vpop.f32.mrb[60].mxu1  ;;  %v1854_v55 = vmul.f32 -1.442695, %v1172_v41  ;;  %v1276_v39 = vsel %vm1212_vm12, %v3038_v40, %v1244_v60 }
 0x192   : > { %v983_v53 = vadd.f32 %v982_v45, %v2676_v48  ;;  %v984_v34 = vpop.f32.mrb[61].mxu1  ;;  %v2391_v54 = vpop.eup %2390 }
 0x193   : > { %v985_v8 = vadd.f32 %v984_v34, %v2678_v50  ;;  %v986_v0 = vpop.f32.mrb[62].mxu1  ;;  %v2393_v52 = vpop.eup %2392  ;;  %v1495_v47 = vmul.f32 %v2391_v54, %v1271_v20  ;;  %2402 = vpow2.f32 %v1854_v55 }
 0x194   : > { %v3057_v59 = vadd.f32 %v2994_v10, %v983_v53  ;;  %v987_v12 = vadd.f32 %v986_v0, %v2676_v48  ;;  %v988_v62 = vpop.f32.mrb[63].mxu1  ;;  %v1402_v23 = vadd.f32 1.0, %v2393_v52 }
 0x195   : > { %v2395_v46 = vpop.eup %2394  ;;  %v1178_v6 = vadd.f32 %v2999_v33, %v985_v8  ;;  %v989_v4 = vadd.f32 %v988_v62, %v2678_v50  ;;  %v1981_v3 = vpack.c.bf16 %v1495_v47, %v1494_v51  ;;  %v1272_v33 = vsel %vm1208_vm8, %v2991_v56, %v1240_v43 }
 0x196   : > { %v1403_v11 = vadd.f32 1.0, %v2395_v46  ;;  %2404 = vrcp.f32 %v1402_v23  ;;  %v1180_v63 = vadd.f32 %v3006_v35, %v987_v12  ;;  %v1246_v2 = vmul.f32 0.2, %v3057_v59 }
 0x197   : > { %v1855_v10 = vmul.f32 -1.442695, %v1178_v6  ;;  %v1182_v48 = vadd.f32 %v3011_v44, %v989_v4  ;;  %2013 = vst [vmem:[%s2761_s11 + $0x58] sm:$0xff] %v1981_v3   ;;  %v1242_v44 = vmul.f32 0.2, %v3019_v61  ;;  %vm1214_vm14 = vcmp.ge.f32.partialorder %v3057_v59, 0.0 }
 0x198   : > { %2406 = vrcp.f32 %v1403_v11  ;;  %v2397_v9 = vpop.eup %2396  ;;  %v1247_v22 = vmul.f32 0.2, %v1180_v63  ;;  %vm1215_vm15 = vcmp.ge.f32.partialorder %v1180_v63, 0.0  ;;  %v1278_v40 = vsel %vm1214_vm14, %v3057_v59, %v1246_v2 }
 0x199   : > { %2408 = vpow2.f32 %v1855_v10  ;;  %v1856_v50 = vmul.f32 -1.442695, %v1182_v48  ;;  %v1496_v17 = vmul.f32 %v2397_v9, %v1272_v33  ;;  %v1274_v31 = vsel %vm1210_vm10, %v3019_v61, %v1242_v44 }
 0x19a   : > { %v2399_v19 = vpop.eup %2398  ;;  %v1245_v61 = vmul.f32 0.2, %v3046_v18  ;;  %v1279_v55 = vsel %vm1215_vm15, %v1180_v63, %v1247_v22 }
 0x19b   : > { %v2401_v25 = vpop.eup %2400  ;;  %v1497_v14 = vmul.f32 %v2399_v19, %v1273_v58  ;;  %2410 = vpow2.f32 %v1856_v50 }
 0x19c   : > { %v1404_v35 = vadd.f32 1.0, %v2401_v25  ;;  %v1277_v30 = vsel %vm1213_vm13, %v3046_v18, %v1245_v61 }
 0x19d   : > { %v1986_v16 = vpack.c.bf16 %v1497_v14, %v1496_v17  ;;  %v2403_v24 = vpop.eup %2402 }
 0x19e   : > { %2412 = vrcp.f32 %v1404_v35  ;;  %v1405_v56 = vadd.f32 1.0, %v2403_v24 }
 0x19f   : > { %2014 = vst [vmem:[%s2761_s11 + $0x60] sm:$0xff] %v1986_v16  }
 0x1a0   : > { %v2405_v49 = vpop.eup %2404  ;;  %2414 = vrcp.f32 %v1405_v56 }
 0x1a1   : > { %v1498_v38 = vmul.f32 %v2405_v49, %v1274_v31 }
 0x1a2   : > { %v2407_v1 = vpop.eup %2406 }
 0x1a3   : > { %v2409_v26 = vpop.eup %2408  ;;  %v1499_v13 = vmul.f32 %v2407_v1, %v1275_v5 }
 0x1a4   : > { %v1406_v28 = vadd.f32 1.0, %v2409_v26 }
 0x1a5   : > { %v2411_v29 = vpop.eup %2410  ;;  %v1991_v57 = vpack.c.bf16 %v1499_v13, %v1498_v38 }
 0x1a6   : > { %2416 = vrcp.f32 %v1406_v28  ;;  %v1407_v36 = vadd.f32 1.0, %v2411_v29 }
 0x1a7   : > { %2015 = vst [vmem:[%s2761_s11 + $0x68] sm:$0xff] %v1991_v57  }
 0x1a8   : > { %v2413_v27 = vpop.eup %2412  ;;  %2418 = vrcp.f32 %v1407_v36 }
 0x1a9   : > { %v1500_v15 = vmul.f32 %v2413_v27, %v1276_v39 }
 0x1aa   : > { %v2415_v32 = vpop.eup %2414 }
 0x1ab   : > { %v1501_v37 = vmul.f32 %v2415_v32, %v1277_v30 }
 0x1ad   : > { %v1996_v41 = vpack.c.bf16 %v1501_v37, %v1500_v15 }
 0x1af   : > { %2016 = vst [vmem:[%s2761_s11 + $0x70] sm:$0xff] %v1996_v41  }
 0x1b0   : > { %v2417_v42 = vpop.eup %2416 }
 0x1b1   : > { %v1502_v51 = vmul.f32 %v2417_v42, %v1278_v40 }
 0x1b2   : > { %v2419_v45 = vpop.eup %2418 }
 0x1b3   : > { %v1503_v53 = vmul.f32 %v2419_v45, %v1279_v55 }
 0x1b5   : > { %v2001_v34 = vpack.c.bf16 %v1503_v53, %v1502_v51 }
 0x1b7   : > { %2017 = vst [vmem:[%s2761_s11 + $0x78] sm:$0xff] %v2001_v34  }
 0x1b8 PF: > { %s13_s12 = sadd.s32 1, %s2426_s12  }
 0x1b9   : > { %p10_p4 = scmp.ge.s32.totalorder %s13_s12, 4  }
 0x1bb   :  { %12 = sbr.rel (!%p10_p4) target bundleno = 1 (0x1), region = 62 }

// kernel: _lambda_.52
= control target key start
LH: loop header
LB: loop body
LE: loop exit
PB: predicated region body
PF: predicated region fallthrough
CT: control target
= control target key end

     0   :  { %s1862_s12 = smov 0   ;;  %s2206_s0 = inlined_call_operand.vmem [shape: bf16[512,256], index: 0, kind: input, shape index: {}]   ;;  %s2207_s1 = inlined_call_operand.vmem [shape: bf16[256,256], index: 1, kind: input, shape index: {}]   ;;  %s2208_s2 = inlined_call_operand.vmem [shape: f32[1,256], index: 2, kind: input, shape index: {}]   ;;  %s2209_s3 = inlined_call_operand.vmem [shape: bf16[512,128], index: 3, kind: output, shape index: {}]  }
   0x1 LB: > { %s1270_s13 = sadd.s32 4294967295, %s1840_s12   ;;  %p1274_p0 = scmp.ge.s32.totalorder %s1840_s12, 1  ;;  %s1840_s12 = sphi %s1862_s12, %s13_s12  }
   0x2   : > { %p139_p1 = scmp.lt.s32.totalorder %s1840_s12, 3 }
   0x4   : > { %p140_p2 = pnand %p1274_p0, %p139_p1 }
   0x5   : > { %v1610_v0 = vld [vmem:[%s2207_s1 + $0x4] ss:$8 sps:$4 sm:$0xff] (!%p140_p2)   ;;  %v1612_v1 = vld [vmem:[%s2207_s1] ss:$8 sps:$4 sm:$0xff] (!%p140_p2)   ;;  %v1613_v2 = vld [vmem:[%s2207_s1 + $0x14] ss:$8 sps:$4 sm:$0xff] (!%p140_p2)  }
   0x6   : > { %143 = sbr.rel (%p140_p2) target bundleno = 387 (0x183), region = 32  ;;  %573 = vmatprep.subr.bf16.mxu0 (!%p140_p2), %v1610_v0  ;;  %1570 = vmatprep.subr.bf16.mxu1 (!%p140_p2), %v1610_v0  ;;  %v1615_v3 = vld [vmem:[%s2207_s1 + $0x10] ss:$8 sps:$4 sm:$0xff] (!%p140_p2)   ;;  %v1616_v4 = vld [vmem:[%s2207_s1 + $0x24] ss:$8 sps:$4 sm:$0xff] (!%p140_p2)   ;;  %s1275_s24 = sshll.u32 (!%p140_p2), %s1270_s13, 5  ;;  %v243_v0 = vlaneseq (!%p140_p2) }
   0x7   : > { %574 = vmatpush1.bf16.msra.mxu0 (!%p140_p2), %v1612_v1  ;;  %1586 = vmatpush1.bf16.msra.mxu1 (!%p140_p2), %v1612_v1  ;;  %v1618_v5 = vld [vmem:[%s2207_s1 + $0x20] ss:$8 sps:$4 sm:$0xff] (!%p140_p2)   ;;  %v1619_v6 = vld [vmem:[%s2207_s1 + $0x34] ss:$8 sps:$4 sm:$0xff] (!%p140_p2)   ;;  %p165_p3 = scmp.lt.s32.totalorder (!%p140_p2), %s1275_s24, 63 }
   0x8   : > { %575 = vmatprep.subr.bf16.mxu0 (!%p140_p2), %v1613_v2  ;;  %1571 = vmatprep.subr.bf16.mxu1 (!%p140_p2), %v1613_v2  ;;  %v1621_v7 = vld [vmem:[%s2207_s1 + $0x30] ss:$8 sps:$4 sm:$0xff] (!%p140_p2)   ;;  %v1622_v8 = vld [vmem:[%s2207_s1 + $0x44] ss:$8 sps:$4 sm:$0xff] (!%p140_p2)   ;;  %v1624_v9 = vld [vmem:[%s2207_s1 + $0x40] ss:$8 sps:$4 sm:$0xff] (!%p140_p2)  }
   0x9   : > { %v1625_v10 = vld [vmem:[%s2207_s1 + $0x54] ss:$8 sps:$4 sm:$0xff] (!%p140_p2)   ;;  %v1627_v11 = vld [vmem:[%s2207_s1 + $0x50] ss:$8 sps:$4 sm:$0xff] (!%p140_p2)   ;;  %v1628_v12 = vld [vmem:[%s2207_s1 + $0x64] ss:$8 sps:$4 sm:$0xff] (!%p140_p2)  }
   0xa   : > { %v1630_v14 = vld [vmem:[%s2207_s1 + $0x60] ss:$8 sps:$4 sm:$0xff] (!%p140_p2)   ;;  %v1631_v16 = vld [vmem:[%s2207_s1 + $0x74] ss:$8 sps:$4 sm:$0xff] (!%p140_p2)   ;;  %v1633_v17 = vld [vmem:[%s2207_s1 + $0x70] ss:$8 sps:$4 sm:$0xff] (!%p140_p2)  }
   0xb   : > { %576 = vmatpush1.bf16.msra.mxu0 (!%p140_p2), %v1615_v3  ;;  %1587 = vmatpush1.bf16.msra.mxu1 (!%p140_p2), %v1615_v3  ;;  %v1634_v18 = vld [vmem:[%s2207_s1 + $0x84] ss:$8 sps:$4 sm:$0xff] (!%p140_p2)   ;;  %v1636_v19 = vld [vmem:[%s2207_s1 + $0x80] ss:$8 sps:$4 sm:$0xff] (!%p140_p2)   ;;  %v1637_v20 = vld [vmem:[%s2207_s1 + $0x94] ss:$8 sps:$4 sm:$0xff] (!%p140_p2)  }
   0xc   : > { %577 = vmatprep.subr.bf16.mxu0 (!%p140_p2), %v1616_v4  ;;  %1572 = vmatprep.subr.bf16.mxu1 (!%p140_p2), %v1616_v4  ;;  %v1639_v21 = vld [vmem:[%s2207_s1 + $0x90] ss:$8 sps:$4 sm:$0xff] (!%p140_p2)   ;;  %v1640_v22 = vld [vmem:[%s2207_s1 + $0xa4] ss:$8 sps:$4 sm:$0xff] (!%p140_p2)   ;;  %v1642_v23 = vld [vmem:[%s2207_s1 + $0xa0] ss:$8 sps:$4 sm:$0xff] (!%p140_p2)  }
   0xd   : > { %s2211_s24 = smov (!%p165_p3, %s1275_s24), 63  ;;  %v1643_v24 = vld [vmem:[%s2207_s1 + $0xb4] ss:$8 sps:$4 sm:$0xff]   ;;  %v1645_v25 = vld [vmem:[%s2207_s1 + $0xb0] ss:$8 sps:$4 sm:$0xff]   ;;  %v2006_v1 = vshrl.u32 %v243_v0, 7 }
   0xe   : > { %s1442_s10 = sshll.u32 %s2211_s24, 3  ;;  %v1646_v26 = vld [vmem:[%s2207_s1 + $0xc4] ss:$8 sps:$4 sm:$0xff]   ;;  %v1648_v27 = vld [vmem:[%s2207_s1 + $0xc0] ss:$8 sps:$4 sm:$0xff]  }
   0xf   : > { %578 = vmatpush1.bf16.msra.mxu0 %v1618_v5  ;;  %1588 = vmatpush1.bf16.msra.mxu1 %v1618_v5  ;;  %s1912_s16 = scalar_lea.vmem %s2206_s0, %s1442_s10  ;;  %v1649_v28 = vld [vmem:[%s2207_s1 + $0xd4] ss:$8 sps:$4 sm:$0xff]   ;;  %v1651_v29 = vld [vmem:[%s2207_s1 + $0xd0] ss:$8 sps:$4 sm:$0xff]   ;;  %v1652_v30 = vld [vmem:[%s2207_s1 + $0xe4] ss:$8 sps:$4 sm:$0xff]  }
  0x10   : > { %579 = vmatprep.subr.bf16.mxu0 %v1619_v6  ;;  %1573 = vmatprep.subr.bf16.mxu1 %v1619_v6  ;;  %v1660_v13 = vld [vmem:[%s1912_s16 + $0x4] ss:$8 sps:$4 sm:$0xff]   ;;  %v1654_v31 = vld [vmem:[%s2207_s1 + $0xe0] ss:$8 sps:$4 sm:$0xff]   ;;  %v1655_v32 = vld [vmem:[%s2207_s1 + $0xf4] ss:$8 sps:$4 sm:$0xff]  }
  0x11   : > { %v1663_v15 = vld [vmem:[%s1912_s16 + $0x84] ss:$8 sps:$4 sm:$0xff]   ;;  %605 = vmatprep.mubr.bf16.mxu0 %v1660_v13  ;;  %v1657_v33 = vld [vmem:[%s2207_s1 + $0xf0] ss:$8 sps:$4 sm:$0xff]   ;;  %v1658_v34 = vld [vmem:[%s1912_s16] ss:$8 sps:$4 sm:$0xff]  }
  0x12   : > { %685 = vmatprep.mubr.bf16.mxu1 %v1663_v15  ;;  %v1661_v35 = vld [vmem:[%s1912_s16 + $0x80] ss:$8 sps:$4 sm:$0xff]   ;;  %v1664_v36 = vld [vmem:[%s1912_s16 + $0x14] ss:$8 sps:$4 sm:$0xff]   ;;  %v1668_v38 = vld [vmem:[%s1912_s16 + $0x10] ss:$8 sps:$4 sm:$0xff]  }
  0x13   : > { %580 = vmatpush1.bf16.msra.mxu0 %v1621_v7  ;;  %1589 = vmatpush1.bf16.msra.mxu1 %v1621_v7  ;;  %v1666_v37 = vld [vmem:[%s1912_s16 + $0x94] ss:$8 sps:$4 sm:$0xff]   ;;  %v1669_v39 = vld [vmem:[%s1912_s16 + $0x90] ss:$8 sps:$4 sm:$0xff]   ;;  %v1670_v40 = vld [vmem:[%s1912_s16 + $0x24] ss:$8 sps:$4 sm:$0xff]  }
  0x14   : > { %581 = vmatprep.subr.bf16.mxu0 %v1622_v8  ;;  %1574 = vmatprep.subr.bf16.mxu1 %v1622_v8  ;;  %v1672_v41 = vld [vmem:[%s1912_s16 + $0xa4] ss:$8 sps:$4 sm:$0xff]   ;;  %v1674_v42 = vld [vmem:[%s1912_s16 + $0x20] ss:$8 sps:$4 sm:$0xff]   ;;  %v1676_v44 = vld [vmem:[%s1912_s16 + $0x34] ss:$8 sps:$4 sm:$0xff]  }
  0x15   : > { %v1675_v43 = vld [vmem:[%s1912_s16 + $0xa0] ss:$8 sps:$4 sm:$0xff]   ;;  %v1678_v45 = vld [vmem:[%s1912_s16 + $0xb4] ss:$8 sps:$4 sm:$0xff]   ;;  %v1680_v46 = vld [vmem:[%s1912_s16 + $0x30] ss:$8 sps:$4 sm:$0xff]  }
  0x16   : > { %v1681_v47 = vld [vmem:[%s1912_s16 + $0xb0] ss:$8 sps:$4 sm:$0xff]   ;;  %v1682_v48 = vld [vmem:[%s1912_s16 + $0x44] ss:$8 sps:$4 sm:$0xff]   ;;  %v1686_v50 = vld [vmem:[%s1912_s16 + $0x40] ss:$8 sps:$4 sm:$0xff]  }
  0x17   : > { %582 = vmatpush1.bf16.msra.mxu0 %v1624_v9  ;;  %1590 = vmatpush1.bf16.msra.mxu1 %v1624_v9  ;;  %v1684_v49 = vld [vmem:[%s1912_s16 + $0xc4] ss:$8 sps:$4 sm:$0xff]   ;;  %v1687_v51 = vld [vmem:[%s1912_s16 + $0xc0] ss:$8 sps:$4 sm:$0xff]   ;;  %v1688_v52 = vld [vmem:[%s1912_s16 + $0x54] ss:$8 sps:$4 sm:$0xff]  }
  0x18   : > { %583 = vmatprep.subr.bf16.mxu0 %v1625_v10  ;;  %1575 = vmatprep.subr.bf16.mxu1 %v1625_v10  ;;  %v1690_v53 = vld [vmem:[%s1912_s16 + $0xd4] ss:$8 sps:$4 sm:$0xff]   ;;  %v1692_v54 = vld [vmem:[%s1912_s16 + $0x50] ss:$8 sps:$4 sm:$0xff]   ;;  %v1694_v56 = vld [vmem:[%s1912_s16 + $0x64] ss:$8 sps:$4 sm:$0xff]  }
  0x19   : > { %v1693_v55 = vld [vmem:[%s1912_s16 + $0xd0] ss:$8 sps:$4 sm:$0xff]   ;;  %v1696_v57 = vld [vmem:[%s1912_s16 + $0xe4] ss:$8 sps:$4 sm:$0xff]   ;;  %v1698_v58 = vld [vmem:[%s1912_s16 + $0x60] ss:$8 sps:$4 sm:$0xff]  }
  0x1a   : > { %v1699_v59 = vld [vmem:[%s1912_s16 + $0xe0] ss:$8 sps:$4 sm:$0xff]   ;;  %v1700_v60 = vld [vmem:[%s1912_s16 + $0x74] ss:$8 sps:$4 sm:$0xff]   ;;  %v1704_v62 = vld [vmem:[%s1912_s16 + $0x70] ss:$8 sps:$4 sm:$0xff]  }
  0x1b   : > { %584 = vmatpush1.bf16.msra.mxu0 %v1627_v11  ;;  %1591 = vmatpush1.bf16.msra.mxu1 %v1627_v11  ;;  %v1702_v61 = vld [vmem:[%s1912_s16 + $0xf4] ss:$8 sps:$4 sm:$0xff]   ;;  %v1705_v63 = vld [vmem:[%s1912_s16 + $0xf0] ss:$8 sps:$4 sm:$0xff]   ;;  %v249_v2 = vsub.s32 1, %v2006_v1  ;;  %s1279_s16 = sshll.u32 %s2211_s24, 2 }
  0x1c   : > { %585 = vmatprep.subr.bf16.mxu0 %v1628_v12  ;;  %1576 = vmatprep.subr.bf16.mxu1 %v1628_v12  ;;  %v2012_v3 = vld [vmem:[%s2208_s2] sm:$0x3]  ;;  %s2093_s10 = scalar_lea.vmem %s2209_s3, %s1279_s16 }
  0x1d   : > { %v2015_v4 = vrot.slane %v2012_v3, %v249_v2 }
  0x1f   : > { %586 = vmatpush1.bf16.msra.mxu0 %v1630_v14  ;;  %1592 = vmatpush1.bf16.msra.mxu1 %v1630_v14 }
  0x20   : > { %587 = vmatprep.subr.bf16.mxu0 %v1631_v16  ;;  %1577 = vmatprep.subr.bf16.mxu1 %v1631_v16 }
  0x23   : > { %588 = vmatpush1.bf16.msra.mxu0 %v1633_v17  ;;  %1593 = vmatpush1.bf16.msra.mxu1 %v1633_v17 }
  0x24   : > { %589 = vmatprep.subr.bf16.mxu0 %v1634_v18  ;;  %1578 = vmatprep.subr.bf16.mxu1 %v1634_v18 }
  0x27   : > { %590 = vmatpush1.bf16.msra.mxu0 %v1636_v19  ;;  %1594 = vmatpush1.bf16.msra.mxu1 %v1636_v19 }
  0x28   : > { %591 = vmatprep.subr.bf16.mxu0 %v1637_v20  ;;  %1579 = vmatprep.subr.bf16.mxu1 %v1637_v20 }
  0x2b   : > { %592 = vmatpush1.bf16.msra.mxu0 %v1639_v21  ;;  %1595 = vmatpush1.bf16.msra.mxu1 %v1639_v21 }
  0x2c   : > { %593 = vmatprep.subr.bf16.mxu0 %v1640_v22  ;;  %1580 = vmatprep.subr.bf16.mxu1 %v1640_v22 }
  0x2f   : > { %594 = vmatpush1.bf16.msra.mxu0 %v1642_v23  ;;  %1596 = vmatpush1.bf16.msra.mxu1 %v1642_v23 }
  0x30   : > { %595 = vmatprep.subr.bf16.mxu0 %v1643_v24  ;;  %1581 = vmatprep.subr.bf16.mxu1 %v1643_v24 }
  0x33   : > { %596 = vmatpush1.bf16.msra.mxu0 %v1645_v25  ;;  %1597 = vmatpush1.bf16.msra.mxu1 %v1645_v25 }
  0x34   : > { %597 = vmatprep.subr.bf16.mxu0 %v1646_v26  ;;  %1582 = vmatprep.subr.bf16.mxu1 %v1646_v26 }
  0x37   : > { %598 = vmatpush1.bf16.msra.mxu0 %v1648_v27  ;;  %1598 = vmatpush1.bf16.msra.mxu1 %v1648_v27 }
  0x38   : > { %599 = vmatprep.subr.bf16.mxu0 %v1649_v28  ;;  %1583 = vmatprep.subr.bf16.mxu1 %v1649_v28 }
  0x3b   : > { %600 = vmatpush1.bf16.msra.mxu0 %v1651_v29  ;;  %1599 = vmatpush1.bf16.msra.mxu1 %v1651_v29 }
  0x3c   : > { %601 = vmatprep.subr.bf16.mxu0 %v1652_v30  ;;  %1584 = vmatprep.subr.bf16.mxu1 %v1652_v30 }
  0x3f   : > { %602 = vmatpush1.bf16.msra.mxu0 %v1654_v31  ;;  %1600 = vmatpush1.bf16.msra.mxu1 %v1654_v31 }
  0x40   : > { %603 = vmatprep.subr.bf16.mxu0 %v1655_v32  ;;  %1585 = vmatprep.subr.bf16.mxu1 %v1655_v32 }
  0x43   : > { %604 = vmatpush1.bf16.msra.mxu0 %v1657_v33  ;;  %1601 = vmatpush1.bf16.msra.mxu1 %v1657_v33 }
  0x46   : > { %606 = vmatmul.mubr.bf16.vlgmr.msra.gmra.mrb[0].mxu0 %v1658_v34  ;;  %686 = vmatmul.mubr.bf16.vlgmr.msra.gmra.mrb[0].mxu1 %v1661_v35 }
  0x47   : > { %615 = vmatprep.mubr.bf16.mxu0 %v1664_v36  ;;  %695 = vmatprep.mubr.bf16.mxu1 %v1666_v37 }
  0x4e   : > { %616 = vmatmul.mubr.bf16.gmra.mrb[4].mxu0 %v1668_v38  ;;  %696 = vmatmul.mubr.bf16.gmra.mrb[4].mxu1 %v1669_v39 }
  0x4f   : > { %625 = vmatprep.mubr.bf16.mxu0 %v1670_v40  ;;  %705 = vmatprep.mubr.bf16.mxu1 %v1672_v41 }
  0x56   : > { %626 = vmatmul.mubr.bf16.gmra.mrb[8].mxu0 %v1674_v42  ;;  %706 = vmatmul.mubr.bf16.gmra.mrb[8].mxu1 %v1675_v43 }
  0x57   : > { %635 = vmatprep.mubr.bf16.mxu0 %v1676_v44  ;;  %715 = vmatprep.mubr.bf16.mxu1 %v1678_v45 }
  0x5e   : > { %636 = vmatmul.mubr.bf16.gmra.mrb[12].mxu0 %v1680_v46  ;;  %716 = vmatmul.mubr.bf16.gmra.mrb[12].mxu1 %v1681_v47 }
  0x5f   : > { %645 = vmatprep.mubr.bf16.mxu0 %v1682_v48  ;;  %725 = vmatprep.mubr.bf16.mxu1 %v1684_v49 }
  0x66   : > { %646 = vmatmul.mubr.bf16.gmra.mrb[16].mxu0 %v1686_v50  ;;  %726 = vmatmul.mubr.bf16.gmra.mrb[16].mxu1 %v1687_v51  ;;  %v245_v51 = vsub.s32 0, %v2006_v1 }
  0x67   : > { %655 = vmatprep.mubr.bf16.mxu0 %v1688_v52  ;;  %735 = vmatprep.mubr.bf16.mxu1 %v1690_v53 }
  0x6e   : > { %656 = vmatmul.mubr.bf16.gmra.mrb[20].mxu0 %v1692_v54  ;;  %736 = vmatmul.mubr.bf16.gmra.mrb[20].mxu1 %v1693_v55 }
  0x6f   : > { %665 = vmatprep.mubr.bf16.mxu0 %v1694_v56  ;;  %745 = vmatprep.mubr.bf16.mxu1 %v1696_v57 }
  0x76   : > { %666 = vmatmul.mubr.bf16.gmra.mrb[24].mxu0 %v1698_v58  ;;  %746 = vmatmul.mubr.bf16.gmra.mrb[24].mxu1 %v1699_v59 }
  0x77   : > { %675 = vmatprep.mubr.bf16.mxu0 %v1700_v60  ;;  %755 = vmatprep.mubr.bf16.mxu1 %v1702_v61  ;;  %v2055_v60 = vrot.slane %v2012_v3, %v245_v51 }
  0x7e   : > { %676 = vmatmul.mubr.bf16.gmra.mrb[28].mxu0 %v1704_v62  ;;  %756 = vmatmul.mubr.bf16.gmra.mrb[28].mxu1 %v1705_v63 }
 0x119   : > { %v2017_v5 = vpop.f32.mrb[0].mxu0  ;;  %v2019_v6 = vpop.f32.mrb[0].mxu1 }
 0x11a   : > { %v609_v7 = vpop.f32.mrb[1].mxu0  ;;  %v689_v8 = vpop.f32.mrb[1].mxu1 }
 0x11b   : > { %v610_v9 = vadd.f32 %v609_v7, %v2015_v4  ;;  %v690_v10 = vadd.f32 %v689_v8, %v2015_v4  ;;  %v2023_v11 = vpop.f32.mrb[2].mxu0  ;;  %v2025_v12 = vpop.f32.mrb[2].mxu1 }
 0x11c   : > { %v613_v13 = vpop.f32.mrb[3].mxu0  ;;  %v693_v14 = vpop.f32.mrb[3].mxu1 }
 0x11d   : > { %v1344_v15 = vmul.f32 -1.442695, %v610_v9  ;;  %v1360_v16 = vmul.f32 -1.442695, %v690_v10  ;;  %v614_v17 = vadd.f32 %v613_v13, %v2015_v4  ;;  %v694_v18 = vadd.f32 %v693_v14, %v2015_v4 }
 0x11f   : > { %1706 = vpow2.f32 %v1344_v15  ;;  %v1345_v19 = vmul.f32 -1.442695, %v614_v17  ;;  %v1361_v20 = vmul.f32 -1.442695, %v694_v18  ;;  %v608_v18 = vadd.f32 %v2017_v5, %v2055_v60 }
 0x120   : > { %1708 = vpow2.f32 %v1360_v16 }
 0x121   : > { %1710 = vpow2.f32 %v1345_v19  ;;  %v2029_v21 = vpop.f32.mrb[4].mxu0  ;;  %v2031_v22 = vpop.f32.mrb[4].mxu1 }
 0x122   : > { %1712 = vpow2.f32 %v1361_v20  ;;  %v619_v23 = vpop.f32.mrb[5].mxu0  ;;  %v699_v24 = vpop.f32.mrb[5].mxu1 }
 0x123   : > { %v620_v25 = vadd.f32 %v619_v23, %v2015_v4  ;;  %v700_v26 = vadd.f32 %v699_v24, %v2015_v4  ;;  %v2035_v27 = vpop.f32.mrb[6].mxu0  ;;  %v2037_v28 = vpop.f32.mrb[6].mxu1 }
 0x124   : > { %v623_v29 = vpop.f32.mrb[7].mxu0  ;;  %v703_v30 = vpop.f32.mrb[7].mxu1 }
 0x125   : > { %v1346_v31 = vmul.f32 -1.442695, %v620_v25  ;;  %v1362_v32 = vmul.f32 -1.442695, %v700_v26  ;;  %v624_v33 = vadd.f32 %v623_v29, %v2015_v4  ;;  %v704_v34 = vadd.f32 %v703_v30, %v2015_v4 }
 0x126   : > { %v688_v30 = vadd.f32 %v2019_v6, %v2055_v60 }
 0x127   : > { %1714 = vpow2.f32 %v1346_v31  ;;  %v1347_v35 = vmul.f32 -1.442695, %v624_v33  ;;  %v1363_v36 = vmul.f32 -1.442695, %v704_v34  ;;  %v612_v34 = vadd.f32 %v2023_v11, %v2055_v60 }
 0x128   : > { %1716 = vpow2.f32 %v1362_v32 }
 0x129   : > { %v1707_v37 = vpop.eup %1706  ;;  %1718 = vpow2.f32 %v1347_v35  ;;  %v2041_v38 = vpop.f32.mrb[8].mxu0  ;;  %v692_v35 = vadd.f32 %v2025_v12, %v2055_v60 }
 0x12a   : > { %v2043_v39 = vpop.f32.mrb[8].mxu1  ;;  %v1709_v40 = vpop.eup %1708  ;;  %v862_v41 = vadd.f32 1.0, %v1707_v37  ;;  %1720 = vpow2.f32 %v1363_v36 }
 0x12b   : > { %v629_v42 = vpop.f32.mrb[9].mxu0  ;;  %v709_v43 = vpop.f32.mrb[9].mxu1  ;;  %v878_v45 = vadd.f32 1.0, %v1709_v40 }
 0x12c   : > { %v1711_v44 = vpop.eup %1710  ;;  %v630_v46 = vadd.f32 %v629_v42, %v2015_v4  ;;  %v710_v47 = vadd.f32 %v709_v43, %v2015_v4  ;;  %v2047_v48 = vpop.f32.mrb[10].mxu0  ;;  %1722 = vrcp.f32 %v862_v41  ;;  %v618_v43 = vadd.f32 %v2029_v21, %v2055_v60 }
 0x12d   : > { %v2049_v49 = vpop.f32.mrb[10].mxu1  ;;  %v1713_v50 = vpop.eup %1712  ;;  %v863_v52 = vadd.f32 1.0, %v1711_v44  ;;  %1724 = vrcp.f32 %v878_v45 }
 0x12e   : > { %v633_v53 = vpop.f32.mrb[11].mxu0  ;;  %v713_v54 = vpop.f32.mrb[11].mxu1  ;;  %v879_v55 = vadd.f32 1.0, %v1713_v50  ;;  %v1348_v56 = vmul.f32 -1.442695, %v630_v46 }
 0x12f   : > { %v1364_v57 = vmul.f32 -1.442695, %v710_v47  ;;  %1726 = vrcp.f32 %v863_v52  ;;  %v634_v58 = vadd.f32 %v633_v53, %v2015_v4  ;;  %v714_v59 = vadd.f32 %v713_v54, %v2015_v4 }
 0x130   : > { %1728 = vrcp.f32 %v879_v55  ;;  %v698_v47 = vadd.f32 %v2031_v22, %v2055_v60 }
 0x131   : > { %1730 = vpow2.f32 %v1348_v56  ;;  %v1349_v61 = vmul.f32 -1.442695, %v634_v58  ;;  %v1365_v62 = vmul.f32 -1.442695, %v714_v59  ;;  %v1715_v63 = vpop.eup %1714  ;;  %v2057_v0 = vpop.f32.mrb[12].mxu0 }
 0x132   : > { %1732 = vpow2.f32 %v1364_v57  ;;  %v2059_v1 = vpop.f32.mrb[12].mxu1  ;;  %v1717_v2 = vpop.eup %1716  ;;  %v864_v7 = vadd.f32 1.0, %v1715_v63 }
 0x133   : > { %1734 = vpow2.f32 %v1349_v61  ;;  %v639_v8 = vpop.f32.mrb[13].mxu0  ;;  %v719_v9 = vpop.f32.mrb[13].mxu1  ;;  %v880_v13 = vadd.f32 1.0, %v1717_v2 }
 0x134   : > { %v1719_v10 = vpop.eup %1718  ;;  %1736 = vpow2.f32 %v1365_v62  ;;  %v640_v3 = vadd.f32 %v639_v8, %v2015_v4  ;;  %v720_v14 = vadd.f32 %v719_v9, %v2015_v4  ;;  %v2063_v15 = vpop.f32.mrb[14].mxu0  ;;  %v622_v8 = vadd.f32 %v2035_v27, %v2055_v60 }
 0x135   : > { %v2065_v16 = vpop.f32.mrb[14].mxu1  ;;  %v1721_v17 = vpop.eup %1720  ;;  %1738 = vrcp.f32 %v864_v7  ;;  %v865_v19 = vadd.f32 1.0, %v1719_v10 }
 0x136   : > { %v643_v20 = vpop.f32.mrb[15].mxu0  ;;  %v723_v23 = vpop.f32.mrb[15].mxu1  ;;  %1740 = vrcp.f32 %v880_v13  ;;  %v881_v24 = vadd.f32 1.0, %v1721_v17  ;;  %v1350_v25 = vmul.f32 -1.442695, %v640_v3 }
 0x137   : > { %v1366_v26 = vmul.f32 -1.442695, %v720_v14  ;;  %v1723_v29 = vpop.eup %1722  ;;  %1742 = vrcp.f32 %v865_v19  ;;  %v644_v31 = vadd.f32 %v643_v20, %v2015_v4  ;;  %v724_v32 = vadd.f32 %v723_v23, %v2015_v4 }
 0x138   : > { %v1725_v33 = vpop.eup %1724  ;;  %v958_v5 = vmul.f32 %v1723_v29, %v608_v18  ;;  %1744 = vrcp.f32 %v881_v24  ;;  %v702_v19 = vadd.f32 %v2037_v28, %v2055_v60  ;;  %v628_v28 = vadd.f32 %v2041_v38, %v2055_v60 }
 0x139   : > { %v1727_v36 = vpop.eup %1726  ;;  %v974_v37 = vmul.f32 %v1725_v33, %v688_v30  ;;  %1746 = vpow2.f32 %v1350_v25  ;;  %v1351_v40 = vmul.f32 -1.442695, %v644_v31  ;;  %v1367_v41 = vmul.f32 -1.442695, %v724_v32  ;;  %v2080_v44 = vpop.f32.mrb[16].mxu0 }
 0x13a   : > { %v1729_v6 = vpop.eup %1728  ;;  %v959_v42 = vmul.f32 %v1727_v36, %v612_v34  ;;  %1748 = vpow2.f32 %v1366_v26  ;;  %v2082_v45 = vpop.f32.mrb[16].mxu1  ;;  %v1376_v46 = vclamps-f32 %v958_v5, 1.0 }
 0x13b   : > { %v1731_v11 = vpop.eup %1730  ;;  %v975_v12 = vmul.f32 %v1729_v6, %v692_v35  ;;  %1750 = vpow2.f32 %v1351_v40  ;;  %v649_v50 = vpop.f32.mrb[17].mxu0  ;;  %v1392_v53 = vclamps-f32 %v974_v37, 1.0 }
 0x13c   : > { %v729_v51 = vpop.f32.mrb[17].mxu1  ;;  %v1733_v52 = vpop.eup %1732  ;;  %v1377_v54 = vclamps-f32 %v959_v42, 1.0  ;;  %v866_v55 = vadd.f32 1.0, %v1731_v11  ;;  %1752 = vpow2.f32 %v1367_v41  ;;  %v650_v59 = vadd.f32 %v649_v50, %v2015_v4 }
 0x13d   : > { %v2086_v21 = vpop.f32.mrb[18].mxu0  ;;  %v2088_v56 = vpop.f32.mrb[18].mxu1  ;;  %v1393_v58 = vclamps-f32 %v975_v12, 1.0  ;;  %v882_v22 = vadd.f32 1.0, %v1733_v52  ;;  %v730_v61 = vadd.f32 %v729_v51, %v2015_v4 }
 0x13e   : > { %v1735_v57 = vpop.eup %1734  ;;  %v653_v62 = vpop.f32.mrb[19].mxu0  ;;  %v1478_v7 = vpack.c.bf16 %v1377_v54, %v1376_v46  ;;  %1754 = vrcp.f32 %v866_v55  ;;  %v1352_v14 = vmul.f32 -1.442695, %v650_v59  ;;  %v708_v59 = vadd.f32 %v2043_v39, %v2055_v60 }
 0x13f   : > { %v733_v63 = vpop.f32.mrb[19].mxu1  ;;  %v1737_v2 = vpop.eup %1736  ;;  %v867_v9 = vadd.f32 1.0, %v1735_v57  ;;  %v1518_v13 = vpack.c.bf16 %v1393_v58, %v1392_v53  ;;  %1756 = vrcp.f32 %v882_v22  ;;  %v1368_v20 = vmul.f32 -1.442695, %v730_v61 }
 0x140   : > { %v1739_v10 = vpop.eup %1738  ;;  %v883_v3 = vadd.f32 1.0, %v1737_v2  ;;  %1479 = vst [vmem:[%s2093_s10] sm:$0xff] %v1478_v7   ;;  %v654_v27 = vadd.f32 %v653_v62, %v2015_v4  ;;  %v734_v25 = vadd.f32 %v733_v63, %v2015_v4  ;;  %v632_v61 = vadd.f32 %v2047_v48, %v2055_v60 }
 0x141   : > { %v1741_v17 = vpop.eup %1740  ;;  %v960_v18 = vmul.f32 %v1739_v10, %v618_v43  ;;  %1758 = vrcp.f32 %v867_v9  ;;  %1562 = vst [vmem:[%s2093_s10 + $0x40] sm:$0xff] %v1518_v13   ;;  %v2105_v30 = vpop.f32.mrb[20].mxu0  ;;  %v712_v13 = vadd.f32 %v2049_v49, %v2055_v60  ;;  %v718_v49 = vadd.f32 %v2059_v1, %v2055_v60 }
 0x142   : > { %v1743_v23 = vpop.eup %1742  ;;  %v976_v24 = vmul.f32 %v1741_v17, %v698_v47  ;;  %1760 = vrcp.f32 %v883_v3  ;;  %v2107_v31 = vpop.f32.mrb[20].mxu1  ;;  %v1353_v5 = vmul.f32 -1.442695, %v654_v27  ;;  %v1369_v47 = vmul.f32 -1.442695, %v734_v25 }
 0x143   : > { %v1745_v26 = vpop.eup %1744  ;;  %v961_v29 = vmul.f32 %v1743_v23, %v622_v8  ;;  %1762 = vpow2.f32 %v1352_v14  ;;  %v659_v34 = vpop.f32.mrb[21].mxu0  ;;  %v1378_v37 = vclamps-f32 %v960_v18, 1.0  ;;  %v638_v18 = vadd.f32 %v2057_v0, %v2055_v60 }
 0x144   : > { %v1747_v32 = vpop.eup %1746  ;;  %v977_v33 = vmul.f32 %v1745_v26, %v702_v19  ;;  %1764 = vpow2.f32 %v1368_v20  ;;  %v739_v35 = vpop.f32.mrb[21].mxu1  ;;  %v1394_v40 = vclamps-f32 %v976_v24, 1.0  ;;  %v660_v54 = vadd.f32 %v659_v34, %v2015_v4 }
 0x145   : > { %v1749_v36 = vpop.eup %1748  ;;  %v1379_v41 = vclamps-f32 %v961_v29, 1.0  ;;  %v868_v6 = vadd.f32 1.0, %v1747_v32  ;;  %v2111_v42 = vpop.f32.mrb[22].mxu0  ;;  %1766 = vpow2.f32 %v1353_v5  ;;  %v740_v58 = vadd.f32 %v739_v35, %v2015_v4 }
 0x146   : > { %v2113_v43 = vpop.f32.mrb[22].mxu1  ;;  %v1751_v11 = vpop.eup %1750  ;;  %v1395_v46 = vclamps-f32 %v977_v33, 1.0  ;;  %v884_v12 = vadd.f32 1.0, %v1749_v36  ;;  %v1354_v62 = vmul.f32 -1.442695, %v660_v54 }
 0x147   : > { %v663_v38 = vpop.f32.mrb[23].mxu0  ;;  %v743_v50 = vpop.f32.mrb[23].mxu1  ;;  %v1483_v52 = vpack.c.bf16 %v1379_v41, %v1378_v37  ;;  %1768 = vrcp.f32 %v868_v6  ;;  %v869_v53 = vadd.f32 1.0, %v1751_v11  ;;  %v1370_v7 = vmul.f32 -1.442695, %v740_v58 }
 0x148   : > { %v1753_v51 = vpop.eup %1752  ;;  %v1523_v55 = vpack.c.bf16 %v1395_v46, %v1394_v40  ;;  %1770 = vrcp.f32 %v884_v12  ;;  %v664_v8 = vadd.f32 %v663_v38, %v2015_v4  ;;  %v744_v39 = vadd.f32 %v743_v50, %v2015_v4 }
 0x149   : > { %v885_v57 = vadd.f32 1.0, %v1753_v51  ;;  %v1755_v22 = vpop.eup %1754  ;;  %1555 = vst [vmem:[%s2093_s10 + $0x8] sm:$0xff] %v1483_v52   ;;  %1772 = vrcp.f32 %v869_v53  ;;  %v2127_v3 = vpop.f32.mrb[24].mxu0  ;;  %v642_v12 = vadd.f32 %v2063_v15, %v2055_v60  ;;  %v722_v51 = vadd.f32 %v2065_v16, %v2055_v60 }
 0x14a   : > { %v1757_v63 = vpop.eup %1756  ;;  %1563 = vst [vmem:[%s2093_s10 + $0x48] sm:$0xff] %v1523_v55   ;;  %v962_v2 = vmul.f32 %v1755_v22, %v628_v28  ;;  %v2129_v48 = vpop.f32.mrb[24].mxu1  ;;  %v1355_v19 = vmul.f32 -1.442695, %v664_v8  ;;  %v1371_v25 = vmul.f32 -1.442695, %v744_v39 }
 0x14b   : > { %1774 = vrcp.f32 %v885_v57  ;;  %v1759_v9 = vpop.eup %1758  ;;  %v978_v10 = vmul.f32 %v1757_v63, %v708_v59  ;;  %v669_v20 = vpop.f32.mrb[25].mxu0  ;;  %v648_v57 = vadd.f32 %v2080_v44, %v2055_v60 }
 0x14c   : > { %1776 = vpow2.f32 %v1369_v47  ;;  %v1761_v14 = vpop.eup %1760  ;;  %v963_v17 = vmul.f32 %v1759_v9, %v632_v61  ;;  %v749_v23 = vpop.f32.mrb[25].mxu1  ;;  %v1380_v33 = vclamps-f32 %v962_v2, 1.0  ;;  %v670_v41 = vadd.f32 %v669_v20, %v2015_v4 }
 0x14d   : > { %1778 = vpow2.f32 %v1354_v62  ;;  %v1763_v24 = vpop.eup %1762  ;;  %v979_v27 = vmul.f32 %v1761_v14, %v712_v13  ;;  %v2135_v26 = vpop.f32.mrb[26].mxu0  ;;  %v1396_v35 = vclamps-f32 %v978_v10, 1.0  ;;  %v750_v6 = vadd.f32 %v749_v23, %v2015_v4 }
 0x14e   : > { %1780 = vpow2.f32 %v1370_v7  ;;  %v2137_v29 = vpop.f32.mrb[26].mxu1  ;;  %v1765_v32 = vpop.eup %1764  ;;  %v1381_v28 = vclamps-f32 %v963_v17, 1.0  ;;  %v870_v5 = vadd.f32 1.0, %v1763_v24  ;;  %v1356_v52 = vmul.f32 -1.442695, %v670_v41 }
 0x14f   : > { %1782 = vpow2.f32 %v1355_v19  ;;  %v673_v0 = vpop.f32.mrb[27].mxu0  ;;  %v753_v34 = vpop.f32.mrb[27].mxu1  ;;  %v1397_v36 = vclamps-f32 %v979_v27, 1.0  ;;  %v886_v37 = vadd.f32 1.0, %v1765_v32  ;;  %v1372_v53 = vmul.f32 -1.442695, %v750_v6 }
 0x150   : > { %1784 = vpow2.f32 %v1371_v25  ;;  %v1767_v40 = vpop.eup %1766  ;;  %v1488_v1 = vpack.c.bf16 %v1381_v28, %v1380_v33  ;;  %v674_v58 = vadd.f32 %v673_v0, %v2015_v4  ;;  %v728_v62 = vadd.f32 %v2082_v45, %v2055_v60 }
 0x151   : > { %1786 = vrcp.f32 %v870_v5  ;;  %v1769_v11 = vpop.eup %1768  ;;  %v1528_v46 = vpack.c.bf16 %v1397_v36, %v1396_v35  ;;  %v871_v47 = vadd.f32 1.0, %v1767_v40  ;;  %v2150_v15 = vpop.f32.mrb[28].mxu0  ;;  %v754_v16 = vadd.f32 %v753_v34, %v2015_v4 }
 0x152   : > { %1788 = vrcp.f32 %v886_v37  ;;  %v1771_v38 = vpop.eup %1770  ;;  %1556 = vst [vmem:[%s2093_s10 + $0x10] sm:$0xff] %v1488_v1   ;;  %v964_v50 = vmul.f32 %v1769_v11, %v638_v18  ;;  %v757_v22 = vpop.f32.mrb[28].mxu1  ;;  %v1357_v44 = vmul.f32 -1.442695, %v674_v58 }
 0x153   : > { %v1773_v54 = vpop.eup %1772  ;;  %1564 = vst [vmem:[%s2093_s10 + $0x50] sm:$0xff] %v1528_v46   ;;  %v980_v55 = vmul.f32 %v1771_v38, %v718_v49  ;;  %1790 = vrcp.f32 %v871_v47  ;;  %v679_v63 = vpop.f32.mrb[29].mxu0  ;;  %v2158_v19 = vadd.f32 %v757_v22, %v2055_v60  ;;  %v1373_v35 = vmul.f32 -1.442695, %v754_v16 }
 0x154   : > { %v965_v61 = vmul.f32 %v1773_v54, %v642_v12  ;;  %1792 = vpow2.f32 %v1356_v52  ;;  %v759_v2 = vpop.f32.mrb[29].mxu1  ;;  %v1382_v8 = vclamps-f32 %v964_v50, 1.0  ;;  %v2155_v10 = vpop.f32.mrb[30].mxu0  ;;  %v680_v49 = vadd.f32 %v679_v63, %v2015_v4 }
 0x155   : > { %v1775_v59 = vpop.eup %1774  ;;  %1794 = vpow2.f32 %v1372_v53  ;;  %v761_v13 = vpop.f32.mrb[30].mxu1  ;;  %v1398_v14 = vclamps-f32 %v980_v55, 1.0  ;;  %v760_v28 = vadd.f32 %v759_v2, %v2015_v4  ;;  %v652_v47 = vadd.f32 %v2086_v21, %v2055_v60 }
 0x156   : > { %v1777_v7 = vpop.eup %1776  ;;  %v981_v9 = vmul.f32 %v1775_v59, %v722_v51  ;;  %v1383_v17 = vclamps-f32 %v965_v61, 1.0  ;;  %v683_v45 = vpop.f32.mrb[31].mxu0  ;;  %1796 = vpow2.f32 %v1357_v44  ;;  %v1358_v40 = vmul.f32 -1.442695, %v680_v49 }
 0x157   : > { %v1779_v39 = vpop.eup %1778  ;;  %v887_v18 = vadd.f32 1.0, %v1777_v7  ;;  %v763_v20 = vpop.f32.mrb[31].mxu1  ;;  %v1374_v1 = vmul.f32 -1.442695, %v760_v28  ;;  %v2165_v11 = vadd.f32 %v761_v13, %v2055_v60  ;;  %v684_v46 = vadd.f32 %v683_v45, %v2015_v4 }
 0x158   : > { %v1781_v23 = vpop.eup %1780  ;;  %v1399_v24 = vclamps-f32 %v981_v9, 1.0  ;;  %v872_v27 = vadd.f32 1.0, %v1779_v39  ;;  %v1493_v32 = vpack.c.bf16 %v1383_v17, %v1382_v8  ;;  %v764_v38 = vadd.f32 %v763_v20, %v2015_v4 }
 0x159   : > { %v1783_v25 = vpop.eup %1782  ;;  %1798 = vrcp.f32 %v887_v18  ;;  %v888_v33 = vadd.f32 1.0, %v1781_v23  ;;  %v1359_v51 = vmul.f32 -1.442695, %v684_v46  ;;  %v732_v21 = vadd.f32 %v2088_v56, %v2055_v60 }
 0x15a   : > { %v1785_v5 = vpop.eup %1784  ;;  %v1533_v0 = vpack.c.bf16 %v1399_v24, %v1398_v14  ;;  %1800 = vrcp.f32 %v872_v27  ;;  %v873_v34 = vadd.f32 1.0, %v1783_v25  ;;  %1557 = vst [vmem:[%s2093_s10 + $0x18] sm:$0xff] %v1493_v32   ;;  %v658_v16 = vadd.f32 %v2105_v30, %v2055_v60 }
 0x15b   : > { %v1787_v36 = vpop.eup %1786  ;;  %1802 = vrcp.f32 %v888_v33  ;;  %v889_v37 = vadd.f32 1.0, %v1785_v5  ;;  %v738_v8 = vadd.f32 %v2107_v31, %v2055_v60  ;;  %v662_v56 = vadd.f32 %v2111_v42, %v2055_v60 }
 0x15c   : > { %v1789_v41 = vpop.eup %1788  ;;  %1565 = vst [vmem:[%s2093_s10 + $0x58] sm:$0xff] %v1533_v0   ;;  %v966_v6 = vmul.f32 %v1787_v36, %v648_v57  ;;  %1804 = vrcp.f32 %v873_v34  ;;  %v1375_v57 = vmul.f32 -1.442695, %v764_v38  ;;  %v742_v17 = vadd.f32 %v2113_v43, %v2055_v60 }
 0x15d   : > { %v982_v12 = vmul.f32 %v1789_v41, %v728_v62  ;;  %1806 = vrcp.f32 %v889_v37  ;;  %v1791_v50 = vpop.eup %1790  ;;  %v668_v43 = vadd.f32 %v2127_v3, %v2055_v60  ;;  %v748_v37 = vadd.f32 %v2129_v48, %v2055_v60 }
 0x15e   : > { %1808 = vpow2.f32 %v1373_v35  ;;  %v1793_v52 = vpop.eup %1792  ;;  %v967_v53 = vmul.f32 %v1791_v50, %v652_v47  ;;  %v1384_v58 = vclamps-f32 %v966_v6, 1.0  ;;  %v672_v3 = vadd.f32 %v2135_v26, %v2055_v60 }
 0x15f   : > { %1810 = vpow2.f32 %v1358_v40  ;;  %v1795_v54 = vpop.eup %1794  ;;  %v874_v55 = vadd.f32 1.0, %v1793_v52  ;;  %v1400_v39 = vclamps-f32 %v982_v12, 1.0 }
 0x160   : > { %1812 = vpow2.f32 %v1374_v1  ;;  %v1385_v22 = vclamps-f32 %v967_v53, 1.0  ;;  %v890_v59 = vadd.f32 1.0, %v1795_v54  ;;  %v1797_v61 = vpop.eup %1796  ;;  %v678_v54 = vadd.f32 %v2150_v15, %v2055_v60 }
 0x161   : > { %1814 = vpow2.f32 %v1359_v51  ;;  %v875_v63 = vadd.f32 1.0, %v1797_v61  ;;  %v752_v51 = vadd.f32 %v2137_v29, %v2055_v60 }
 0x162   : > { %1816 = vrcp.f32 %v874_v55  ;;  %v1498_v62 = vpack.c.bf16 %v1385_v22, %v1384_v58  ;;  %v682_v22 = vadd.f32 %v2155_v10, %v2055_v60 }
 0x163   : > { %v1799_v4 = vpop.eup %1798  ;;  %1818 = vrcp.f32 %v890_v59 }
 0x164   : > { %v1801_v2 = vpop.eup %1800  ;;  %v983_v7 = vmul.f32 %v1799_v4, %v732_v21  ;;  %1820 = vpow2.f32 %v1375_v57  ;;  %1558 = vst [vmem:[%s2093_s10 + $0x20] sm:$0xff] %v1498_v62  }
 0x165   : > { %v1803_v9 = vpop.eup %1802  ;;  %v968_v44 = vmul.f32 %v1801_v2, %v658_v16  ;;  %1822 = vrcp.f32 %v875_v63 }
 0x166   : > { %v1805_v13 = vpop.eup %1804  ;;  %v1401_v14 = vclamps-f32 %v983_v7, 1.0  ;;  %v984_v30 = vmul.f32 %v1803_v9, %v738_v8 }
 0x167   : > { %v1807_v18 = vpop.eup %1806  ;;  %v969_v45 = vmul.f32 %v1805_v13, %v662_v56  ;;  %v1386_v27 = vclamps-f32 %v968_v44, 1.0 }
 0x168   : > { %v1809_v20 = vpop.eup %1808  ;;  %v1538_v31 = vpack.c.bf16 %v1401_v14, %v1400_v39  ;;  %v985_v23 = vmul.f32 %v1807_v18, %v742_v17  ;;  %v1402_v42 = vclamps-f32 %v984_v30, 1.0 }
 0x169   : > { %v1811_v24 = vpop.eup %1810  ;;  %v1387_v49 = vclamps-f32 %v969_v45, 1.0  ;;  %v891_v25 = vadd.f32 1.0, %v1809_v20 }
 0x16a   : > { %v1813_v32 = vpop.eup %1812  ;;  %1566 = vst [vmem:[%s2093_s10 + $0x60] sm:$0xff] %v1538_v31   ;;  %v1403_v33 = vclamps-f32 %v985_v23, 1.0  ;;  %v876_v28 = vadd.f32 1.0, %v1811_v24 }
 0x16b   : > { %v1815_v5 = vpop.eup %1814  ;;  %v1503_v0 = vpack.c.bf16 %v1387_v49, %v1386_v27  ;;  %1824 = vrcp.f32 %v891_v25  ;;  %v892_v34 = vadd.f32 1.0, %v1813_v32 }
 0x16c   : > { %v1817_v35 = vpop.eup %1816  ;;  %v1543_v36 = vpack.c.bf16 %v1403_v33, %v1402_v42  ;;  %1826 = vrcp.f32 %v876_v28  ;;  %v877_v40 = vadd.f32 1.0, %v1815_v5 }
 0x16d   : > { %v1819_v1 = vpop.eup %1818  ;;  %1559 = vst [vmem:[%s2093_s10 + $0x28] sm:$0xff] %v1503_v0   ;;  %v970_v41 = vmul.f32 %v1817_v35, %v668_v43  ;;  %1828 = vrcp.f32 %v892_v34 }
 0x16e   : > { %v1821_v6 = vpop.eup %1820  ;;  %1567 = vst [vmem:[%s2093_s10 + $0x68] sm:$0xff] %v1543_v36   ;;  %v986_v46 = vmul.f32 %v1819_v1, %v748_v37  ;;  %1830 = vrcp.f32 %v877_v40 }
 0x16f   : > { %v1823_v12 = vpop.eup %1822  ;;  %v893_v47 = vadd.f32 1.0, %v1821_v6  ;;  %v1388_v50 = vclamps-f32 %v970_v41, 1.0 }
 0x170   : > { %v971_v38 = vmul.f32 %v1823_v12, %v672_v3  ;;  %v1404_v61 = vclamps-f32 %v986_v46, 1.0 }
 0x171   : > { %1832 = vrcp.f32 %v893_v47 }
 0x172   : > { %v1389_v48 = vclamps-f32 %v971_v38, 1.0 }
 0x174   : > { %v1508_v52 = vpack.c.bf16 %v1389_v48, %v1388_v50 }
 0x175   : > { %v1825_v53 = vpop.eup %1824 }
 0x176   : > { %v1827_v55 = vpop.eup %1826  ;;  %1560 = vst [vmem:[%s2093_s10 + $0x30] sm:$0xff] %v1508_v52   ;;  %v987_v57 = vmul.f32 %v1825_v53, %v752_v51 }
 0x177   : > { %v1829_v26 = vpop.eup %1828  ;;  %v972_v58 = vmul.f32 %v1827_v55, %v678_v54 }
 0x178   : > { %v1831_v59 = vpop.eup %1830  ;;  %v1405_v21 = vclamps-f32 %v987_v57, 1.0  ;;  %v988_v29 = vmul.f32 %v1829_v26, %v2158_v19 }
 0x179   : > { %v973_v4 = vmul.f32 %v1831_v59, %v682_v22  ;;  %v1390_v15 = vclamps-f32 %v972_v58, 1.0 }
 0x17a   : > { %v1548_v62 = vpack.c.bf16 %v1405_v21, %v1404_v61  ;;  %v1406_v8 = vclamps-f32 %v988_v29, 1.0 }
 0x17b   : > { %v1833_v16 = vpop.eup %1832  ;;  %v1391_v63 = vclamps-f32 %v973_v4, 1.0 }
 0x17c   : > { %1568 = vst [vmem:[%s2093_s10 + $0x70] sm:$0xff] %v1548_v62   ;;  %v989_v2 = vmul.f32 %v1833_v16, %v2165_v11 }
 0x17d   : > { %v1513_v7 = vpack.c.bf16 %v1391_v63, %v1390_v15 }
 0x17e   : > { %v1407_v9 = vclamps-f32 %v989_v2, 1.0 }
 0x17f   : > { %1561 = vst [vmem:[%s2093_s10 + $0x38] sm:$0xff] %v1513_v7  }
 0x180   : > { %v1553_v44 = vpack.c.bf16 %v1407_v9, %v1406_v8 }
 0x182   : > { %1569 = vst [vmem:[%s2093_s10 + $0x78] sm:$0xff] %v1553_v44  }
 0x183 PF: > { %s13_s12 = sadd.s32 1, %s1840_s12  }
 0x184   : > { %p10_p4 = scmp.ge.s32.totalorder %s13_s12, 4  }
 0x186   :  { %12 = sbr.rel (!%p10_p4) target bundleno = 1 (0x1), region = 62 }

// kernel: _lambda_.55
= control target key start
LH: loop header
LB: loop body
LE: loop exit
PB: predicated region body
PF: predicated region fallthrough
CT: control target
= control target key end

     0   :  { %s1189_s12 = smov 0   ;;  %s1442_s0 = inlined_call_operand.vmem [shape: bf16[128,384], index: 0, kind: input, shape index: {}]   ;;  %s1443_s1 = inlined_call_operand.vmem [shape: bf16[384,256], index: 1, kind: input, shape index: {}]   ;;  %s1444_s2 = inlined_call_operand.vmem [shape: f32[1,256], index: 2, kind: input, shape index: {}]   ;;  %s1445_s3 = inlined_call_operand.vmem [shape: bf16[128,128], index: 3, kind: output, shape index: {}]  }
   0x1 LB: > { %s880_s13 = sadd.s32 4294967295, %s1166_s12   ;;  %p884_p0 = scmp.ge.s32.totalorder %s1166_s12, 1  ;;  %s1166_s12 = sphi %s1189_s12, %s13_s12  }
   0x2   : > { %p139_p1 = scmp.lt.s32.totalorder %s1166_s12, 3 }
   0x4   : > { %p140_p2 = pnand %p884_p0, %p139_p1 }
   0x5   : > { %v1040_v0 = vld [vmem:[%s1443_s1 + $0x4] ss:$8 sps:$4 sm:$0xff] (!%p140_p2)   ;;  %v1042_v1 = vld [vmem:[%s1443_s1] ss:$8 sps:$4 sm:$0xff] (!%p140_p2)   ;;  %v1168_v2 = vmov (!%p140_p2), 0   ;;  %s885_s11 = sshll.u32 (!%p140_p2), %s880_s13, 3 }
   0x6   : > { %143 = sbr.rel (%p140_p2) target bundleno = 344 (0x158), region = 32  ;;  %663 = vmatprep.mubr.bf16.mxu0 (!%p140_p2), %v1168_v2  ;;  %558 = vmatprep.subr.bf16.mxu1 (!%p140_p2), %v1040_v0  ;;  %v1043_v3 = vld [vmem:[%s1443_s1 + $0x14] ss:$8 sps:$4 sm:$0xff] (!%p140_p2)   ;;  %v1045_v4 = vld [vmem:[%s1443_s1 + $0x10] ss:$8 sps:$4 sm:$0xff] (!%p140_p2)   ;;  %p165_p3 = scmp.lt.s32.totalorder (!%p140_p2), %s885_s11, 15 }
   0x7   : > { %559 = vmatpush1.bf16.msra.mxu1 (!%p140_p2), %v1042_v1  ;;  %v1046_v5 = vld [vmem:[%s1443_s1 + $0x24] ss:$8 sps:$4 sm:$0xff] (!%p140_p2)   ;;  %v1048_v6 = vld [vmem:[%s1443_s1 + $0x20] ss:$8 sps:$4 sm:$0xff] (!%p140_p2)   ;;  %v1049_v7 = vld [vmem:[%s1443_s1 + $0x34] ss:$8 sps:$4 sm:$0xff] (!%p140_p2)   ;;  %v244_v1 = vlaneseq (!%p140_p2) }
   0x8   : > { %560 = vmatprep.subr.bf16.mxu1 (!%p140_p2), %v1043_v3  ;;  %v1051_v8 = vld [vmem:[%s1443_s1 + $0x30] ss:$8 sps:$4 sm:$0xff] (!%p140_p2)   ;;  %v1064_v9 = vld [vmem:[%s1443_s1 + $0x104] ss:$8 sps:$4 sm:$0xff] (!%p140_p2)   ;;  %v1068_v11 = vld [vmem:[%s1443_s1 + $0x100] ss:$8 sps:$4 sm:$0xff] (!%p140_p2)  }
   0x9   : > { %v1052_v10 = vld [vmem:[%s1443_s1 + $0x44] ss:$8 sps:$4 sm:$0xff] (!%p140_p2)   ;;  %631 = vmatprep.subr.bf16.mxu0 (!%p140_p2), %v1064_v9  ;;  %v1070_v12 = vld [vmem:[%s1443_s1 + $0x114] ss:$8 sps:$4 sm:$0xff] (!%p140_p2)   ;;  %v1054_v13 = vld [vmem:[%s1443_s1 + $0x40] ss:$8 sps:$4 sm:$0xff] (!%p140_p2)  }
   0xa   : > { %632 = vmatpush1.bf16.msra.mxu0 (!%p140_p2), %v1068_v11  ;;  %v1055_v14 = vld [vmem:[%s1443_s1 + $0x54] ss:$8 sps:$4 sm:$0xff] (!%p140_p2)   ;;  %v1074_v15 = vld [vmem:[%s1443_s1 + $0x110] ss:$8 sps:$4 sm:$0xff] (!%p140_p2)   ;;  %v1076_v16 = vld [vmem:[%s1443_s1 + $0x124] ss:$8 sps:$4 sm:$0xff] (!%p140_p2)  }
   0xb   : > { %561 = vmatpush1.bf16.msra.mxu1 (!%p140_p2), %v1045_v4  ;;  %633 = vmatprep.subr.bf16.mxu0 (!%p140_p2), %v1070_v12  ;;  %v1057_v17 = vld [vmem:[%s1443_s1 + $0x50] ss:$8 sps:$4 sm:$0xff] (!%p140_p2)   ;;  %v1080_v18 = vld [vmem:[%s1443_s1 + $0x120] ss:$8 sps:$4 sm:$0xff] (!%p140_p2)   ;;  %v1082_v19 = vld [vmem:[%s1443_s1 + $0x134] ss:$8 sps:$4 sm:$0xff] (!%p140_p2)  }
   0xc   : > { %562 = vmatprep.subr.bf16.mxu1 (!%p140_p2), %v1046_v5  ;;  %v1058_v20 = vld [vmem:[%s1443_s1 + $0x64] ss:$8 sps:$4 sm:$0xff] (!%p140_p2)   ;;  %v1086_v21 = vld [vmem:[%s1443_s1 + $0x130] ss:$8 sps:$4 sm:$0xff] (!%p140_p2)   ;;  %v1060_v22 = vld [vmem:[%s1443_s1 + $0x60] ss:$8 sps:$4 sm:$0xff] (!%p140_p2)  }
   0xd   : > { %s1447_s11 = smov (!%p165_p3, %s885_s11), 15  ;;  %v1088_v23 = vld [vmem:[%s1443_s1 + $0x144] ss:$8 sps:$4 sm:$0xff]   ;;  %v1061_v24 = vld [vmem:[%s1443_s1 + $0x74] ss:$8 sps:$4 sm:$0xff]   ;;  %v245_v4 = vshrl.u32 %v244_v1, 7 }
   0xe   : > { %634 = vmatpush1.bf16.msra.mxu0 %v1074_v15  ;;  %v1063_v25 = vld [vmem:[%s1443_s1 + $0x70] ss:$8 sps:$4 sm:$0xff]   ;;  %v1092_v26 = vld [vmem:[%s1443_s1 + $0x140] ss:$8 sps:$4 sm:$0xff]   ;;  %s1030_s17 = smul.u32 12, %s1447_s11 }
   0xf   : > { %563 = vmatpush1.bf16.msra.mxu1 %v1048_v6  ;;  %635 = vmatprep.subr.bf16.mxu0 %v1076_v16  ;;  %v1094_v27 = vld [vmem:[%s1443_s1 + $0x154] ss:$8 sps:$4 sm:$0xff]   ;;  %v1066_v28 = vld [vmem:[%s1443_s1 + $0x84] ss:$8 sps:$4 sm:$0xff]   ;;  %v1098_v29 = vld [vmem:[%s1443_s1 + $0x150] ss:$8 sps:$4 sm:$0xff]  }
  0x10   : > { %564 = vmatprep.subr.bf16.mxu1 %v1049_v7  ;;  %s1291_s25 = scalar_lea.vmem %s1442_s0, %s1030_s17  ;;  %v1069_v30 = vld [vmem:[%s1443_s1 + $0x80] ss:$8 sps:$4 sm:$0xff]   ;;  %v1100_v31 = vld [vmem:[%s1443_s1 + $0x164] ss:$8 sps:$4 sm:$0xff]   ;;  %v1072_v32 = vld [vmem:[%s1443_s1 + $0x94] ss:$8 sps:$4 sm:$0xff]  }
  0x11   : > { %v1075_v33 = vld [vmem:[%s1443_s1 + $0x90] ss:$8 sps:$4 sm:$0xff]   ;;  %v1104_v35 = vld [vmem:[%s1443_s1 + $0x160] ss:$8 sps:$4 sm:$0xff]   ;;  %v1106_v36 = vld [vmem:[%s1443_s1 + $0x174] ss:$8 sps:$4 sm:$0xff]  }
  0x12   : > { %636 = vmatpush1.bf16.msra.mxu0 %v1080_v18  ;;  %v1114_v34 = vld [vmem:[%s1291_s25 + $0x4] ss:$12 sps:$4 sm:$0xff]   ;;  %v1081_v39 = vld [vmem:[%s1443_s1 + $0xa0] ss:$8 sps:$4 sm:$0xff]   ;;  %v1084_v40 = vld [vmem:[%s1443_s1 + $0xb4] ss:$8 sps:$4 sm:$0xff]  }
  0x13   : > { %565 = vmatpush1.bf16.msra.mxu1 %v1051_v8  ;;  %637 = vmatprep.subr.bf16.mxu0 %v1082_v19  ;;  %v1078_v37 = vld [vmem:[%s1443_s1 + $0xa4] ss:$8 sps:$4 sm:$0xff]   ;;  %v1110_v38 = vld [vmem:[%s1443_s1 + $0x170] ss:$8 sps:$4 sm:$0xff]   ;;  %v1115_v41 = vld [vmem:[%s1291_s25 + $0x8] ss:$12 sps:$4 sm:$0xff]  }
  0x14   : > { %566 = vmatprep.subr.bf16.mxu1 %v1052_v10  ;;  %590 = vmatprep.mubr.bf16.mxu1 %v1114_v34  ;;  %v1087_v42 = vld [vmem:[%s1443_s1 + $0xb0] ss:$8 sps:$4 sm:$0xff]   ;;  %v1090_v43 = vld [vmem:[%s1443_s1 + $0xc4] ss:$8 sps:$4 sm:$0xff]   ;;  %v1093_v44 = vld [vmem:[%s1443_s1 + $0xc0] ss:$8 sps:$4 sm:$0xff]  }
  0x15   : > { %v1096_v45 = vld [vmem:[%s1443_s1 + $0xd4] ss:$8 sps:$4 sm:$0xff]   ;;  %v1118_v46 = vld [vmem:[%s1291_s25 + $0x20] ss:$12 sps:$4 sm:$0xff]   ;;  %v1099_v47 = vld [vmem:[%s1443_s1 + $0xd0] ss:$8 sps:$4 sm:$0xff]  }
  0x16   : > { %638 = vmatpush1.bf16.msra.mxu0 %v1086_v21  ;;  %v1102_v48 = vld [vmem:[%s1443_s1 + $0xe4] ss:$8 sps:$4 sm:$0xff]   ;;  %v1105_v49 = vld [vmem:[%s1443_s1 + $0xe0] ss:$8 sps:$4 sm:$0xff]   ;;  %v1108_v50 = vld [vmem:[%s1443_s1 + $0xf4] ss:$8 sps:$4 sm:$0xff]  }
  0x17   : > { %567 = vmatpush1.bf16.msra.mxu1 %v1054_v13  ;;  %639 = vmatprep.subr.bf16.mxu0 %v1088_v23  ;;  %v1122_v51 = vld [vmem:[%s1291_s25 + $0x38] ss:$12 sps:$4 sm:$0xff]   ;;  %v1112_v53 = vld [vmem:[%s1291_s25] ss:$12 sps:$4 sm:$0xff]   ;;  %v1116_v54 = vld [vmem:[%s1291_s25 + $0x1c] ss:$12 sps:$4 sm:$0xff]  }
  0x18   : > { %568 = vmatprep.subr.bf16.mxu1 %v1055_v14  ;;  %v1111_v52 = vld [vmem:[%s1443_s1 + $0xf0] ss:$8 sps:$4 sm:$0xff]   ;;  %v1120_v57 = vld [vmem:[%s1291_s25 + $0x34] ss:$12 sps:$4 sm:$0xff]   ;;  %v246_v7 = vsub.s32 0, %v245_v4  ;;  %v250_v9 = vsub.s32 1, %v245_v4 }
  0x19   : > { %v1126_v55 = vld [vmem:[%s1291_s25 + $0x50] ss:$12 sps:$4 sm:$0xff]   ;;  %v1119_v56 = vld [vmem:[%s1291_s25 + $0x18] ss:$12 sps:$4 sm:$0xff]   ;;  %v1127_v60 = vld [vmem:[%s1291_s25 + $0x48] ss:$12 sps:$4 sm:$0xff]  }
  0x1a   : > { %640 = vmatpush1.bf16.msra.mxu0 %v1092_v26  ;;  %v1123_v58 = vld [vmem:[%s1291_s25 + $0x30] ss:$12 sps:$4 sm:$0xff]   ;;  %v1124_v59 = vld [vmem:[%s1291_s25 + $0x4c] ss:$12 sps:$4 sm:$0xff]   ;;  %v242_v8 = vld [vmem:[%s1444_s2] sm:$0x3] }
  0x1b   : > { %569 = vmatpush1.bf16.msra.mxu1 %v1057_v17  ;;  %641 = vmatprep.subr.bf16.mxu0 %v1094_v27  ;;  %v1368_v12 = vrot.slane %v242_v8, %v246_v7  ;;  %v1370_v14 = vrot.slane %v242_v8, %v250_v9  ;;  %s888_s25 = sshll.u32 %s1447_s11, 2 }
  0x1c   : > { %570 = vmatprep.subr.bf16.mxu1 %v1058_v20  ;;  %s1418_s20 = scalar_lea.vmem %s1445_s3, %s888_s25 }
  0x1e   : > { %642 = vmatpush1.bf16.msra.mxu0 %v1098_v29 }
  0x1f   : > { %571 = vmatpush1.bf16.msra.mxu1 %v1060_v22  ;;  %643 = vmatprep.subr.bf16.mxu0 %v1100_v31 }
  0x20   : > { %572 = vmatprep.subr.bf16.mxu1 %v1061_v24 }
  0x22   : > { %644 = vmatpush1.bf16.msra.mxu0 %v1104_v35 }
  0x23   : > { %573 = vmatpush1.bf16.msra.mxu1 %v1063_v25  ;;  %645 = vmatprep.subr.bf16.mxu0 %v1106_v36 }
  0x24   : > { %574 = vmatprep.subr.bf16.mxu1 %v1066_v28 }
  0x26   : > { %646 = vmatpush1.bf16.msra.mxu0 %v1110_v38 }
  0x27   : > { %575 = vmatpush1.bf16.msra.mxu1 %v1069_v30 }
  0x28   : > { %576 = vmatprep.subr.bf16.mxu1 %v1072_v32 }
  0x29   : > { %664 = vmatmul.mubr.bf16.vlgmr.msra.gmra.mrb[0].mxu0 %v1115_v41 }
  0x2a   : > { %673 = vmatprep.mubr.bf16.mxu0 %v1168_v2 }
  0x2b   : > { %577 = vmatpush1.bf16.msra.mxu1 %v1075_v33 }
  0x2c   : > { %578 = vmatprep.subr.bf16.mxu1 %v1078_v37 }
  0x2f   : > { %579 = vmatpush1.bf16.msra.mxu1 %v1081_v39 }
  0x30   : > { %580 = vmatprep.subr.bf16.mxu1 %v1084_v40 }
  0x31   : > { %674 = vmatmul.mubr.bf16.gmra.mrb[4].mxu0 %v1118_v46 }
  0x32   : > { %683 = vmatprep.mubr.bf16.mxu0 %v1168_v2 }
  0x33   : > { %581 = vmatpush1.bf16.msra.mxu1 %v1087_v42 }
  0x34   : > { %582 = vmatprep.subr.bf16.mxu1 %v1090_v43 }
  0x37   : > { %583 = vmatpush1.bf16.msra.mxu1 %v1093_v44 }
  0x38   : > { %584 = vmatprep.subr.bf16.mxu1 %v1096_v45 }
  0x39   : > { %684 = vmatmul.mubr.bf16.gmra.mrb[8].mxu0 %v1122_v51 }
  0x3a   : > { %693 = vmatprep.mubr.bf16.mxu0 %v1168_v2 }
  0x3b   : > { %585 = vmatpush1.bf16.msra.mxu1 %v1099_v47 }
  0x3c   : > { %586 = vmatprep.subr.bf16.mxu1 %v1102_v48 }
  0x3f   : > { %587 = vmatpush1.bf16.msra.mxu1 %v1105_v49 }
  0x40   : > { %588 = vmatprep.subr.bf16.mxu1 %v1108_v50 }
  0x41   : > { %694 = vmatmul.mubr.bf16.gmra.mrb[12].mxu0 %v1126_v55 }
  0x43   : > { %589 = vmatpush1.bf16.msra.mxu1 %v1111_v52 }
  0x46   : > { %591 = vmatmul.mubr.bf16.vlgmr.msra.gmra.mrb[0].mxu1 %v1112_v53 }
  0x47   : > { %600 = vmatprep.mubr.bf16.mxu1 %v1116_v54 }
  0x4e   : > { %601 = vmatmul.mubr.bf16.gmra.mrb[4].mxu1 %v1119_v56 }
  0x4f   : > { %610 = vmatprep.mubr.bf16.mxu1 %v1120_v57 }
  0x56   : > { %611 = vmatmul.mubr.bf16.gmra.mrb[8].mxu1 %v1123_v58 }
  0x57   : > { %620 = vmatprep.mubr.bf16.mxu1 %v1124_v59 }
  0x5e   : > { %621 = vmatmul.mubr.bf16.gmra.mrb[12].mxu1 %v1127_v60 }
  0xfc   : > { %v665_v61 = vpop.f32.mrb[0].mxu0 }
  0xfd   : > { %v667_v62 = vpop.f32.mrb[1].mxu0 }
  0xfe   : > { %v669_v63 = vpop.f32.mrb[2].mxu0 }
  0xff   : > { %v671_v0 = vpop.f32.mrb[3].mxu0 }
 0x104   : > { %v675_v2 = vpop.f32.mrb[4].mxu0 }
 0x105   : > { %v677_v3 = vpop.f32.mrb[5].mxu0 }
 0x106   : > { %v679_v5 = vpop.f32.mrb[6].mxu0 }
 0x107   : > { %v681_v6 = vpop.f32.mrb[7].mxu0 }
 0x10c   : > { %v685_v10 = vpop.f32.mrb[8].mxu0 }
 0x10d   : > { %v687_v11 = vpop.f32.mrb[9].mxu0 }
 0x10e   : > { %v689_v13 = vpop.f32.mrb[10].mxu0 }
 0x10f   : > { %v691_v15 = vpop.f32.mrb[11].mxu0 }
 0x114   : > { %v695_v24 = vpop.f32.mrb[12].mxu0 }
 0x115   : > { %v697_v27 = vpop.f32.mrb[13].mxu0 }
 0x116   : > { %v1380_v29 = vpop.f32.mrb[14].mxu0 }
 0x117   : > { %v1382_v32 = vpop.f32.mrb[15].mxu0 }
 0x119   : > { %v592_v16 = vpop.f32.mrb[0].mxu1 }
 0x11a   : > { %v593_v17 = vadd.f32 %v592_v16, %v1368_v12  ;;  %v594_v18 = vpop.f32.mrb[1].mxu1 }
 0x11b   : > { %v595_v19 = vadd.f32 %v594_v18, %v1370_v14  ;;  %v596_v20 = vpop.f32.mrb[2].mxu1 }
 0x11c   : > { %v1374_v21 = vadd.f32 %v665_v61, %v593_v17  ;;  %v597_v22 = vadd.f32 %v596_v20, %v1368_v12  ;;  %v598_v23 = vpop.f32.mrb[3].mxu1 }
 0x11d   : > { %v668_v25 = vadd.f32 %v667_v62, %v595_v19  ;;  %v599_v26 = vadd.f32 %v598_v23, %v1370_v14 }
 0x11e   : > { %v1378_v28 = vadd.f32 %v669_v63, %v597_v22  ;;  %v712_v8 = vmul.f32 0.2, %v1374_v21  ;;  %vm704_vm0 = vcmp.ge.f32.partialorder %v1374_v21, 0.0 }
 0x11f   : > { %v949_v30 = vmul.f32 -1.442695, %v668_v25  ;;  %v672_v31 = vadd.f32 %v671_v0, %v599_v26 }
 0x120   : > { %v713_v18 = vmul.f32 0.2, %v1378_v28  ;;  %vm705_vm1 = vcmp.ge.f32.partialorder %v1378_v28, 0.0 }
 0x121   : > { %1128 = vpow2.f32 %v949_v30  ;;  %v950_v33 = vmul.f32 -1.442695, %v672_v31  ;;  %v602_v34 = vpop.f32.mrb[4].mxu1 }
 0x122   : > { %v603_v35 = vadd.f32 %v602_v34, %v1368_v12  ;;  %v604_v36 = vpop.f32.mrb[5].mxu1 }
 0x123   : > { %1130 = vpow2.f32 %v950_v33  ;;  %v605_v37 = vadd.f32 %v604_v36, %v1370_v14  ;;  %v606_v38 = vpop.f32.mrb[6].mxu1 }
 0x124   : > { %v1386_v39 = vadd.f32 %v675_v2, %v603_v35  ;;  %v607_v40 = vadd.f32 %v606_v38, %v1368_v12  ;;  %v608_v41 = vpop.f32.mrb[7].mxu1 }
 0x125   : > { %v678_v42 = vadd.f32 %v677_v3, %v605_v37  ;;  %v609_v43 = vadd.f32 %v608_v41, %v1370_v14 }
 0x126   : > { %v1390_v44 = vadd.f32 %v679_v5, %v607_v40  ;;  %vm706_vm2 = vcmp.ge.f32.partialorder %v1386_v39, 0.0 }
 0x127   : > { %v951_v45 = vmul.f32 -1.442695, %v678_v42  ;;  %v682_v46 = vadd.f32 %v681_v6, %v609_v43 }
 0x128   : > { %v715_v34 = vmul.f32 0.2, %v1390_v44  ;;  %vm707_vm3 = vcmp.ge.f32.partialorder %v1390_v44, 0.0 }
 0x129   : > { %1132 = vpow2.f32 %v951_v45  ;;  %v952_v47 = vmul.f32 -1.442695, %v682_v46  ;;  %v612_v48 = vpop.f32.mrb[8].mxu1 }
 0x12a   : > { %v613_v49 = vadd.f32 %v612_v48, %v1368_v12  ;;  %v614_v50 = vpop.f32.mrb[9].mxu1  ;;  %v723_v40 = vsel %vm707_vm3, %v1390_v44, %v715_v34 }
 0x12b   : > { %v1129_v51 = vpop.eup %1128  ;;  %1134 = vpow2.f32 %v952_v47  ;;  %v615_v52 = vadd.f32 %v614_v50, %v1370_v14  ;;  %v616_v53 = vpop.f32.mrb[10].mxu1 }
 0x12c   : > { %v752_v54 = vadd.f32 1.0, %v1129_v51  ;;  %v1394_v55 = vadd.f32 %v685_v10, %v613_v49  ;;  %v617_v56 = vadd.f32 %v616_v53, %v1368_v12  ;;  %v618_v57 = vpop.f32.mrb[11].mxu1 }
 0x12d   : > { %v1131_v58 = vpop.eup %1130  ;;  %v688_v59 = vadd.f32 %v687_v11, %v615_v52  ;;  %v619_v60 = vadd.f32 %v618_v57, %v1370_v14 }
 0x12e   : > { %1136 = vrcp.f32 %v752_v54  ;;  %v753_v61 = vadd.f32 1.0, %v1131_v58  ;;  %v1398_v63 = vadd.f32 %v689_v13, %v617_v56  ;;  %v716_v43 = vmul.f32 0.2, %v1394_v55 }
 0x12f   : > { %v953_v62 = vmul.f32 -1.442695, %v688_v59  ;;  %v692_v0 = vadd.f32 %v691_v15, %v619_v60  ;;  %vm708_vm4 = vcmp.ge.f32.partialorder %v1394_v55, 0.0 }
 0x130   : > { %1138 = vrcp.f32 %v753_v61  ;;  %v717_v48 = vmul.f32 0.2, %v1398_v63  ;;  %vm709_vm5 = vcmp.ge.f32.partialorder %v1398_v63, 0.0  ;;  %v724_v44 = vsel %vm708_vm4, %v1394_v55, %v716_v43 }
 0x131   : > { %1140 = vpow2.f32 %v953_v62  ;;  %v954_v1 = vmul.f32 -1.442695, %v692_v0  ;;  %v622_v2 = vpop.f32.mrb[12].mxu1 }
 0x132   : > { %v623_v3 = vadd.f32 %v622_v2, %v1368_v12  ;;  %v624_v4 = vpop.f32.mrb[13].mxu1  ;;  %v725_v52 = vsel %vm709_vm5, %v1398_v63, %v717_v48 }
 0x133   : > { %v1133_v5 = vpop.eup %1132  ;;  %1142 = vpow2.f32 %v954_v1  ;;  %v625_v6 = vadd.f32 %v624_v4, %v1370_v14  ;;  %v626_v7 = vpop.f32.mrb[14].mxu1 }
 0x134   : > { %v754_v9 = vadd.f32 1.0, %v1133_v5  ;;  %v1403_v10 = vadd.f32 %v695_v24, %v623_v3  ;;  %v627_v11 = vadd.f32 %v626_v7, %v1368_v12  ;;  %v628_v13 = vpop.f32.mrb[15].mxu1  ;;  %v720_v24 = vsel %vm704_vm0, %v1374_v21, %v712_v8 }
 0x135   : > { %v1135_v15 = vpop.eup %1134  ;;  %v698_v16 = vadd.f32 %v697_v27, %v625_v6  ;;  %v629_v17 = vadd.f32 %v628_v13, %v1370_v14  ;;  %v721_v14 = vsel %vm705_vm1, %v1378_v28, %v713_v18 }
 0x136   : > { %1144 = vrcp.f32 %v754_v9  ;;  %v755_v19 = vadd.f32 1.0, %v1135_v15  ;;  %v700_v22 = vadd.f32 %v1380_v29, %v627_v11  ;;  %v714_v29 = vmul.f32 0.2, %v1386_v39 }
 0x137   : > { %v955_v20 = vmul.f32 -1.442695, %v698_v16  ;;  %v702_v23 = vadd.f32 %v1382_v32, %v629_v17  ;;  %v718_v54 = vmul.f32 0.2, %v1403_v10  ;;  %vm710_vm6 = vcmp.ge.f32.partialorder %v1403_v10, 0.0 }
 0x138   : > { %v1137_v12 = vpop.eup %1136  ;;  %1146 = vrcp.f32 %v755_v19  ;;  %v722_v36 = vsel %vm706_vm2, %v1386_v39, %v714_v29  ;;  %v719_v57 = vmul.f32 0.2, %v700_v22  ;;  %vm711_vm7 = vcmp.ge.f32.partialorder %v700_v22, 0.0 }
 0x139   : > { %v776_v25 = vmul.f32 %v1137_v12, %v720_v24  ;;  %1148 = vpow2.f32 %v955_v20  ;;  %v956_v27 = vmul.f32 -1.442695, %v702_v23  ;;  %v726_v59 = vsel %vm710_vm6, %v1403_v10, %v718_v54 }
 0x13a   : > { %v1139_v26 = vpop.eup %1138  ;;  %v727_v61 = vsel %vm711_vm7, %v700_v22, %v719_v57 }
 0x13b   : > { %v1141_v30 = vpop.eup %1140  ;;  %v777_v31 = vmul.f32 %v1139_v26, %v721_v14  ;;  %1150 = vpow2.f32 %v956_v27 }
 0x13c   : > { %v756_v32 = vadd.f32 1.0, %v1141_v30 }
 0x13d   : > { %v1143_v21 = vpop.eup %1142  ;;  %v978_v33 = vpack.c.bf16 %v777_v31, %v776_v25 }
 0x13e   : > { %1152 = vrcp.f32 %v756_v32  ;;  %v757_v28 = vadd.f32 1.0, %v1143_v21 }
 0x13f   : > { %979 = vst [vmem:[%s1418_s20] sm:$0xff] %v978_v33  }
 0x140   : > { %v1145_v35 = vpop.eup %1144  ;;  %1154 = vrcp.f32 %v757_v28 }
 0x141   : > { %v778_v37 = vmul.f32 %v1145_v35, %v722_v36 }
 0x142   : > { %v1147_v38 = vpop.eup %1146 }
 0x143   : > { %v1149_v41 = vpop.eup %1148  ;;  %v779_v42 = vmul.f32 %v1147_v38, %v723_v40 }
 0x144   : > { %v758_v45 = vadd.f32 1.0, %v1149_v41 }
 0x145   : > { %v983_v46 = vpack.c.bf16 %v779_v42, %v778_v37  ;;  %v1151_v47 = vpop.eup %1150 }
 0x146   : > { %1156 = vrcp.f32 %v758_v45  ;;  %v759_v39 = vadd.f32 1.0, %v1151_v47 }
 0x147   : > { %995 = vst [vmem:[%s1418_s20 + $0x8] sm:$0xff] %v983_v46  }
 0x148   : > { %v1153_v49 = vpop.eup %1152  ;;  %1158 = vrcp.f32 %v759_v39 }
 0x149   : > { %v780_v50 = vmul.f32 %v1153_v49, %v724_v44 }
 0x14a   : > { %v1155_v51 = vpop.eup %1154 }
 0x14b   : > { %v781_v53 = vmul.f32 %v1155_v51, %v725_v52 }
 0x14d   : > { %v988_v56 = vpack.c.bf16 %v781_v53, %v780_v50 }
 0x14f   : > { %996 = vst [vmem:[%s1418_s20 + $0x10] sm:$0xff] %v988_v56  }
 0x150   : > { %v1157_v58 = vpop.eup %1156 }
 0x151   : > { %v782_v60 = vmul.f32 %v1157_v58, %v726_v59 }
 0x152   : > { %v1159_v55 = vpop.eup %1158 }
 0x153   : > { %v783_v62 = vmul.f32 %v1159_v55, %v727_v61 }
 0x155   : > { %v993_v0 = vpack.c.bf16 %v783_v62, %v782_v60 }
 0x157   : > { %997 = vst [vmem:[%s1418_s20 + $0x18] sm:$0xff] %v993_v0  }
 0x158 PF: > { %s13_s12 = sadd.s32 1, %s1166_s12  }
 0x159   : > { %p10_p4 = scmp.ge.s32.totalorder %s13_s12, 4  }
 0x15b   :  { %12 = sbr.rel (!%p10_p4) target bundleno = 1 (0x1), region = 62 }

// kernel: _lambda_.64
= control target key start
LH: loop header
LB: loop body
LE: loop exit
PB: predicated region body
PF: predicated region fallthrough
CT: control target
= control target key end

     0   :  { %s945_s23 = smov 0   ;;  %s1060_s0 = inlined_call_operand.vmem [shape: bf16[2,16,128], index: 0, kind: input, shape index: {}]   ;;  %s1061_s1 = inlined_call_operand.vmem [shape: bf16[128,256], index: 1, kind: input, shape index: {}]   ;;  %s1062_s2 = inlined_call_operand.vmem [shape: bf16[128,128], index: 2, kind: input, shape index: {}]   ;;  %s1063_s3 = inlined_call_operand.vmem [shape: f32[1,256], index: 3, kind: input, shape index: {}]   ;;  %s1064_s4 = inlined_call_operand.vmem [shape: f32[1,128], index: 4, kind: input, shape index: {}]   ;;  %s1065_s5 = inlined_call_operand.<no memory space> [shape: f32[1], index: 5, kind: input, shape index: {}]   ;;  %s1066_s6 = inlined_call_operand.vmem [shape: bf16[2,16,128], index: 6, kind: output, shape index: {}]  }
   0x1   :  { %11 = sst [smem:[#allocation2]] %s1065_s5 }
   0x2 LB: > { %s742_s24 = sadd.s32 4294967295, %s902_s23   ;;  %p746_p0 = scmp.ge.s32.totalorder %s902_s23, 1  ;;  %s902_s23 = sphi %s945_s23, %s17_s23  }
   0x3   : > { %p213_p1 = scmp.lt.s32.totalorder %s902_s23, 3 }
   0x5   : > { %p214_p2 = pnand %p746_p0, %p213_p1 }
   0x6   : > { %v854_v0 = vld [vmem:[%s1061_s1 + $0x4] ss:$8 sps:$4 sm:$0xff] (!%p214_p2)   ;;  %v856_v1 = vld [vmem:[%s1061_s1] ss:$8 sps:$4 sm:$0xff] (!%p214_p2)   ;;  %v904_v2 = vmov (!%p214_p2), 0   ;;  %p243_p3 = scmp.lt.s32.totalorder (!%p214_p2), %s742_s24, 1  ;;  %v274_v18 = vlaneseq (!%p214_p2) }
   0x7   : > { %217 = sbr.rel (%p214_p2) target bundleno = 1020 (0x3fc), region = 44  ;;  %402 = vmatprep.mubr.bf16.mxu0 (!%p214_p2), %v904_v2  ;;  %370 = vmatprep.subr.bf16.mxu0 (!%p214_p2), %v854_v0  ;;  %v857_v3 = vld [vmem:[%s1061_s1 + $0x14] ss:$8 sps:$4 sm:$0xff] (!%p214_p2)   ;;  %v859_v4 = vld [vmem:[%s1061_s1 + $0x10] ss:$8 sps:$4 sm:$0xff] (!%p214_p2)   ;;  %v879_v34 = vld [vmem:[%s1062_s2] sm:$0xff] (!%p214_p2)  }
   0x8   : > { %371 = vmatpush1.bf16.msra.mxu0 (!%p214_p2), %v856_v1  ;;  %v860_v5 = vld [vmem:[%s1061_s1 + $0x24] ss:$8 sps:$4 sm:$0xff] (!%p214_p2)   ;;  %v862_v6 = vld [vmem:[%s1061_s1 + $0x20] ss:$8 sps:$4 sm:$0xff] (!%p214_p2)   ;;  %v863_v7 = vld [vmem:[%s1061_s1 + $0x34] ss:$8 sps:$4 sm:$0xff] (!%p214_p2)  }
   0x9   : > { %372 = vmatprep.subr.bf16.mxu0 (!%p214_p2), %v857_v3  ;;  %v865_v8 = vld [vmem:[%s1061_s1 + $0x30] ss:$8 sps:$4 sm:$0xff] (!%p214_p2)   ;;  %v866_v9 = vld [vmem:[%s1061_s1 + $0x44] ss:$8 sps:$4 sm:$0xff] (!%p214_p2)   ;;  %v868_v10 = vld [vmem:[%s1061_s1 + $0x40] ss:$8 sps:$4 sm:$0xff] (!%p214_p2)  }
   0xa   : > { %v869_v11 = vld [vmem:[%s1061_s1 + $0x54] ss:$8 sps:$4 sm:$0xff] (!%p214_p2)   ;;  %v871_v12 = vld [vmem:[%s1061_s1 + $0x50] ss:$8 sps:$4 sm:$0xff] (!%p214_p2)   ;;  %v872_v13 = vld [vmem:[%s1061_s1 + $0x64] ss:$8 sps:$4 sm:$0xff] (!%p214_p2)  }
   0xb   : > { %v874_v14 = vld [vmem:[%s1061_s1 + $0x60] ss:$8 sps:$4 sm:$0xff] (!%p214_p2)   ;;  %v875_v15 = vld [vmem:[%s1061_s1 + $0x74] ss:$8 sps:$4 sm:$0xff] (!%p214_p2)   ;;  %v877_v16 = vld [vmem:[%s1061_s1 + $0x70] ss:$8 sps:$4 sm:$0xff] (!%p214_p2)  }
   0xc   : > { %373 = vmatpush1.bf16.msra.mxu0 (!%p214_p2), %v859_v4  ;;  %v275_v19 = vshrl.u32 (!%p214_p2), %v274_v18, 7  ;;  %v272_v21 = vld [vmem:[%s1063_s3] sm:$0x3] (!%p214_p2)  ;;  %v905_v35 = vmov (!%p214_p2), 0.0   ;;  %vm906_vm0 = vmmov (!%p214_p2), 0   ;;  %v880_v36 = vld [vmem:[%s1062_s2 + $0x8] sm:$0xff] (!%p214_p2)  }
   0xd   : > { %374 = vmatprep.subr.bf16.mxu0 (!%p214_p2), %v860_v5  ;;  %806 = vmatprep.subr.bf16.mxu1 (!%p214_p2), %v905_v35  ;;  %v881_v37 = vld [vmem:[%s1062_s2 + $0x10] sm:$0xff] (!%p214_p2)   ;;  %v882_v38 = vld [vmem:[%s1062_s2 + $0x18] sm:$0xff] (!%p214_p2)   ;;  %v883_v39 = vld [vmem:[%s1062_s2 + $0x20] sm:$0xff] (!%p214_p2)   ;;  %vm600_vm1 = vcmask (!%p214_p2), 130048   ;;  %s669_s11 = sld [smem:[#allocation2]] (!%p214_p2) }
   0xe   : > { %s1068_s24 = smov (!%p243_p3, %s742_s24), 1  ;;  %v276_v20 = vsub.s32 0, %v275_v19  ;;  %v280_v22 = vsub.s32 1, %v275_v19  ;;  %822 = vmatprep.mubr.msk.bf16.mxu1 %vm906_vm0, %v905_v35  ;;  %807 = vmatpush3.bf16.msra.mxu1 %v879_v34  ;;  %v884_v40 = vld [vmem:[%s1062_s2 + $0x28] sm:$0xff]   ;;  %v885_v41 = vld [vmem:[%s1062_s2 + $0x30] sm:$0xff]   ;;  %v886_v42 = vld [vmem:[%s1062_s2 + $0x38] sm:$0xff]  }
   0xf   : > { %s782_s27 = sshll.u32 %s1068_s24, 3  ;;  %808 = vmatprep.subr.bf16.mxu1 %v905_v35  ;;  %v768_v60 = vld [vmem:[%s1064_s4] ss:$0 sm:$0xff] }
  0x10   : > { %375 = vmatpush1.bf16.msra.mxu0 %v862_v6  ;;  %s247_s10 = scalar_lea.vmem %s1060_s0, %s782_s27  ;;  %v277_v23 = vrot.slane %v272_v21, %v276_v20  ;;  %v281_v25 = vrot.slane %v272_v21, %v280_v22  ;;  %s252_s14 = scalar_lea.vmem %s1066_s6, %s782_s27 }
  0x11   : > { %376 = vmatprep.subr.bf16.mxu0 %v863_v7  ;;  %v1009_v17 = vld [vmem:[%s247_s10] sm:$0xff]  }
  0x12   : > { %809 = vmatpush3.bf16.msra.mxu1 %v880_v36 }
  0x13   : > { %810 = vmatprep.subr.bf16.mxu1 %v905_v35 }
  0x14   : > { %377 = vmatpush1.bf16.msra.mxu0 %v865_v8  ;;  %v670_v8 = vstv %s669_s11 }
  0x15   : > { %378 = vmatprep.subr.bf16.mxu0 %v866_v9 }
  0x16   : > { %811 = vmatpush3.bf16.msra.mxu1 %v881_v37 }
  0x17   : > { %812 = vmatprep.subr.bf16.mxu1 %v905_v35 }
  0x18   : > { %379 = vmatpush1.bf16.msra.mxu0 %v868_v10 }
  0x19   : > { %380 = vmatprep.subr.bf16.mxu0 %v869_v11  ;;  %v673_v11 = vunpack.c.l.bf16 %v1009_v17 }
  0x1a   : > { %813 = vmatpush3.bf16.msra.mxu1 %v882_v38 }
  0x1b   : > { %814 = vmatprep.subr.bf16.mxu1 %v905_v35 }
  0x1c   : > { %381 = vmatpush1.bf16.msra.mxu0 %v871_v12 }
  0x1d   : > { %382 = vmatprep.subr.bf16.mxu0 %v872_v13  ;;  %v674_v13 = vunpack.c.h.bf16 %v1009_v17 }
  0x1e   : > { %815 = vmatpush3.bf16.msra.mxu1 %v883_v39 }
  0x1f   : > { %816 = vmatprep.subr.bf16.mxu1 %v905_v35 }
  0x20   : > { %383 = vmatpush1.bf16.msra.mxu0 %v874_v14 }
  0x21   : > { %384 = vmatprep.subr.bf16.mxu0 %v875_v15 }
  0x22   : > { %817 = vmatpush3.bf16.msra.mxu1 %v884_v40 }
  0x23   : > { %818 = vmatprep.subr.bf16.mxu1 %v905_v35 }
  0x24   : > { %385 = vmatpush1.bf16.msra.mxu0 %v877_v16 }
  0x26   : > { %819 = vmatpush3.bf16.msra.mxu1 %v885_v41 }
  0x27   : > { %403 = vmatmul.mubr.bf16.vlgmr.msra.gmra.mrb[0].mxu0 %v1009_v17  ;;  %820 = vmatprep.subr.bf16.mxu1 %v905_v35 }
  0x2a   : > { %821 = vmatpush3.bf16.msra.mxu1 %v886_v42 }
  0x2b   : > { %833 = vmatprep.subr.bf16.mxu1 %v905_v35 }
  0x2d   : > { %823 = vmatmul.mubr.bf16.vlgmr.msra.gmra.mrb[0].mxu1 %v1009_v17 }
  0x2e   : > { %835 = vmatprep.mubr.msk.bf16.mxu1 %vm906_vm0, %v905_v35 }
  0xfa   : > { %v404_v24 = vpop.f32.mrb[0].mxu0 }
  0xfb   : > { %v405_v26 = vadd.f32 %v404_v24, %v277_v23  ;;  %v406_v27 = vpop.f32.mrb[1].mxu0 }
  0xfc   : > { %v408_v28 = vpop.f32.mrb[2].mxu0  ;;  %v407_v30 = vadd.f32 %v406_v27, %v281_v25 }
  0xfd   : > { %v410_v29 = vpop.f32.mrb[3].mxu0  ;;  %830 = vmatprep.mubr.f32.mxu0 %v405_v26  ;;  %v409_v33 = vadd.f32 %v408_v28, %v277_v23 }
  0xfe   : > { %v411_v31 = vadd.f32 %v410_v29, %v281_v25 }
 0x100   : > { %v839_v32 = vpack.c.bf16 %v411_v31, %v407_v30  ;;  %v518_v57 = vpop.f32.mrb[0].mxu1 }
 0x101   : > { %v824_v58 = vpop.f32.mrb[1].mxu1  ;;  %v519_v62 = vadd.f32 %v768_v60, %v518_v57 }
 0x102   : > { %840 = vmatprep.subr.bf16.mxu0 %v839_v32  ;;  %v521_v59 = vpop.f32.mrb[2].mxu1 }
 0x103   : > { %842 = vmatpush3.bf16.xpose.msra.mxu0 %v839_v32  ;;  %v825_v61 = vpop.f32.mrb[3].mxu1  ;;  %v522_v63 = vadd.f32 %v768_v60, %v521_v59 }
 0x105   : > { %v624_v0 = vpack.c.bf16 %v522_v63, %v519_v62 }
 0x107   : > { %834 = vmatpush3.bf16.msra.mxu1 %v624_v0 }
 0x10a   : > { %831 = vmatmul.mubr.f32.vlgmr.msra.gmra.mrb[4].mxu0 %v409_v33 }
 0x1dd   : > { %v832_v43 = vpop.f32.mrb[4].mxu0 }
 0x1de   : > { %v591_v44 = vpop.f32.mrb[5].mxu0  ;;  %v604_v46 = vsel %vm600_vm1, %v832_v43, -inf }
 0x1df   : > { %v601_v45 = vsel %vm600_vm1, %v591_v44, -inf }
 0x1e0   : > { %602 = vmax.xlane.f32.xlu0 %v601_v45 }
 0x1e4   : > { %605 = vmax.xlane.f32.xlu0 %v604_v46 }
 0x26d   : > { %v603_v47 = vpop.xlane.xlu0 %602 }
 0x26e   : > { %v607_v48 = vsub.f32 %v591_v44, %v603_v47 }
 0x270   : > { %v609_v49 = vmul.f32 1.442695, %v607_v48 }
 0x271   : > { %v606_v50 = vpop.xlane.xlu0 %605 }
 0x272   : > { %888 = vpow2.f32 %v609_v49  ;;  %v608_v51 = vsub.f32 %v832_v43, %v606_v50 }
 0x274   : > { %v611_v52 = vmul.f32 1.442695, %v608_v51 }
 0x276   : > { %890 = vpow2.f32 %v611_v52 }
 0x27c   : > { %v889_v53 = vpop.eup %888 }
 0x27d   : > { %v613_v54 = vsel %vm600_vm1, %v889_v53, 0.0 }
 0x27e   : > { %614 = vadd.xlane.f32.xlu1 %v613_v54 }
 0x280   : > { %v891_v55 = vpop.eup %890 }
 0x281   : > { %v616_v56 = vsel %vm600_vm1, %v891_v55, 0.0 }
 0x282   : > { %617 = vadd.xlane.f32.xlu1 %v616_v56 }
 0x30b   : > { %v615_v1 = vpop.xlane.xlu1 %614 }
 0x30c   : > { %892 = vrcp.f32 %v615_v1 }
 0x30f   : > { %v618_v2 = vpop.xlane.xlu1 %617 }
 0x310   : > { %894 = vrcp.f32 %v618_v2 }
 0x316   : > { %v893_v3 = vpop.eup %892 }
 0x317   : > { %v621_v5 = vmul.f32 %v893_v3, %v889_v53 }
 0x31a   : > { %v895_v4 = vpop.eup %894 }
 0x31b   : > { %v622_v6 = vmul.f32 %v895_v4, %v891_v55 }
 0x31d   : > { %v623_v7 = vpack.c.bf16 %v622_v6, %v621_v5 }
 0x31f   : > { %836 = vmatmul.mubr.msk.bf16.vlgmr.msra.gmra.mrb[4].mxu1 %vm600_vm1, %v623_v7 }
 0x3f2   : > { %v662_v9 = vpop.f32.mrb[4].mxu1 }
 0x3f3   : > { %v671_v10 = vmul.f32 %v670_v8, %v662_v9  ;;  %v837_v12 = vpop.f32.mrb[5].mxu1 }
 0x3f4   : > { %v665_v14 = vpop.f32.mrb[6].mxu1 }
 0x3f5   : > { %v672_v15 = vmul.f32 %v670_v8, %v665_v14  ;;  %v838_v16 = vpop.f32.mrb[7].mxu1  ;;  %v675_v18 = vadd.f32 %v673_v11, %v671_v10 }
 0x3f7   : > { %v676_v19 = vadd.f32 %v674_v13, %v672_v15 }
 0x3f9   : > { %v789_v20 = vpack.c.bf16 %v676_v19, %v675_v18 }
 0x3fb   : > { %790 = vst [vmem:[%s252_s14] sm:$0xff] %v789_v20  }
 0x3fc PF: > { %s17_s23 = sadd.s32 1, %s902_s23  }
 0x3fd   : > { %p14_p4 = scmp.ge.s32.totalorder %s17_s23, 4  }
 0x3ff   :  { %16 = sbr.rel (!%p14_p4) target bundleno = 2 (0x2), region = 74 }

// kernel: _lambda_.57
= control target key start
LH: loop header
LB: loop body
LE: loop exit
PB: predicated region body
PF: predicated region fallthrough
CT: control target
= control target key end

     0   :  { %s1210_s12 = smov 0   ;;  %s1483_s0 = inlined_call_operand.vmem [shape: bf16[32,640], index: 0, kind: input, shape index: {}]   ;;  %s1484_s1 = inlined_call_operand.vmem [shape: bf16[640,256], index: 1, kind: input, shape index: {}]   ;;  %s1485_s2 = inlined_call_operand.vmem [shape: f32[1,256], index: 2, kind: input, shape index: {}]   ;;  %s1486_s3 = inlined_call_operand.vmem [shape: bf16[32,128], index: 3, kind: output, shape index: {}]  }
   0x1 LB: > { %s917_s13 = sadd.s32 4294967295, %s1187_s12   ;;  %p921_p0 = scmp.ge.s32.totalorder %s1187_s12, 1  ;;  %s1187_s12 = sphi %s1210_s12, %s13_s12  }
   0x2   : > { %p139_p1 = scmp.lt.s32.totalorder %s1187_s12, 3 }
   0x4   : > { %p140_p2 = pnand %p921_p0, %p139_p1 }
   0x5   : > { %v1046_v0 = vld [vmem:[%s1484_s1 + $0x104] ss:$8 sps:$4 sm:$0xff] (!%p140_p2)   ;;  %v1048_v1 = vld [vmem:[%s1484_s1 + $0x100] ss:$8 sps:$4 sm:$0xff] (!%p140_p2)   ;;  %v1049_v2 = vld [vmem:[%s1484_s1 + $0x114] ss:$8 sps:$4 sm:$0xff] (!%p140_p2)  }
   0x6   : > { %143 = sbr.rel (%p140_p2) target bundleno = 350 (0x15e), region = 32  ;;  %745 = vmatprep.subr.bf16.mxu0 (!%p140_p2), %v1046_v0  ;;  %v1051_v3 = vld [vmem:[%s1484_s1 + $0x110] ss:$8 sps:$4 sm:$0xff] (!%p140_p2)   ;;  %v1052_v4 = vld [vmem:[%s1484_s1 + $0x124] ss:$8 sps:$4 sm:$0xff] (!%p140_p2)   ;;  %s922_s23 = sshll.u32 (!%p140_p2), %s917_s13, 1 }
   0x7   : > { %746 = vmatpush1.bf16.msra.mxu0 (!%p140_p2), %v1048_v1  ;;  %v1054_v5 = vld [vmem:[%s1484_s1 + $0x120] ss:$8 sps:$4 sm:$0xff] (!%p140_p2)   ;;  %v1055_v6 = vld [vmem:[%s1484_s1 + $0x134] ss:$8 sps:$4 sm:$0xff] (!%p140_p2)   ;;  %v1067_v7 = vld [vmem:[%s1484_s1 + $0x4] ss:$8 sps:$4 sm:$0xff] (!%p140_p2)  }
   0x8   : > { %747 = vmatprep.subr.bf16.mxu0 (!%p140_p2), %v1049_v2  ;;  %v1069_v8 = vld [vmem:[%s1484_s1] ss:$8 sps:$4 sm:$0xff] (!%p140_p2)   ;;  %v1057_v9 = vld [vmem:[%s1484_s1 + $0x130] ss:$8 sps:$4 sm:$0xff] (!%p140_p2)   ;;  %v1058_v10 = vld [vmem:[%s1484_s1 + $0x144] ss:$8 sps:$4 sm:$0xff] (!%p140_p2)   ;;  %702 = vmatprep.subr.bf16.mxu1 (!%p140_p2), %v1067_v7 }
   0x9   : > { %v1073_v11 = vld [vmem:[%s1484_s1 + $0x14] ss:$8 sps:$4 sm:$0xff] (!%p140_p2)   ;;  %703 = vmatpush1.bf16.msra.mxu1 (!%p140_p2), %v1069_v8  ;;  %v1075_v12 = vld [vmem:[%s1484_s1 + $0x10] ss:$8 sps:$4 sm:$0xff] (!%p140_p2)   ;;  %v1060_v13 = vld [vmem:[%s1484_s1 + $0x140] ss:$8 sps:$4 sm:$0xff] (!%p140_p2)  }
   0xa   : > { %704 = vmatprep.subr.bf16.mxu1 (!%p140_p2), %v1073_v11  ;;  %v1079_v14 = vld [vmem:[%s1484_s1 + $0x24] ss:$8 sps:$4 sm:$0xff] (!%p140_p2)   ;;  %v1061_v15 = vld [vmem:[%s1484_s1 + $0x154] ss:$8 sps:$4 sm:$0xff] (!%p140_p2)   ;;  %v1081_v16 = vld [vmem:[%s1484_s1 + $0x20] ss:$8 sps:$4 sm:$0xff] (!%p140_p2)  }
   0xb   : > { %748 = vmatpush1.bf16.msra.mxu0 (!%p140_p2), %v1051_v3  ;;  %v1085_v17 = vld [vmem:[%s1484_s1 + $0x34] ss:$8 sps:$4 sm:$0xff] (!%p140_p2)   ;;  %v1063_v18 = vld [vmem:[%s1484_s1 + $0x150] ss:$8 sps:$4 sm:$0xff] (!%p140_p2)   ;;  %v1064_v19 = vld [vmem:[%s1484_s1 + $0x164] ss:$8 sps:$4 sm:$0xff] (!%p140_p2)  }
   0xc   : > { %749 = vmatprep.subr.bf16.mxu0 (!%p140_p2), %v1052_v4  ;;  %p165_p3 = scmp.lt.s32.totalorder (!%p140_p2), %s922_s23, 3  ;;  %v1087_v20 = vld [vmem:[%s1484_s1 + $0x30] ss:$8 sps:$4 sm:$0xff] (!%p140_p2)   ;;  %v1091_v21 = vld [vmem:[%s1484_s1 + $0x44] ss:$8 sps:$4 sm:$0xff] (!%p140_p2)  }
   0xd   : > { %705 = vmatpush1.bf16.msra.mxu1 %v1075_v12  ;;  %v1066_v22 = vld [vmem:[%s1484_s1 + $0x160] ss:$8 sps:$4 sm:$0xff]   ;;  %v1070_v23 = vld [vmem:[%s1484_s1 + $0x174] ss:$8 sps:$4 sm:$0xff]   ;;  %v1072_v26 = vld [vmem:[%s1484_s1 + $0x170] ss:$8 sps:$4 sm:$0xff]  }
   0xe   : > { %706 = vmatprep.subr.bf16.mxu1 %v1079_v14  ;;  %s1488_s23 = smov (!%p165_p3, %s922_s23), 3  ;;  %v1093_v24 = vld [vmem:[%s1484_s1 + $0x40] ss:$8 sps:$4 sm:$0xff]   ;;  %v1097_v25 = vld [vmem:[%s1484_s1 + $0x54] ss:$8 sps:$4 sm:$0xff]  }
   0xf   : > { %750 = vmatpush1.bf16.msra.mxu0 %v1054_v5  ;;  %v1076_v27 = vld [vmem:[%s1484_s1 + $0x184] ss:$8 sps:$4 sm:$0xff]   ;;  %s1036_s20 = smul.u32 20, %s1488_s23  ;;  %v1099_v28 = vld [vmem:[%s1484_s1 + $0x50] ss:$8 sps:$4 sm:$0xff]  }
  0x10   : > { %751 = vmatprep.subr.bf16.mxu0 %v1055_v6  ;;  %v1103_v29 = vld [vmem:[%s1484_s1 + $0x64] ss:$8 sps:$4 sm:$0xff]   ;;  %v1078_v30 = vld [vmem:[%s1484_s1 + $0x180] ss:$8 sps:$4 sm:$0xff]   ;;  %v1082_v31 = vld [vmem:[%s1484_s1 + $0x194] ss:$8 sps:$4 sm:$0xff]  }
  0x11   : > { %707 = vmatpush1.bf16.msra.mxu1 %v1081_v16  ;;  %s1322_s13 = scalar_lea.vmem %s1483_s0, %s1036_s20  ;;  %v1105_v32 = vld [vmem:[%s1484_s1 + $0x60] ss:$8 sps:$4 sm:$0xff]   ;;  %v1109_v33 = vld [vmem:[%s1484_s1 + $0x74] ss:$8 sps:$4 sm:$0xff]   ;;  %v1084_v34 = vld [vmem:[%s1484_s1 + $0x190] ss:$8 sps:$4 sm:$0xff]  }
  0x12   : > { %708 = vmatprep.subr.bf16.mxu1 %v1085_v17  ;;  %v1126_v35 = vld [vmem:[%s1322_s13 + $0xc] ss:$20 sps:$4 sm:$0xff]   ;;  %v1111_v37 = vld [vmem:[%s1484_s1 + $0x70] ss:$8 sps:$4 sm:$0xff]   ;;  %v1094_v40 = vld [vmem:[%s1484_s1 + $0x1b4] ss:$8 sps:$4 sm:$0xff]  }
  0x13   : > { %752 = vmatpush1.bf16.msra.mxu0 %v1057_v9  ;;  %v1088_v36 = vld [vmem:[%s1484_s1 + $0x1a4] ss:$8 sps:$4 sm:$0xff]   ;;  %777 = vmatprep.mubr.bf16.mxu0 %v1126_v35  ;;  %v1090_v39 = vld [vmem:[%s1484_s1 + $0x1a0] ss:$8 sps:$4 sm:$0xff]   ;;  %v1121_v42 = vld [vmem:[%s1484_s1 + $0x94] ss:$8 sps:$4 sm:$0xff]  }
  0x14   : > { %753 = vmatprep.subr.bf16.mxu0 %v1058_v10  ;;  %v1115_v38 = vld [vmem:[%s1484_s1 + $0x84] ss:$8 sps:$4 sm:$0xff]   ;;  %v1117_v41 = vld [vmem:[%s1484_s1 + $0x80] ss:$8 sps:$4 sm:$0xff]   ;;  %v1096_v43 = vld [vmem:[%s1484_s1 + $0x1b0] ss:$8 sps:$4 sm:$0xff]  }
  0x15   : > { %709 = vmatpush1.bf16.msra.mxu1 %v1087_v20  ;;  %v1100_v44 = vld [vmem:[%s1484_s1 + $0x1c4] ss:$8 sps:$4 sm:$0xff]   ;;  %v1123_v45 = vld [vmem:[%s1484_s1 + $0x90] ss:$8 sps:$4 sm:$0xff]   ;;  %v1102_v47 = vld [vmem:[%s1484_s1 + $0x1c0] ss:$8 sps:$4 sm:$0xff]  }
  0x16   : > { %710 = vmatprep.subr.bf16.mxu1 %v1091_v21  ;;  %v1130_v46 = vld [vmem:[%s1484_s1 + $0xa4] ss:$8 sps:$4 sm:$0xff]   ;;  %v1106_v48 = vld [vmem:[%s1484_s1 + $0x1d4] ss:$8 sps:$4 sm:$0xff]   ;;  %v1132_v49 = vld [vmem:[%s1484_s1 + $0xa0] ss:$8 sps:$4 sm:$0xff]  }
  0x17   : > { %754 = vmatpush1.bf16.msra.mxu0 %v1060_v13  ;;  %v1136_v50 = vld [vmem:[%s1484_s1 + $0xb4] ss:$8 sps:$4 sm:$0xff]   ;;  %v1108_v51 = vld [vmem:[%s1484_s1 + $0x1d0] ss:$8 sps:$4 sm:$0xff]   ;;  %v1112_v52 = vld [vmem:[%s1484_s1 + $0x1e4] ss:$8 sps:$4 sm:$0xff]  }
  0x18   : > { %755 = vmatprep.subr.bf16.mxu0 %v1061_v15  ;;  %v1138_v53 = vld [vmem:[%s1484_s1 + $0xb0] ss:$8 sps:$4 sm:$0xff]   ;;  %v1142_v54 = vld [vmem:[%s1484_s1 + $0xc4] ss:$8 sps:$4 sm:$0xff]   ;;  %v1114_v56 = vld [vmem:[%s1484_s1 + $0x1e0] ss:$8 sps:$4 sm:$0xff]  }
  0x19   : > { %711 = vmatpush1.bf16.msra.mxu1 %v1093_v24  ;;  %v1168_v55 = vld [vmem:[%s1322_s13 + $0x4] ss:$20 sps:$4 sm:$0xff]   ;;  %v1118_v57 = vld [vmem:[%s1484_s1 + $0x1f4] ss:$8 sps:$4 sm:$0xff]   ;;  %v1144_v58 = vld [vmem:[%s1484_s1 + $0xc0] ss:$8 sps:$4 sm:$0xff]  }
  0x1a   : > { %712 = vmatprep.subr.bf16.mxu1 %v1097_v25  ;;  %734 = vmatprep.mubr.bf16.mxu1 %v1168_v55  ;;  %v1148_v59 = vld [vmem:[%s1484_s1 + $0xd4] ss:$8 sps:$4 sm:$0xff]   ;;  %v1120_v60 = vld [vmem:[%s1484_s1 + $0x1f0] ss:$8 sps:$4 sm:$0xff]   ;;  %v1129_v61 = vld [vmem:[%s1484_s1 + $0x204] ss:$8 sps:$4 sm:$0xff]   ;;  %v266_v25 = vlaneseq }
  0x1b   : > { %756 = vmatpush1.bf16.msra.mxu0 %v1063_v18  ;;  %v1150_v62 = vld [vmem:[%s1484_s1 + $0xd0] ss:$8 sps:$4 sm:$0xff]   ;;  %v1124_v63 = vld [vmem:[%s1322_s13 + $0x8] ss:$20 sps:$4 sm:$0xff]   ;;  %v1154_v0 = vld [vmem:[%s1484_s1 + $0xe4] ss:$8 sps:$4 sm:$0xff]  }
  0x1c   : > { %757 = vmatprep.subr.bf16.mxu0 %v1064_v19  ;;  %v1127_v1 = vld [vmem:[%s1484_s1 + $0x200] ss:$8 sps:$4 sm:$0xff]   ;;  %v1135_v2 = vld [vmem:[%s1484_s1 + $0x214] ss:$8 sps:$4 sm:$0xff]   ;;  %v1133_v5 = vld [vmem:[%s1484_s1 + $0x210] ss:$8 sps:$4 sm:$0xff]  }
  0x1d   : > { %713 = vmatpush1.bf16.msra.mxu1 %v1099_v28  ;;  %v1156_v3 = vld [vmem:[%s1484_s1 + $0xe0] ss:$8 sps:$4 sm:$0xff]   ;;  %v1160_v4 = vld [vmem:[%s1484_s1 + $0xf4] ss:$8 sps:$4 sm:$0xff]   ;;  %v1189_v6 = vmov 0  }
  0x1e   : > { %714 = vmatprep.subr.bf16.mxu1 %v1103_v29  ;;  %v1141_v7 = vld [vmem:[%s1484_s1 + $0x224] ss:$8 sps:$4 sm:$0xff]   ;;  %v1162_v8 = vld [vmem:[%s1484_s1 + $0xf0] ss:$8 sps:$4 sm:$0xff]   ;;  %v1139_v9 = vld [vmem:[%s1484_s1 + $0x220] ss:$8 sps:$4 sm:$0xff]  }
  0x1f   : > { %758 = vmatpush1.bf16.msra.mxu0 %v1066_v22  ;;  %v1147_v10 = vld [vmem:[%s1484_s1 + $0x234] ss:$8 sps:$4 sm:$0xff]   ;;  %v1145_v12 = vld [vmem:[%s1484_s1 + $0x230] ss:$8 sps:$4 sm:$0xff]   ;;  %v1153_v13 = vld [vmem:[%s1484_s1 + $0x244] ss:$8 sps:$4 sm:$0xff]  }
  0x20   : > { %759 = vmatprep.subr.bf16.mxu0 %v1070_v23  ;;  %v1166_v11 = vld [vmem:[%s1322_s13] ss:$20 sps:$4 sm:$0xff]   ;;  %v1157_v16 = vld [vmem:[%s1484_s1 + $0x250] ss:$8 sps:$4 sm:$0xff]   ;;  %v1165_v17 = vld [vmem:[%s1484_s1 + $0x264] ss:$8 sps:$4 sm:$0xff]  }
  0x21   : > { %715 = vmatpush1.bf16.msra.mxu1 %v1105_v32  ;;  %v1151_v14 = vld [vmem:[%s1484_s1 + $0x240] ss:$8 sps:$4 sm:$0xff]   ;;  %v1159_v15 = vld [vmem:[%s1484_s1 + $0x254] ss:$8 sps:$4 sm:$0xff]   ;;  %v1169_v20 = vld [vmem:[%s1484_s1 + $0x270] ss:$8 sps:$4 sm:$0xff]  }
  0x22   : > { %716 = vmatprep.subr.bf16.mxu1 %v1109_v33  ;;  %v1163_v18 = vld [vmem:[%s1484_s1 + $0x260] ss:$8 sps:$4 sm:$0xff]   ;;  %v1171_v19 = vld [vmem:[%s1484_s1 + $0x274] ss:$8 sps:$4 sm:$0xff]   ;;  %v1172_v21 = vld [vmem:[%s1322_s13 + $0x10] ss:$20 sps:$4 sm:$0xff]  }
  0x23   : > { %760 = vmatpush1.bf16.msra.mxu0 %v1072_v26  ;;  %v264_v29 = vld [vmem:[%s1485_s2] sm:$0x3]  ;;  %s925_s13 = sshll.u32 %s1488_s23, 2 }
  0x24   : > { %761 = vmatprep.subr.bf16.mxu0 %v1076_v27  ;;  %v267_v27 = vshrl.u32 %v266_v25, 7  ;;  %s175_s9 = scalar_lea.vmem %s1486_s3, %s925_s13 }
  0x25   : > { %717 = vmatpush1.bf16.msra.mxu1 %v1111_v37 }
  0x26   : > { %718 = vmatprep.subr.bf16.mxu1 %v1115_v38  ;;  %v268_v28 = vsub.s32 0, %v267_v27 }
  0x27   : > { %762 = vmatpush1.bf16.msra.mxu0 %v1078_v30  ;;  %v272_v30 = vsub.s32 1, %v267_v27 }
  0x28   : > { %763 = vmatprep.subr.bf16.mxu0 %v1082_v31  ;;  %v269_v31 = vrot.slane %v264_v29, %v268_v28 }
  0x29   : > { %719 = vmatpush1.bf16.msra.mxu1 %v1117_v41  ;;  %v273_v32 = vrot.slane %v264_v29, %v272_v30 }
  0x2a   : > { %720 = vmatprep.subr.bf16.mxu1 %v1121_v42 }
  0x2b   : > { %764 = vmatpush1.bf16.msra.mxu0 %v1084_v34 }
  0x2c   : > { %765 = vmatprep.subr.bf16.mxu0 %v1088_v36 }
  0x2d   : > { %721 = vmatpush1.bf16.msra.mxu1 %v1123_v45 }
  0x2e   : > { %722 = vmatprep.subr.bf16.mxu1 %v1130_v46 }
  0x2f   : > { %766 = vmatpush1.bf16.msra.mxu0 %v1090_v39 }
  0x30   : > { %767 = vmatprep.subr.bf16.mxu0 %v1094_v40 }
  0x31   : > { %723 = vmatpush1.bf16.msra.mxu1 %v1132_v49 }
  0x32   : > { %724 = vmatprep.subr.bf16.mxu1 %v1136_v50 }
  0x33   : > { %768 = vmatpush1.bf16.msra.mxu0 %v1096_v43 }
  0x34   : > { %769 = vmatprep.subr.bf16.mxu0 %v1100_v44 }
  0x35   : > { %725 = vmatpush1.bf16.msra.mxu1 %v1138_v53 }
  0x36   : > { %726 = vmatprep.subr.bf16.mxu1 %v1142_v54 }
  0x37   : > { %770 = vmatpush1.bf16.msra.mxu0 %v1102_v47 }
  0x38   : > { %771 = vmatprep.subr.bf16.mxu0 %v1106_v48 }
  0x39   : > { %727 = vmatpush1.bf16.msra.mxu1 %v1144_v58 }
  0x3a   : > { %728 = vmatprep.subr.bf16.mxu1 %v1148_v59 }
  0x3b   : > { %772 = vmatpush1.bf16.msra.mxu0 %v1108_v51 }
  0x3c   : > { %773 = vmatprep.subr.bf16.mxu0 %v1112_v52 }
  0x3d   : > { %729 = vmatpush1.bf16.msra.mxu1 %v1150_v62 }
  0x3e   : > { %730 = vmatprep.subr.bf16.mxu1 %v1154_v0 }
  0x3f   : > { %774 = vmatpush1.bf16.msra.mxu0 %v1114_v56 }
  0x40   : > { %775 = vmatprep.subr.bf16.mxu0 %v1118_v57 }
  0x41   : > { %731 = vmatpush1.bf16.msra.mxu1 %v1156_v3 }
  0x42   : > { %732 = vmatprep.subr.bf16.mxu1 %v1160_v4 }
  0x43   : > { %776 = vmatpush1.bf16.msra.mxu0 %v1120_v60 }
  0x44   : > { %788 = vmatprep.subr.bf16.mxu0 %v1129_v61 }
  0x45   : > { %733 = vmatpush1.bf16.msra.mxu1 %v1162_v8 }
  0x46   : > { %778 = vmatmul.mubr.bf16.vlgmr.msra.gmra.mrb[0].mxu0 %v1124_v63 }
  0x47   : > { %789 = vmatpush1.bf16.msra.mxu0 %v1127_v1  ;;  %820 = vmatprep.mubr.bf16.mxu0 %v1189_v6 }
  0x48   : > { %790 = vmatprep.subr.bf16.mxu0 %v1135_v2  ;;  %735 = vmatmul.mubr.bf16.vlgmr.msra.gmra.mrb[0].mxu1 %v1166_v11 }
  0x4b   : > { %791 = vmatpush1.bf16.msra.mxu0 %v1133_v5 }
  0x4c   : > { %792 = vmatprep.subr.bf16.mxu0 %v1141_v7 }
  0x4f   : > { %793 = vmatpush1.bf16.msra.mxu0 %v1139_v9 }
  0x50   : > { %794 = vmatprep.subr.bf16.mxu0 %v1147_v10 }
  0x53   : > { %795 = vmatpush1.bf16.msra.mxu0 %v1145_v12 }
  0x54   : > { %796 = vmatprep.subr.bf16.mxu0 %v1153_v13 }
  0x57   : > { %797 = vmatpush1.bf16.msra.mxu0 %v1151_v14 }
  0x58   : > { %798 = vmatprep.subr.bf16.mxu0 %v1159_v15 }
  0x5b   : > { %799 = vmatpush1.bf16.msra.mxu0 %v1157_v16 }
  0x5c   : > { %800 = vmatprep.subr.bf16.mxu0 %v1165_v17 }
  0x5f   : > { %801 = vmatpush1.bf16.msra.mxu0 %v1163_v18 }
  0x60   : > { %802 = vmatprep.subr.bf16.mxu0 %v1171_v19 }
  0x63   : > { %803 = vmatpush1.bf16.msra.mxu0 %v1169_v20 }
  0x66   : > { %821 = vmatmul.mubr.bf16.vlgmr.msra.gmra.mrb[0].mxu0 %v1172_v21 }
 0x11b   : > { %v736_v22 = vpop.f32.mrb[0].mxu1 }
 0x11c   : > { %v738_v23 = vpop.f32.mrb[1].mxu1  ;;  %v737_v33 = vadd.f32 %v736_v22, %v269_v31 }
 0x11d   : > { %v740_v24 = vpop.f32.mrb[2].mxu1  ;;  %v739_v34 = vadd.f32 %v738_v23, %v273_v32 }
 0x11e   : > { %v742_v26 = vpop.f32.mrb[3].mxu1  ;;  %v741_v36 = vadd.f32 %v740_v24, %v269_v31 }
 0x11f   : > { %v743_v39 = vadd.f32 %v742_v26, %v273_v32 }
 0x139   : > { %v822_v35 = vpop.f32.mrb[0].mxu0 }
 0x13a   : > { %v1025_v37 = vadd.f32 %v822_v35, %v737_v33  ;;  %v824_v38 = vpop.f32.mrb[1].mxu0 }
 0x13b   : > { %v1027_v40 = vadd.f32 %v824_v38, %v739_v34  ;;  %v826_v41 = vpop.f32.mrb[2].mxu0 }
 0x13c   : > { %v1029_v42 = vadd.f32 %v826_v41, %v741_v36  ;;  %v828_v43 = vpop.f32.mrb[3].mxu0  ;;  %v833_v51 = vmul.f32 0.2, %v1025_v37  ;;  %vm831_vm0 = vcmp.ge.f32.partialorder %v1025_v37, 0.0 }
 0x13d   : > { %v1011_v44 = vmul.f32 -1.442695, %v1027_v40  ;;  %v1031_v45 = vadd.f32 %v828_v43, %v743_v39 }
 0x13e   : > { %v834_v52 = vmul.f32 0.2, %v1029_v42  ;;  %vm832_vm1 = vcmp.ge.f32.partialorder %v1029_v42, 0.0  ;;  %v835_v54 = vsel %vm831_vm0, %v1025_v37, %v833_v51 }
 0x13f   : > { %1173 = vpow2.f32 %v1011_v44  ;;  %v1012_v46 = vmul.f32 -1.442695, %v1031_v45 }
 0x140   : > { %v836_v57 = vsel %vm832_vm1, %v1029_v42, %v834_v52 }
 0x141   : > { %1175 = vpow2.f32 %v1012_v46 }
 0x149   : > { %v1174_v47 = vpop.eup %1173 }
 0x14a   : > { %v843_v48 = vadd.f32 1.0, %v1174_v47 }
 0x14b   : > { %v1176_v49 = vpop.eup %1175 }
 0x14c   : > { %1177 = vrcp.f32 %v843_v48  ;;  %v844_v50 = vadd.f32 1.0, %v1176_v49 }
 0x14e   : > { %1179 = vrcp.f32 %v844_v50 }
 0x156   : > { %v1178_v53 = vpop.eup %1177 }
 0x157   : > { %v849_v55 = vmul.f32 %v1178_v53, %v835_v54 }
 0x158   : > { %v1180_v56 = vpop.eup %1179 }
 0x159   : > { %v850_v58 = vmul.f32 %v1180_v56, %v836_v57 }
 0x15b   : > { %v1022_v59 = vpack.c.bf16 %v850_v58, %v849_v55 }
 0x15d   : > { %1023 = vst [vmem:[%s175_s9] sm:$0xff] %v1022_v59  }
 0x15e PF: > { %s13_s12 = sadd.s32 1, %s1187_s12  }
 0x15f   : > { %p10_p4 = scmp.ge.s32.totalorder %s13_s12, 4  }
 0x161   :  { %12 = sbr.rel (!%p10_p4) target bundleno = 1 (0x1), region = 62 }

</bundles_post_ra>
